<compile_context>
chip_gen: v7x
topology: tpu7x:2x2x1
jax: 0.10.0
libtpu: 0.0.40
codegen_flags: <defaults>
</compile_context>

<pallas_src>
import functools

import jax
import jax.numpy as jnp
from jax import lax
from jax.experimental import pallas as pl
from jax.experimental.pallas import tpu as pltpu

# ---- model dimensions (mirror the PyTorch module config) ----
D_IN = 20
D_RNN = 32            # d_rnn == attention d_model == LSTM input/hidden
N_HEADS = 4
DH = D_RNN // N_HEADS
N_ATTN_LAYERS = 2
H_RNN = 32
G4 = 4 * H_RNN        # LSTM gate width (i, f, g, o)
D_RNN_OUT = 2 * H_RNN # bidirectional
D_OUT_FC = 32
OUT_DIM = 2
OUT_PAD = 128         # lane-dense padded output width
LN_EPS = 1e-5
BB = 8                # batch rows per grid block (one sublane tile)
NEG_INF = -1e9


# ------------------------------------------------------------------
# One fused kernel per batch-block of BB rows:
#   proj -> 2x(MHA + residual + LN) -> biLSTM -> fc1+ReLU -> fc2 (lane-padded)
# Inside the block: attention is batch-major (row = b*T + t); the LSTM / FC
# stages are time-major (row = t*BB + b) after an MXU permutation.
# ------------------------------------------------------------------
def _model_kernel(
    # inputs
    x_ref, lens_ref, perm_ref, proj_w_ref,
    aw_in_ref, ab_in_ref, aw_out_ref, ab_out_ref, ln_g_ref, ln_b_ref,
    wih_ref, bih_ref, whh_ref,
    w1f_ref, w1b_ref, b1_ref, w2_ref, b2_ref,
    # output
    o_ref,
    # scratch
    gx_s, hf_s, hb_s,
    *, t_steps):
  bb = BB
  n = bb * t_steps
  scale = DH ** -0.5
  hdim = H_RNN

  lens = lens_ref[...]                                                   # (bb, 1) int32

  # ---- input projection (nn.Linear, bias=False); batch-major rows b*T + t ----
  x2 = x_ref[...].reshape(n, D_IN).astype(jnp.bfloat16)
  h = jnp.dot(x2, proj_w_ref[...], preferred_element_type=jnp.float32)   # (n, D) f32

  # Additive key-padding mask, built in-kernel from x_len (no (T*B)^2 HBM mask).
  key_t = lax.broadcasted_iota(jnp.int32, (bb, 1, t_steps), 2)
  kmask = jnp.where(key_t < lens[:, :, None], 0.0, NEG_INF)              # (bb, 1, T)

  # ---- 2 x SelfAttentionLayer: per-batch scores, heads accumulated into W_out ----
  for l in range(N_ATTN_LAYERS):
    qkv = jnp.dot(h.astype(jnp.bfloat16), aw_in_ref[l],
                  preferred_element_type=jnp.float32) + ab_in_ref[l]     # (n, 3D) f32
    qkv_b = qkv.astype(jnp.bfloat16).reshape(bb, t_steps, 3 * D_RNN)
    proj = jnp.zeros((n, D_RNN), jnp.float32)
    for hd in range(N_HEADS):
      q = qkv_b[:, :, hd * DH:(hd + 1) * DH]                             # (bb, T, DH)
      k = qkv_b[:, :, D_RNN + hd * DH:D_RNN + (hd + 1) * DH]
      v = qkv_b[:, :, 2 * D_RNN + hd * DH:2 * D_RNN + (hd + 1) * DH]
      s = jnp.einsum('btd,bsd->bts', q, k,
                     preferred_element_type=jnp.float32) * scale + kmask  # (bb, T, T)
      s = s - jnp.max(s, axis=-1, keepdims=True)
      p = jnp.exp(s)
      p = p * pl.reciprocal(jnp.sum(p, axis=-1, keepdims=True), approx=True)
      head = jnp.einsum('bts,bsd->btd', p.astype(jnp.bfloat16), v,
                        preferred_element_type=jnp.float32)               # (bb, T, DH)
      proj = proj + jnp.dot(head.reshape(n, DH).astype(jnp.bfloat16),
                            aw_out_ref[l][hd * DH:(hd + 1) * DH, :],
                            preferred_element_type=jnp.float32)
    z = h + proj + ab_out_ref[l]                                          # residual
    mu = jnp.mean(z, axis=-1, keepdims=True)
    zc = z - mu
    var = jnp.mean(zc * zc, axis=-1, keepdims=True)
    h = zc * lax.rsqrt(var + LN_EPS) * ln_g_ref[l] + ln_b_ref[l]

  # ---- biLSTM: MXU permutation to time-major + fused fwd|bwd input projection ----
  h_tm = jnp.dot(perm_ref[...], h.astype(jnp.bfloat16),
                 preferred_element_type=jnp.float32).astype(jnp.bfloat16)  # (T*bb, D)
  gx = jnp.dot(h_tm, wih_ref[...],
               preferred_element_type=jnp.float32) + bih_ref[...]          # (T*bb, 2*G4)
  gx_s[...] = gx.reshape(t_steps, bb, 2 * G4)

  whh = whh_ref[...]                                                       # (2H, 2*G4) bf16
  hfb = jnp.zeros((bb, 2 * hdim), jnp.float32)                             # [h_f | h_b]
  c_f = jnp.zeros((bb, hdim), jnp.float32)
  c_b = jnp.zeros((bb, hdim), jnp.float32)

  # Fully-unrolled time loop (static T): fwd processes t, bwd processes T-1-t.
  for i in range(t_steps):
    t_f = i
    t_b = t_steps - 1 - i
    rr = jnp.dot(hfb.astype(jnp.bfloat16), whh,
                 preferred_element_type=jnp.float32)                       # (bb, 2*G4)
    g_f = gx_s[t_f][:, :G4] + rr[:, :G4]                                   # (bb, 4H)
    g_b = gx_s[t_b][:, G4:] + rr[:, G4:]
    sig_f = jax.nn.sigmoid(g_f)
    tah_f = jnp.tanh(g_f)
    sig_b = jax.nn.sigmoid(g_b)
    tah_b = jnp.tanh(g_b)
    cf_new = sig_f[:, hdim:2 * hdim] * c_f + sig_f[:, :hdim] * tah_f[:, 2 * hdim:3 * hdim]
    hf_new = sig_f[:, 3 * hdim:] * jnp.tanh(cf_new)
    cb_new = sig_b[:, hdim:2 * hdim] * c_b + sig_b[:, :hdim] * tah_b[:, 2 * hdim:3 * hdim]
    hb_new = sig_b[:, 3 * hdim:] * jnp.tanh(cb_new)
    v_f = jnp.where(lens > t_f, 1.0, 0.0)                                  # (bb, 1)
    v_b = jnp.where(lens > t_b, 1.0, 0.0)
    # pad_packed_sequence: outputs at t >= len are zero; state frozen past length.
    hf_s[t_f] = v_f * hf_new
    hb_s[t_b] = v_b * hb_new
    hf_keep = v_f * hf_new + (1.0 - v_f) * hfb[:, :hdim]
    hb_keep = v_b * hb_new + (1.0 - v_b) * hfb[:, hdim:]
    c_f = v_f * cf_new + (1.0 - v_f) * c_f
    c_b = v_b * cb_new + (1.0 - v_b) * c_b
    hfb = jnp.concatenate([hf_keep, hb_keep], axis=-1)

  # ---- Regressor: Linear(2H->32)+ReLU(+Dropout=id) -> Linear(32->2), lane-padded ----
  hf_all = hf_s[...].reshape(n, hdim).astype(jnp.bfloat16)
  hb_all = hb_s[...].reshape(n, hdim).astype(jnp.bfloat16)
  z1 = (jnp.dot(hf_all, w1f_ref[...], preferred_element_type=jnp.float32)
        + jnp.dot(hb_all, w1b_ref[...], preferred_element_type=jnp.float32)
        + b1_ref[...])
  z1 = jnp.maximum(z1, 0.0)
  y = jnp.dot(z1.astype(jnp.bfloat16), w2_ref[...],
              preferred_element_type=jnp.float32) + b2_ref[...]            # (n, 128)
  o_ref[...] = y.reshape(t_steps, bb, OUT_PAD)


# ------------------------------------------------------------------
# Wrapper: batch padding, weight pre-packing (bf16), batch-parallel grid
# ------------------------------------------------------------------
def model_forward(x, x_len, params):
  # x: (B, T, d_in) batch-first float32; x_len: (B,) int
  b, t, d_in = x.shape
  assert d_in == D_IN
  b_pad = ((b + BB - 1) // BB) * BB
  nb = b_pad // BB

  x_p = jnp.zeros((b_pad, t, d_in), jnp.float32).at[:b].set(x.astype(jnp.float32))
  lens_p = jnp.zeros((b_pad, 1), jnp.int32).at[:b, 0].set(x_len.astype(jnp.int32))

  # (T*BB, BB*T) 0/1 permutation: batch-major rows -> time-major rows (done on the MXU).
  rows = jnp.arange(t * BB)
  perm = jax.nn.one_hot((rows % BB) * t + rows // BB, BB * t, dtype=jnp.bfloat16)

  bf = lambda a: a.astype(jnp.bfloat16)
  al = params['attn_layers']

  whh_blk = jnp.zeros((2 * H_RNN, 2 * G4), jnp.float32)
  whh_blk = whh_blk.at[:H_RNN, :G4].set(params['whh_f'].T)
  whh_blk = whh_blk.at[H_RNN:, G4:].set(params['whh_b'].T)

  fc1_wt = params['fc1_w'].T                                              # (2H, 32)
  w2_pad = jnp.zeros((D_OUT_FC, OUT_PAD), jnp.float32).at[:, :OUT_DIM].set(params['fc2_w'].T)
  b2_pad = jnp.zeros((1, OUT_PAD), jnp.float32).at[0, :OUT_DIM].set(params['fc2_b'])

  args = (
      x_p, lens_p, perm,
      bf(params['proj_w'].T),                                             # (d_in, D)
      bf(jnp.stack([lp['w_in'].T for lp in al])),                         # (L, D, 3D)
      jnp.stack([lp['b_in'].reshape(1, -1) for lp in al]),                # (L, 1, 3D)
      bf(jnp.stack([lp['w_out'].T for lp in al])),                        # (L, D, D)
      jnp.stack([lp['b_out'].reshape(1, -1) for lp in al]),               # (L, 1, D)
      jnp.stack([lp['ln_g'].reshape(1, -1) for lp in al]),                # (L, 1, D)
      jnp.stack([lp['ln_b'].reshape(1, -1) for lp in al]),                # (L, 1, D)
      bf(jnp.concatenate([params['wih_f'].T, params['wih_b'].T], axis=1)),  # (D, 2*G4)
      jnp.concatenate([params['b_f'], params['b_b']]).reshape(1, -1),       # (1, 2*G4)
      bf(whh_blk),                                                        # (2H, 2*G4) block-diag
      bf(fc1_wt[:H_RNN]), bf(fc1_wt[H_RNN:]),                             # (H, 32) x2
      params['fc1_b'].reshape(1, -1),
      bf(w2_pad), b2_pad,
  )

  def _full(a):
    zeros = (0,) * a.ndim
    return pl.BlockSpec(a.shape, lambda i: zeros)

  in_specs = [
      pl.BlockSpec((BB, t, d_in), lambda i: (i, 0, 0)),   # per-batch-block input
      pl.BlockSpec((BB, 1), lambda i: (i, 0)),            # per-batch-block lengths
  ] + [_full(a) for a in args[2:]]                        # weights resident in VMEM

  out_specs = pl.BlockSpec((t, BB, OUT_PAD), lambda i: (0, i, 0))

  # Advisory cost estimate (attention dominates at large T).
  n_rows = b_pad * t
  flops = int(
      2 * n_rows * D_IN * D_RNN
      + N_ATTN_LAYERS * (2 * n_rows * D_RNN * 3 * D_RNN
                         + N_HEADS * 4 * b_pad * t * t * DH
                         + 2 * n_rows * D_RNN * D_RNN)
      + 2 * n_rows * (BB * t) * D_RNN               # time-major permutation matmul
      + 2 * n_rows * D_RNN * 2 * G4                 # fused LSTM input projection
      + 2 * n_rows * 2 * H_RNN * 2 * G4             # merged recurrent matmuls
      + 2 * n_rows * 2 * H_RNN * D_OUT_FC
      + 2 * n_rows * D_OUT_FC * OUT_PAD)
  transcendentals = int(
      N_ATTN_LAYERS * N_HEADS * b_pad * t * t       # exp
      + N_ATTN_LAYERS * N_HEADS * b_pad * t         # approx reciprocal
      + n_rows * (4 * G4 + 2 * H_RNN))              # sigmoid / tanh
  bytes_accessed = int(sum(a.size * a.dtype.itemsize for a in args)
                       + t * b_pad * OUT_PAD * 4)

  out = pl.pallas_call(
      functools.partial(_model_kernel, t_steps=t),
      grid=(nb,),
      out_shape=jax.ShapeDtypeStruct((t, b_pad, OUT_PAD), jnp.float32),
      in_specs=in_specs,
      out_specs=out_specs,
      scratch_shapes=[
          pltpu.VMEM((t, BB, 2 * G4), jnp.float32),   # fused fwd|bwd gate inputs
          pltpu.VMEM((t, BB, H_RNN), jnp.float32),    # fwd hidden outputs
          pltpu.VMEM((t, BB, H_RNN), jnp.float32),    # bwd hidden outputs
      ],
      compiler_params=pltpu.CompilerParams(
          dimension_semantics=("parallel",),          # batch-block axis (v7x 2-TC split)
          vmem_limit_bytes=32 * 1024 * 1024),
      cost_estimate=pl.CostEstimate(flops=flops,
                                    transcendentals=transcendentals,
                                    bytes_accessed=bytes_accessed),
  )(*args)

  # (T, B_pad, 128) -> (B, T, OUT_DIM)
  return out[:, :b, :OUT_DIM].transpose(1, 0, 2)


# ------------------------------------------------------------------
# Deterministic parameter init (synthetic; shapes follow the PyTorch module)
# ------------------------------------------------------------------
def init_params(key):
  ks = iter(jax.random.split(key, 32))

  def rnd(shape, scale=0.1):
    return scale * jax.random.normal(next(ks), shape, jnp.float32)

  attn_layers = []
  for _ in range(N_ATTN_LAYERS):
    attn_layers.append(dict(
        w_in=rnd((3 * D_RNN, D_RNN)),
        b_in=rnd((3 * D_RNN,)),
        w_out=rnd((D_RNN, D_RNN)),
        b_out=rnd((D_RNN,)),
        ln_g=jnp.ones((D_RNN,), jnp.float32),
        ln_b=jnp.zeros((D_RNN,), jnp.float32),
    ))

  return dict(
      proj_w=rnd((D_RNN, D_IN)),
      attn_layers=attn_layers,
      wih_f=rnd((4 * H_RNN, D_RNN)),
      whh_f=rnd((4 * H_RNN, H_RNN)),
      b_f=rnd((4 * H_RNN,)),           # b_ih + b_hh combined
      wih_b=rnd((4 * H_RNN, D_RNN)),
      whh_b=rnd((4 * H_RNN, H_RNN)),
      b_b=rnd((4 * H_RNN,)),
      fc1_w=rnd((D_OUT_FC, D_RNN_OUT)),
      fc1_b=rnd((D_OUT_FC,)),
      fc2_w=rnd((OUT_DIM, D_OUT_FC)),
      fc2_b=jnp.zeros((OUT_DIM,), jnp.float32),   # nn.init.constant_(fc_2.bias, 0)
  )


if __name__ == "__main__":
  key = jax.random.PRNGKey(0)
  kx, kp = jax.random.split(key)

  B, T = 2, 8
  x = jax.random.normal(kx, (B, T, D_IN), jnp.float32)
  x_len = jnp.array([8, 5], dtype=jnp.int32)   # variable lengths (pack/pad semantics)

  params = init_params(kp)
  fwd = jax.jit(model_forward)
  y = fwd(x, x_len, params)
  y = jax.block_until_ready(y)
  assert y.shape == (B, T, OUT_DIM), y.shape
  assert bool(jnp.all(jnp.isfinite(y)))
  print("KERNEL_OK")
</pallas_src>

<mosaic_0001>
module attributes {stable_mosaic.version = 11 : i64} {
  func.func @_model_kernel(%arg0: i32, %arg1: memref<8x8x20xf32, #tpu.memory_space<vmem>>, %arg2: memref<8x1xi32, #tpu.memory_space<vmem>>, %arg3: memref<64x64xbf16, #tpu.memory_space<vmem>>, %arg4: memref<20x32xbf16, #tpu.memory_space<vmem>>, %arg5: memref<2x32x96xbf16, #tpu.memory_space<vmem>>, %arg6: memref<2x1x96xf32, #tpu.memory_space<vmem>>, %arg7: memref<2x32x32xbf16, #tpu.memory_space<vmem>>, %arg8: memref<2x1x32xf32, #tpu.memory_space<vmem>>, %arg9: memref<2x1x32xf32, #tpu.memory_space<vmem>>, %arg10: memref<2x1x32xf32, #tpu.memory_space<vmem>>, %arg11: memref<32x256xbf16, #tpu.memory_space<vmem>>, %arg12: memref<1x256xf32, #tpu.memory_space<vmem>>, %arg13: memref<64x256xbf16, #tpu.memory_space<vmem>>, %arg14: memref<32x32xbf16, #tpu.memory_space<vmem>>, %arg15: memref<32x32xbf16, #tpu.memory_space<vmem>>, %arg16: memref<1x32xf32, #tpu.memory_space<vmem>>, %arg17: memref<32x128xbf16, #tpu.memory_space<vmem>>, %arg18: memref<1x128xf32, #tpu.memory_space<vmem>>, %arg19: memref<8x8x128xf32, #tpu.memory_space<vmem>>, %arg20: memref<8x8x256xf32, #tpu.memory_space<vmem>>, %arg21: memref<8x8x32xf32, #tpu.memory_space<vmem>>, %arg22: memref<8x8x32xf32, #tpu.memory_space<vmem>>) attributes {dimension_semantics = [#tpu.dimension_semantics<parallel>], iteration_bounds = array<i64: 1>, scalar_prefetch = 0 : i64, scratch_operands = 3 : i64, tpu.core_type = #tpu.core_type<tc>, window_params = [{transform_indices = @transform_0, window_bounds = array<i64: 8, 8, 20>}, {transform_indices = @transform_1, window_bounds = array<i64: 8, 1>}, {pipeline_mode = #tpu.pipeline_mode<synchronous>, transform_indices = @transform_2, window_bounds = array<i64: 64, 64>}, {pipeline_mode = #tpu.pipeline_mode<synchronous>, transform_indices = @transform_3, window_bounds = array<i64: 20, 32>}, {pipeline_mode = #tpu.pipeline_mode<synchronous>, transform_indices = @transform_4, window_bounds = array<i64: 2, 32, 96>}, {pipeline_mode = #tpu.pipeline_mode<synchronous>, transform_indices = @transform_5, window_bounds = array<i64: 2, 1, 96>}, {pipeline_mode = #tpu.pipeline_mode<synchronous>, transform_indices = @transform_6, window_bounds = array<i64: 2, 32, 32>}, {pipeline_mode = #tpu.pipeline_mode<synchronous>, transform_indices = @transform_7, window_bounds = array<i64: 2, 1, 32>}, {pipeline_mode = #tpu.pipeline_mode<synchronous>, transform_indices = @transform_8, window_bounds = array<i64: 2, 1, 32>}, {pipeline_mode = #tpu.pipeline_mode<synchronous>, transform_indices = @transform_9, window_bounds = array<i64: 2, 1, 32>}, {pipeline_mode = #tpu.pipeline_mode<synchronous>, transform_indices = @transform_10, window_bounds = array<i64: 32, 256>}, {pipeline_mode = #tpu.pipeline_mode<synchronous>, transform_indices = @transform_11, window_bounds = array<i64: 1, 256>}, {pipeline_mode = #tpu.pipeline_mode<synchronous>, transform_indices = @transform_12, window_bounds = array<i64: 64, 256>}, {pipeline_mode = #tpu.pipeline_mode<synchronous>, transform_indices = @transform_13, window_bounds = array<i64: 32, 32>}, {pipeline_mode = #tpu.pipeline_mode<synchronous>, transform_indices = @transform_14, window_bounds = array<i64: 32, 32>}, {pipeline_mode = #tpu.pipeline_mode<synchronous>, transform_indices = @transform_15, window_bounds = array<i64: 1, 32>}, {pipeline_mode = #tpu.pipeline_mode<synchronous>, transform_indices = @transform_16, window_bounds = array<i64: 32, 128>}, {pipeline_mode = #tpu.pipeline_mode<synchronous>, transform_indices = @transform_17, window_bounds = array<i64: 1, 128>}, {transform_indices = @transform_18, window_bounds = array<i64: 8, 8, 128>}]} {
    %c0 = arith.constant 0 : index
    %c0_0 = arith.constant 0 : index
    %0 = vector.load %arg2[%c0, %c0_0] : memref<8x1xi32, #tpu.memory_space<vmem>>, vector<8x1xi32>
    %c0_1 = arith.constant 0 : index
    %c0_2 = arith.constant 0 : index
    %c0_3 = arith.constant 0 : index
    %1 = vector.load %arg1[%c0_1, %c0_2, %c0_3] : memref<8x8x20xf32, #tpu.memory_space<vmem>>, vector<8x8x20xf32>
    %2 = vector.shape_cast %1 : vector<8x8x20xf32> to vector<64x20xf32>
    %3 = arith.truncf %2 : vector<64x20xf32> to vector<64x20xbf16>
    %c0_4 = arith.constant 0 : index
    %c0_5 = arith.constant 0 : index
    %4 = vector.load %arg4[%c0_4, %c0_5] : memref<20x32xbf16, #tpu.memory_space<vmem>>, vector<20x32xbf16>
    %cst = arith.constant dense<0.000000e+00> : vector<64x32xf32>
    %5 = tpu.matmul %3, %4, %cst {dimension_numbers = #tpu.dot_dimension_numbers<[1], [0], [0], [1], [0, 0, 1, 1], [], []>} : vector<64x20xbf16>, vector<20x32xbf16>, vector<64x32xf32> -> vector<64x32xf32>
    %6 = tpu.iota {dimensions = array<i32: 2>} : vector<8x1x8xi32>
    %7 = vector.shape_cast %0 : vector<8x1xi32> to vector<8x1x1xi32>
    %8 = vector.broadcast %7 : vector<8x1x1xi32> to vector<8x1x8xi32>
    %9 = arith.cmpi slt, %6, %8 : vector<8x1x8xi32>
    %cst_6 = arith.constant 0.000000e+00 : f32
    %cst_7 = arith.constant -1.000000e+09 : f32
    %10 = vector.broadcast %cst_6 : f32 to vector<8x1x8xf32>
    %11 = vector.broadcast %cst_7 : f32 to vector<8x1x8xf32>
    %12 = arith.select %9, %10, %11 : vector<8x1x8xi1>, vector<8x1x8xf32>
    %13 = arith.truncf %5 : vector<64x32xf32> to vector<64x32xbf16>
    %c0_8 = arith.constant 0 : index
    %c0_9 = arith.constant 0 : index
    %c0_10 = arith.constant 0 : index
    %14 = vector.load %arg5[%c0_8, %c0_9, %c0_10] : memref<2x32x96xbf16, #tpu.memory_space<vmem>>, vector<1x32x96xbf16>
    %15 = vector.shape_cast %14 : vector<1x32x96xbf16> to vector<32x96xbf16>
    %cst_11 = arith.constant dense<0.000000e+00> : vector<64x96xf32>
    %16 = tpu.matmul %13, %15, %cst_11 {dimension_numbers = #tpu.dot_dimension_numbers<[1], [0], [0], [1], [0, 0, 1, 1], [], []>} : vector<64x32xbf16>, vector<32x96xbf16>, vector<64x96xf32> -> vector<64x96xf32>
    %c0_12 = arith.constant 0 : index
    %c0_13 = arith.constant 0 : index
    %c0_14 = arith.constant 0 : index
    %17 = vector.load %arg6[%c0_12, %c0_13, %c0_14] : memref<2x1x96xf32, #tpu.memory_space<vmem>>, vector<1x1x96xf32>
    %18 = vector.shape_cast %17 : vector<1x1x96xf32> to vector<1x96xf32>
    %19 = vector.broadcast %18 : vector<1x96xf32> to vector<64x96xf32>
    %20 = arith.addf %16, %19 : vector<64x96xf32>
    %21 = arith.truncf %20 : vector<64x96xf32> to vector<64x96xbf16>
    %22 = vector.shape_cast %21 : vector<64x96xbf16> to vector<8x8x96xbf16>
    %cst_15 = arith.constant 0.000000e+00 : f32
    %23 = vector.broadcast %cst_15 : f32 to vector<64x32xf32>
    %24 = vector.extract_strided_slice %22 {offsets = [0, 0, 0], sizes = [8, 8, 8], strides = [1, 1, 1]} : vector<8x8x96xbf16> to vector<8x8x8xbf16>
    %25 = vector.extract_strided_slice %22 {offsets = [0, 0, 32], sizes = [8, 8, 8], strides = [1, 1, 1]} : vector<8x8x96xbf16> to vector<8x8x8xbf16>
    %26 = vector.extract_strided_slice %22 {offsets = [0, 0, 64], sizes = [8, 8, 8], strides = [1, 1, 1]} : vector<8x8x96xbf16> to vector<8x8x8xbf16>
    "tpu.trace_start"() <{level = 10 : i32, message = "btd,bsd->bts"}> : () -> ()
    %cst_16 = arith.constant dense<0.000000e+00> : vector<8x8x8xf32>
    %27 = tpu.matmul %24, %25, %cst_16 {dimension_numbers = #tpu.dot_dimension_numbers<[2], [2], [1], [1], [0, 0, 0, 1, 1, 1], [0], [0]>} : vector<8x8x8xbf16>, vector<8x8x8xbf16>, vector<8x8x8xf32> -> vector<8x8x8xf32>
    "tpu.trace_stop"() : () -> ()
    %cst_17 = arith.constant 0.353553385 : f32
    %28 = vector.broadcast %cst_17 : f32 to vector<8x8x8xf32>
    %29 = arith.mulf %27, %28 : vector<8x8x8xf32>
    %30 = vector.broadcast %12 : vector<8x1x8xf32> to vector<8x8x8xf32>
    %31 = arith.addf %29, %30 : vector<8x8x8xf32>
    %cst_18 = arith.constant dense<0xFF800000> : vector<8x8xf32>
    %32 = vector.multi_reduction <maximumf>, %31, %cst_18 [2] : vector<8x8x8xf32> to vector<8x8xf32>
    %33 = vector.shape_cast %32 : vector<8x8xf32> to vector<8x8x1xf32>
    %34 = vector.broadcast %33 : vector<8x8x1xf32> to vector<8x8x8xf32>
    %35 = arith.subf %31, %34 : vector<8x8x8xf32>
    %36 = math.exp %35 : vector<8x8x8xf32>
    %cst_19 = arith.constant dense<0.000000e+00> : vector<8x8xf32>
    %37 = vector.multi_reduction <add>, %36, %cst_19 [2] : vector<8x8x8xf32> to vector<8x8xf32>
    %38 = vector.shape_cast %37 : vector<8x8xf32> to vector<8x8x1xf32>
    %39 = tpu.reciprocal %38 {approx = true} : vector<8x8x1xf32> -> vector<8x8x1xf32>
    %40 = vector.broadcast %39 : vector<8x8x1xf32> to vector<8x8x8xf32>
    %41 = arith.mulf %36, %40 : vector<8x8x8xf32>
    %42 = arith.truncf %41 : vector<8x8x8xf32> to vector<8x8x8xbf16>
    "tpu.trace_start"() <{level = 10 : i32, message = "bts,bsd->btd"}> : () -> ()
    %cst_20 = arith.constant dense<0.000000e+00> : vector<8x8x8xf32>
    %43 = tpu.matmul %42, %26, %cst_20 {dimension_numbers = #tpu.dot_dimension_numbers<[2], [1], [1], [2], [0, 0, 0, 1, 1, 2], [0], [0]>} : vector<8x8x8xbf16>, vector<8x8x8xbf16>, vector<8x8x8xf32> -> vector<8x8x8xf32>
    "tpu.trace_stop"() : () -> ()
    %44 = vector.shape_cast %43 : vector<8x8x8xf32> to vector<64x8xf32>
    %45 = arith.truncf %44 : vector<64x8xf32> to vector<64x8xbf16>
    %c0_21 = arith.constant 0 : index
    %c0_22 = arith.constant 0 : index
    %c0_23 = arith.constant 0 : index
    %46 = vector.load %arg7[%c0_21, %c0_22, %c0_23] : memref<2x32x32xbf16, #tpu.memory_space<vmem>>, vector<1x32x32xbf16>
    %47 = vector.shape_cast %46 : vector<1x32x32xbf16> to vector<32x32xbf16>
    %48 = vector.extract_strided_slice %47 {offsets = [0, 0], sizes = [8, 32], strides = [1, 1]} : vector<32x32xbf16> to vector<8x32xbf16>
    %cst_24 = arith.constant dense<0.000000e+00> : vector<64x32xf32>
    %49 = tpu.matmul %45, %48, %cst_24 {dimension_numbers = #tpu.dot_dimension_numbers<[1], [0], [0], [1], [0, 0, 1, 1], [], []>} : vector<64x8xbf16>, vector<8x32xbf16>, vector<64x32xf32> -> vector<64x32xf32>
    %50 = arith.addf %23, %49 : vector<64x32xf32>
    %51 = vector.extract_strided_slice %22 {offsets = [0, 0, 8], sizes = [8, 8, 8], strides = [1, 1, 1]} : vector<8x8x96xbf16> to vector<8x8x8xbf16>
    %52 = vector.extract_strided_slice %22 {offsets = [0, 0, 40], sizes = [8, 8, 8], strides = [1, 1, 1]} : vector<8x8x96xbf16> to vector<8x8x8xbf16>
    %53 = vector.extract_strided_slice %22 {offsets = [0, 0, 72], sizes = [8, 8, 8], strides = [1, 1, 1]} : vector<8x8x96xbf16> to vector<8x8x8xbf16>
    "tpu.trace_start"() <{level = 10 : i32, message = "btd,bsd->bts"}> : () -> ()
    %cst_25 = arith.constant dense<0.000000e+00> : vector<8x8x8xf32>
    %54 = tpu.matmul %51, %52, %cst_25 {dimension_numbers = #tpu.dot_dimension_numbers<[2], [2], [1], [1], [0, 0, 0, 1, 1, 1], [0], [0]>} : vector<8x8x8xbf16>, vector<8x8x8xbf16>, vector<8x8x8xf32> -> vector<8x8x8xf32>
    "tpu.trace_stop"() : () -> ()
    %cst_26 = arith.constant 0.353553385 : f32
    %55 = vector.broadcast %cst_26 : f32 to vector<8x8x8xf32>
    %56 = arith.mulf %54, %55 : vector<8x8x8xf32>
    %57 = vector.broadcast %12 : vector<8x1x8xf32> to vector<8x8x8xf32>
    %58 = arith.addf %56, %57 : vector<8x8x8xf32>
    %cst_27 = arith.constant dense<0xFF800000> : vector<8x8xf32>
    %59 = vector.multi_reduction <maximumf>, %58, %cst_27 [2] : vector<8x8x8xf32> to vector<8x8xf32>
    %60 = vector.shape_cast %59 : vector<8x8xf32> to vector<8x8x1xf32>
    %61 = vector.broadcast %60 : vector<8x8x1xf32> to vector<8x8x8xf32>
    %62 = arith.subf %58, %61 : vector<8x8x8xf32>
    %63 = math.exp %62 : vector<8x8x8xf32>
    %cst_28 = arith.constant dense<0.000000e+00> : vector<8x8xf32>
    %64 = vector.multi_reduction <add>, %63, %cst_28 [2] : vector<8x8x8xf32> to vector<8x8xf32>
    %65 = vector.shape_cast %64 : vector<8x8xf32> to vector<8x8x1xf32>
    %66 = tpu.reciprocal %65 {approx = true} : vector<8x8x1xf32> -> vector<8x8x1xf32>
    %67 = vector.broadcast %66 : vector<8x8x1xf32> to vector<8x8x8xf32>
    %68 = arith.mulf %63, %67 : vector<8x8x8xf32>
    %69 = arith.truncf %68 : vector<8x8x8xf32> to vector<8x8x8xbf16>
    "tpu.trace_start"() <{level = 10 : i32, message = "bts,bsd->btd"}> : () -> ()
    %cst_29 = arith.constant dense<0.000000e+00> : vector<8x8x8xf32>
    %70 = tpu.matmul %69, %53, %cst_29 {dimension_numbers = #tpu.dot_dimension_numbers<[2], [1], [1], [2], [0, 0, 0, 1, 1, 2], [0], [0]>} : vector<8x8x8xbf16>, vector<8x8x8xbf16>, vector<8x8x8xf32> -> vector<8x8x8xf32>
    "tpu.trace_stop"() : () -> ()
    %71 = vector.shape_cast %70 : vector<8x8x8xf32> to vector<64x8xf32>
    %72 = arith.truncf %71 : vector<64x8xf32> to vector<64x8xbf16>
    %c0_30 = arith.constant 0 : index
    %c0_31 = arith.constant 0 : index
    %c0_32 = arith.constant 0 : index
    %73 = vector.load %arg7[%c0_30, %c0_31, %c0_32] : memref<2x32x32xbf16, #tpu.memory_space<vmem>>, vector<1x32x32xbf16>
    %74 = vector.shape_cast %73 : vector<1x32x32xbf16> to vector<32x32xbf16>
    %75 = vector.extract_strided_slice %74 {offsets = [8, 0], sizes = [8, 32], strides = [1, 1]} : vector<32x32xbf16> to vector<8x32xbf16>
    %cst_33 = arith.constant dense<0.000000e+00> : vector<64x32xf32>
    %76 = tpu.matmul %72, %75, %cst_33 {dimension_numbers = #tpu.dot_dimension_numbers<[1], [0], [0], [1], [0, 0, 1, 1], [], []>} : vector<64x8xbf16>, vector<8x32xbf16>, vector<64x32xf32> -> vector<64x32xf32>
    %77 = arith.addf %50, %76 : vector<64x32xf32>
    %78 = vector.extract_strided_slice %22 {offsets = [0, 0, 16], sizes = [8, 8, 8], strides = [1, 1, 1]} : vector<8x8x96xbf16> to vector<8x8x8xbf16>
    %79 = vector.extract_strided_slice %22 {offsets = [0, 0, 48], sizes = [8, 8, 8], strides = [1, 1, 1]} : vector<8x8x96xbf16> to vector<8x8x8xbf16>
    %80 = vector.extract_strided_slice %22 {offsets = [0, 0, 80], sizes = [8, 8, 8], strides = [1, 1, 1]} : vector<8x8x96xbf16> to vector<8x8x8xbf16>
    "tpu.trace_start"() <{level = 10 : i32, message = "btd,bsd->bts"}> : () -> ()
    %cst_34 = arith.constant dense<0.000000e+00> : vector<8x8x8xf32>
    %81 = tpu.matmul %78, %79, %cst_34 {dimension_numbers = #tpu.dot_dimension_numbers<[2], [2], [1], [1], [0, 0, 0, 1, 1, 1], [0], [0]>} : vector<8x8x8xbf16>, vector<8x8x8xbf16>, vector<8x8x8xf32> -> vector<8x8x8xf32>
    "tpu.trace_stop"() : () -> ()
    %cst_35 = arith.constant 0.353553385 : f32
    %82 = vector.broadcast %cst_35 : f32 to vector<8x8x8xf32>
    %83 = arith.mulf %81, %82 : vector<8x8x8xf32>
    %84 = vector.broadcast %12 : vector<8x1x8xf32> to vector<8x8x8xf32>
    %85 = arith.addf %83, %84 : vector<8x8x8xf32>
    %cst_36 = arith.constant dense<0xFF800000> : vector<8x8xf32>
    %86 = vector.multi_reduction <maximumf>, %85, %cst_36 [2] : vector<8x8x8xf32> to vector<8x8xf32>
    %87 = vector.shape_cast %86 : vector<8x8xf32> to vector<8x8x1xf32>
    %88 = vector.broadcast %87 : vector<8x8x1xf32> to vector<8x8x8xf32>
    %89 = arith.subf %85, %88 : vector<8x8x8xf32>
    %90 = math.exp %89 : vector<8x8x8xf32>
    %cst_37 = arith.constant dense<0.000000e+00> : vector<8x8xf32>
    %91 = vector.multi_reduction <add>, %90, %cst_37 [2] : vector<8x8x8xf32> to vector<8x8xf32>
    %92 = vector.shape_cast %91 : vector<8x8xf32> to vector<8x8x1xf32>
    %93 = tpu.reciprocal %92 {approx = true} : vector<8x8x1xf32> -> vector<8x8x1xf32>
    %94 = vector.broadcast %93 : vector<8x8x1xf32> to vector<8x8x8xf32>
    %95 = arith.mulf %90, %94 : vector<8x8x8xf32>
    %96 = arith.truncf %95 : vector<8x8x8xf32> to vector<8x8x8xbf16>
    "tpu.trace_start"() <{level = 10 : i32, message = "bts,bsd->btd"}> : () -> ()
    %cst_38 = arith.constant dense<0.000000e+00> : vector<8x8x8xf32>
    %97 = tpu.matmul %96, %80, %cst_38 {dimension_numbers = #tpu.dot_dimension_numbers<[2], [1], [1], [2], [0, 0, 0, 1, 1, 2], [0], [0]>} : vector<8x8x8xbf16>, vector<8x8x8xbf16>, vector<8x8x8xf32> -> vector<8x8x8xf32>
    "tpu.trace_stop"() : () -> ()
    %98 = vector.shape_cast %97 : vector<8x8x8xf32> to vector<64x8xf32>
    %99 = arith.truncf %98 : vector<64x8xf32> to vector<64x8xbf16>
    %c0_39 = arith.constant 0 : index
    %c0_40 = arith.constant 0 : index
    %c0_41 = arith.constant 0 : index
    %100 = vector.load %arg7[%c0_39, %c0_40, %c0_41] : memref<2x32x32xbf16, #tpu.memory_space<vmem>>, vector<1x32x32xbf16>
    %101 = vector.shape_cast %100 : vector<1x32x32xbf16> to vector<32x32xbf16>
    %102 = vector.extract_strided_slice %101 {offsets = [16, 0], sizes = [8, 32], strides = [1, 1]} : vector<32x32xbf16> to vector<8x32xbf16>
    %cst_42 = arith.constant dense<0.000000e+00> : vector<64x32xf32>
    %103 = tpu.matmul %99, %102, %cst_42 {dimension_numbers = #tpu.dot_dimension_numbers<[1], [0], [0], [1], [0, 0, 1, 1], [], []>} : vector<64x8xbf16>, vector<8x32xbf16>, vector<64x32xf32> -> vector<64x32xf32>
    %104 = arith.addf %77, %103 : vector<64x32xf32>
    %105 = vector.extract_strided_slice %22 {offsets = [0, 0, 24], sizes = [8, 8, 8], strides = [1, 1, 1]} : vector<8x8x96xbf16> to vector<8x8x8xbf16>
    %106 = vector.extract_strided_slice %22 {offsets = [0, 0, 56], sizes = [8, 8, 8], strides = [1, 1, 1]} : vector<8x8x96xbf16> to vector<8x8x8xbf16>
    %107 = vector.extract_strided_slice %22 {offsets = [0, 0, 88], sizes = [8, 8, 8], strides = [1, 1, 1]} : vector<8x8x96xbf16> to vector<8x8x8xbf16>
    "tpu.trace_start"() <{level = 10 : i32, message = "btd,bsd->bts"}> : () -> ()
    %cst_43 = arith.constant dense<0.000000e+00> : vector<8x8x8xf32>
    %108 = tpu.matmul %105, %106, %cst_43 {dimension_numbers = #tpu.dot_dimension_numbers<[2], [2], [1], [1], [0, 0, 0, 1, 1, 1], [0], [0]>} : vector<8x8x8xbf16>, vector<8x8x8xbf16>, vector<8x8x8xf32> -> vector<8x8x8xf32>
    "tpu.trace_stop"() : () -> ()
    %cst_44 = arith.constant 0.353553385 : f32
    %109 = vector.broadcast %cst_44 : f32 to vector<8x8x8xf32>
    %110 = arith.mulf %108, %109 : vector<8x8x8xf32>
    %111 = vector.broadcast %12 : vector<8x1x8xf32> to vector<8x8x8xf32>
    %112 = arith.addf %110, %111 : vector<8x8x8xf32>
    %cst_45 = arith.constant dense<0xFF800000> : vector<8x8xf32>
    %113 = vector.multi_reduction <maximumf>, %112, %cst_45 [2] : vector<8x8x8xf32> to vector<8x8xf32>
    %114 = vector.shape_cast %113 : vector<8x8xf32> to vector<8x8x1xf32>
    %115 = vector.broadcast %114 : vector<8x8x1xf32> to vector<8x8x8xf32>
    %116 = arith.subf %112, %115 : vector<8x8x8xf32>
    %117 = math.exp %116 : vector<8x8x8xf32>
    %cst_46 = arith.constant dense<0.000000e+00> : vector<8x8xf32>
    %118 = vector.multi_reduction <add>, %117, %cst_46 [2] : vector<8x8x8xf32> to vector<8x8xf32>
    %119 = vector.shape_cast %118 : vector<8x8xf32> to vector<8x8x1xf32>
    %120 = tpu.reciprocal %119 {approx = true} : vector<8x8x1xf32> -> vector<8x8x1xf32>
    %121 = vector.broadcast %120 : vector<8x8x1xf32> to vector<8x8x8xf32>
    %122 = arith.mulf %117, %121 : vector<8x8x8xf32>
    %123 = arith.truncf %122 : vector<8x8x8xf32> to vector<8x8x8xbf16>
    "tpu.trace_start"() <{level = 10 : i32, message = "bts,bsd->btd"}> : () -> ()
    %cst_47 = arith.constant dense<0.000000e+00> : vector<8x8x8xf32>
    %124 = tpu.matmul %123, %107, %cst_47 {dimension_numbers = #tpu.dot_dimension_numbers<[2], [1], [1], [2], [0, 0, 0, 1, 1, 2], [0], [0]>} : vector<8x8x8xbf16>, vector<8x8x8xbf16>, vector<8x8x8xf32> -> vector<8x8x8xf32>
    "tpu.trace_stop"() : () -> ()
    %125 = vector.shape_cast %124 : vector<8x8x8xf32> to vector<64x8xf32>
    %126 = arith.truncf %125 : vector<64x8xf32> to vector<64x8xbf16>
    %c0_48 = arith.constant 0 : index
    %c0_49 = arith.constant 0 : index
    %c0_50 = arith.constant 0 : index
    %127 = vector.load %arg7[%c0_48, %c0_49, %c0_50] : memref<2x32x32xbf16, #tpu.memory_space<vmem>>, vector<1x32x32xbf16>
    %128 = vector.shape_cast %127 : vector<1x32x32xbf16> to vector<32x32xbf16>
    %129 = vector.extract_strided_slice %128 {offsets = [24, 0], sizes = [8, 32], strides = [1, 1]} : vector<32x32xbf16> to vector<8x32xbf16>
    %cst_51 = arith.constant dense<0.000000e+00> : vector<64x32xf32>
    %130 = tpu.matmul %126, %129, %cst_51 {dimension_numbers = #tpu.dot_dimension_numbers<[1], [0], [0], [1], [0, 0, 1, 1], [], []>} : vector<64x8xbf16>, vector<8x32xbf16>, vector<64x32xf32> -> vector<64x32xf32>
    %131 = arith.addf %104, %130 : vector<64x32xf32>
    %132 = arith.addf %5, %131 : vector<64x32xf32>
    %c0_52 = arith.constant 0 : index
    %c0_53 = arith.constant 0 : index
    %c0_54 = arith.constant 0 : index
    %133 = vector.load %arg8[%c0_52, %c0_53, %c0_54] : memref<2x1x32xf32, #tpu.memory_space<vmem>>, vector<1x1x32xf32>
    %134 = vector.shape_cast %133 : vector<1x1x32xf32> to vector<1x32xf32>
    %135 = vector.broadcast %134 : vector<1x32xf32> to vector<64x32xf32>
    %136 = arith.addf %132, %135 : vector<64x32xf32>
    %cst_55 = arith.constant dense<0.000000e+00> : vector<64xf32>
    %137 = vector.multi_reduction <add>, %136, %cst_55 [1] : vector<64x32xf32> to vector<64xf32>
    %138 = vector.shape_cast %137 : vector<64xf32> to vector<64x1xf32>
    %cst_56 = arith.constant 3.200000e+01 : f32
    %139 = vector.broadcast %cst_56 : f32 to vector<64x1xf32>
    %140 = arith.divf %138, %139 : vector<64x1xf32>
    %141 = vector.broadcast %140 : vector<64x1xf32> to vector<64x32xf32>
    %142 = arith.subf %136, %141 : vector<64x32xf32>
    %143 = arith.mulf %142, %142 : vector<64x32xf32>
    %cst_57 = arith.constant dense<0.000000e+00> : vector<64xf32>
    %144 = vector.multi_reduction <add>, %143, %cst_57 [1] : vector<64x32xf32> to vector<64xf32>
    %145 = vector.shape_cast %144 : vector<64xf32> to vector<64x1xf32>
    %cst_58 = arith.constant 3.200000e+01 : f32
    %146 = vector.broadcast %cst_58 : f32 to vector<64x1xf32>
    %147 = arith.divf %145, %146 : vector<64x1xf32>
    %cst_59 = arith.constant 9.99999974E-6 : f32
    %148 = vector.broadcast %cst_59 : f32 to vector<64x1xf32>
    %149 = arith.addf %147, %148 : vector<64x1xf32>
    %150 = math.rsqrt %149 : vector<64x1xf32>
    %151 = vector.broadcast %150 : vector<64x1xf32> to vector<64x32xf32>
    %152 = arith.mulf %142, %151 : vector<64x32xf32>
    %c0_60 = arith.constant 0 : index
    %c0_61 = arith.constant 0 : index
    %c0_62 = arith.constant 0 : index
    %153 = vector.load %arg9[%c0_60, %c0_61, %c0_62] : memref<2x1x32xf32, #tpu.memory_space<vmem>>, vector<1x1x32xf32>
    %154 = vector.shape_cast %153 : vector<1x1x32xf32> to vector<1x32xf32>
    %155 = vector.broadcast %154 : vector<1x32xf32> to vector<64x32xf32>
    %156 = arith.mulf %152, %155 : vector<64x32xf32>
    %c0_63 = arith.constant 0 : index
    %c0_64 = arith.constant 0 : index
    %c0_65 = arith.constant 0 : index
    %157 = vector.load %arg10[%c0_63, %c0_64, %c0_65] : memref<2x1x32xf32, #tpu.memory_space<vmem>>, vector<1x1x32xf32>
    %158 = vector.shape_cast %157 : vector<1x1x32xf32> to vector<1x32xf32>
    %159 = vector.broadcast %158 : vector<1x32xf32> to vector<64x32xf32>
    %160 = arith.addf %156, %159 : vector<64x32xf32>
    %161 = arith.truncf %160 : vector<64x32xf32> to vector<64x32xbf16>
    %c1 = arith.constant 1 : index
    %c0_66 = arith.constant 0 : index
    %c0_67 = arith.constant 0 : index
    %162 = vector.load %arg5[%c1, %c0_66, %c0_67] : memref<2x32x96xbf16, #tpu.memory_space<vmem>>, vector<1x32x96xbf16>
    %163 = vector.shape_cast %162 : vector<1x32x96xbf16> to vector<32x96xbf16>
    %cst_68 = arith.constant dense<0.000000e+00> : vector<64x96xf32>
    %164 = tpu.matmul %161, %163, %cst_68 {dimension_numbers = #tpu.dot_dimension_numbers<[1], [0], [0], [1], [0, 0, 1, 1], [], []>} : vector<64x32xbf16>, vector<32x96xbf16>, vector<64x96xf32> -> vector<64x96xf32>
    %c1_69 = arith.constant 1 : index
    %c0_70 = arith.constant 0 : index
    %c0_71 = arith.constant 0 : index
    %165 = vector.load %arg6[%c1_69, %c0_70, %c0_71] : memref<2x1x96xf32, #tpu.memory_space<vmem>>, vector<1x1x96xf32>
    %166 = vector.shape_cast %165 : vector<1x1x96xf32> to vector<1x96xf32>
    %167 = vector.broadcast %166 : vector<1x96xf32> to vector<64x96xf32>
    %168 = arith.addf %164, %167 : vector<64x96xf32>
    %169 = arith.truncf %168 : vector<64x96xf32> to vector<64x96xbf16>
    %170 = vector.shape_cast %169 : vector<64x96xbf16> to vector<8x8x96xbf16>
    %cst_72 = arith.constant 0.000000e+00 : f32
    %171 = vector.broadcast %cst_72 : f32 to vector<64x32xf32>
    %172 = vector.extract_strided_slice %170 {offsets = [0, 0, 0], sizes = [8, 8, 8], strides = [1, 1, 1]} : vector<8x8x96xbf16> to vector<8x8x8xbf16>
    %173 = vector.extract_strided_slice %170 {offsets = [0, 0, 32], sizes = [8, 8, 8], strides = [1, 1, 1]} : vector<8x8x96xbf16> to vector<8x8x8xbf16>
    %174 = vector.extract_strided_slice %170 {offsets = [0, 0, 64], sizes = [8, 8, 8], strides = [1, 1, 1]} : vector<8x8x96xbf16> to vector<8x8x8xbf16>
    "tpu.trace_start"() <{level = 10 : i32, message = "btd,bsd->bts"}> : () -> ()
    %cst_73 = arith.constant dense<0.000000e+00> : vector<8x8x8xf32>
    %175 = tpu.matmul %172, %173, %cst_73 {dimension_numbers = #tpu.dot_dimension_numbers<[2], [2], [1], [1], [0, 0, 0, 1, 1, 1], [0], [0]>} : vector<8x8x8xbf16>, vector<8x8x8xbf16>, vector<8x8x8xf32> -> vector<8x8x8xf32>
    "tpu.trace_stop"() : () -> ()
    %cst_74 = arith.constant 0.353553385 : f32
    %176 = vector.broadcast %cst_74 : f32 to vector<8x8x8xf32>
    %177 = arith.mulf %175, %176 : vector<8x8x8xf32>
    %178 = vector.broadcast %12 : vector<8x1x8xf32> to vector<8x8x8xf32>
    %179 = arith.addf %177, %178 : vector<8x8x8xf32>
    %cst_75 = arith.constant dense<0xFF800000> : vector<8x8xf32>
    %180 = vector.multi_reduction <maximumf>, %179, %cst_75 [2] : vector<8x8x8xf32> to vector<8x8xf32>
    %181 = vector.shape_cast %180 : vector<8x8xf32> to vector<8x8x1xf32>
    %182 = vector.broadcast %181 : vector<8x8x1xf32> to vector<8x8x8xf32>
    %183 = arith.subf %179, %182 : vector<8x8x8xf32>
    %184 = math.exp %183 : vector<8x8x8xf32>
    %cst_76 = arith.constant dense<0.000000e+00> : vector<8x8xf32>
    %185 = vector.multi_reduction <add>, %184, %cst_76 [2] : vector<8x8x8xf32> to vector<8x8xf32>
    %186 = vector.shape_cast %185 : vector<8x8xf32> to vector<8x8x1xf32>
    %187 = tpu.reciprocal %186 {approx = true} : vector<8x8x1xf32> -> vector<8x8x1xf32>
    %188 = vector.broadcast %187 : vector<8x8x1xf32> to vector<8x8x8xf32>
    %189 = arith.mulf %184, %188 : vector<8x8x8xf32>
    %190 = arith.truncf %189 : vector<8x8x8xf32> to vector<8x8x8xbf16>
    "tpu.trace_start"() <{level = 10 : i32, message = "bts,bsd->btd"}> : () -> ()
    %cst_77 = arith.constant dense<0.000000e+00> : vector<8x8x8xf32>
    %191 = tpu.matmul %190, %174, %cst_77 {dimension_numbers = #tpu.dot_dimension_numbers<[2], [1], [1], [2], [0, 0, 0, 1, 1, 2], [0], [0]>} : vector<8x8x8xbf16>, vector<8x8x8xbf16>, vector<8x8x8xf32> -> vector<8x8x8xf32>
    "tpu.trace_stop"() : () -> ()
    %192 = vector.shape_cast %191 : vector<8x8x8xf32> to vector<64x8xf32>
    %193 = arith.truncf %192 : vector<64x8xf32> to vector<64x8xbf16>
    %c1_78 = arith.constant 1 : index
    %c0_79 = arith.constant 0 : index
    %c0_80 = arith.constant 0 : index
    %194 = vector.load %arg7[%c1_78, %c0_79, %c0_80] : memref<2x32x32xbf16, #tpu.memory_space<vmem>>, vector<1x32x32xbf16>
    %195 = vector.shape_cast %194 : vector<1x32x32xbf16> to vector<32x32xbf16>
    %196 = vector.extract_strided_slice %195 {offsets = [0, 0], sizes = [8, 32], strides = [1, 1]} : vector<32x32xbf16> to vector<8x32xbf16>
    %cst_81 = arith.constant dense<0.000000e+00> : vector<64x32xf32>
    %197 = tpu.matmul %193, %196, %cst_81 {dimension_numbers = #tpu.dot_dimension_numbers<[1], [0], [0], [1], [0, 0, 1, 1], [], []>} : vector<64x8xbf16>, vector<8x32xbf16>, vector<64x32xf32> -> vector<64x32xf32>
    %198 = arith.addf %171, %197 : vector<64x32xf32>
    %199 = vector.extract_strided_slice %170 {offsets = [0, 0, 8], sizes = [8, 8, 8], strides = [1, 1, 1]} : vector<8x8x96xbf16> to vector<8x8x8xbf16>
    %200 = vector.extract_strided_slice %170 {offsets = [0, 0, 40], sizes = [8, 8, 8], strides = [1, 1, 1]} : vector<8x8x96xbf16> to vector<8x8x8xbf16>
    %201 = vector.extract_strided_slice %170 {offsets = [0, 0, 72], sizes = [8, 8, 8], strides = [1, 1, 1]} : vector<8x8x96xbf16> to vector<8x8x8xbf16>
    "tpu.trace_start"() <{level = 10 : i32, message = "btd,bsd->bts"}> : () -> ()
    %cst_82 = arith.constant dense<0.000000e+00> : vector<8x8x8xf32>
    %202 = tpu.matmul %199, %200, %cst_82 {dimension_numbers = #tpu.dot_dimension_numbers<[2], [2], [1], [1], [0, 0, 0, 1, 1, 1], [0], [0]>} : vector<8x8x8xbf16>, vector<8x8x8xbf16>, vector<8x8x8xf32> -> vector<8x8x8xf32>
    "tpu.trace_stop"() : () -> ()
    %cst_83 = arith.constant 0.353553385 : f32
    %203 = vector.broadcast %cst_83 : f32 to vector<8x8x8xf32>
    %204 = arith.mulf %202, %203 : vector<8x8x8xf32>
    %205 = vector.broadcast %12 : vector<8x1x8xf32> to vector<8x8x8xf32>
    %206 = arith.addf %204, %205 : vector<8x8x8xf32>
    %cst_84 = arith.constant dense<0xFF800000> : vector<8x8xf32>
    %207 = vector.multi_reduction <maximumf>, %206, %cst_84 [2] : vector<8x8x8xf32> to vector<8x8xf32>
    %208 = vector.shape_cast %207 : vector<8x8xf32> to vector<8x8x1xf32>
    %209 = vector.broadcast %208 : vector<8x8x1xf32> to vector<8x8x8xf32>
    %210 = arith.subf %206, %209 : vector<8x8x8xf32>
    %211 = math.exp %210 : vector<8x8x8xf32>
    %cst_85 = arith.constant dense<0.000000e+00> : vector<8x8xf32>
    %212 = vector.multi_reduction <add>, %211, %cst_85 [2] : vector<8x8x8xf32> to vector<8x8xf32>
    %213 = vector.shape_cast %212 : vector<8x8xf32> to vector<8x8x1xf32>
    %214 = tpu.reciprocal %213 {approx = true} : vector<8x8x1xf32> -> vector<8x8x1xf32>
    %215 = vector.broadcast %214 : vector<8x8x1xf32> to vector<8x8x8xf32>
    %216 = arith.mulf %211, %215 : vector<8x8x8xf32>
    %217 = arith.truncf %216 : vector<8x8x8xf32> to vector<8x8x8xbf16>
    "tpu.trace_start"() <{level = 10 : i32, message = "bts,bsd->btd"}> : () -> ()
    %cst_86 = arith.constant dense<0.000000e+00> : vector<8x8x8xf32>
    %218 = tpu.matmul %217, %201, %cst_86 {dimension_numbers = #tpu.dot_dimension_numbers<[2], [1], [1], [2], [0, 0, 0, 1, 1, 2], [0], [0]>} : vector<8x8x8xbf16>, vector<8x8x8xbf16>, vector<8x8x8xf32> -> vector<8x8x8xf32>
    "tpu.trace_stop"() : () -> ()
    %219 = vector.shape_cast %218 : vector<8x8x8xf32> to vector<64x8xf32>
    %220 = arith.truncf %219 : vector<64x8xf32> to vector<64x8xbf16>
    %c1_87 = arith.constant 1 : index
    %c0_88 = arith.constant 0 : index
    %c0_89 = arith.constant 0 : index
    %221 = vector.load %arg7[%c1_87, %c0_88, %c0_89] : memref<2x32x32xbf16, #tpu.memory_space<vmem>>, vector<1x32x32xbf16>
    %222 = vector.shape_cast %221 : vector<1x32x32xbf16> to vector<32x32xbf16>
    %223 = vector.extract_strided_slice %222 {offsets = [8, 0], sizes = [8, 32], strides = [1, 1]} : vector<32x32xbf16> to vector<8x32xbf16>
    %cst_90 = arith.constant dense<0.000000e+00> : vector<64x32xf32>
    %224 = tpu.matmul %220, %223, %cst_90 {dimension_numbers = #tpu.dot_dimension_numbers<[1], [0], [0], [1], [0, 0, 1, 1], [], []>} : vector<64x8xbf16>, vector<8x32xbf16>, vector<64x32xf32> -> vector<64x32xf32>
    %225 = arith.addf %198, %224 : vector<64x32xf32>
    %226 = vector.extract_strided_slice %170 {offsets = [0, 0, 16], sizes = [8, 8, 8], strides = [1, 1, 1]} : vector<8x8x96xbf16> to vector<8x8x8xbf16>
    %227 = vector.extract_strided_slice %170 {offsets = [0, 0, 48], sizes = [8, 8, 8], strides = [1, 1, 1]} : vector<8x8x96xbf16> to vector<8x8x8xbf16>
    %228 = vector.extract_strided_slice %170 {offsets = [0, 0, 80], sizes = [8, 8, 8], strides = [1, 1, 1]} : vector<8x8x96xbf16> to vector<8x8x8xbf16>
    "tpu.trace_start"() <{level = 10 : i32, message = "btd,bsd->bts"}> : () -> ()
    %cst_91 = arith.constant dense<0.000000e+00> : vector<8x8x8xf32>
    %229 = tpu.matmul %226, %227, %cst_91 {dimension_numbers = #tpu.dot_dimension_numbers<[2], [2], [1], [1], [0, 0, 0, 1, 1, 1], [0], [0]>} : vector<8x8x8xbf16>, vector<8x8x8xbf16>, vector<8x8x8xf32> -> vector<8x8x8xf32>
    "tpu.trace_stop"() : () -> ()
    %cst_92 = arith.constant 0.353553385 : f32
    %230 = vector.broadcast %cst_92 : f32 to vector<8x8x8xf32>
    %231 = arith.mulf %229, %230 : vector<8x8x8xf32>
    %232 = vector.broadcast %12 : vector<8x1x8xf32> to vector<8x8x8xf32>
    %233 = arith.addf %231, %232 : vector<8x8x8xf32>
    %cst_93 = arith.constant dense<0xFF800000> : vector<8x8xf32>
    %234 = vector.multi_reduction <maximumf>, %233, %cst_93 [2] : vector<8x8x8xf32> to vector<8x8xf32>
    %235 = vector.shape_cast %234 : vector<8x8xf32> to vector<8x8x1xf32>
    %236 = vector.broadcast %235 : vector<8x8x1xf32> to vector<8x8x8xf32>
    %237 = arith.subf %233, %236 : vector<8x8x8xf32>
    %238 = math.exp %237 : vector<8x8x8xf32>
    %cst_94 = arith.constant dense<0.000000e+00> : vector<8x8xf32>
    %239 = vector.multi_reduction <add>, %238, %cst_94 [2] : vector<8x8x8xf32> to vector<8x8xf32>
    %240 = vector.shape_cast %239 : vector<8x8xf32> to vector<8x8x1xf32>
    %241 = tpu.reciprocal %240 {approx = true} : vector<8x8x1xf32> -> vector<8x8x1xf32>
    %242 = vector.broadcast %241 : vector<8x8x1xf32> to vector<8x8x8xf32>
    %243 = arith.mulf %238, %242 : vector<8x8x8xf32>
    %244 = arith.truncf %243 : vector<8x8x8xf32> to vector<8x8x8xbf16>
    "tpu.trace_start"() <{level = 10 : i32, message = "bts,bsd->btd"}> : () -> ()
    %cst_95 = arith.constant dense<0.000000e+00> : vector<8x8x8xf32>
    %245 = tpu.matmul %244, %228, %cst_95 {dimension_numbers = #tpu.dot_dimension_numbers<[2], [1], [1], [2], [0, 0, 0, 1, 1, 2], [0], [0]>} : vector<8x8x8xbf16>, vector<8x8x8xbf16>, vector<8x8x8xf32> -> vector<8x8x8xf32>
    "tpu.trace_stop"() : () -> ()
    %246 = vector.shape_cast %245 : vector<8x8x8xf32> to vector<64x8xf32>
    %247 = arith.truncf %246 : vector<64x8xf32> to vector<64x8xbf16>
    %c1_96 = arith.constant 1 : index
    %c0_97 = arith.constant 0 : index
    %c0_98 = arith.constant 0 : index
    %248 = vector.load %arg7[%c1_96, %c0_97, %c0_98] : memref<2x32x32xbf16, #tpu.memory_space<vmem>>, vector<1x32x32xbf16>
    %249 = vector.shape_cast %248 : vector<1x32x32xbf16> to vector<32x32xbf16>
    %250 = vector.extract_strided_slice %249 {offsets = [16, 0], sizes = [8, 32], strides = [1, 1]} : vector<32x32xbf16> to vector<8x32xbf16>
    %cst_99 = arith.constant dense<0.000000e+00> : vector<64x32xf32>
    %251 = tpu.matmul %247, %250, %cst_99 {dimension_numbers = #tpu.dot_dimension_numbers<[1], [0], [0], [1], [0, 0, 1, 1], [], []>} : vector<64x8xbf16>, vector<8x32xbf16>, vector<64x32xf32> -> vector<64x32xf32>
    %252 = arith.addf %225, %251 : vector<64x32xf32>
    %253 = vector.extract_strided_slice %170 {offsets = [0, 0, 24], sizes = [8, 8, 8], strides = [1, 1, 1]} : vector<8x8x96xbf16> to vector<8x8x8xbf16>
    %254 = vector.extract_strided_slice %170 {offsets = [0, 0, 56], sizes = [8, 8, 8], strides = [1, 1, 1]} : vector<8x8x96xbf16> to vector<8x8x8xbf16>
    %255 = vector.extract_strided_slice %170 {offsets = [0, 0, 88], sizes = [8, 8, 8], strides = [1, 1, 1]} : vector<8x8x96xbf16> to vector<8x8x8xbf16>
    "tpu.trace_start"() <{level = 10 : i32, message = "btd,bsd->bts"}> : () -> ()
    %cst_100 = arith.constant dense<0.000000e+00> : vector<8x8x8xf32>
    %256 = tpu.matmul %253, %254, %cst_100 {dimension_numbers = #tpu.dot_dimension_numbers<[2], [2], [1], [1], [0, 0, 0, 1, 1, 1], [0], [0]>} : vector<8x8x8xbf16>, vector<8x8x8xbf16>, vector<8x8x8xf32> -> vector<8x8x8xf32>
    "tpu.trace_stop"() : () -> ()
    %cst_101 = arith.constant 0.353553385 : f32
    %257 = vector.broadcast %cst_101 : f32 to vector<8x8x8xf32>
    %258 = arith.mulf %256, %257 : vector<8x8x8xf32>
    %259 = vector.broadcast %12 : vector<8x1x8xf32> to vector<8x8x8xf32>
    %260 = arith.addf %258, %259 : vector<8x8x8xf32>
    %cst_102 = arith.constant dense<0xFF800000> : vector<8x8xf32>
    %261 = vector.multi_reduction <maximumf>, %260, %cst_102 [2] : vector<8x8x8xf32> to vector<8x8xf32>
    %262 = vector.shape_cast %261 : vector<8x8xf32> to vector<8x8x1xf32>
    %263 = vector.broadcast %262 : vector<8x8x1xf32> to vector<8x8x8xf32>
    %264 = arith.subf %260, %263 : vector<8x8x8xf32>
    %265 = math.exp %264 : vector<8x8x8xf32>
    %cst_103 = arith.constant dense<0.000000e+00> : vector<8x8xf32>
    %266 = vector.multi_reduction <add>, %265, %cst_103 [2] : vector<8x8x8xf32> to vector<8x8xf32>
    %267 = vector.shape_cast %266 : vector<8x8xf32> to vector<8x8x1xf32>
    %268 = tpu.reciprocal %267 {approx = true} : vector<8x8x1xf32> -> vector<8x8x1xf32>
    %269 = vector.broadcast %268 : vector<8x8x1xf32> to vector<8x8x8xf32>
    %270 = arith.mulf %265, %269 : vector<8x8x8xf32>
    %271 = arith.truncf %270 : vector<8x8x8xf32> to vector<8x8x8xbf16>
    "tpu.trace_start"() <{level = 10 : i32, message = "bts,bsd->btd"}> : () -> ()
    %cst_104 = arith.constant dense<0.000000e+00> : vector<8x8x8xf32>
    %272 = tpu.matmul %271, %255, %cst_104 {dimension_numbers = #tpu.dot_dimension_numbers<[2], [1], [1], [2], [0, 0, 0, 1, 1, 2], [0], [0]>} : vector<8x8x8xbf16>, vector<8x8x8xbf16>, vector<8x8x8xf32> -> vector<8x8x8xf32>
    "tpu.trace_stop"() : () -> ()
    %273 = vector.shape_cast %272 : vector<8x8x8xf32> to vector<64x8xf32>
    %274 = arith.truncf %273 : vector<64x8xf32> to vector<64x8xbf16>
    %c1_105 = arith.constant 1 : index
    %c0_106 = arith.constant 0 : index
    %c0_107 = arith.constant 0 : index
    %275 = vector.load %arg7[%c1_105, %c0_106, %c0_107] : memref<2x32x32xbf16, #tpu.memory_space<vmem>>, vector<1x32x32xbf16>
    %276 = vector.shape_cast %275 : vector<1x32x32xbf16> to vector<32x32xbf16>
    %277 = vector.extract_strided_slice %276 {offsets = [24, 0], sizes = [8, 32], strides = [1, 1]} : vector<32x32xbf16> to vector<8x32xbf16>
    %cst_108 = arith.constant dense<0.000000e+00> : vector<64x32xf32>
    %278 = tpu.matmul %274, %277, %cst_108 {dimension_numbers = #tpu.dot_dimension_numbers<[1], [0], [0], [1], [0, 0, 1, 1], [], []>} : vector<64x8xbf16>, vector<8x32xbf16>, vector<64x32xf32> -> vector<64x32xf32>
    %279 = arith.addf %252, %278 : vector<64x32xf32>
    %280 = arith.addf %160, %279 : vector<64x32xf32>
    %c1_109 = arith.constant 1 : index
    %c0_110 = arith.constant 0 : index
    %c0_111 = arith.constant 0 : index
    %281 = vector.load %arg8[%c1_109, %c0_110, %c0_111] : memref<2x1x32xf32, #tpu.memory_space<vmem>>, vector<1x1x32xf32>
    %282 = vector.shape_cast %281 : vector<1x1x32xf32> to vector<1x32xf32>
    %283 = vector.broadcast %282 : vector<1x32xf32> to vector<64x32xf32>
    %284 = arith.addf %280, %283 : vector<64x32xf32>
    %cst_112 = arith.constant dense<0.000000e+00> : vector<64xf32>
    %285 = vector.multi_reduction <add>, %284, %cst_112 [1] : vector<64x32xf32> to vector<64xf32>
    %286 = vector.shape_cast %285 : vector<64xf32> to vector<64x1xf32>
    %cst_113 = arith.constant 3.200000e+01 : f32
    %287 = vector.broadcast %cst_113 : f32 to vector<64x1xf32>
    %288 = arith.divf %286, %287 : vector<64x1xf32>
    %289 = vector.broadcast %288 : vector<64x1xf32> to vector<64x32xf32>
    %290 = arith.subf %284, %289 : vector<64x32xf32>
    %291 = arith.mulf %290, %290 : vector<64x32xf32>
    %cst_114 = arith.constant dense<0.000000e+00> : vector<64xf32>
    %292 = vector.multi_reduction <add>, %291, %cst_114 [1] : vector<64x32xf32> to vector<64xf32>
    %293 = vector.shape_cast %292 : vector<64xf32> to vector<64x1xf32>
    %cst_115 = arith.constant 3.200000e+01 : f32
    %294 = vector.broadcast %cst_115 : f32 to vector<64x1xf32>
    %295 = arith.divf %293, %294 : vector<64x1xf32>
    %cst_116 = arith.constant 9.99999974E-6 : f32
    %296 = vector.broadcast %cst_116 : f32 to vector<64x1xf32>
    %297 = arith.addf %295, %296 : vector<64x1xf32>
    %298 = math.rsqrt %297 : vector<64x1xf32>
    %299 = vector.broadcast %298 : vector<64x1xf32> to vector<64x32xf32>
    %300 = arith.mulf %290, %299 : vector<64x32xf32>
    %c1_117 = arith.constant 1 : index
    %c0_118 = arith.constant 0 : index
    %c0_119 = arith.constant 0 : index
    %301 = vector.load %arg9[%c1_117, %c0_118, %c0_119] : memref<2x1x32xf32, #tpu.memory_space<vmem>>, vector<1x1x32xf32>
    %302 = vector.shape_cast %301 : vector<1x1x32xf32> to vector<1x32xf32>
    %303 = vector.broadcast %302 : vector<1x32xf32> to vector<64x32xf32>
    %304 = arith.mulf %300, %303 : vector<64x32xf32>
    %c1_120 = arith.constant 1 : index
    %c0_121 = arith.constant 0 : index
    %c0_122 = arith.constant 0 : index
    %305 = vector.load %arg10[%c1_120, %c0_121, %c0_122] : memref<2x1x32xf32, #tpu.memory_space<vmem>>, vector<1x1x32xf32>
    %306 = vector.shape_cast %305 : vector<1x1x32xf32> to vector<1x32xf32>
    %307 = vector.broadcast %306 : vector<1x32xf32> to vector<64x32xf32>
    %308 = arith.addf %304, %307 : vector<64x32xf32>
    %c0_123 = arith.constant 0 : index
    %c0_124 = arith.constant 0 : index
    %309 = vector.load %arg3[%c0_123, %c0_124] : memref<64x64xbf16, #tpu.memory_space<vmem>>, vector<64x64xbf16>
    %310 = arith.truncf %308 : vector<64x32xf32> to vector<64x32xbf16>
    %cst_125 = arith.constant dense<0.000000e+00> : vector<64x32xf32>
    %311 = tpu.matmul %309, %310, %cst_125 {dimension_numbers = #tpu.dot_dimension_numbers<[1], [0], [0], [1], [0, 0, 1, 1], [], []>} : vector<64x64xbf16>, vector<64x32xbf16>, vector<64x32xf32> -> vector<64x32xf32>
    %312 = arith.truncf %311 : vector<64x32xf32> to vector<64x32xbf16>
    %c0_126 = arith.constant 0 : index
    %c0_127 = arith.constant 0 : index
    %313 = vector.load %arg11[%c0_126, %c0_127] : memref<32x256xbf16, #tpu.memory_space<vmem>>, vector<32x256xbf16>
    %cst_128 = arith.constant dense<0.000000e+00> : vector<64x256xf32>
    %314 = tpu.matmul %312, %313, %cst_128 {dimension_numbers = #tpu.dot_dimension_numbers<[1], [0], [0], [1], [0, 0, 1, 1], [], []>} : vector<64x32xbf16>, vector<32x256xbf16>, vector<64x256xf32> -> vector<64x256xf32>
    %c0_129 = arith.constant 0 : index
    %c0_130 = arith.constant 0 : index
    %315 = vector.load %arg12[%c0_129, %c0_130] : memref<1x256xf32, #tpu.memory_space<vmem>>, vector<1x256xf32>
    %316 = vector.broadcast %315 : vector<1x256xf32> to vector<64x256xf32>
    %317 = arith.addf %314, %316 : vector<64x256xf32>
    %318 = vector.shape_cast %317 : vector<64x256xf32> to vector<8x8x256xf32>
    %c0_131 = arith.constant 0 : index
    %c0_132 = arith.constant 0 : index
    %c0_133 = arith.constant 0 : index
    %319 = vector.load %arg20[%c0_131, %c0_132, %c0_133] : memref<8x8x256xf32, #tpu.memory_space<vmem>>, vector<8x8x256xf32>
    tpu.vector_store %arg20[%c0_131, %c0_132, %c0_133], %318 {strides = array<i32>} : memref<8x8x256xf32, #tpu.memory_space<vmem>>, vector<8x8x256xf32>,
    %c0_134 = arith.constant 0 : index
    %c0_135 = arith.constant 0 : index
    %320 = vector.load %arg13[%c0_134, %c0_135] : memref<64x256xbf16, #tpu.memory_space<vmem>>, vector<64x256xbf16>
    %cst_136 = arith.constant 0.000000e+00 : f32
    %321 = vector.broadcast %cst_136 : f32 to vector<8x64xf32>
    %cst_137 = arith.constant 0.000000e+00 : f32
    %322 = vector.broadcast %cst_137 : f32 to vector<8x32xf32>
    %cst_138 = arith.constant 0.000000e+00 : f32
    %323 = vector.broadcast %cst_138 : f32 to vector<8x32xf32>
    %324 = arith.truncf %321 : vector<8x64xf32> to vector<8x64xbf16>
    %cst_139 = arith.constant dense<0.000000e+00> : vector<8x256xf32>
    %325 = tpu.matmul %324, %320, %cst_139 {dimension_numbers = #tpu.dot_dimension_numbers<[1], [0], [0], [1], [0, 0, 1, 1], [], []>} : vector<8x64xbf16>, vector<64x256xbf16>, vector<8x256xf32> -> vector<8x256xf32>
    %c0_140 = arith.constant 0 : index
    %c0_141 = arith.constant 0 : index
    %c0_142 = arith.constant 0 : index
    %326 = vector.load %arg20[%c0_140, %c0_141, %c0_142] : memref<8x8x256xf32, #tpu.memory_space<vmem>>, vector<1x8x256xf32>
    %327 = vector.shape_cast %326 : vector<1x8x256xf32> to vector<8x256xf32>
    %328 = vector.extract_strided_slice %327 {offsets = [0, 0], sizes = [8, 128], strides = [1, 1]} : vector<8x256xf32> to vector<8x128xf32>
    %329 = vector.extract_strided_slice %325 {offsets = [0, 0], sizes = [8, 128], strides = [1, 1]} : vector<8x256xf32> to vector<8x128xf32>
    %330 = arith.addf %328, %329 : vector<8x128xf32>
    %c7 = arith.constant 7 : index
    %c0_143 = arith.constant 0 : index
    %c0_144 = arith.constant 0 : index
    %331 = vector.load %arg20[%c7, %c0_143, %c0_144] : memref<8x8x256xf32, #tpu.memory_space<vmem>>, vector<1x8x256xf32>
    %332 = vector.shape_cast %331 : vector<1x8x256xf32> to vector<8x256xf32>
    %333 = vector.extract_strided_slice %332 {offsets = [0, 128], sizes = [8, 128], strides = [1, 1]} : vector<8x256xf32> to vector<8x128xf32>
    %334 = vector.extract_strided_slice %325 {offsets = [0, 128], sizes = [8, 128], strides = [1, 1]} : vector<8x256xf32> to vector<8x128xf32>
    %335 = arith.addf %333, %334 : vector<8x128xf32>
    %336 = arith.negf %330 : vector<8x128xf32>
    %337 = math.exp %336 : vector<8x128xf32>
    %cst_145 = arith.constant 1.000000e+00 : f32
    %338 = vector.broadcast %cst_145 : f32 to vector<8x128xf32>
    %339 = arith.addf %338, %337 : vector<8x128xf32>
    %340 = arith.divf %338, %339 : vector<8x128xf32>
    %341 = math.tanh %330 : vector<8x128xf32>
    %342 = arith.negf %335 : vector<8x128xf32>
    %343 = math.exp %342 : vector<8x128xf32>
    %cst_146 = arith.constant 1.000000e+00 : f32
    %344 = vector.broadcast %cst_146 : f32 to vector<8x128xf32>
    %345 = arith.addf %344, %343 : vector<8x128xf32>
    %346 = arith.divf %344, %345 : vector<8x128xf32>
    %347 = math.tanh %335 : vector<8x128xf32>
    %348 = vector.extract_strided_slice %340 {offsets = [0, 32], sizes = [8, 32], strides = [1, 1]} : vector<8x128xf32> to vector<8x32xf32>
    %349 = arith.mulf %348, %322 : vector<8x32xf32>
    %350 = vector.extract_strided_slice %340 {offsets = [0, 0], sizes = [8, 32], strides = [1, 1]} : vector<8x128xf32> to vector<8x32xf32>
    %351 = vector.extract_strided_slice %341 {offsets = [0, 64], sizes = [8, 32], strides = [1, 1]} : vector<8x128xf32> to vector<8x32xf32>
    %352 = arith.mulf %350, %351 : vector<8x32xf32>
    %353 = arith.addf %349, %352 : vector<8x32xf32>
    %354 = vector.extract_strided_slice %340 {offsets = [0, 96], sizes = [8, 32], strides = [1, 1]} : vector<8x128xf32> to vector<8x32xf32>
    %355 = math.tanh %353 : vector<8x32xf32>
    %356 = arith.mulf %354, %355 : vector<8x32xf32>
    %357 = vector.extract_strided_slice %346 {offsets = [0, 32], sizes = [8, 32], strides = [1, 1]} : vector<8x128xf32> to vector<8x32xf32>
    %358 = arith.mulf %357, %323 : vector<8x32xf32>
    %359 = vector.extract_strided_slice %346 {offsets = [0, 0], sizes = [8, 32], strides = [1, 1]} : vector<8x128xf32> to vector<8x32xf32>
    %360 = vector.extract_strided_slice %347 {offsets = [0, 64], sizes = [8, 32], strides = [1, 1]} : vector<8x128xf32> to vector<8x32xf32>
    %361 = arith.mulf %359, %360 : vector<8x32xf32>
    %362 = arith.addf %358, %361 : vector<8x32xf32>
    %363 = vector.extract_strided_slice %346 {offsets = [0, 96], sizes = [8, 32], strides = [1, 1]} : vector<8x128xf32> to vector<8x32xf32>
    %364 = math.tanh %362 : vector<8x32xf32>
    %365 = arith.mulf %363, %364 : vector<8x32xf32>
    %c0_i32 = arith.constant 0 : i32
    %366 = vector.broadcast %c0_i32 : i32 to vector<8x1xi32>
    %367 = arith.cmpi sgt, %0, %366 : vector<8x1xi32>
    %cst_147 = arith.constant 1.000000e+00 : f32
    %cst_148 = arith.constant 0.000000e+00 : f32
    %368 = vector.broadcast %cst_147 : f32 to vector<8x1xf32>
    %369 = vector.broadcast %cst_148 : f32 to vector<8x1xf32>
    %370 = arith.select %367, %368, %369 : vector<8x1xi1>, vector<8x1xf32>
    %c7_i32 = arith.constant 7 : i32
    %371 = vector.broadcast %c7_i32 : i32 to vector<8x1xi32>
    %372 = arith.cmpi sgt, %0, %371 : vector<8x1xi32>
    %cst_149 = arith.constant 1.000000e+00 : f32
    %cst_150 = arith.constant 0.000000e+00 : f32
    %373 = vector.broadcast %cst_149 : f32 to vector<8x1xf32>
    %374 = vector.broadcast %cst_150 : f32 to vector<8x1xf32>
    %375 = arith.select %372, %373, %374 : vector<8x1xi1>, vector<8x1xf32>
    %376 = vector.broadcast %370 : vector<8x1xf32> to vector<8x32xf32>
    %377 = arith.mulf %376, %356 : vector<8x32xf32>
    %c0_151 = arith.constant 0 : index
    %c0_152 = arith.constant 0 : index
    %c0_153 = arith.constant 0 : index
    %378 = vector.load %arg21[%c0_151, %c0_152, %c0_153] : memref<8x8x32xf32, #tpu.memory_space<vmem>>, vector<1x8x32xf32>
    %379 = vector.shape_cast %378 : vector<1x8x32xf32> to vector<8x32xf32>
    %380 = vector.shape_cast %377 : vector<8x32xf32> to vector<1x8x32xf32>
    tpu.vector_store %arg21[%c0_151, %c0_152, %c0_153], %380 {strides = array<i32>} : memref<8x8x32xf32, #tpu.memory_space<vmem>>, vector<1x8x32xf32>,
    %381 = vector.broadcast %375 : vector<8x1xf32> to vector<8x32xf32>
    %382 = arith.mulf %381, %365 : vector<8x32xf32>
    %c7_154 = arith.constant 7 : index
    %c0_155 = arith.constant 0 : index
    %c0_156 = arith.constant 0 : index
    %383 = vector.load %arg22[%c7_154, %c0_155, %c0_156] : memref<8x8x32xf32, #tpu.memory_space<vmem>>, vector<1x8x32xf32>
    %384 = vector.shape_cast %383 : vector<1x8x32xf32> to vector<8x32xf32>
    %385 = vector.shape_cast %382 : vector<8x32xf32> to vector<1x8x32xf32>
    tpu.vector_store %arg22[%c7_154, %c0_155, %c0_156], %385 {strides = array<i32>} : memref<8x8x32xf32, #tpu.memory_space<vmem>>, vector<1x8x32xf32>,
    %386 = vector.broadcast %370 : vector<8x1xf32> to vector<8x32xf32>
    %387 = arith.mulf %386, %356 : vector<8x32xf32>
    %cst_157 = arith.constant 1.000000e+00 : f32
    %388 = vector.broadcast %cst_157 : f32 to vector<8x1xf32>
    %389 = arith.subf %388, %370 : vector<8x1xf32>
    %390 = vector.extract_strided_slice %321 {offsets = [0, 0], sizes = [8, 32], strides = [1, 1]} : vector<8x64xf32> to vector<8x32xf32>
    %391 = vector.broadcast %389 : vector<8x1xf32> to vector<8x32xf32>
    %392 = arith.mulf %391, %390 : vector<8x32xf32>
    %393 = arith.addf %387, %392 : vector<8x32xf32>
    %394 = vector.broadcast %375 : vector<8x1xf32> to vector<8x32xf32>
    %395 = arith.mulf %394, %365 : vector<8x32xf32>
    %cst_158 = arith.constant 1.000000e+00 : f32
    %396 = vector.broadcast %cst_158 : f32 to vector<8x1xf32>
    %397 = arith.subf %396, %375 : vector<8x1xf32>
    %398 = vector.extract_strided_slice %321 {offsets = [0, 32], sizes = [8, 32], strides = [1, 1]} : vector<8x64xf32> to vector<8x32xf32>
    %399 = vector.broadcast %397 : vector<8x1xf32> to vector<8x32xf32>
    %400 = arith.mulf %399, %398 : vector<8x32xf32>
    %401 = arith.addf %395, %400 : vector<8x32xf32>
    %402 = vector.broadcast %370 : vector<8x1xf32> to vector<8x32xf32>
    %403 = arith.mulf %402, %353 : vector<8x32xf32>
    %cst_159 = arith.constant 1.000000e+00 : f32
    %404 = vector.broadcast %cst_159 : f32 to vector<8x1xf32>
    %405 = arith.subf %404, %370 : vector<8x1xf32>
    %406 = vector.broadcast %405 : vector<8x1xf32> to vector<8x32xf32>
    %407 = arith.mulf %406, %322 : vector<8x32xf32>
    %408 = arith.addf %403, %407 : vector<8x32xf32>
    %409 = vector.broadcast %375 : vector<8x1xf32> to vector<8x32xf32>
    %410 = arith.mulf %409, %362 : vector<8x32xf32>
    %cst_160 = arith.constant 1.000000e+00 : f32
    %411 = vector.broadcast %cst_160 : f32 to vector<8x1xf32>
    %412 = arith.subf %411, %375 : vector<8x1xf32>
    %413 = vector.broadcast %412 : vector<8x1xf32> to vector<8x32xf32>
    %414 = arith.mulf %413, %323 : vector<8x32xf32>
    %415 = arith.addf %410, %414 : vector<8x32xf32>
    %416 = tpu.concatenate %393, %401 in 1 : vector<8x32xf32>, vector<8x32xf32> -> vector<8x64xf32>
    %417 = arith.truncf %416 : vector<8x64xf32> to vector<8x64xbf16>
    %cst_161 = arith.constant dense<0.000000e+00> : vector<8x256xf32>
    %418 = tpu.matmul %417, %320, %cst_161 {dimension_numbers = #tpu.dot_dimension_numbers<[1], [0], [0], [1], [0, 0, 1, 1], [], []>} : vector<8x64xbf16>, vector<64x256xbf16>, vector<8x256xf32> -> vector<8x256xf32>
    %c1_162 = arith.constant 1 : index
    %c0_163 = arith.constant 0 : index
    %c0_164 = arith.constant 0 : index
    %419 = vector.load %arg20[%c1_162, %c0_163, %c0_164] : memref<8x8x256xf32, #tpu.memory_space<vmem>>, vector<1x8x256xf32>
    %420 = vector.shape_cast %419 : vector<1x8x256xf32> to vector<8x256xf32>
    %421 = vector.extract_strided_slice %420 {offsets = [0, 0], sizes = [8, 128], strides = [1, 1]} : vector<8x256xf32> to vector<8x128xf32>
    %422 = vector.extract_strided_slice %418 {offsets = [0, 0], sizes = [8, 128], strides = [1, 1]} : vector<8x256xf32> to vector<8x128xf32>
    %423 = arith.addf %421, %422 : vector<8x128xf32>
    %c6 = arith.constant 6 : index
    %c0_165 = arith.constant 0 : index
    %c0_166 = arith.constant 0 : index
    %424 = vector.load %arg20[%c6, %c0_165, %c0_166] : memref<8x8x256xf32, #tpu.memory_space<vmem>>, vector<1x8x256xf32>
    %425 = vector.shape_cast %424 : vector<1x8x256xf32> to vector<8x256xf32>
    %426 = vector.extract_strided_slice %425 {offsets = [0, 128], sizes = [8, 128], strides = [1, 1]} : vector<8x256xf32> to vector<8x128xf32>
    %427 = vector.extract_strided_slice %418 {offsets = [0, 128], sizes = [8, 128], strides = [1, 1]} : vector<8x256xf32> to vector<8x128xf32>
    %428 = arith.addf %426, %427 : vector<8x128xf32>
    %429 = arith.negf %423 : vector<8x128xf32>
    %430 = math.exp %429 : vector<8x128xf32>
    %cst_167 = arith.constant 1.000000e+00 : f32
    %431 = vector.broadcast %cst_167 : f32 to vector<8x128xf32>
    %432 = arith.addf %431, %430 : vector<8x128xf32>
    %433 = arith.divf %431, %432 : vector<8x128xf32>
    %434 = math.tanh %423 : vector<8x128xf32>
    %435 = arith.negf %428 : vector<8x128xf32>
    %436 = math.exp %435 : vector<8x128xf32>
    %cst_168 = arith.constant 1.000000e+00 : f32
    %437 = vector.broadcast %cst_168 : f32 to vector<8x128xf32>
    %438 = arith.addf %437, %436 : vector<8x128xf32>
    %439 = arith.divf %437, %438 : vector<8x128xf32>
    %440 = math.tanh %428 : vector<8x128xf32>
    %441 = vector.extract_strided_slice %433 {offsets = [0, 32], sizes = [8, 32], strides = [1, 1]} : vector<8x128xf32> to vector<8x32xf32>
    %442 = arith.mulf %441, %408 : vector<8x32xf32>
    %443 = vector.extract_strided_slice %433 {offsets = [0, 0], sizes = [8, 32], strides = [1, 1]} : vector<8x128xf32> to vector<8x32xf32>
    %444 = vector.extract_strided_slice %434 {offsets = [0, 64], sizes = [8, 32], strides = [1, 1]} : vector<8x128xf32> to vector<8x32xf32>
    %445 = arith.mulf %443, %444 : vector<8x32xf32>
    %446 = arith.addf %442, %445 : vector<8x32xf32>
    %447 = vector.extract_strided_slice %433 {offsets = [0, 96], sizes = [8, 32], strides = [1, 1]} : vector<8x128xf32> to vector<8x32xf32>
    %448 = math.tanh %446 : vector<8x32xf32>
    %449 = arith.mulf %447, %448 : vector<8x32xf32>
    %450 = vector.extract_strided_slice %439 {offsets = [0, 32], sizes = [8, 32], strides = [1, 1]} : vector<8x128xf32> to vector<8x32xf32>
    %451 = arith.mulf %450, %415 : vector<8x32xf32>
    %452 = vector.extract_strided_slice %439 {offsets = [0, 0], sizes = [8, 32], strides = [1, 1]} : vector<8x128xf32> to vector<8x32xf32>
    %453 = vector.extract_strided_slice %440 {offsets = [0, 64], sizes = [8, 32], strides = [1, 1]} : vector<8x128xf32> to vector<8x32xf32>
    %454 = arith.mulf %452, %453 : vector<8x32xf32>
    %455 = arith.addf %451, %454 : vector<8x32xf32>
    %456 = vector.extract_strided_slice %439 {offsets = [0, 96], sizes = [8, 32], strides = [1, 1]} : vector<8x128xf32> to vector<8x32xf32>
    %457 = math.tanh %455 : vector<8x32xf32>
    %458 = arith.mulf %456, %457 : vector<8x32xf32>
    %c1_i32 = arith.constant 1 : i32
    %459 = vector.broadcast %c1_i32 : i32 to vector<8x1xi32>
    %460 = arith.cmpi sgt, %0, %459 : vector<8x1xi32>
    %cst_169 = arith.constant 1.000000e+00 : f32
    %cst_170 = arith.constant 0.000000e+00 : f32
    %461 = vector.broadcast %cst_169 : f32 to vector<8x1xf32>
    %462 = vector.broadcast %cst_170 : f32 to vector<8x1xf32>
    %463 = arith.select %460, %461, %462 : vector<8x1xi1>, vector<8x1xf32>
    %c6_i32 = arith.constant 6 : i32
    %464 = vector.broadcast %c6_i32 : i32 to vector<8x1xi32>
    %465 = arith.cmpi sgt, %0, %464 : vector<8x1xi32>
    %cst_171 = arith.constant 1.000000e+00 : f32
    %cst_172 = arith.constant 0.000000e+00 : f32
    %466 = vector.broadcast %cst_171 : f32 to vector<8x1xf32>
    %467 = vector.broadcast %cst_172 : f32 to vector<8x1xf32>
    %468 = arith.select %465, %466, %467 : vector<8x1xi1>, vector<8x1xf32>
    %469 = vector.broadcast %463 : vector<8x1xf32> to vector<8x32xf32>
    %470 = arith.mulf %469, %449 : vector<8x32xf32>
    %c1_173 = arith.constant 1 : index
    %c0_174 = arith.constant 0 : index
    %c0_175 = arith.constant 0 : index
    %471 = vector.load %arg21[%c1_173, %c0_174, %c0_175] : memref<8x8x32xf32, #tpu.memory_space<vmem>>, vector<1x8x32xf32>
    %472 = vector.shape_cast %471 : vector<1x8x32xf32> to vector<8x32xf32>
    %473 = vector.shape_cast %470 : vector<8x32xf32> to vector<1x8x32xf32>
    tpu.vector_store %arg21[%c1_173, %c0_174, %c0_175], %473 {strides = array<i32>} : memref<8x8x32xf32, #tpu.memory_space<vmem>>, vector<1x8x32xf32>,
    %474 = vector.broadcast %468 : vector<8x1xf32> to vector<8x32xf32>
    %475 = arith.mulf %474, %458 : vector<8x32xf32>
    %c6_176 = arith.constant 6 : index
    %c0_177 = arith.constant 0 : index
    %c0_178 = arith.constant 0 : index
    %476 = vector.load %arg22[%c6_176, %c0_177, %c0_178] : memref<8x8x32xf32, #tpu.memory_space<vmem>>, vector<1x8x32xf32>
    %477 = vector.shape_cast %476 : vector<1x8x32xf32> to vector<8x32xf32>
    %478 = vector.shape_cast %475 : vector<8x32xf32> to vector<1x8x32xf32>
    tpu.vector_store %arg22[%c6_176, %c0_177, %c0_178], %478 {strides = array<i32>} : memref<8x8x32xf32, #tpu.memory_space<vmem>>, vector<1x8x32xf32>,
    %479 = vector.broadcast %463 : vector<8x1xf32> to vector<8x32xf32>
    %480 = arith.mulf %479, %449 : vector<8x32xf32>
    %cst_179 = arith.constant 1.000000e+00 : f32
    %481 = vector.broadcast %cst_179 : f32 to vector<8x1xf32>
    %482 = arith.subf %481, %463 : vector<8x1xf32>
    %483 = vector.extract_strided_slice %416 {offsets = [0, 0], sizes = [8, 32], strides = [1, 1]} : vector<8x64xf32> to vector<8x32xf32>
    %484 = vector.broadcast %482 : vector<8x1xf32> to vector<8x32xf32>
    %485 = arith.mulf %484, %483 : vector<8x32xf32>
    %486 = arith.addf %480, %485 : vector<8x32xf32>
    %487 = vector.broadcast %468 : vector<8x1xf32> to vector<8x32xf32>
    %488 = arith.mulf %487, %458 : vector<8x32xf32>
    %cst_180 = arith.constant 1.000000e+00 : f32
    %489 = vector.broadcast %cst_180 : f32 to vector<8x1xf32>
    %490 = arith.subf %489, %468 : vector<8x1xf32>
    %491 = vector.extract_strided_slice %416 {offsets = [0, 32], sizes = [8, 32], strides = [1, 1]} : vector<8x64xf32> to vector<8x32xf32>
    %492 = vector.broadcast %490 : vector<8x1xf32> to vector<8x32xf32>
    %493 = arith.mulf %492, %491 : vector<8x32xf32>
    %494 = arith.addf %488, %493 : vector<8x32xf32>
    %495 = vector.broadcast %463 : vector<8x1xf32> to vector<8x32xf32>
    %496 = arith.mulf %495, %446 : vector<8x32xf32>
    %cst_181 = arith.constant 1.000000e+00 : f32
    %497 = vector.broadcast %cst_181 : f32 to vector<8x1xf32>
    %498 = arith.subf %497, %463 : vector<8x1xf32>
    %499 = vector.broadcast %498 : vector<8x1xf32> to vector<8x32xf32>
    %500 = arith.mulf %499, %408 : vector<8x32xf32>
    %501 = arith.addf %496, %500 : vector<8x32xf32>
    %502 = vector.broadcast %468 : vector<8x1xf32> to vector<8x32xf32>
    %503 = arith.mulf %502, %455 : vector<8x32xf32>
    %cst_182 = arith.constant 1.000000e+00 : f32
    %504 = vector.broadcast %cst_182 : f32 to vector<8x1xf32>
    %505 = arith.subf %504, %468 : vector<8x1xf32>
    %506 = vector.broadcast %505 : vector<8x1xf32> to vector<8x32xf32>
    %507 = arith.mulf %506, %415 : vector<8x32xf32>
    %508 = arith.addf %503, %507 : vector<8x32xf32>
    %509 = tpu.concatenate %486, %494 in 1 : vector<8x32xf32>, vector<8x32xf32> -> vector<8x64xf32>
    %510 = arith.truncf %509 : vector<8x64xf32> to vector<8x64xbf16>
    %cst_183 = arith.constant dense<0.000000e+00> : vector<8x256xf32>
    %511 = tpu.matmul %510, %320, %cst_183 {dimension_numbers = #tpu.dot_dimension_numbers<[1], [0], [0], [1], [0, 0, 1, 1], [], []>} : vector<8x64xbf16>, vector<64x256xbf16>, vector<8x256xf32> -> vector<8x256xf32>
    %c2 = arith.constant 2 : index
    %c0_184 = arith.constant 0 : index
    %c0_185 = arith.constant 0 : index
    %512 = vector.load %arg20[%c2, %c0_184, %c0_185] : memref<8x8x256xf32, #tpu.memory_space<vmem>>, vector<1x8x256xf32>
    %513 = vector.shape_cast %512 : vector<1x8x256xf32> to vector<8x256xf32>
    %514 = vector.extract_strided_slice %513 {offsets = [0, 0], sizes = [8, 128], strides = [1, 1]} : vector<8x256xf32> to vector<8x128xf32>
    %515 = vector.extract_strided_slice %511 {offsets = [0, 0], sizes = [8, 128], strides = [1, 1]} : vector<8x256xf32> to vector<8x128xf32>
    %516 = arith.addf %514, %515 : vector<8x128xf32>
    %c5 = arith.constant 5 : index
    %c0_186 = arith.constant 0 : index
    %c0_187 = arith.constant 0 : index
    %517 = vector.load %arg20[%c5, %c0_186, %c0_187] : memref<8x8x256xf32, #tpu.memory_space<vmem>>, vector<1x8x256xf32>
    %518 = vector.shape_cast %517 : vector<1x8x256xf32> to vector<8x256xf32>
    %519 = vector.extract_strided_slice %518 {offsets = [0, 128], sizes = [8, 128], strides = [1, 1]} : vector<8x256xf32> to vector<8x128xf32>
    %520 = vector.extract_strided_slice %511 {offsets = [0, 128], sizes = [8, 128], strides = [1, 1]} : vector<8x256xf32> to vector<8x128xf32>
    %521 = arith.addf %519, %520 : vector<8x128xf32>
    %522 = arith.negf %516 : vector<8x128xf32>
    %523 = math.exp %522 : vector<8x128xf32>
    %cst_188 = arith.constant 1.000000e+00 : f32
    %524 = vector.broadcast %cst_188 : f32 to vector<8x128xf32>
    %525 = arith.addf %524, %523 : vector<8x128xf32>
    %526 = arith.divf %524, %525 : vector<8x128xf32>
    %527 = math.tanh %516 : vector<8x128xf32>
    %528 = arith.negf %521 : vector<8x128xf32>
    %529 = math.exp %528 : vector<8x128xf32>
    %cst_189 = arith.constant 1.000000e+00 : f32
    %530 = vector.broadcast %cst_189 : f32 to vector<8x128xf32>
    %531 = arith.addf %530, %529 : vector<8x128xf32>
    %532 = arith.divf %530, %531 : vector<8x128xf32>
    %533 = math.tanh %521 : vector<8x128xf32>
    %534 = vector.extract_strided_slice %526 {offsets = [0, 32], sizes = [8, 32], strides = [1, 1]} : vector<8x128xf32> to vector<8x32xf32>
    %535 = arith.mulf %534, %501 : vector<8x32xf32>
    %536 = vector.extract_strided_slice %526 {offsets = [0, 0], sizes = [8, 32], strides = [1, 1]} : vector<8x128xf32> to vector<8x32xf32>
    %537 = vector.extract_strided_slice %527 {offsets = [0, 64], sizes = [8, 32], strides = [1, 1]} : vector<8x128xf32> to vector<8x32xf32>
    %538 = arith.mulf %536, %537 : vector<8x32xf32>
    %539 = arith.addf %535, %538 : vector<8x32xf32>
    %540 = vector.extract_strided_slice %526 {offsets = [0, 96], sizes = [8, 32], strides = [1, 1]} : vector<8x128xf32> to vector<8x32xf32>
    %541 = math.tanh %539 : vector<8x32xf32>
    %542 = arith.mulf %540, %541 : vector<8x32xf32>
    %543 = vector.extract_strided_slice %532 {offsets = [0, 32], sizes = [8, 32], strides = [1, 1]} : vector<8x128xf32> to vector<8x32xf32>
    %544 = arith.mulf %543, %508 : vector<8x32xf32>
    %545 = vector.extract_strided_slice %532 {offsets = [0, 0], sizes = [8, 32], strides = [1, 1]} : vector<8x128xf32> to vector<8x32xf32>
    %546 = vector.extract_strided_slice %533 {offsets = [0, 64], sizes = [8, 32], strides = [1, 1]} : vector<8x128xf32> to vector<8x32xf32>
    %547 = arith.mulf %545, %546 : vector<8x32xf32>
    %548 = arith.addf %544, %547 : vector<8x32xf32>
    %549 = vector.extract_strided_slice %532 {offsets = [0, 96], sizes = [8, 32], strides = [1, 1]} : vector<8x128xf32> to vector<8x32xf32>
    %550 = math.tanh %548 : vector<8x32xf32>
    %551 = arith.mulf %549, %550 : vector<8x32xf32>
    %c2_i32 = arith.constant 2 : i32
    %552 = vector.broadcast %c2_i32 : i32 to vector<8x1xi32>
    %553 = arith.cmpi sgt, %0, %552 : vector<8x1xi32>
    %cst_190 = arith.constant 1.000000e+00 : f32
    %cst_191 = arith.constant 0.000000e+00 : f32
    %554 = vector.broadcast %cst_190 : f32 to vector<8x1xf32>
    %555 = vector.broadcast %cst_191 : f32 to vector<8x1xf32>
    %556 = arith.select %553, %554, %555 : vector<8x1xi1>, vector<8x1xf32>
    %c5_i32 = arith.constant 5 : i32
    %557 = vector.broadcast %c5_i32 : i32 to vector<8x1xi32>
    %558 = arith.cmpi sgt, %0, %557 : vector<8x1xi32>
    %cst_192 = arith.constant 1.000000e+00 : f32
    %cst_193 = arith.constant 0.000000e+00 : f32
    %559 = vector.broadcast %cst_192 : f32 to vector<8x1xf32>
    %560 = vector.broadcast %cst_193 : f32 to vector<8x1xf32>
    %561 = arith.select %558, %559, %560 : vector<8x1xi1>, vector<8x1xf32>
    %562 = vector.broadcast %556 : vector<8x1xf32> to vector<8x32xf32>
    %563 = arith.mulf %562, %542 : vector<8x32xf32>
    %c2_194 = arith.constant 2 : index
    %c0_195 = arith.constant 0 : index
    %c0_196 = arith.constant 0 : index
    %564 = vector.load %arg21[%c2_194, %c0_195, %c0_196] : memref<8x8x32xf32, #tpu.memory_space<vmem>>, vector<1x8x32xf32>
    %565 = vector.shape_cast %564 : vector<1x8x32xf32> to vector<8x32xf32>
    %566 = vector.shape_cast %563 : vector<8x32xf32> to vector<1x8x32xf32>
    tpu.vector_store %arg21[%c2_194, %c0_195, %c0_196], %566 {strides = array<i32>} : memref<8x8x32xf32, #tpu.memory_space<vmem>>, vector<1x8x32xf32>,
    %567 = vector.broadcast %561 : vector<8x1xf32> to vector<8x32xf32>
    %568 = arith.mulf %567, %551 : vector<8x32xf32>
    %c5_197 = arith.constant 5 : index
    %c0_198 = arith.constant 0 : index
    %c0_199 = arith.constant 0 : index
    %569 = vector.load %arg22[%c5_197, %c0_198, %c0_199] : memref<8x8x32xf32, #tpu.memory_space<vmem>>, vector<1x8x32xf32>
    %570 = vector.shape_cast %569 : vector<1x8x32xf32> to vector<8x32xf32>
    %571 = vector.shape_cast %568 : vector<8x32xf32> to vector<1x8x32xf32>
    tpu.vector_store %arg22[%c5_197, %c0_198, %c0_199], %571 {strides = array<i32>} : memref<8x8x32xf32, #tpu.memory_space<vmem>>, vector<1x8x32xf32>,
    %572 = vector.broadcast %556 : vector<8x1xf32> to vector<8x32xf32>
    %573 = arith.mulf %572, %542 : vector<8x32xf32>
    %cst_200 = arith.constant 1.000000e+00 : f32
    %574 = vector.broadcast %cst_200 : f32 to vector<8x1xf32>
    %575 = arith.subf %574, %556 : vector<8x1xf32>
    %576 = vector.extract_strided_slice %509 {offsets = [0, 0], sizes = [8, 32], strides = [1, 1]} : vector<8x64xf32> to vector<8x32xf32>
    %577 = vector.broadcast %575 : vector<8x1xf32> to vector<8x32xf32>
    %578 = arith.mulf %577, %576 : vector<8x32xf32>
    %579 = arith.addf %573, %578 : vector<8x32xf32>
    %580 = vector.broadcast %561 : vector<8x1xf32> to vector<8x32xf32>
    %581 = arith.mulf %580, %551 : vector<8x32xf32>
    %cst_201 = arith.constant 1.000000e+00 : f32
    %582 = vector.broadcast %cst_201 : f32 to vector<8x1xf32>
    %583 = arith.subf %582, %561 : vector<8x1xf32>
    %584 = vector.extract_strided_slice %509 {offsets = [0, 32], sizes = [8, 32], strides = [1, 1]} : vector<8x64xf32> to vector<8x32xf32>
    %585 = vector.broadcast %583 : vector<8x1xf32> to vector<8x32xf32>
    %586 = arith.mulf %585, %584 : vector<8x32xf32>
    %587 = arith.addf %581, %586 : vector<8x32xf32>
    %588 = vector.broadcast %556 : vector<8x1xf32> to vector<8x32xf32>
    %589 = arith.mulf %588, %539 : vector<8x32xf32>
    %cst_202 = arith.constant 1.000000e+00 : f32
    %590 = vector.broadcast %cst_202 : f32 to vector<8x1xf32>
    %591 = arith.subf %590, %556 : vector<8x1xf32>
    %592 = vector.broadcast %591 : vector<8x1xf32> to vector<8x32xf32>
    %593 = arith.mulf %592, %501 : vector<8x32xf32>
    %594 = arith.addf %589, %593 : vector<8x32xf32>
    %595 = vector.broadcast %561 : vector<8x1xf32> to vector<8x32xf32>
    %596 = arith.mulf %595, %548 : vector<8x32xf32>
    %cst_203 = arith.constant 1.000000e+00 : f32
    %597 = vector.broadcast %cst_203 : f32 to vector<8x1xf32>
    %598 = arith.subf %597, %561 : vector<8x1xf32>
    %599 = vector.broadcast %598 : vector<8x1xf32> to vector<8x32xf32>
    %600 = arith.mulf %599, %508 : vector<8x32xf32>
    %601 = arith.addf %596, %600 : vector<8x32xf32>
    %602 = tpu.concatenate %579, %587 in 1 : vector<8x32xf32>, vector<8x32xf32> -> vector<8x64xf32>
    %603 = arith.truncf %602 : vector<8x64xf32> to vector<8x64xbf16>
    %cst_204 = arith.constant dense<0.000000e+00> : vector<8x256xf32>
    %604 = tpu.matmul %603, %320, %cst_204 {dimension_numbers = #tpu.dot_dimension_numbers<[1], [0], [0], [1], [0, 0, 1, 1], [], []>} : vector<8x64xbf16>, vector<64x256xbf16>, vector<8x256xf32> -> vector<8x256xf32>
    %c3 = arith.constant 3 : index
    %c0_205 = arith.constant 0 : index
    %c0_206 = arith.constant 0 : index
    %605 = vector.load %arg20[%c3, %c0_205, %c0_206] : memref<8x8x256xf32, #tpu.memory_space<vmem>>, vector<1x8x256xf32>
    %606 = vector.shape_cast %605 : vector<1x8x256xf32> to vector<8x256xf32>
    %607 = vector.extract_strided_slice %606 {offsets = [0, 0], sizes = [8, 128], strides = [1, 1]} : vector<8x256xf32> to vector<8x128xf32>
    %608 = vector.extract_strided_slice %604 {offsets = [0, 0], sizes = [8, 128], strides = [1, 1]} : vector<8x256xf32> to vector<8x128xf32>
    %609 = arith.addf %607, %608 : vector<8x128xf32>
    %c4 = arith.constant 4 : index
    %c0_207 = arith.constant 0 : index
    %c0_208 = arith.constant 0 : index
    %610 = vector.load %arg20[%c4, %c0_207, %c0_208] : memref<8x8x256xf32, #tpu.memory_space<vmem>>, vector<1x8x256xf32>
    %611 = vector.shape_cast %610 : vector<1x8x256xf32> to vector<8x256xf32>
    %612 = vector.extract_strided_slice %611 {offsets = [0, 128], sizes = [8, 128], strides = [1, 1]} : vector<8x256xf32> to vector<8x128xf32>
    %613 = vector.extract_strided_slice %604 {offsets = [0, 128], sizes = [8, 128], strides = [1, 1]} : vector<8x256xf32> to vector<8x128xf32>
    %614 = arith.addf %612, %613 : vector<8x128xf32>
    %615 = arith.negf %609 : vector<8x128xf32>
    %616 = math.exp %615 : vector<8x128xf32>
    %cst_209 = arith.constant 1.000000e+00 : f32
    %617 = vector.broadcast %cst_209 : f32 to vector<8x128xf32>
    %618 = arith.addf %617, %616 : vector<8x128xf32>
    %619 = arith.divf %617, %618 : vector<8x128xf32>
    %620 = math.tanh %609 : vector<8x128xf32>
    %621 = arith.negf %614 : vector<8x128xf32>
    %622 = math.exp %621 : vector<8x128xf32>
    %cst_210 = arith.constant 1.000000e+00 : f32
    %623 = vector.broadcast %cst_210 : f32 to vector<8x128xf32>
    %624 = arith.addf %623, %622 : vector<8x128xf32>
    %625 = arith.divf %623, %624 : vector<8x128xf32>
    %626 = math.tanh %614 : vector<8x128xf32>
    %627 = vector.extract_strided_slice %619 {offsets = [0, 32], sizes = [8, 32], strides = [1, 1]} : vector<8x128xf32> to vector<8x32xf32>
    %628 = arith.mulf %627, %594 : vector<8x32xf32>
    %629 = vector.extract_strided_slice %619 {offsets = [0, 0], sizes = [8, 32], strides = [1, 1]} : vector<8x128xf32> to vector<8x32xf32>
    %630 = vector.extract_strided_slice %620 {offsets = [0, 64], sizes = [8, 32], strides = [1, 1]} : vector<8x128xf32> to vector<8x32xf32>
    %631 = arith.mulf %629, %630 : vector<8x32xf32>
    %632 = arith.addf %628, %631 : vector<8x32xf32>
    %633 = vector.extract_strided_slice %619 {offsets = [0, 96], sizes = [8, 32], strides = [1, 1]} : vector<8x128xf32> to vector<8x32xf32>
    %634 = math.tanh %632 : vector<8x32xf32>
    %635 = arith.mulf %633, %634 : vector<8x32xf32>
    %636 = vector.extract_strided_slice %625 {offsets = [0, 32], sizes = [8, 32], strides = [1, 1]} : vector<8x128xf32> to vector<8x32xf32>
    %637 = arith.mulf %636, %601 : vector<8x32xf32>
    %638 = vector.extract_strided_slice %625 {offsets = [0, 0], sizes = [8, 32], strides = [1, 1]} : vector<8x128xf32> to vector<8x32xf32>
    %639 = vector.extract_strided_slice %626 {offsets = [0, 64], sizes = [8, 32], strides = [1, 1]} : vector<8x128xf32> to vector<8x32xf32>
    %640 = arith.mulf %638, %639 : vector<8x32xf32>
    %641 = arith.addf %637, %640 : vector<8x32xf32>
    %642 = vector.extract_strided_slice %625 {offsets = [0, 96], sizes = [8, 32], strides = [1, 1]} : vector<8x128xf32> to vector<8x32xf32>
    %643 = math.tanh %641 : vector<8x32xf32>
    %644 = arith.mulf %642, %643 : vector<8x32xf32>
    %c3_i32 = arith.constant 3 : i32
    %645 = vector.broadcast %c3_i32 : i32 to vector<8x1xi32>
    %646 = arith.cmpi sgt, %0, %645 : vector<8x1xi32>
    %cst_211 = arith.constant 1.000000e+00 : f32
    %cst_212 = arith.constant 0.000000e+00 : f32
    %647 = vector.broadcast %cst_211 : f32 to vector<8x1xf32>
    %648 = vector.broadcast %cst_212 : f32 to vector<8x1xf32>
    %649 = arith.select %646, %647, %648 : vector<8x1xi1>, vector<8x1xf32>
    %c4_i32 = arith.constant 4 : i32
    %650 = vector.broadcast %c4_i32 : i32 to vector<8x1xi32>
    %651 = arith.cmpi sgt, %0, %650 : vector<8x1xi32>
    %cst_213 = arith.constant 1.000000e+00 : f32
    %cst_214 = arith.constant 0.000000e+00 : f32
    %652 = vector.broadcast %cst_213 : f32 to vector<8x1xf32>
    %653 = vector.broadcast %cst_214 : f32 to vector<8x1xf32>
    %654 = arith.select %651, %652, %653 : vector<8x1xi1>, vector<8x1xf32>
    %655 = vector.broadcast %649 : vector<8x1xf32> to vector<8x32xf32>
    %656 = arith.mulf %655, %635 : vector<8x32xf32>
    %c3_215 = arith.constant 3 : index
    %c0_216 = arith.constant 0 : index
    %c0_217 = arith.constant 0 : index
    %657 = vector.load %arg21[%c3_215, %c0_216, %c0_217] : memref<8x8x32xf32, #tpu.memory_space<vmem>>, vector<1x8x32xf32>
    %658 = vector.shape_cast %657 : vector<1x8x32xf32> to vector<8x32xf32>
    %659 = vector.shape_cast %656 : vector<8x32xf32> to vector<1x8x32xf32>
    tpu.vector_store %arg21[%c3_215, %c0_216, %c0_217], %659 {strides = array<i32>} : memref<8x8x32xf32, #tpu.memory_space<vmem>>, vector<1x8x32xf32>,
    %660 = vector.broadcast %654 : vector<8x1xf32> to vector<8x32xf32>
    %661 = arith.mulf %660, %644 : vector<8x32xf32>
    %c4_218 = arith.constant 4 : index
    %c0_219 = arith.constant 0 : index
    %c0_220 = arith.constant 0 : index
    %662 = vector.load %arg22[%c4_218, %c0_219, %c0_220] : memref<8x8x32xf32, #tpu.memory_space<vmem>>, vector<1x8x32xf32>
    %663 = vector.shape_cast %662 : vector<1x8x32xf32> to vector<8x32xf32>
    %664 = vector.shape_cast %661 : vector<8x32xf32> to vector<1x8x32xf32>
    tpu.vector_store %arg22[%c4_218, %c0_219, %c0_220], %664 {strides = array<i32>} : memref<8x8x32xf32, #tpu.memory_space<vmem>>, vector<1x8x32xf32>,
    %665 = vector.broadcast %649 : vector<8x1xf32> to vector<8x32xf32>
    %666 = arith.mulf %665, %635 : vector<8x32xf32>
    %cst_221 = arith.constant 1.000000e+00 : f32
    %667 = vector.broadcast %cst_221 : f32 to vector<8x1xf32>
    %668 = arith.subf %667, %649 : vector<8x1xf32>
    %669 = vector.extract_strided_slice %602 {offsets = [0, 0], sizes = [8, 32], strides = [1, 1]} : vector<8x64xf32> to vector<8x32xf32>
    %670 = vector.broadcast %668 : vector<8x1xf32> to vector<8x32xf32>
    %671 = arith.mulf %670, %669 : vector<8x32xf32>
    %672 = arith.addf %666, %671 : vector<8x32xf32>
    %673 = vector.broadcast %654 : vector<8x1xf32> to vector<8x32xf32>
    %674 = arith.mulf %673, %644 : vector<8x32xf32>
    %cst_222 = arith.constant 1.000000e+00 : f32
    %675 = vector.broadcast %cst_222 : f32 to vector<8x1xf32>
    %676 = arith.subf %675, %654 : vector<8x1xf32>
    %677 = vector.extract_strided_slice %602 {offsets = [0, 32], sizes = [8, 32], strides = [1, 1]} : vector<8x64xf32> to vector<8x32xf32>
    %678 = vector.broadcast %676 : vector<8x1xf32> to vector<8x32xf32>
    %679 = arith.mulf %678, %677 : vector<8x32xf32>
    %680 = arith.addf %674, %679 : vector<8x32xf32>
    %681 = vector.broadcast %649 : vector<8x1xf32> to vector<8x32xf32>
    %682 = arith.mulf %681, %632 : vector<8x32xf32>
    %cst_223 = arith.constant 1.000000e+00 : f32
    %683 = vector.broadcast %cst_223 : f32 to vector<8x1xf32>
    %684 = arith.subf %683, %649 : vector<8x1xf32>
    %685 = vector.broadcast %684 : vector<8x1xf32> to vector<8x32xf32>
    %686 = arith.mulf %685, %594 : vector<8x32xf32>
    %687 = arith.addf %682, %686 : vector<8x32xf32>
    %688 = vector.broadcast %654 : vector<8x1xf32> to vector<8x32xf32>
    %689 = arith.mulf %688, %641 : vector<8x32xf32>
    %cst_224 = arith.constant 1.000000e+00 : f32
    %690 = vector.broadcast %cst_224 : f32 to vector<8x1xf32>
    %691 = arith.subf %690, %654 : vector<8x1xf32>
    %692 = vector.broadcast %691 : vector<8x1xf32> to vector<8x32xf32>
    %693 = arith.mulf %692, %601 : vector<8x32xf32>
    %694 = arith.addf %689, %693 : vector<8x32xf32>
    %695 = tpu.concatenate %672, %680 in 1 : vector<8x32xf32>, vector<8x32xf32> -> vector<8x64xf32>
    %696 = arith.truncf %695 : vector<8x64xf32> to vector<8x64xbf16>
    %cst_225 = arith.constant dense<0.000000e+00> : vector<8x256xf32>
    %697 = tpu.matmul %696, %320, %cst_225 {dimension_numbers = #tpu.dot_dimension_numbers<[1], [0], [0], [1], [0, 0, 1, 1], [], []>} : vector<8x64xbf16>, vector<64x256xbf16>, vector<8x256xf32> -> vector<8x256xf32>
    %c4_226 = arith.constant 4 : index
    %c0_227 = arith.constant 0 : index
    %c0_228 = arith.constant 0 : index
    %698 = vector.load %arg20[%c4_226, %c0_227, %c0_228] : memref<8x8x256xf32, #tpu.memory_space<vmem>>, vector<1x8x256xf32>
    %699 = vector.shape_cast %698 : vector<1x8x256xf32> to vector<8x256xf32>
    %700 = vector.extract_strided_slice %699 {offsets = [0, 0], sizes = [8, 128], strides = [1, 1]} : vector<8x256xf32> to vector<8x128xf32>
    %701 = vector.extract_strided_slice %697 {offsets = [0, 0], sizes = [8, 128], strides = [1, 1]} : vector<8x256xf32> to vector<8x128xf32>
    %702 = arith.addf %700, %701 : vector<8x128xf32>
    %c3_229 = arith.constant 3 : index
    %c0_230 = arith.constant 0 : index
    %c0_231 = arith.constant 0 : index
    %703 = vector.load %arg20[%c3_229, %c0_230, %c0_231] : memref<8x8x256xf32, #tpu.memory_space<vmem>>, vector<1x8x256xf32>
    %704 = vector.shape_cast %703 : vector<1x8x256xf32> to vector<8x256xf32>
    %705 = vector.extract_strided_slice %704 {offsets = [0, 128], sizes = [8, 128], strides = [1, 1]} : vector<8x256xf32> to vector<8x128xf32>
    %706 = vector.extract_strided_slice %697 {offsets = [0, 128], sizes = [8, 128], strides = [1, 1]} : vector<8x256xf32> to vector<8x128xf32>
    %707 = arith.addf %705, %706 : vector<8x128xf32>
    %708 = arith.negf %702 : vector<8x128xf32>
    %709 = math.exp %708 : vector<8x128xf32>
    %cst_232 = arith.constant 1.000000e+00 : f32
    %710 = vector.broadcast %cst_232 : f32 to vector<8x128xf32>
    %711 = arith.addf %710, %709 : vector<8x128xf32>
    %712 = arith.divf %710, %711 : vector<8x128xf32>
    %713 = math.tanh %702 : vector<8x128xf32>
    %714 = arith.negf %707 : vector<8x128xf32>
    %715 = math.exp %714 : vector<8x128xf32>
    %cst_233 = arith.constant 1.000000e+00 : f32
    %716 = vector.broadcast %cst_233 : f32 to vector<8x128xf32>
    %717 = arith.addf %716, %715 : vector<8x128xf32>
    %718 = arith.divf %716, %717 : vector<8x128xf32>
    %719 = math.tanh %707 : vector<8x128xf32>
    %720 = vector.extract_strided_slice %712 {offsets = [0, 32], sizes = [8, 32], strides = [1, 1]} : vector<8x128xf32> to vector<8x32xf32>
    %721 = arith.mulf %720, %687 : vector<8x32xf32>
    %722 = vector.extract_strided_slice %712 {offsets = [0, 0], sizes = [8, 32], strides = [1, 1]} : vector<8x128xf32> to vector<8x32xf32>
    %723 = vector.extract_strided_slice %713 {offsets = [0, 64], sizes = [8, 32], strides = [1, 1]} : vector<8x128xf32> to vector<8x32xf32>
    %724 = arith.mulf %722, %723 : vector<8x32xf32>
    %725 = arith.addf %721, %724 : vector<8x32xf32>
    %726 = vector.extract_strided_slice %712 {offsets = [0, 96], sizes = [8, 32], strides = [1, 1]} : vector<8x128xf32> to vector<8x32xf32>
    %727 = math.tanh %725 : vector<8x32xf32>
    %728 = arith.mulf %726, %727 : vector<8x32xf32>
    %729 = vector.extract_strided_slice %718 {offsets = [0, 32], sizes = [8, 32], strides = [1, 1]} : vector<8x128xf32> to vector<8x32xf32>
    %730 = arith.mulf %729, %694 : vector<8x32xf32>
    %731 = vector.extract_strided_slice %718 {offsets = [0, 0], sizes = [8, 32], strides = [1, 1]} : vector<8x128xf32> to vector<8x32xf32>
    %732 = vector.extract_strided_slice %719 {offsets = [0, 64], sizes = [8, 32], strides = [1, 1]} : vector<8x128xf32> to vector<8x32xf32>
    %733 = arith.mulf %731, %732 : vector<8x32xf32>
    %734 = arith.addf %730, %733 : vector<8x32xf32>
    %735 = vector.extract_strided_slice %718 {offsets = [0, 96], sizes = [8, 32], strides = [1, 1]} : vector<8x128xf32> to vector<8x32xf32>
    %736 = math.tanh %734 : vector<8x32xf32>
    %737 = arith.mulf %735, %736 : vector<8x32xf32>
    %c4_i32_234 = arith.constant 4 : i32
    %738 = vector.broadcast %c4_i32_234 : i32 to vector<8x1xi32>
    %739 = arith.cmpi sgt, %0, %738 : vector<8x1xi32>
    %cst_235 = arith.constant 1.000000e+00 : f32
    %cst_236 = arith.constant 0.000000e+00 : f32
    %740 = vector.broadcast %cst_235 : f32 to vector<8x1xf32>
    %741 = vector.broadcast %cst_236 : f32 to vector<8x1xf32>
    %742 = arith.select %739, %740, %741 : vector<8x1xi1>, vector<8x1xf32>
    %c3_i32_237 = arith.constant 3 : i32
    %743 = vector.broadcast %c3_i32_237 : i32 to vector<8x1xi32>
    %744 = arith.cmpi sgt, %0, %743 : vector<8x1xi32>
    %cst_238 = arith.constant 1.000000e+00 : f32
    %cst_239 = arith.constant 0.000000e+00 : f32
    %745 = vector.broadcast %cst_238 : f32 to vector<8x1xf32>
    %746 = vector.broadcast %cst_239 : f32 to vector<8x1xf32>
    %747 = arith.select %744, %745, %746 : vector<8x1xi1>, vector<8x1xf32>
    %748 = vector.broadcast %742 : vector<8x1xf32> to vector<8x32xf32>
    %749 = arith.mulf %748, %728 : vector<8x32xf32>
    %c4_240 = arith.constant 4 : index
    %c0_241 = arith.constant 0 : index
    %c0_242 = arith.constant 0 : index
    %750 = vector.load %arg21[%c4_240, %c0_241, %c0_242] : memref<8x8x32xf32, #tpu.memory_space<vmem>>, vector<1x8x32xf32>
    %751 = vector.shape_cast %750 : vector<1x8x32xf32> to vector<8x32xf32>
    %752 = vector.shape_cast %749 : vector<8x32xf32> to vector<1x8x32xf32>
    tpu.vector_store %arg21[%c4_240, %c0_241, %c0_242], %752 {strides = array<i32>} : memref<8x8x32xf32, #tpu.memory_space<vmem>>, vector<1x8x32xf32>,
    %753 = vector.broadcast %747 : vector<8x1xf32> to vector<8x32xf32>
    %754 = arith.mulf %753, %737 : vector<8x32xf32>
    %c3_243 = arith.constant 3 : index
    %c0_244 = arith.constant 0 : index
    %c0_245 = arith.constant 0 : index
    %755 = vector.load %arg22[%c3_243, %c0_244, %c0_245] : memref<8x8x32xf32, #tpu.memory_space<vmem>>, vector<1x8x32xf32>
    %756 = vector.shape_cast %755 : vector<1x8x32xf32> to vector<8x32xf32>
    %757 = vector.shape_cast %754 : vector<8x32xf32> to vector<1x8x32xf32>
    tpu.vector_store %arg22[%c3_243, %c0_244, %c0_245], %757 {strides = array<i32>} : memref<8x8x32xf32, #tpu.memory_space<vmem>>, vector<1x8x32xf32>,
    %758 = vector.broadcast %742 : vector<8x1xf32> to vector<8x32xf32>
    %759 = arith.mulf %758, %728 : vector<8x32xf32>
    %cst_246 = arith.constant 1.000000e+00 : f32
    %760 = vector.broadcast %cst_246 : f32 to vector<8x1xf32>
    %761 = arith.subf %760, %742 : vector<8x1xf32>
    %762 = vector.extract_strided_slice %695 {offsets = [0, 0], sizes = [8, 32], strides = [1, 1]} : vector<8x64xf32> to vector<8x32xf32>
    %763 = vector.broadcast %761 : vector<8x1xf32> to vector<8x32xf32>
    %764 = arith.mulf %763, %762 : vector<8x32xf32>
    %765 = arith.addf %759, %764 : vector<8x32xf32>
    %766 = vector.broadcast %747 : vector<8x1xf32> to vector<8x32xf32>
    %767 = arith.mulf %766, %737 : vector<8x32xf32>
    %cst_247 = arith.constant 1.000000e+00 : f32
    %768 = vector.broadcast %cst_247 : f32 to vector<8x1xf32>
    %769 = arith.subf %768, %747 : vector<8x1xf32>
    %770 = vector.extract_strided_slice %695 {offsets = [0, 32], sizes = [8, 32], strides = [1, 1]} : vector<8x64xf32> to vector<8x32xf32>
    %771 = vector.broadcast %769 : vector<8x1xf32> to vector<8x32xf32>
    %772 = arith.mulf %771, %770 : vector<8x32xf32>
    %773 = arith.addf %767, %772 : vector<8x32xf32>
    %774 = vector.broadcast %742 : vector<8x1xf32> to vector<8x32xf32>
    %775 = arith.mulf %774, %725 : vector<8x32xf32>
    %cst_248 = arith.constant 1.000000e+00 : f32
    %776 = vector.broadcast %cst_248 : f32 to vector<8x1xf32>
    %777 = arith.subf %776, %742 : vector<8x1xf32>
    %778 = vector.broadcast %777 : vector<8x1xf32> to vector<8x32xf32>
    %779 = arith.mulf %778, %687 : vector<8x32xf32>
    %780 = arith.addf %775, %779 : vector<8x32xf32>
    %781 = vector.broadcast %747 : vector<8x1xf32> to vector<8x32xf32>
    %782 = arith.mulf %781, %734 : vector<8x32xf32>
    %cst_249 = arith.constant 1.000000e+00 : f32
    %783 = vector.broadcast %cst_249 : f32 to vector<8x1xf32>
    %784 = arith.subf %783, %747 : vector<8x1xf32>
    %785 = vector.broadcast %784 : vector<8x1xf32> to vector<8x32xf32>
    %786 = arith.mulf %785, %694 : vector<8x32xf32>
    %787 = arith.addf %782, %786 : vector<8x32xf32>
    %788 = tpu.concatenate %765, %773 in 1 : vector<8x32xf32>, vector<8x32xf32> -> vector<8x64xf32>
    %789 = arith.truncf %788 : vector<8x64xf32> to vector<8x64xbf16>
    %cst_250 = arith.constant dense<0.000000e+00> : vector<8x256xf32>
    %790 = tpu.matmul %789, %320, %cst_250 {dimension_numbers = #tpu.dot_dimension_numbers<[1], [0], [0], [1], [0, 0, 1, 1], [], []>} : vector<8x64xbf16>, vector<64x256xbf16>, vector<8x256xf32> -> vector<8x256xf32>
    %c5_251 = arith.constant 5 : index
    %c0_252 = arith.constant 0 : index
    %c0_253 = arith.constant 0 : index
    %791 = vector.load %arg20[%c5_251, %c0_252, %c0_253] : memref<8x8x256xf32, #tpu.memory_space<vmem>>, vector<1x8x256xf32>
    %792 = vector.shape_cast %791 : vector<1x8x256xf32> to vector<8x256xf32>
    %793 = vector.extract_strided_slice %792 {offsets = [0, 0], sizes = [8, 128], strides = [1, 1]} : vector<8x256xf32> to vector<8x128xf32>
    %794 = vector.extract_strided_slice %790 {offsets = [0, 0], sizes = [8, 128], strides = [1, 1]} : vector<8x256xf32> to vector<8x128xf32>
    %795 = arith.addf %793, %794 : vector<8x128xf32>
    %c2_254 = arith.constant 2 : index
    %c0_255 = arith.constant 0 : index
    %c0_256 = arith.constant 0 : index
    %796 = vector.load %arg20[%c2_254, %c0_255, %c0_256] : memref<8x8x256xf32, #tpu.memory_space<vmem>>, vector<1x8x256xf32>
    %797 = vector.shape_cast %796 : vector<1x8x256xf32> to vector<8x256xf32>
    %798 = vector.extract_strided_slice %797 {offsets = [0, 128], sizes = [8, 128], strides = [1, 1]} : vector<8x256xf32> to vector<8x128xf32>
    %799 = vector.extract_strided_slice %790 {offsets = [0, 128], sizes = [8, 128], strides = [1, 1]} : vector<8x256xf32> to vector<8x128xf32>
    %800 = arith.addf %798, %799 : vector<8x128xf32>
    %801 = arith.negf %795 : vector<8x128xf32>
    %802 = math.exp %801 : vector<8x128xf32>
    %cst_257 = arith.constant 1.000000e+00 : f32
    %803 = vector.broadcast %cst_257 : f32 to vector<8x128xf32>
    %804 = arith.addf %803, %802 : vector<8x128xf32>
    %805 = arith.divf %803, %804 : vector<8x128xf32>
    %806 = math.tanh %795 : vector<8x128xf32>
    %807 = arith.negf %800 : vector<8x128xf32>
    %808 = math.exp %807 : vector<8x128xf32>
    %cst_258 = arith.constant 1.000000e+00 : f32
    %809 = vector.broadcast %cst_258 : f32 to vector<8x128xf32>
    %810 = arith.addf %809, %808 : vector<8x128xf32>
    %811 = arith.divf %809, %810 : vector<8x128xf32>
    %812 = math.tanh %800 : vector<8x128xf32>
    %813 = vector.extract_strided_slice %805 {offsets = [0, 32], sizes = [8, 32], strides = [1, 1]} : vector<8x128xf32> to vector<8x32xf32>
    %814 = arith.mulf %813, %780 : vector<8x32xf32>
    %815 = vector.extract_strided_slice %805 {offsets = [0, 0], sizes = [8, 32], strides = [1, 1]} : vector<8x128xf32> to vector<8x32xf32>
    %816 = vector.extract_strided_slice %806 {offsets = [0, 64], sizes = [8, 32], strides = [1, 1]} : vector<8x128xf32> to vector<8x32xf32>
    %817 = arith.mulf %815, %816 : vector<8x32xf32>
    %818 = arith.addf %814, %817 : vector<8x32xf32>
    %819 = vector.extract_strided_slice %805 {offsets = [0, 96], sizes = [8, 32], strides = [1, 1]} : vector<8x128xf32> to vector<8x32xf32>
    %820 = math.tanh %818 : vector<8x32xf32>
    %821 = arith.mulf %819, %820 : vector<8x32xf32>
    %822 = vector.extract_strided_slice %811 {offsets = [0, 32], sizes = [8, 32], strides = [1, 1]} : vector<8x128xf32> to vector<8x32xf32>
    %823 = arith.mulf %822, %787 : vector<8x32xf32>
    %824 = vector.extract_strided_slice %811 {offsets = [0, 0], sizes = [8, 32], strides = [1, 1]} : vector<8x128xf32> to vector<8x32xf32>
    %825 = vector.extract_strided_slice %812 {offsets = [0, 64], sizes = [8, 32], strides = [1, 1]} : vector<8x128xf32> to vector<8x32xf32>
    %826 = arith.mulf %824, %825 : vector<8x32xf32>
    %827 = arith.addf %823, %826 : vector<8x32xf32>
    %828 = vector.extract_strided_slice %811 {offsets = [0, 96], sizes = [8, 32], strides = [1, 1]} : vector<8x128xf32> to vector<8x32xf32>
    %829 = math.tanh %827 : vector<8x32xf32>
    %830 = arith.mulf %828, %829 : vector<8x32xf32>
    %c5_i32_259 = arith.constant 5 : i32
    %831 = vector.broadcast %c5_i32_259 : i32 to vector<8x1xi32>
    %832 = arith.cmpi sgt, %0, %831 : vector<8x1xi32>
    %cst_260 = arith.constant 1.000000e+00 : f32
    %cst_261 = arith.constant 0.000000e+00 : f32
    %833 = vector.broadcast %cst_260 : f32 to vector<8x1xf32>
    %834 = vector.broadcast %cst_261 : f32 to vector<8x1xf32>
    %835 = arith.select %832, %833, %834 : vector<8x1xi1>, vector<8x1xf32>
    %c2_i32_262 = arith.constant 2 : i32
    %836 = vector.broadcast %c2_i32_262 : i32 to vector<8x1xi32>
    %837 = arith.cmpi sgt, %0, %836 : vector<8x1xi32>
    %cst_263 = arith.constant 1.000000e+00 : f32
    %cst_264 = arith.constant 0.000000e+00 : f32
    %838 = vector.broadcast %cst_263 : f32 to vector<8x1xf32>
    %839 = vector.broadcast %cst_264 : f32 to vector<8x1xf32>
    %840 = arith.select %837, %838, %839 : vector<8x1xi1>, vector<8x1xf32>
    %841 = vector.broadcast %835 : vector<8x1xf32> to vector<8x32xf32>
    %842 = arith.mulf %841, %821 : vector<8x32xf32>
    %c5_265 = arith.constant 5 : index
    %c0_266 = arith.constant 0 : index
    %c0_267 = arith.constant 0 : index
    %843 = vector.load %arg21[%c5_265, %c0_266, %c0_267] : memref<8x8x32xf32, #tpu.memory_space<vmem>>, vector<1x8x32xf32>
    %844 = vector.shape_cast %843 : vector<1x8x32xf32> to vector<8x32xf32>
    %845 = vector.shape_cast %842 : vector<8x32xf32> to vector<1x8x32xf32>
    tpu.vector_store %arg21[%c5_265, %c0_266, %c0_267], %845 {strides = array<i32>} : memref<8x8x32xf32, #tpu.memory_space<vmem>>, vector<1x8x32xf32>,
    %846 = vector.broadcast %840 : vector<8x1xf32> to vector<8x32xf32>
    %847 = arith.mulf %846, %830 : vector<8x32xf32>
    %c2_268 = arith.constant 2 : index
    %c0_269 = arith.constant 0 : index
    %c0_270 = arith.constant 0 : index
    %848 = vector.load %arg22[%c2_268, %c0_269, %c0_270] : memref<8x8x32xf32, #tpu.memory_space<vmem>>, vector<1x8x32xf32>
    %849 = vector.shape_cast %848 : vector<1x8x32xf32> to vector<8x32xf32>
    %850 = vector.shape_cast %847 : vector<8x32xf32> to vector<1x8x32xf32>
    tpu.vector_store %arg22[%c2_268, %c0_269, %c0_270], %850 {strides = array<i32>} : memref<8x8x32xf32, #tpu.memory_space<vmem>>, vector<1x8x32xf32>,
    %851 = vector.broadcast %835 : vector<8x1xf32> to vector<8x32xf32>
    %852 = arith.mulf %851, %821 : vector<8x32xf32>
    %cst_271 = arith.constant 1.000000e+00 : f32
    %853 = vector.broadcast %cst_271 : f32 to vector<8x1xf32>
    %854 = arith.subf %853, %835 : vector<8x1xf32>
    %855 = vector.extract_strided_slice %788 {offsets = [0, 0], sizes = [8, 32], strides = [1, 1]} : vector<8x64xf32> to vector<8x32xf32>
    %856 = vector.broadcast %854 : vector<8x1xf32> to vector<8x32xf32>
    %857 = arith.mulf %856, %855 : vector<8x32xf32>
    %858 = arith.addf %852, %857 : vector<8x32xf32>
    %859 = vector.broadcast %840 : vector<8x1xf32> to vector<8x32xf32>
    %860 = arith.mulf %859, %830 : vector<8x32xf32>
    %cst_272 = arith.constant 1.000000e+00 : f32
    %861 = vector.broadcast %cst_272 : f32 to vector<8x1xf32>
    %862 = arith.subf %861, %840 : vector<8x1xf32>
    %863 = vector.extract_strided_slice %788 {offsets = [0, 32], sizes = [8, 32], strides = [1, 1]} : vector<8x64xf32> to vector<8x32xf32>
    %864 = vector.broadcast %862 : vector<8x1xf32> to vector<8x32xf32>
    %865 = arith.mulf %864, %863 : vector<8x32xf32>
    %866 = arith.addf %860, %865 : vector<8x32xf32>
    %867 = vector.broadcast %835 : vector<8x1xf32> to vector<8x32xf32>
    %868 = arith.mulf %867, %818 : vector<8x32xf32>
    %cst_273 = arith.constant 1.000000e+00 : f32
    %869 = vector.broadcast %cst_273 : f32 to vector<8x1xf32>
    %870 = arith.subf %869, %835 : vector<8x1xf32>
    %871 = vector.broadcast %870 : vector<8x1xf32> to vector<8x32xf32>
    %872 = arith.mulf %871, %780 : vector<8x32xf32>
    %873 = arith.addf %868, %872 : vector<8x32xf32>
    %874 = vector.broadcast %840 : vector<8x1xf32> to vector<8x32xf32>
    %875 = arith.mulf %874, %827 : vector<8x32xf32>
    %cst_274 = arith.constant 1.000000e+00 : f32
    %876 = vector.broadcast %cst_274 : f32 to vector<8x1xf32>
    %877 = arith.subf %876, %840 : vector<8x1xf32>
    %878 = vector.broadcast %877 : vector<8x1xf32> to vector<8x32xf32>
    %879 = arith.mulf %878, %787 : vector<8x32xf32>
    %880 = arith.addf %875, %879 : vector<8x32xf32>
    %881 = tpu.concatenate %858, %866 in 1 : vector<8x32xf32>, vector<8x32xf32> -> vector<8x64xf32>
    %882 = arith.truncf %881 : vector<8x64xf32> to vector<8x64xbf16>
    %cst_275 = arith.constant dense<0.000000e+00> : vector<8x256xf32>
    %883 = tpu.matmul %882, %320, %cst_275 {dimension_numbers = #tpu.dot_dimension_numbers<[1], [0], [0], [1], [0, 0, 1, 1], [], []>} : vector<8x64xbf16>, vector<64x256xbf16>, vector<8x256xf32> -> vector<8x256xf32>
    %c6_276 = arith.constant 6 : index
    %c0_277 = arith.constant 0 : index
    %c0_278 = arith.constant 0 : index
    %884 = vector.load %arg20[%c6_276, %c0_277, %c0_278] : memref<8x8x256xf32, #tpu.memory_space<vmem>>, vector<1x8x256xf32>
    %885 = vector.shape_cast %884 : vector<1x8x256xf32> to vector<8x256xf32>
    %886 = vector.extract_strided_slice %885 {offsets = [0, 0], sizes = [8, 128], strides = [1, 1]} : vector<8x256xf32> to vector<8x128xf32>
    %887 = vector.extract_strided_slice %883 {offsets = [0, 0], sizes = [8, 128], strides = [1, 1]} : vector<8x256xf32> to vector<8x128xf32>
    %888 = arith.addf %886, %887 : vector<8x128xf32>
    %c1_279 = arith.constant 1 : index
    %c0_280 = arith.constant 0 : index
    %c0_281 = arith.constant 0 : index
    %889 = vector.load %arg20[%c1_279, %c0_280, %c0_281] : memref<8x8x256xf32, #tpu.memory_space<vmem>>, vector<1x8x256xf32>
    %890 = vector.shape_cast %889 : vector<1x8x256xf32> to vector<8x256xf32>
    %891 = vector.extract_strided_slice %890 {offsets = [0, 128], sizes = [8, 128], strides = [1, 1]} : vector<8x256xf32> to vector<8x128xf32>
    %892 = vector.extract_strided_slice %883 {offsets = [0, 128], sizes = [8, 128], strides = [1, 1]} : vector<8x256xf32> to vector<8x128xf32>
    %893 = arith.addf %891, %892 : vector<8x128xf32>
    %894 = arith.negf %888 : vector<8x128xf32>
    %895 = math.exp %894 : vector<8x128xf32>
    %cst_282 = arith.constant 1.000000e+00 : f32
    %896 = vector.broadcast %cst_282 : f32 to vector<8x128xf32>
    %897 = arith.addf %896, %895 : vector<8x128xf32>
    %898 = arith.divf %896, %897 : vector<8x128xf32>
    %899 = math.tanh %888 : vector<8x128xf32>
    %900 = arith.negf %893 : vector<8x128xf32>
    %901 = math.exp %900 : vector<8x128xf32>
    %cst_283 = arith.constant 1.000000e+00 : f32
    %902 = vector.broadcast %cst_283 : f32 to vector<8x128xf32>
    %903 = arith.addf %902, %901 : vector<8x128xf32>
    %904 = arith.divf %902, %903 : vector<8x128xf32>
    %905 = math.tanh %893 : vector<8x128xf32>
    %906 = vector.extract_strided_slice %898 {offsets = [0, 32], sizes = [8, 32], strides = [1, 1]} : vector<8x128xf32> to vector<8x32xf32>
    %907 = arith.mulf %906, %873 : vector<8x32xf32>
    %908 = vector.extract_strided_slice %898 {offsets = [0, 0], sizes = [8, 32], strides = [1, 1]} : vector<8x128xf32> to vector<8x32xf32>
    %909 = vector.extract_strided_slice %899 {offsets = [0, 64], sizes = [8, 32], strides = [1, 1]} : vector<8x128xf32> to vector<8x32xf32>
    %910 = arith.mulf %908, %909 : vector<8x32xf32>
    %911 = arith.addf %907, %910 : vector<8x32xf32>
    %912 = vector.extract_strided_slice %898 {offsets = [0, 96], sizes = [8, 32], strides = [1, 1]} : vector<8x128xf32> to vector<8x32xf32>
    %913 = math.tanh %911 : vector<8x32xf32>
    %914 = arith.mulf %912, %913 : vector<8x32xf32>
    %915 = vector.extract_strided_slice %904 {offsets = [0, 32], sizes = [8, 32], strides = [1, 1]} : vector<8x128xf32> to vector<8x32xf32>
    %916 = arith.mulf %915, %880 : vector<8x32xf32>
    %917 = vector.extract_strided_slice %904 {offsets = [0, 0], sizes = [8, 32], strides = [1, 1]} : vector<8x128xf32> to vector<8x32xf32>
    %918 = vector.extract_strided_slice %905 {offsets = [0, 64], sizes = [8, 32], strides = [1, 1]} : vector<8x128xf32> to vector<8x32xf32>
    %919 = arith.mulf %917, %918 : vector<8x32xf32>
    %920 = arith.addf %916, %919 : vector<8x32xf32>
    %921 = vector.extract_strided_slice %904 {offsets = [0, 96], sizes = [8, 32], strides = [1, 1]} : vector<8x128xf32> to vector<8x32xf32>
    %922 = math.tanh %920 : vector<8x32xf32>
    %923 = arith.mulf %921, %922 : vector<8x32xf32>
    %c6_i32_284 = arith.constant 6 : i32
    %924 = vector.broadcast %c6_i32_284 : i32 to vector<8x1xi32>
    %925 = arith.cmpi sgt, %0, %924 : vector<8x1xi32>
    %cst_285 = arith.constant 1.000000e+00 : f32
    %cst_286 = arith.constant 0.000000e+00 : f32
    %926 = vector.broadcast %cst_285 : f32 to vector<8x1xf32>
    %927 = vector.broadcast %cst_286 : f32 to vector<8x1xf32>
    %928 = arith.select %925, %926, %927 : vector<8x1xi1>, vector<8x1xf32>
    %c1_i32_287 = arith.constant 1 : i32
    %929 = vector.broadcast %c1_i32_287 : i32 to vector<8x1xi32>
    %930 = arith.cmpi sgt, %0, %929 : vector<8x1xi32>
    %cst_288 = arith.constant 1.000000e+00 : f32
    %cst_289 = arith.constant 0.000000e+00 : f32
    %931 = vector.broadcast %cst_288 : f32 to vector<8x1xf32>
    %932 = vector.broadcast %cst_289 : f32 to vector<8x1xf32>
    %933 = arith.select %930, %931, %932 : vector<8x1xi1>, vector<8x1xf32>
    %934 = vector.broadcast %928 : vector<8x1xf32> to vector<8x32xf32>
    %935 = arith.mulf %934, %914 : vector<8x32xf32>
    %c6_290 = arith.constant 6 : index
    %c0_291 = arith.constant 0 : index
    %c0_292 = arith.constant 0 : index
    %936 = vector.load %arg21[%c6_290, %c0_291, %c0_292] : memref<8x8x32xf32, #tpu.memory_space<vmem>>, vector<1x8x32xf32>
    %937 = vector.shape_cast %936 : vector<1x8x32xf32> to vector<8x32xf32>
    %938 = vector.shape_cast %935 : vector<8x32xf32> to vector<1x8x32xf32>
    tpu.vector_store %arg21[%c6_290, %c0_291, %c0_292], %938 {strides = array<i32>} : memref<8x8x32xf32, #tpu.memory_space<vmem>>, vector<1x8x32xf32>,
    %939 = vector.broadcast %933 : vector<8x1xf32> to vector<8x32xf32>
    %940 = arith.mulf %939, %923 : vector<8x32xf32>
    %c1_293 = arith.constant 1 : index
    %c0_294 = arith.constant 0 : index
    %c0_295 = arith.constant 0 : index
    %941 = vector.load %arg22[%c1_293, %c0_294, %c0_295] : memref<8x8x32xf32, #tpu.memory_space<vmem>>, vector<1x8x32xf32>
    %942 = vector.shape_cast %941 : vector<1x8x32xf32> to vector<8x32xf32>
    %943 = vector.shape_cast %940 : vector<8x32xf32> to vector<1x8x32xf32>
    tpu.vector_store %arg22[%c1_293, %c0_294, %c0_295], %943 {strides = array<i32>} : memref<8x8x32xf32, #tpu.memory_space<vmem>>, vector<1x8x32xf32>,
    %944 = vector.broadcast %928 : vector<8x1xf32> to vector<8x32xf32>
    %945 = arith.mulf %944, %914 : vector<8x32xf32>
    %cst_296 = arith.constant 1.000000e+00 : f32
    %946 = vector.broadcast %cst_296 : f32 to vector<8x1xf32>
    %947 = arith.subf %946, %928 : vector<8x1xf32>
    %948 = vector.extract_strided_slice %881 {offsets = [0, 0], sizes = [8, 32], strides = [1, 1]} : vector<8x64xf32> to vector<8x32xf32>
    %949 = vector.broadcast %947 : vector<8x1xf32> to vector<8x32xf32>
    %950 = arith.mulf %949, %948 : vector<8x32xf32>
    %951 = arith.addf %945, %950 : vector<8x32xf32>
    %952 = vector.broadcast %933 : vector<8x1xf32> to vector<8x32xf32>
    %953 = arith.mulf %952, %923 : vector<8x32xf32>
    %cst_297 = arith.constant 1.000000e+00 : f32
    %954 = vector.broadcast %cst_297 : f32 to vector<8x1xf32>
    %955 = arith.subf %954, %933 : vector<8x1xf32>
    %956 = vector.extract_strided_slice %881 {offsets = [0, 32], sizes = [8, 32], strides = [1, 1]} : vector<8x64xf32> to vector<8x32xf32>
    %957 = vector.broadcast %955 : vector<8x1xf32> to vector<8x32xf32>
    %958 = arith.mulf %957, %956 : vector<8x32xf32>
    %959 = arith.addf %953, %958 : vector<8x32xf32>
    %960 = vector.broadcast %928 : vector<8x1xf32> to vector<8x32xf32>
    %961 = arith.mulf %960, %911 : vector<8x32xf32>
    %cst_298 = arith.constant 1.000000e+00 : f32
    %962 = vector.broadcast %cst_298 : f32 to vector<8x1xf32>
    %963 = arith.subf %962, %928 : vector<8x1xf32>
    %964 = vector.broadcast %963 : vector<8x1xf32> to vector<8x32xf32>
    %965 = arith.mulf %964, %873 : vector<8x32xf32>
    %966 = arith.addf %961, %965 : vector<8x32xf32>
    %967 = vector.broadcast %933 : vector<8x1xf32> to vector<8x32xf32>
    %968 = arith.mulf %967, %920 : vector<8x32xf32>
    %cst_299 = arith.constant 1.000000e+00 : f32
    %969 = vector.broadcast %cst_299 : f32 to vector<8x1xf32>
    %970 = arith.subf %969, %933 : vector<8x1xf32>
    %971 = vector.broadcast %970 : vector<8x1xf32> to vector<8x32xf32>
    %972 = arith.mulf %971, %880 : vector<8x32xf32>
    %973 = arith.addf %968, %972 : vector<8x32xf32>
    %974 = tpu.concatenate %951, %959 in 1 : vector<8x32xf32>, vector<8x32xf32> -> vector<8x64xf32>
    %975 = arith.truncf %974 : vector<8x64xf32> to vector<8x64xbf16>
    %cst_300 = arith.constant dense<0.000000e+00> : vector<8x256xf32>
    %976 = tpu.matmul %975, %320, %cst_300 {dimension_numbers = #tpu.dot_dimension_numbers<[1], [0], [0], [1], [0, 0, 1, 1], [], []>} : vector<8x64xbf16>, vector<64x256xbf16>, vector<8x256xf32> -> vector<8x256xf32>
    %c7_301 = arith.constant 7 : index
    %c0_302 = arith.constant 0 : index
    %c0_303 = arith.constant 0 : index
    %977 = vector.load %arg20[%c7_301, %c0_302, %c0_303] : memref<8x8x256xf32, #tpu.memory_space<vmem>>, vector<1x8x256xf32>
    %978 = vector.shape_cast %977 : vector<1x8x256xf32> to vector<8x256xf32>
    %979 = vector.extract_strided_slice %978 {offsets = [0, 0], sizes = [8, 128], strides = [1, 1]} : vector<8x256xf32> to vector<8x128xf32>
    %980 = vector.extract_strided_slice %976 {offsets = [0, 0], sizes = [8, 128], strides = [1, 1]} : vector<8x256xf32> to vector<8x128xf32>
    %981 = arith.addf %979, %980 : vector<8x128xf32>
    %c0_304 = arith.constant 0 : index
    %c0_305 = arith.constant 0 : index
    %c0_306 = arith.constant 0 : index
    %982 = vector.load %arg20[%c0_304, %c0_305, %c0_306] : memref<8x8x256xf32, #tpu.memory_space<vmem>>, vector<1x8x256xf32>
    %983 = vector.shape_cast %982 : vector<1x8x256xf32> to vector<8x256xf32>
    %984 = vector.extract_strided_slice %983 {offsets = [0, 128], sizes = [8, 128], strides = [1, 1]} : vector<8x256xf32> to vector<8x128xf32>
    %985 = vector.extract_strided_slice %976 {offsets = [0, 128], sizes = [8, 128], strides = [1, 1]} : vector<8x256xf32> to vector<8x128xf32>
    %986 = arith.addf %984, %985 : vector<8x128xf32>
    %987 = arith.negf %981 : vector<8x128xf32>
    %988 = math.exp %987 : vector<8x128xf32>
    %cst_307 = arith.constant 1.000000e+00 : f32
    %989 = vector.broadcast %cst_307 : f32 to vector<8x128xf32>
    %990 = arith.addf %989, %988 : vector<8x128xf32>
    %991 = arith.divf %989, %990 : vector<8x128xf32>
    %992 = math.tanh %981 : vector<8x128xf32>
    %993 = arith.negf %986 : vector<8x128xf32>
    %994 = math.exp %993 : vector<8x128xf32>
    %cst_308 = arith.constant 1.000000e+00 : f32
    %995 = vector.broadcast %cst_308 : f32 to vector<8x128xf32>
    %996 = arith.addf %995, %994 : vector<8x128xf32>
    %997 = arith.divf %995, %996 : vector<8x128xf32>
    %998 = math.tanh %986 : vector<8x128xf32>
    %999 = vector.extract_strided_slice %991 {offsets = [0, 32], sizes = [8, 32], strides = [1, 1]} : vector<8x128xf32> to vector<8x32xf32>
    %1000 = arith.mulf %999, %966 : vector<8x32xf32>
    %1001 = vector.extract_strided_slice %991 {offsets = [0, 0], sizes = [8, 32], strides = [1, 1]} : vector<8x128xf32> to vector<8x32xf32>
    %1002 = vector.extract_strided_slice %992 {offsets = [0, 64], sizes = [8, 32], strides = [1, 1]} : vector<8x128xf32> to vector<8x32xf32>
    %1003 = arith.mulf %1001, %1002 : vector<8x32xf32>
    %1004 = arith.addf %1000, %1003 : vector<8x32xf32>
    %1005 = vector.extract_strided_slice %991 {offsets = [0, 96], sizes = [8, 32], strides = [1, 1]} : vector<8x128xf32> to vector<8x32xf32>
    %1006 = math.tanh %1004 : vector<8x32xf32>
    %1007 = arith.mulf %1005, %1006 : vector<8x32xf32>
    %1008 = vector.extract_strided_slice %997 {offsets = [0, 32], sizes = [8, 32], strides = [1, 1]} : vector<8x128xf32> to vector<8x32xf32>
    %1009 = arith.mulf %1008, %973 : vector<8x32xf32>
    %1010 = vector.extract_strided_slice %997 {offsets = [0, 0], sizes = [8, 32], strides = [1, 1]} : vector<8x128xf32> to vector<8x32xf32>
    %1011 = vector.extract_strided_slice %998 {offsets = [0, 64], sizes = [8, 32], strides = [1, 1]} : vector<8x128xf32> to vector<8x32xf32>
    %1012 = arith.mulf %1010, %1011 : vector<8x32xf32>
    %1013 = arith.addf %1009, %1012 : vector<8x32xf32>
    %1014 = vector.extract_strided_slice %997 {offsets = [0, 96], sizes = [8, 32], strides = [1, 1]} : vector<8x128xf32> to vector<8x32xf32>
    %1015 = math.tanh %1013 : vector<8x32xf32>
    %1016 = arith.mulf %1014, %1015 : vector<8x32xf32>
    %c7_i32_309 = arith.constant 7 : i32
    %1017 = vector.broadcast %c7_i32_309 : i32 to vector<8x1xi32>
    %1018 = arith.cmpi sgt, %0, %1017 : vector<8x1xi32>
    %cst_310 = arith.constant 1.000000e+00 : f32
    %cst_311 = arith.constant 0.000000e+00 : f32
    %1019 = vector.broadcast %cst_310 : f32 to vector<8x1xf32>
    %1020 = vector.broadcast %cst_311 : f32 to vector<8x1xf32>
    %1021 = arith.select %1018, %1019, %1020 : vector<8x1xi1>, vector<8x1xf32>
    %c0_i32_312 = arith.constant 0 : i32
    %1022 = vector.broadcast %c0_i32_312 : i32 to vector<8x1xi32>
    %1023 = arith.cmpi sgt, %0, %1022 : vector<8x1xi32>
    %cst_313 = arith.constant 1.000000e+00 : f32
    %cst_314 = arith.constant 0.000000e+00 : f32
    %1024 = vector.broadcast %cst_313 : f32 to vector<8x1xf32>
    %1025 = vector.broadcast %cst_314 : f32 to vector<8x1xf32>
    %1026 = arith.select %1023, %1024, %1025 : vector<8x1xi1>, vector<8x1xf32>
    %1027 = vector.broadcast %1021 : vector<8x1xf32> to vector<8x32xf32>
    %1028 = arith.mulf %1027, %1007 : vector<8x32xf32>
    %c7_315 = arith.constant 7 : index
    %c0_316 = arith.constant 0 : index
    %c0_317 = arith.constant 0 : index
    %1029 = vector.load %arg21[%c7_315, %c0_316, %c0_317] : memref<8x8x32xf32, #tpu.memory_space<vmem>>, vector<1x8x32xf32>
    %1030 = vector.shape_cast %1029 : vector<1x8x32xf32> to vector<8x32xf32>
    %1031 = vector.shape_cast %1028 : vector<8x32xf32> to vector<1x8x32xf32>
    tpu.vector_store %arg21[%c7_315, %c0_316, %c0_317], %1031 {strides = array<i32>} : memref<8x8x32xf32, #tpu.memory_space<vmem>>, vector<1x8x32xf32>,
    %1032 = vector.broadcast %1026 : vector<8x1xf32> to vector<8x32xf32>
    %1033 = arith.mulf %1032, %1016 : vector<8x32xf32>
    %c0_318 = arith.constant 0 : index
    %c0_319 = arith.constant 0 : index
    %c0_320 = arith.constant 0 : index
    %1034 = vector.load %arg22[%c0_318, %c0_319, %c0_320] : memref<8x8x32xf32, #tpu.memory_space<vmem>>, vector<1x8x32xf32>
    %1035 = vector.shape_cast %1034 : vector<1x8x32xf32> to vector<8x32xf32>
    %1036 = vector.shape_cast %1033 : vector<8x32xf32> to vector<1x8x32xf32>
    tpu.vector_store %arg22[%c0_318, %c0_319, %c0_320], %1036 {strides = array<i32>} : memref<8x8x32xf32, #tpu.memory_space<vmem>>, vector<1x8x32xf32>,
    %c0_321 = arith.constant 0 : index
    %c0_322 = arith.constant 0 : index
    %c0_323 = arith.constant 0 : index
    %1037 = vector.load %arg21[%c0_321, %c0_322, %c0_323] : memref<8x8x32xf32, #tpu.memory_space<vmem>>, vector<8x8x32xf32>
    %1038 = vector.shape_cast %1037 : vector<8x8x32xf32> to vector<64x32xf32>
    %1039 = arith.truncf %1038 : vector<64x32xf32> to vector<64x32xbf16>
    %c0_324 = arith.constant 0 : index
    %c0_325 = arith.constant 0 : index
    %c0_326 = arith.constant 0 : index
    %1040 = vector.load %arg22[%c0_324, %c0_325, %c0_326] : memref<8x8x32xf32, #tpu.memory_space<vmem>>, vector<8x8x32xf32>
    %1041 = vector.shape_cast %1040 : vector<8x8x32xf32> to vector<64x32xf32>
    %1042 = arith.truncf %1041 : vector<64x32xf32> to vector<64x32xbf16>
    %c0_327 = arith.constant 0 : index
    %c0_328 = arith.constant 0 : index
    %1043 = vector.load %arg14[%c0_327, %c0_328] : memref<32x32xbf16, #tpu.memory_space<vmem>>, vector<32x32xbf16>
    %cst_329 = arith.constant dense<0.000000e+00> : vector<64x32xf32>
    %1044 = tpu.matmul %1039, %1043, %cst_329 {dimension_numbers = #tpu.dot_dimension_numbers<[1], [0], [0], [1], [0, 0, 1, 1], [], []>} : vector<64x32xbf16>, vector<32x32xbf16>, vector<64x32xf32> -> vector<64x32xf32>
    %c0_330 = arith.constant 0 : index
    %c0_331 = arith.constant 0 : index
    %1045 = vector.load %arg15[%c0_330, %c0_331] : memref<32x32xbf16, #tpu.memory_space<vmem>>, vector<32x32xbf16>
    %cst_332 = arith.constant dense<0.000000e+00> : vector<64x32xf32>
    %1046 = tpu.matmul %1042, %1045, %cst_332 {dimension_numbers = #tpu.dot_dimension_numbers<[1], [0], [0], [1], [0, 0, 1, 1], [], []>} : vector<64x32xbf16>, vector<32x32xbf16>, vector<64x32xf32> -> vector<64x32xf32>
    %1047 = arith.addf %1044, %1046 : vector<64x32xf32>
    %c0_333 = arith.constant 0 : index
    %c0_334 = arith.constant 0 : index
    %1048 = vector.load %arg16[%c0_333, %c0_334] : memref<1x32xf32, #tpu.memory_space<vmem>>, vector<1x32xf32>
    %1049 = vector.broadcast %1048 : vector<1x32xf32> to vector<64x32xf32>
    %1050 = arith.addf %1047, %1049 : vector<64x32xf32>
    %cst_335 = arith.constant 0.000000e+00 : f32
    %1051 = vector.broadcast %cst_335 : f32 to vector<64x32xf32>
    %1052 = arith.maximumf %1050, %1051 : vector<64x32xf32>
    %1053 = arith.truncf %1052 : vector<64x32xf32> to vector<64x32xbf16>
    %c0_336 = arith.constant 0 : index
    %c0_337 = arith.constant 0 : index
    %1054 = vector.load %arg17[%c0_336, %c0_337] : memref<32x128xbf16, #tpu.memory_space<vmem>>, vector<32x128xbf16>
    %cst_338 = arith.constant dense<0.000000e+00> : vector<64x128xf32>
    %1055 = tpu.matmul %1053, %1054, %cst_338 {dimension_numbers = #tpu.dot_dimension_numbers<[1], [0], [0], [1], [0, 0, 1, 1], [], []>} : vector<64x32xbf16>, vector<32x128xbf16>, vector<64x128xf32> -> vector<64x128xf32>
    %c0_339 = arith.constant 0 : index
    %c0_340 = arith.constant 0 : index
    %1056 = vector.load %arg18[%c0_339, %c0_340] : memref<1x128xf32, #tpu.memory_space<vmem>>, vector<1x128xf32>
    %1057 = vector.broadcast %1056 : vector<1x128xf32> to vector<64x128xf32>
    %1058 = arith.addf %1055, %1057 : vector<64x128xf32>
    %1059 = vector.shape_cast %1058 : vector<64x128xf32> to vector<8x8x128xf32>
    %c0_341 = arith.constant 0 : index
    %c0_342 = arith.constant 0 : index
    %c0_343 = arith.constant 0 : index
    %1060 = vector.load %arg19[%c0_341, %c0_342, %c0_343] : memref<8x8x128xf32, #tpu.memory_space<vmem>>, vector<8x8x128xf32>
    tpu.vector_store %arg19[%c0_341, %c0_342, %c0_343], %1059 {strides = array<i32>} : memref<8x8x128xf32, #tpu.memory_space<vmem>>, vector<8x8x128xf32>,
    return
  }
  func.func @transform_0(%arg0: i32) -> (i32, i32, i32) {
    %c0_i32 = arith.constant 0 : i32
    %c0_i32_0 = arith.constant 0 : i32
    %c0_i32_1 = arith.constant 0 : i32
    return %arg0, %c0_i32, %c0_i32_0 : i32, i32, i32
  }
  func.func @transform_1(%arg0: i32) -> (i32, i32) {
    %c0_i32 = arith.constant 0 : i32
    %c0_i32_0 = arith.constant 0 : i32
    return %arg0, %c0_i32 : i32, i32
  }
  func.func @transform_2(%arg0: i32) -> (i32, i32) {
    %c0_i32 = arith.constant 0 : i32
    %c0_i32_0 = arith.constant 0 : i32
    %c0_i32_1 = arith.constant 0 : i32
    return %c0_i32, %c0_i32_0 : i32, i32
  }
  func.func @transform_3(%arg0: i32) -> (i32, i32) {
    %c0_i32 = arith.constant 0 : i32
    %c0_i32_0 = arith.constant 0 : i32
    %c0_i32_1 = arith.constant 0 : i32
    return %c0_i32, %c0_i32_0 : i32, i32
  }
  func.func @transform_4(%arg0: i32) -> (i32, i32, i32) {
    %c0_i32 = arith.constant 0 : i32
    %c0_i32_0 = arith.constant 0 : i32
    %c0_i32_1 = arith.constant 0 : i32
    %c0_i32_2 = arith.constant 0 : i32
    return %c0_i32, %c0_i32_0, %c0_i32_1 : i32, i32, i32
  }
  func.func @transform_5(%arg0: i32) -> (i32, i32, i32) {
    %c0_i32 = arith.constant 0 : i32
    %c0_i32_0 = arith.constant 0 : i32
    %c0_i32_1 = arith.constant 0 : i32
    %c0_i32_2 = arith.constant 0 : i32
    return %c0_i32, %c0_i32_0, %c0_i32_1 : i32, i32, i32
  }
  func.func @transform_6(%arg0: i32) -> (i32, i32, i32) {
    %c0_i32 = arith.constant 0 : i32
    %c0_i32_0 = arith.constant 0 : i32
    %c0_i32_1 = arith.constant 0 : i32
    %c0_i32_2 = arith.constant 0 : i32
    return %c0_i32, %c0_i32_0, %c0_i32_1 : i32, i32, i32
  }
  func.func @transform_7(%arg0: i32) -> (i32, i32, i32) {
    %c0_i32 = arith.constant 0 : i32
    %c0_i32_0 = arith.constant 0 : i32
    %c0_i32_1 = arith.constant 0 : i32
    %c0_i32_2 = arith.constant 0 : i32
    return %c0_i32, %c0_i32_0, %c0_i32_1 : i32, i32, i32
  }
  func.func @transform_8(%arg0: i32) -> (i32, i32, i32) {
    %c0_i32 = arith.constant 0 : i32
    %c0_i32_0 = arith.constant 0 : i32
    %c0_i32_1 = arith.constant 0 : i32
    %c0_i32_2 = arith.constant 0 : i32
    return %c0_i32, %c0_i32_0, %c0_i32_1 : i32, i32, i32
  }
  func.func @transform_9(%arg0: i32) -> (i32, i32, i32) {
    %c0_i32 = arith.constant 0 : i32
    %c0_i32_0 = arith.constant 0 : i32
    %c0_i32_1 = arith.constant 0 : i32
    %c0_i32_2 = arith.constant 0 : i32
    return %c0_i32, %c0_i32_0, %c0_i32_1 : i32, i32, i32
  }
  func.func @transform_10(%arg0: i32) -> (i32, i32) {
    %c0_i32 = arith.constant 0 : i32
    %c0_i32_0 = arith.constant 0 : i32
    %c0_i32_1 = arith.constant 0 : i32
    return %c0_i32, %c0_i32_0 : i32, i32
  }
  func.func @transform_11(%arg0: i32) -> (i32, i32) {
    %c0_i32 = arith.constant 0 : i32
    %c0_i32_0 = arith.constant 0 : i32
    %c0_i32_1 = arith.constant 0 : i32
    return %c0_i32, %c0_i32_0 : i32, i32
  }
  func.func @transform_12(%arg0: i32) -> (i32, i32) {
    %c0_i32 = arith.constant 0 : i32
    %c0_i32_0 = arith.constant 0 : i32
    %c0_i32_1 = arith.constant 0 : i32
    return %c0_i32, %c0_i32_0 : i32, i32
  }
  func.func @transform_13(%arg0: i32) -> (i32, i32) {
    %c0_i32 = arith.constant 0 : i32
    %c0_i32_0 = arith.constant 0 : i32
    %c0_i32_1 = arith.constant 0 : i32
    return %c0_i32, %c0_i32_0 : i32, i32
  }
  func.func @transform_14(%arg0: i32) -> (i32, i32) {
    %c0_i32 = arith.constant 0 : i32
    %c0_i32_0 = arith.constant 0 : i32
    %c0_i32_1 = arith.constant 0 : i32
    return %c0_i32, %c0_i32_0 : i32, i32
  }
  func.func @transform_15(%arg0: i32) -> (i32, i32) {
    %c0_i32 = arith.constant 0 : i32
    %c0_i32_0 = arith.constant 0 : i32
    %c0_i32_1 = arith.constant 0 : i32
    return %c0_i32, %c0_i32_0 : i32, i32
  }
  func.func @transform_16(%arg0: i32) -> (i32, i32) {
    %c0_i32 = arith.constant 0 : i32
    %c0_i32_0 = arith.constant 0 : i32
    %c0_i32_1 = arith.constant 0 : i32
    return %c0_i32, %c0_i32_0 : i32, i32
  }
  func.func @transform_17(%arg0: i32) -> (i32, i32) {
    %c0_i32 = arith.constant 0 : i32
    %c0_i32_0 = arith.constant 0 : i32
    %c0_i32_1 = arith.constant 0 : i32
    return %c0_i32, %c0_i32_0 : i32, i32
  }
  func.func @transform_18(%arg0: i32) -> (i32, i32, i32) {
    %c0_i32 = arith.constant 0 : i32
    %c0_i32_0 = arith.constant 0 : i32
    %c0_i32_1 = arith.constant 0 : i32
    return %c0_i32, %arg0, %c0_i32_0 : i32, i32, i32
  }
}

</mosaic_0001>

<bundles_post_ra>
// kernel: model_forward.1
= control target key start
LH: loop header
LB: loop body
LE: loop exit
PB: predicated region body
PF: predicated region fallthrough
CT: control target
= control target key end

     0   :  { %vm98_vm0 = vcmask 1041408   ;;  %vm85_vm1 = vcmask 162816   ;;  %vm317_vm2 = vcmask 261120   ;;  %v12677_v29 = vmov 0   ;;  %s12681_s26 = smov 96   ;;  %s12684_s30 = smov 88   ;;  %s15472_s3 = inlined_call_operand.vmem [shape: bf16[20,32], index: 3, kind: input, shape index: {}]   ;;  %s15473_s0 = inlined_call_operand.vmem [shape: f32[8,8,20], index: 0, kind: input, shape index: {}]   ;;  %s15474_s4 = inlined_call_operand.vmem [shape: bf16[2,32,96], index: 4, kind: input, shape index: {}]   ;;  %s15475_s5 = inlined_call_operand.vmem [shape: f32[2,1,96], index: 5, kind: input, shape index: {}]   ;;  %s15476_s1 = inlined_call_operand.vmem [shape: s32[8,1], index: 1, kind: input, shape index: {}]   ;;  %s15477_s6 = inlined_call_operand.vmem [shape: bf16[2,32,32], index: 6, kind: input, shape index: {}]   ;;  %s15478_s7 = inlined_call_operand.vmem [shape: f32[2,1,32], index: 7, kind: input, shape index: {}]   ;;  %s15479_s8 = inlined_call_operand.vmem [shape: f32[2,1,32], index: 8, kind: input, shape index: {}]   ;;  %s15480_s9 = inlined_call_operand.vmem [shape: f32[2,1,32], index: 9, kind: input, shape index: {}]   ;;  %s15481_s2 = inlined_call_operand.vmem [shape: bf16[64,64], index: 2, kind: input, shape index: {}]   ;;  %s15482_s12 = inlined_call_operand.vmem [shape: bf16[64,256], index: 12, kind: input, shape index: {}]   ;;  %s15483_s10 = inlined_call_operand.vmem [shape: bf16[32,256], index: 10, kind: input, shape index: {}]   ;;  %s15484_s11 = inlined_call_operand.vmem [shape: f32[1,256], index: 11, kind: input, shape index: {}]   ;;  %s15485_s14 = inlined_call_operand.vmem [shape: bf16[32,32], index: 14, kind: input, shape index: {}]   ;;  %s15486_s13 = inlined_call_operand.vmem [shape: bf16[32,32], index: 13, kind: input, shape index: {}]   ;;  %s15487_s16 = inlined_call_operand.vmem [shape: bf16[32,128], index: 16, kind: input, shape index: {}]   ;;  %s15488_s15 = inlined_call_operand.vmem [shape: f32[1,32], index: 15, kind: input, shape index: {}]   ;;  %s15489_s17 = inlined_call_operand.vmem [shape: f32[1,128], index: 17, kind: input, shape index: {}]   ;;  %s15490_s18 = inlined_call_operand.vmem [shape: f32[8,8,128], index: 18, kind: output, shape index: {}]  }
   0x1   :  { %15496 = sst [smem:[#allocation5_spill]] %s15472_s3  ;;  %12196 = vset.pattern.permute.xlu0 %v12677_v29  ;;  %12197 = vset.pattern.permute.xlu1 %v12677_v29  ;;  %v12678_v30 = vmov 0.0   ;;  %v10547_v31 = vld [vmem:[%s15475_s5] ss:$0 sm:$0xff]  ;;  %v167_v32 = vlaneseq  ;;  %v12679_v33 = vmov 1966171168  }
   0x2   :  { %15497 = sst [smem:[#allocation6_spill]] %s15473_s0  ;;  %s15499_s29 = sld [smem:[#allocation5_spill]]  ;;  %v171_v34 = vunpack.c.l.s4 %v12679_v33  ;;  %vm12680_vm3 = vmmov 0   ;;  %v60_v49 = vld [vmem:[%s15476_s1] sm:$0xff]  ;;  %vm421_vm4 = vcmask 64512   ;;  %vm921_vm5 = vcmask 1043456  }
   0x3   :  { %15498 = sst [smem:[#allocation7_spill]] %s15474_s4  ;;  %s15500_s20 = sld [smem:[#allocation6_spill]]  ;;  %v12869_v41 = vshrl.u32 %v167_v32, 7  ;;  %vm8750_vm14 = vcmask 523264  }
   0x4   :  { %s15501_s19 = sld [smem:[#allocation7_spill]]  ;;  %v172_v40 = vunpack.c.0.s8 %v171_v34  ;;  %s12685_s3 = smov 120  }
   0x5   :  { %s12686_s0 = smov 56   ;;  %s12687_s21 = smov 80  }
   0x6   :  { %v175_v47 = vsub.s32 %v172_v40, %v12869_v41  ;;  %s12688_s22 = smov 112   ;;  %s12689_s25 = smov 48  }
   0x7   :  { %s12690_s27 = smov 72   ;;  %s12691_s28 = smov 104  }
   0x8   :  { %v12218_v0 = vld [vmem:[%s15499_s29] sm:$0xff]   ;;  %v12219_v1 = vld [vmem:[%s15499_s29 + $0x8] ss:$0 sps:$4 sm:$0x33]   ;;  %v176_v56 = vrot.slane %v60_v49, %v175_v47  ;;  %s12682_s29 = smov 64   ;;  %s15494_s24 = smov 40  }
   0x9   :  { %v61_v2 = vld [vmem:[%s15500_s20] sm:$0xff]  ;;  %v62_v3 = vld [vmem:[%s15500_s20 + $0x8] sm:$0xff]  ;;  %11178 = vmatprep.subr.bf16.mxu0 %v12218_v0  ;;  %v63_v5 = vld [vmem:[%s15500_s20 + $0x10] sm:$0xff]  ;;  %v100_v9 = vsel %vm98_vm0, %v12219_v1, 0  ;;  %s12693_s4 = smov 32  }
   0xa   :  { %v69_v4 = vpack.c.bf16 %v62_v3, %v61_v2  ;;  %v64_v6 = vld [vmem:[%s15500_s20 + $0x18] sm:$0xff]  ;;  %v65_v7 = vld [vmem:[%s15500_s20 + $0x20] sm:$0xff]  ;;  %11179 = vmatpush3.bf16.msra.mxu0 %v12218_v0  ;;  %v66_v8 = vld [vmem:[%s15500_s20 + $0x28] sm:$0xff]  ;;  %v184_v63 = vcombine.high %v176_v56, %v176_v56  ;;  %v169_v0 = vcombine.high %v60_v49, %v60_v49  ;;  %v192_v2 = vrot.slane %v176_v56, %v175_v47 }
   0xb   :  { %12170 = vmatprep.subr.msk.bf16.mxu0 %vm98_vm0, %v12219_v1  ;;  %v12220_v10 = vld [vmem:[%s15501_s19] sm:$0xff]   ;;  %v70_v11 = vpack.c.bf16 %v64_v6, %v63_v5  ;;  %v71_v12 = vpack.c.bf16 %v66_v8, %v65_v7  ;;  %v67_v13 = vld [vmem:[%s15500_s20 + $0x30] sm:$0xff]  ;;  %v68_v14 = vld [vmem:[%s15500_s20 + $0x38] sm:$0xff]  ;;  %v12976_v56 = vsub.s32 0, %v12869_v41 }
   0xc   :  { %11182 = vmatprep.mubr.msk.bf16.mxu0 %vm85_vm1, %v69_v4  ;;  %11190 = vmatprep.subr.bf16.mxu1 %v12220_v10  ;;  %v72_v15 = vpack.c.bf16 %v68_v14, %v67_v13  ;;  %v12221_v16 = vld [vmem:[%s15501_s19 + $0x8] sm:$0xff]   ;;  %v206_v3 = vrot.slane %v184_v63, %v175_v47  ;;  %v183_v4 = vrot.slane %v169_v0, %v175_v47  ;;  %v12683_v63 = vmov -1e+09  }
   0xd   :  { %11191 = vmatpush3.bf16.msra.mxu1 %v12220_v10  ;;  %v214_v7 = vcombine.high %v192_v2, %v192_v2 }
   0xe   :  { %11181 = vmatpush3.bf16.msra.mxu0 %v100_v9  ;;  %11192 = vmatprep.subr.bf16.mxu1 %v12221_v16  ;;  %v216_v5 = vcombine.high %v206_v3, %v206_v3  ;;  %v185_v6 = vcombine.high %v183_v4, %v183_v4  ;;  %v199_v9 = vrot.slane %v183_v4, %v175_v47 }
   0xf   :  { %11202 = vmatprep.subr.bf16.mxu0 %v12678_v30 }
  0x10   :  { %v213_v8 = vrot.slane %v185_v6, %v175_v47 }
  0x11   :  { %11183 = vmatmul.mubr.msk.bf16.vlgmr.msra.gmra.mrb[0].mxu0 %vm85_vm1, %v70_v11  ;;  %11193 = vmatpush3.bf16.msra.mxu1 %v12221_v16  ;;  %v215_v11 = vcombine.high %v199_v9, %v199_v9 }
  0x12   :  { %11186 = vmatprep.mubr.msk.bf16.mxu0 %vm85_vm1, %v71_v12  ;;  %11208 = vmatprep.subr.bf16.mxu1 %v12678_v30  ;;  %v217_v10 = vcombine.high %v213_v8, %v213_v8 }
  0x19   :  { %11187 = vmatmul.mubr.msk.bf16.gmra.mrb[4].mxu0 %vm85_vm1, %v72_v15 }
  0x1a   :  { %11204 = vmatprep.mubr.msk.bf16.mxu0 %vm12680_vm3, %v12678_v30 }
  0xe4   :  { %v12829_v17 = vpop.f32.mrb[0].mxu0 }
  0xe5   :  { %v12831_v18 = vpop.f32.mrb[1].mxu0 }
  0xe6   :  { %v12833_v19 = vpop.f32.mrb[2].mxu0 }
  0xe7   :  { %v291_v20 = vpack.c.bf16 %v12833_v19, %v12829_v17  ;;  %v12837_v21 = vpop.f32.mrb[3].mxu0 }
  0xe8   :  { %v290_v22 = vpack.c.bf16 %v12837_v21, %v12831_v18 }
  0xea   :  { %11194 = vmatprep.mubr.msk.bf16.mxu1 %vm317_vm2, %v290_v22 }
  0xeb   :  { %11195 = vmatmul.mubr.msk.bf16.vlgmr.msra.gmra.mrb[0].mxu1 %vm317_vm2, %v291_v20 }
  0xec   :  { %v12843_v23 = vpop.f32.mrb[4].mxu0 }
  0xed   :  { %v12845_v24 = vpop.f32.mrb[5].mxu0 }
  0xee   :  { %v12847_v25 = vpop.f32.mrb[6].mxu0 }
  0xef   :  { %v293_v26 = vpack.c.bf16 %v12847_v25, %v12843_v23  ;;  %v12851_v27 = vpop.f32.mrb[7].mxu0 }
  0xf0   :  { %v292_v28 = vpack.c.bf16 %v12851_v27, %v12845_v24 }
  0xf2   :  { %11198 = vmatprep.mubr.msk.bf16.mxu1 %vm317_vm2, %v292_v28 }
  0xf3   :  { %11199 = vmatmul.mubr.msk.bf16.gmra.mrb[4].mxu1 %vm317_vm2, %v293_v26 }
  0xf4   :  { %11210 = vmatprep.mubr.msk.bf16.mxu1 %vm12680_vm3, %v12678_v30 }
 0x1be   :  { %v11196_v35 = vpop.f32.mrb[0].mxu1 }
 0x1bf   :  { %v373_v36 = vadd.f32 %v11196_v35, %v10547_v31  ;;  %v364_v37 = vpop.f32.mrb[1].mxu1 }
 0x1c0   :  { %v365_v38 = vadd.f32 %v10547_v31, %v364_v37  ;;  %v11197_v39 = vpop.f32.mrb[2].mxu1 }
 0x1c1   :  { %v12871_v42 = vpack.c.bf16 %v373_v36, %v373_v36  ;;  %v376_v43 = vadd.f32 %v11197_v39, %v10547_v31  ;;  %v367_v44 = vpop.f32.mrb[3].mxu1 }
 0x1c2   :  { %v12873_v45 = vpack.c.bf16 %v365_v38, %v365_v38  ;;  %v368_v46 = vadd.f32 %v10547_v31, %v367_v44 }
 0x1c3   :  { %516 = vrot.lane.b32.xlu1 %v12871_v42, %s12681_s26  ;;  %v12880_v48 = vpack.c.bf16 %v376_v43, %v376_v43 }
 0x1c4   :  { %419 = vrot.lane.b32.xlu0 %v12873_v45, %s12681_s26  ;;  %v12885_v50 = vpack.c.bf16 %v368_v46, %v368_v46 }
 0x1c6   :  { %v11200_v51 = vpop.f32.mrb[4].mxu1 }
 0x1c7   :  { %564 = vrot.lane.b32.xlu1 %v12880_v48, %s12681_s26  ;;  %v380_v52 = vpop.f32.mrb[5].mxu1  ;;  %v389_v53 = vadd.f32 %v11200_v51, %v10547_v31 }
 0x1c8   :  { %v381_v54 = vadd.f32 %v10547_v31, %v380_v52  ;;  %468 = vrot.lane.b32.xlu0 %v12885_v50, %s12681_s26  ;;  %v11201_v55 = vpop.f32.mrb[6].mxu1 }
 0x1c9   :  { %v383_v57 = vpop.f32.mrb[7].mxu1  ;;  %v392_v59 = vadd.f32 %v11201_v55, %v10547_v31  ;;  %v12893_v61 = vpack.c.bf16 %v389_v53, %v389_v53 }
 0x1ca   :  { %v12891_v58 = vpack.c.bf16 %v381_v54, %v381_v54  ;;  %v384_v60 = vadd.f32 %v10547_v31, %v383_v57  ;;  %v12979_v57 = vand.u32 127, %v167_v32 }
 0x1cb   :  { %v12899_v1 = vpack.c.bf16 %v392_v59, %v392_v59 }
 0x1cc   :  { %v12895_v62 = vpack.c.bf16 %v384_v60, %v384_v60  ;;  %612 = vrot.lane.b32.xlu0 %v12891_v58, %s12681_s26 }
 0x1ce   :  { %660 = vrot.lane.b32.xlu1 %v12895_v62, %s12681_s26 }
 0x1d0   :  { %708 = vrot.lane.b32.xlu0 %v12893_v61, %s12681_s26 }
 0x1d2   :  { %756 = vrot.lane.b32.xlu1 %v12899_v1, %s12681_s26 }
 0x1d4   :  { %219 = vperm.xlu0 %12196, %v192_v2  }
 0x1d6   :  { %226 = vperm.xlu1 %12197, %v206_v3  }
 0x1d8   :  { %240 = vperm.xlu0 %12196, %v216_v5  }
 0x1da   :  { %233 = vperm.xlu1 %12197, %v214_v7  }
 0x1dc   :  { %254 = vperm.xlu0 %12196, %v213_v8  }
 0x1de   :  { %247 = vperm.xlu1 %12197, %v199_v9  }
 0x1e0   :  { %268 = vperm.xlu0 %12196, %v217_v10  }
 0x1e2   :  { %261 = vperm.xlu1 %12197, %v215_v11  }
 0x1e4   :  { %916 = vrot.lane.b32.xlu0 %v12873_v45, %s12682_s29 }
 0x1e6   :  { %965 = vrot.lane.b32.xlu1 %v12885_v50, %s12682_s29 }
 0x1e8   :  { %1061 = vrot.lane.b32.xlu0 %v12880_v48, %s12682_s29 }
 0x1ea   :  { %1013 = vrot.lane.b32.xlu1 %v12871_v42, %s12682_s29 }
 0x1ee   :  { %1109 = vrot.lane.b32.xlu1 %v12891_v58, %s12682_s29 }
 0x235   :  { %v517_v14 = vpop.permute.xlu1 %516 }
 0x236   :  { %v420_v12 = vpop.permute.xlu0 %419  ;;  %v522_v20 = vsel %vm421_vm4, %v517_v14, 0 }
 0x237   :  { %v426_v13 = vsel %vm421_vm4, %v420_v12, 0 }
 0x238   :  { %11203 = vmatpush3.bf16.xpose.msra.mxu0 %v426_v13 }
 0x239   :  { %11214 = vmatprep.subr.bf16.mxu0 %v12678_v30  ;;  %v565_v22 = vpop.permute.xlu1 %564 }
 0x23a   :  { %v469_v15 = vpop.permute.xlu0 %468  ;;  %v570_v26 = vsel %vm421_vm4, %v565_v22, 0 }
 0x23b   :  { %v474_v16 = vsel %vm421_vm4, %v469_v15, 0 }
 0x23c   :  { %11209 = vmatpush3.bf16.xpose.msra.mxu1 %v474_v16 }
 0x23d   :  { %11220 = vmatprep.subr.bf16.mxu1 %v12678_v30 }
 0x23e   :  { %v613_v28 = vpop.permute.xlu0 %612 }
 0x23f   :  { %11205 = vmatmul.mubr.msk.bf16.vlgmr.msra.gmra.mrb[8].mxu0 %vm421_vm4, %v12873_v45  ;;  %v618_v31 = vsel %vm421_vm4, %v613_v28, 0 }
 0x240   :  { %11215 = vmatpush3.bf16.xpose.msra.mxu0 %v522_v20  ;;  %11216 = vmatprep.mubr.msk.bf16.mxu0 %vm12680_vm3, %v12678_v30  ;;  %v661_v33 = vpop.permute.xlu1 %660 }
 0x241   :  { %11226 = vmatprep.subr.bf16.mxu0 %v12678_v30  ;;  %v666_v34 = vsel %vm421_vm4, %v661_v33, 0 }
 0x242   :  { %v709_v35 = vpop.permute.xlu0 %708 }
 0x243   :  { %11211 = vmatmul.mubr.msk.bf16.vlgmr.msra.gmra.mrb[8].mxu1 %vm421_vm4, %v12885_v50  ;;  %v714_v36 = vsel %vm421_vm4, %v709_v35, 0 }
 0x244   :  { %11221 = vmatpush3.bf16.xpose.msra.mxu1 %v570_v26  ;;  %11222 = vmatprep.mubr.msk.bf16.mxu1 %vm12680_vm3, %v12678_v30  ;;  %v757_v37 = vpop.permute.xlu1 %756 }
 0x245   :  { %11232 = vmatprep.subr.bf16.mxu1 %v12678_v30  ;;  %v762_v38 = vsel %vm421_vm4, %v757_v37, 0 }
 0x247   :  { %11217 = vmatmul.mubr.msk.bf16.vlgmr.msra.gmra.mrb[12].mxu0 %vm421_vm4, %v12871_v42 }
 0x248   :  { %11227 = vmatpush3.bf16.xpose.msra.mxu0 %v618_v31  ;;  %11228 = vmatprep.mubr.msk.bf16.mxu0 %vm12680_vm3, %v12678_v30 }
 0x249   :  { %11238 = vmatprep.subr.bf16.mxu0 %v12678_v30 }
 0x24b   :  { %11223 = vmatmul.mubr.msk.bf16.vlgmr.msra.gmra.mrb[12].mxu1 %vm421_vm4, %v12880_v48 }
 0x24c   :  { %11233 = vmatpush3.bf16.xpose.msra.mxu1 %v666_v34  ;;  %11234 = vmatprep.mubr.msk.bf16.mxu1 %vm12680_vm3, %v12678_v30 }
 0x24d   :  { %11244 = vmatprep.subr.bf16.mxu1 %v12678_v30 }
 0x24f   :  { %11229 = vmatmul.mubr.msk.bf16.vlgmr.msra.gmra.mrb[16].mxu0 %vm421_vm4, %v12891_v58 }
 0x250   :  { %11239 = vmatpush3.bf16.xpose.msra.mxu0 %v714_v36  ;;  %11240 = vmatprep.mubr.msk.bf16.mxu0 %vm12680_vm3, %v12678_v30 }
 0x251   :  { %11250 = vmatprep.subr.bf16.mxu0 %v12678_v30 }
 0x253   :  { %11235 = vmatmul.mubr.msk.bf16.vlgmr.msra.gmra.mrb[16].mxu1 %vm421_vm4, %v12895_v62  ;;  %v220_v39 = vpop.permute.xlu0 %219 }
 0x254   :  { %11245 = vmatpush3.bf16.xpose.msra.mxu1 %v762_v38  ;;  %11246 = vmatprep.mubr.msk.bf16.mxu1 %vm12680_vm3, %v12678_v30  ;;  %v224_v59 = vrot.slane %v220_v39, %v12976_v56 }
 0x255   :  { %v227_v40 = vpop.permute.xlu1 %226  ;;  %11256 = vmatprep.subr.bf16.mxu1 %v12678_v30 }
 0x256   :  { %vm274_vm6 = vcmp.lt.s32.totalorder %v12979_v57, %v224_v59  ;;  %v231_v60 = vrot.slane %v227_v40, %v12976_v56 }
 0x257   :  { %11241 = vmatmul.mubr.msk.bf16.vlgmr.msra.gmra.mrb[20].mxu0 %vm421_vm4, %v12893_v61  ;;  %v241_v43 = vpop.permute.xlu0 %240  ;;  %v12985_v0 = vsel %vm274_vm6, 0.0, %v12683_v63 }
 0x258   :  { %11252 = vmatprep.mubr.msk.bf16.mxu0 %vm12680_vm3, %v12678_v30  ;;  %vm275_vm7 = vcmp.lt.s32.totalorder %v12979_v57, %v231_v60  ;;  %v245_v10 = vrot.slane %v241_v43, %v12976_v56 }
 0x259   :  { %v234_v44 = vpop.permute.xlu1 %233  ;;  %v12993_v8 = vsel %vm275_vm7, 0.0, %v12683_v63 }
 0x25a   :  { %v238_v3 = vrot.slane %v234_v44, %v12976_v56  ;;  %vm277_vm9 = vcmp.lt.s32.totalorder %v12979_v57, %v245_v10 }
 0x25b   :  { %11247 = vmatmul.mubr.msk.bf16.vlgmr.msra.gmra.mrb[20].mxu1 %vm421_vm4, %v12899_v1  ;;  %v12963_v46 = vpop.permute.xlu0 %254  ;;  %v13013_v37 = vsel %vm277_vm9, 0.0, %v12683_v63 }
 0x25c   :  { %11258 = vmatprep.mubr.msk.bf16.mxu1 %vm12680_vm3, %v12678_v30  ;;  %vm276_vm8 = vcmp.lt.s32.totalorder %v12979_v57, %v238_v3 }
 0x25d   :  { %v248_v47 = vpop.permute.xlu1 %247  ;;  %v13003_v20 = vsel %vm276_vm8, 0.0, %v12683_v63 }
 0x25e   :  { %v252_v34 = vrot.slane %v248_v47, %v12976_v56 }
 0x25f   :  { %v12967_v49 = vpop.permute.xlu0 %268 }
 0x260   :  { %vm278_vm10 = vcmp.lt.s32.totalorder %v12979_v57, %v252_v34 }
 0x261   :  { %v12969_v51 = vpop.permute.xlu1 %261 }
 0x263   :  { %v917_v52 = vpop.permute.xlu0 %916 }
 0x264   :  { %v923_v53 = vsel %vm921_vm5, %v917_v52, 0  ;;  %v259_v52 = vrot.slane %v12963_v46, %v12976_v56  ;;  %v266_v46 = vrot.slane %v12969_v51, %v12976_v56 }
 0x265   :  { %v966_v54 = vpop.permute.xlu1 %965  ;;  %11251 = vmatpush3.bf16.msra.mxu0 %v923_v53 }
 0x266   :  { %v971_v55 = vsel %vm921_vm5, %v966_v54, 0  ;;  %11262 = vmatprep.subr.bf16.mxu0 %v12678_v30  ;;  %vm279_vm11 = vcmp.lt.s32.totalorder %v12979_v57, %v259_v52  ;;  %vm280_vm12 = vcmp.lt.s32.totalorder %v12979_v57, %v266_v46 }
 0x267   :  { %11257 = vmatpush3.bf16.msra.mxu1 %v971_v55 }
 0x268   :  { %11268 = vmatprep.subr.bf16.mxu1 %v12678_v30 }
 0x312   :  { %v462_v2 = vpop.f32.mrb[8].mxu0 }
 0x313   :  { %v804_v4 = vmul.f32 0.35355338, %v462_v2  ;;  %v11206_v5 = vpop.f32.mrb[9].mxu0  ;;  %v13026_v2 = vsel %vm278_vm10, 0.0, %v12683_v63 }
 0x314   :  { %v465_v6 = vpop.f32.mrb[10].mxu0 }
 0x315   :  { %v11207_v32 = vpop.f32.mrb[11].mxu0  ;;  %v12990_v7 = vadd.f32 %v804_v4, %v12985_v0 }
 0x316   :  { %v510_v9 = vpop.f32.mrb[8].mxu1 }
 0x317   :  { %v805_v11 = vmul.f32 0.35355338, %v510_v9  ;;  %v11212_v12 = vpop.f32.mrb[9].mxu1  ;;  %v820_v13 = vsel %vm421_vm4, %v12990_v7, -inf }
 0x318   :  { %v513_v14 = vpop.f32.mrb[10].mxu1  ;;  %821 = vmax.xlane.f32.xlu1 %v820_v13  ;;  %v273_v13 = vrot.slane %v12967_v49, %v12976_v56 }
 0x319   :  { %v11213_v15 = vpop.f32.mrb[11].mxu1  ;;  %v13000_v16 = vadd.f32 %v805_v11, %v12993_v8  ;;  %v13034_v11 = vsel %vm279_vm11, 0.0, %v12683_v63 }
 0x31a   :  { %v558_v22 = vpop.f32.mrb[12].mxu0  ;;  %vm281_vm13 = vcmp.lt.s32.totalorder %v12979_v57, %v273_v13 }
 0x31b   :  { %v806_v26 = vmul.f32 0.35355338, %v558_v22  ;;  %v11218_v28 = vpop.f32.mrb[13].mxu0  ;;  %v823_v31 = vsel %vm421_vm4, %v13000_v16, -inf }
 0x31c   :  { %v561_v33 = vpop.f32.mrb[14].mxu0  ;;  %824 = vmax.xlane.f32.xlu0 %v823_v31  ;;  %v13042_v31 = vsel %vm280_vm12, 0.0, %v12683_v63 }
 0x31d   :  { %v11219_v35 = vpop.f32.mrb[15].mxu0  ;;  %v13010_v36 = vadd.f32 %v806_v26, %v13003_v20 }
 0x31e   :  { %v606_v38 = vpop.f32.mrb[12].mxu1 }
 0x31f   :  { %v807_v39 = vmul.f32 0.35355338, %v606_v38  ;;  %v11224_v40 = vpop.f32.mrb[13].mxu1  ;;  %v826_v43 = vsel %vm421_vm4, %v13010_v36, -inf }
 0x320   :  { %v609_v44 = vpop.f32.mrb[14].mxu1  ;;  %827 = vmax.xlane.f32.xlu0 %v826_v43  ;;  %v13051_v43 = vsel %vm281_vm13, 0.0, %v12683_v63  ;;  %v13063_v63 = vpop.permute.xlu0 %1061 }
 0x321   :  { %v11225_v47 = vpop.f32.mrb[15].mxu1  ;;  %v13021_v53 = vadd.f32 %v807_v39, %v13013_v37 }
 0x322   :  { %v654_v54 = vpop.f32.mrb[16].mxu0 }
 0x323   :  { %v808_v55 = vmul.f32 0.35355338, %v654_v54  ;;  %v11230_v59 = vpop.f32.mrb[17].mxu0  ;;  %v829_v60 = vsel %vm421_vm4, %v13021_v53, -inf  ;;  %v13059_v54 = vpop.permute.xlu1 %1013 }
 0x324   :  { %v657_v3 = vpop.f32.mrb[18].mxu0  ;;  %830 = vmax.xlane.f32.xlu1 %v829_v60 }
 0x325   :  { %v11231_v4 = vpop.f32.mrb[19].mxu0  ;;  %v816_v5 = vadd.f32 %v808_v55, %v13026_v2 }
 0x326   :  { %v702_v6 = vpop.f32.mrb[16].mxu1 }
 0x327   :  { %v809_v32 = vmul.f32 0.35355338, %v702_v6  ;;  %v11236_v9 = vpop.f32.mrb[17].mxu1  ;;  %v832_v10 = vsel %vm421_vm4, %v816_v5, -inf  ;;  %v13061_v55 = vpop.permute.xlu1 %1109 }
 0x328   :  { %v705_v12 = vpop.f32.mrb[18].mxu1  ;;  %833 = vmax.xlane.f32.xlu0 %v832_v10 }
 0x329   :  { %v11237_v14 = vpop.f32.mrb[19].mxu1  ;;  %v817_v51 = vadd.f32 %v809_v32, %v13034_v11 }
 0x32a   :  { %v750_v15 = vpop.f32.mrb[20].mxu0 }
 0x32b   :  { %v810_v22 = vmul.f32 0.35355338, %v750_v15  ;;  %v11242_v26 = vpop.f32.mrb[21].mxu0  ;;  %v835_v28 = vsel %vm421_vm4, %v817_v51, -inf }
 0x32c   :  { %v753_v33 = vpop.f32.mrb[22].mxu0  ;;  %836 = vmax.xlane.f32.xlu1 %v835_v28 }
 0x32d   :  { %v11243_v34 = vpop.f32.mrb[23].mxu0  ;;  %v13046_v49 = vadd.f32 %v810_v22, %v13042_v31 }
 0x32e   :  { %v798_v35 = vpop.f32.mrb[20].mxu1 }
 0x32f   :  { %v811_v38 = vmul.f32 0.35355338, %v798_v35  ;;  %v11248_v39 = vpop.f32.mrb[21].mxu1  ;;  %v838_v40 = vsel %vm421_vm4, %v13046_v49, -inf }
 0x330   :  { %v801_v44 = vpop.f32.mrb[22].mxu1  ;;  %839 = vmax.xlane.f32.xlu0 %v838_v40 }
 0x331   :  { %v11249_v52 = vpop.f32.mrb[23].mxu1  ;;  %v819_v47 = vadd.f32 %v811_v38, %v13051_v43 }
 0x333   :  { %v841_v57 = vsel %vm421_vm4, %v819_v47, -inf }
 0x334   :  { %842 = vmax.xlane.f32.xlu1 %v841_v57 }
 0x345   :  { %1205 = vrot.lane.b32.xlu1 %v12893_v61, %s12682_s29 }
 0x346   :  { %1157 = vrot.lane.b32.xlu0 %v12895_v62, %s12682_s29 }
 0x3a5   :  { %v822_v59 = vpop.xlane.xlu1 %821 }
 0x3a6   :  { %v844_v60 = vsub.f32 %v12990_v7, %v822_v59 }
 0x3a8   :  { %v852_v3 = vmul.f32 1.442695, %v844_v60 }
 0x3a9   :  { %v825_v46 = vpop.xlane.xlu0 %824 }
 0x3aa   :  { %12253 = vpow2.f32 %v852_v3  ;;  %v845_v4 = vsub.f32 %v13000_v16, %v825_v46 }
 0x3ac   :  { %v854_v6 = vmul.f32 1.442695, %v845_v4 }
 0x3ad   :  { %v828_v32 = vpop.xlane.xlu0 %827 }
 0x3ae   :  { %12255 = vpow2.f32 %v854_v6  ;;  %v846_v9 = vsub.f32 %v13010_v36, %v828_v32 }
 0x3b0   :  { %v856_v10 = vmul.f32 1.442695, %v846_v9 }
 0x3b1   :  { %v831_v12 = vpop.xlane.xlu1 %830 }
 0x3b2   :  { %12257 = vpow2.f32 %v856_v10  ;;  %v847_v13 = vsub.f32 %v13021_v53, %v831_v12 }
 0x3b4   :  { %v13069_v14 = vpop.eup %12253  ;;  %v858_v15 = vmul.f32 1.442695, %v847_v13 }
 0x3b5   :  { %v834_v22 = vpop.xlane.xlu0 %833  ;;  %v868_v7 = vsel %vm421_vm4, %v13069_v14, 0.0 }
 0x3b6   :  { %12259 = vpow2.f32 %v858_v15  ;;  %v848_v26 = vsub.f32 %v816_v5, %v834_v22  ;;  %869 = vadd.xlane.f32.xlu0 %v868_v7 }
 0x3b8   :  { %v13073_v16 = vpop.eup %12255  ;;  %v860_v28 = vmul.f32 1.442695, %v848_v26 }
 0x3b9   :  { %v837_v33 = vpop.xlane.xlu1 %836  ;;  %v871_v36 = vsel %vm421_vm4, %v13073_v16, 0.0 }
 0x3ba   :  { %12261 = vpow2.f32 %v860_v28  ;;  %v849_v34 = vsub.f32 %v817_v51, %v837_v33  ;;  %872 = vadd.xlane.f32.xlu1 %v871_v36  ;;  %v1019_v36 = vsel %vm921_vm5, %v13059_v54, 0 }
 0x3bc   :  { %v13077_v53 = vpop.eup %12257  ;;  %v862_v35 = vmul.f32 1.442695, %v849_v34 }
 0x3bd   :  { %v874_v38 = vsel %vm421_vm4, %v13077_v53, 0.0  ;;  %v840_v57 = vpop.xlane.xlu0 %839 }
 0x3be   :  { %12263 = vpow2.f32 %v862_v35  ;;  %875 = vadd.xlane.f32.xlu0 %v874_v38  ;;  %v850_v59 = vsub.f32 %v13046_v49, %v840_v57  ;;  %v1115_v57 = vsel %vm921_vm5, %v13061_v55, 0 }
 0x3c0   :  { %v13081_v5 = vpop.eup %12259  ;;  %v864_v3 = vmul.f32 1.442695, %v850_v59 }
 0x3c1   :  { %v877_v39 = vsel %vm421_vm4, %v13081_v5, 0.0  ;;  %v843_v60 = vpop.xlane.xlu1 %842  ;;  %v1158_v49 = vpop.permute.xlu0 %1157 }
 0x3c2   :  { %878 = vadd.xlane.f32.xlu1 %v877_v39  ;;  %v851_v46 = vsub.f32 %v819_v47, %v843_v60  ;;  %12265 = vpow2.f32 %v864_v3  ;;  %v1067_v39 = vsel %vm921_vm5, %v13063_v63, 0  ;;  %v1163_v60 = vsel %vm921_vm5, %v1158_v49, 0 }
 0x3c4   :  { %v13085_v40 = vpop.eup %12261  ;;  %v866_v4 = vmul.f32 1.442695, %v851_v46 }
 0x3c5   :  { %v880_v51 = vsel %vm421_vm4, %v13085_v40, 0.0  ;;  %v1206_v47 = vpop.permute.xlu1 %1205 }
 0x3c6   :  { %881 = vadd.xlane.f32.xlu0 %v880_v51  ;;  %12267 = vpow2.f32 %v866_v4  ;;  %v1211_v46 = vsel %vm921_vm5, %v1206_v47, 0 }
 0x3c8   :  { %v13089_v44 = vpop.eup %12263 }
 0x3c9   :  { %v883_v52 = vsel %vm421_vm4, %v13089_v44, 0.0 }
 0x3ca   :  { %884 = vadd.xlane.f32.xlu1 %v883_v52 }
 0x3cc   :  { %v13098_v6 = vpop.eup %12265 }
 0x3cd   :  { %v886_v32 = vsel %vm421_vm4, %v13098_v6, 0.0 }
 0x3d0   :  { %v13102_v9 = vpop.eup %12267 }
 0x3d1   :  { %v889_v10 = vsel %vm421_vm4, %v13102_v9, 0.0 }
 0x3db   :  { %1308 = vrot.lane.b32.xlu1 %v12873_v45, %s12684_s30 }
 0x3dc   :  { %1253 = vrot.lane.b32.xlu0 %v12899_v1, %s12682_s29 }
 0x3fb   :  { %887 = vadd.xlane.f32.xlu0 %v886_v32 }
 0x3ff   :  { %890 = vadd.xlane.f32.xlu1 %v889_v10 }
 0x410   :  { %1306 = vrot.lane.b32.xlu1 %v12873_v45, %s12685_s3 }
 0x411   :  { %1358 = vrot.lane.b32.xlu0 %v12885_v50, %s12684_s30 }
 0x414   :  { %1408 = vrot.lane.b32.xlu1 %v12871_v42, %s12684_s30 }
 0x415   :  { %1356 = vrot.lane.b32.xlu0 %v12885_v50, %s12685_s3 }
 0x418   :  { %1406 = vrot.lane.b32.xlu1 %v12871_v42, %s12685_s3 }
 0x419   :  { %1458 = vrot.lane.b32.xlu0 %v12880_v48, %s12684_s30 }
 0x41c   :  { %1508 = vrot.lane.b32.xlu1 %v12891_v58, %s12684_s30 }
 0x41d   :  { %1456 = vrot.lane.b32.xlu0 %v12880_v48, %s12685_s3 }
 0x420   :  { %1506 = vrot.lane.b32.xlu1 %v12891_v58, %s12685_s3 }
 0x421   :  { %1558 = vrot.lane.b32.xlu0 %v12895_v62, %s12684_s30 }
 0x424   :  { %1608 = vrot.lane.b32.xlu1 %v12893_v61, %s12684_s30 }
 0x425   :  { %1556 = vrot.lane.b32.xlu0 %v12895_v62, %s12685_s3 }
 0x428   :  { %1606 = vrot.lane.b32.xlu1 %v12893_v61, %s12685_s3 }
 0x429   :  { %1658 = vrot.lane.b32.xlu0 %v12899_v1, %s12684_s30 }
 0x42c   :  { %1866 = vrot.lane.b32.xlu1 %v12885_v50, %s12686_s0 }
 0x42d   :  { %1656 = vrot.lane.b32.xlu0 %v12899_v1, %s12685_s3 }
 0x431   :  { %1818 = vrot.lane.b32.xlu0 %v12873_v45, %s12686_s0 }
 0x443   :  { %v870_v12 = vpop.xlane.xlu0 %869 }
 0x444   :  { %12269 = vrcp.f32 %v870_v12 }
 0x447   :  { %v873_v13 = vpop.xlane.xlu1 %872 }
 0x448   :  { %12271 = vrcp.f32 %v873_v13 }
 0x44b   :  { %v876_v15 = vpop.xlane.xlu0 %875 }
 0x44c   :  { %12273 = vrcp.f32 %v876_v15 }
 0x44e   :  { %v12270_v22 = vpop.eup %12269 }
 0x44f   :  { %v879_v7 = vpop.xlane.xlu1 %878  ;;  %v900_v26 = vmul.f32 %v12270_v22, %v13069_v14 }
 0x450   :  { %12275 = vrcp.f32 %v879_v7 }
 0x451   :  { %v908_v28 = vpack.c.bf16 %v900_v26, %v900_v26 }
 0x452   :  { %v12272_v33 = vpop.eup %12271 }
 0x453   :  { %11253 = vmatmul.mubr.msk.bf16.vlgmr.msra.gmra.mrb[24].mxu0 %vm421_vm4, %v908_v28  ;;  %v882_v34 = vpop.xlane.xlu0 %881  ;;  %v901_v35 = vmul.f32 %v12272_v33, %v13073_v16 }
 0x454   :  { %11263 = vmatpush3.bf16.msra.mxu0 %v1019_v36  ;;  %12277 = vrcp.f32 %v882_v34  ;;  %11264 = vmatprep.mubr.msk.bf16.mxu0 %vm12680_vm3, %v12678_v30 }
 0x455   :  { %v909_v38 = vpack.c.bf16 %v901_v35, %v901_v35  ;;  %11274 = vmatprep.subr.bf16.mxu0 %v12678_v30 }
 0x456   :  { %v12274_v14 = vpop.eup %12273 }
 0x457   :  { %11259 = vmatmul.mubr.msk.bf16.vlgmr.msra.gmra.mrb[24].mxu1 %vm421_vm4, %v909_v38  ;;  %v885_v54 = vpop.xlane.xlu1 %884  ;;  %v902_v51 = vmul.f32 %v12274_v14, %v13077_v53  ;;  %v1254_v32 = vpop.permute.xlu0 %1253 }
 0x458   :  { %11269 = vmatpush3.bf16.msra.mxu1 %v1067_v39  ;;  %12279 = vrcp.f32 %v885_v54  ;;  %11270 = vmatprep.mubr.msk.bf16.mxu1 %vm12680_vm3, %v12678_v30  ;;  %v1259_v10 = vsel %vm921_vm5, %v1254_v32, 0 }
 0x459   :  { %v910_v16 = vpack.c.bf16 %v902_v51, %v902_v51  ;;  %11280 = vmatprep.subr.bf16.mxu1 %v12678_v30 }
 0x45a   :  { %v12276_v52 = vpop.eup %12275 }
 0x45b   :  { %11265 = vmatmul.mubr.msk.bf16.vlgmr.msra.gmra.mrb[28].mxu0 %vm421_vm4, %v910_v16  ;;  %v903_v63 = vmul.f32 %v12276_v52, %v13081_v5  ;;  %v1309_v49 = vpop.permute.xlu1 %1308 }
 0x45c   :  { %11275 = vmatpush3.bf16.msra.mxu0 %v1115_v57  ;;  %11276 = vmatprep.mubr.msk.bf16.mxu0 %vm12680_vm3, %v12678_v30  ;;  %v1314_v34 = vsel %vm421_vm4, %v1309_v49, 0 }
 0x45d   :  { %v911_v53 = vpack.c.bf16 %v903_v63, %v903_v63  ;;  %11286 = vmatprep.subr.bf16.mxu0 %v12678_v30 }
 0x45e   :  { %v12278_v59 = vpop.eup %12277 }
 0x45f   :  { %11271 = vmatmul.mubr.msk.bf16.vlgmr.msra.gmra.mrb[28].mxu1 %vm421_vm4, %v911_v53  ;;  %v904_v3 = vmul.f32 %v12278_v59, %v13085_v40 }
 0x460   :  { %11281 = vmatpush3.bf16.msra.mxu1 %v1163_v60  ;;  %11282 = vmatprep.mubr.msk.bf16.mxu1 %vm12680_vm3, %v12678_v30 }
 0x461   :  { %v912_v55 = vpack.c.bf16 %v904_v3, %v904_v3  ;;  %11292 = vmatprep.subr.bf16.mxu1 %v12678_v30 }
 0x462   :  { %v12280_v5 = vpop.eup %12279 }
 0x463   :  { %11277 = vmatmul.mubr.msk.bf16.vlgmr.msra.gmra.mrb[32].mxu0 %vm421_vm4, %v912_v55  ;;  %v905_v4 = vmul.f32 %v12280_v5, %v13089_v44 }
 0x464   :  { %11287 = vmatpush3.bf16.msra.mxu0 %v1211_v46  ;;  %11288 = vmatprep.mubr.msk.bf16.mxu0 %vm12680_vm3, %v12678_v30 }
 0x465   :  { %v913_v40 = vpack.c.bf16 %v905_v4, %v905_v4  ;;  %11298 = vmatprep.subr.bf16.mxu0 %v12678_v30 }
 0x467   :  { %11283 = vmatmul.mubr.msk.bf16.vlgmr.msra.gmra.mrb[32].mxu1 %vm421_vm4, %v913_v40 }
 0x468   :  { %11293 = vmatpush3.bf16.msra.mxu1 %v1259_v10  ;;  %11294 = vmatprep.mubr.msk.bf16.mxu1 %vm12680_vm3, %v12678_v30 }
 0x469   :  { %11304 = vmatprep.subr.bf16.mxu1 %v12678_v30 }
 0x488   :  { %v888_v44 = vpop.xlane.xlu0 %887 }
 0x489   :  { %12281 = vrcp.f32 %v888_v44 }
 0x48c   :  { %v891_v47 = vpop.xlane.xlu1 %890  ;;  %v1359_v12 = vpop.permute.xlu0 %1358 }
 0x48d   :  { %12283 = vrcp.f32 %v891_v47 }
 0x490   :  { %v1307_v13 = vpop.permute.xlu1 %1306  ;;  %v1357_v15 = vpop.permute.xlu0 %1356 }
 0x493   :  { %v12282_v22 = vpop.eup %12281 }
 0x494   :  { %v1459_v7 = vpop.permute.xlu0 %1458  ;;  %v906_v26 = vmul.f32 %v12282_v22, %v13098_v6  ;;  %v1409_v28 = vpop.permute.xlu1 %1408  ;;  %v1364_v6 = vsel %vm421_vm4, %v1359_v12, 0 }
 0x495   :  { %v1464_v52 = vsel %vm421_vm4, %v1459_v7, 0 }
 0x496   :  { %v914_v33 = vpack.c.bf16 %v906_v26, %v906_v26 }
 0x497   :  { %v12284_v36 = vpop.eup %12283 }
 0x498   :  { %11289 = vmatmul.mubr.msk.bf16.vlgmr.msra.gmra.mrb[36].mxu0 %vm421_vm4, %v914_v33  ;;  %v1457_v35 = vpop.permute.xlu0 %1456  ;;  %v907_v38 = vmul.f32 %v12284_v36, %v13102_v9  ;;  %v1407_v39 = vpop.permute.xlu1 %1406  ;;  %v1414_v9 = vsel %vm421_vm4, %v1409_v28, 0 }
 0x499   :  { %11299 = vmatpush3.bf16.xpose.msra.mxu0 %v1314_v34  ;;  %11300 = vmatprep.mubr.msk.bf16.mxu0 %vm12680_vm3, %v12678_v30 }
 0x49a   :  { %v915_v14 = vpack.c.bf16 %v907_v38, %v907_v38  ;;  %11310 = vmatprep.subr.bf16.mxu0 %v12678_v30 }
 0x49c   :  { %11295 = vmatmul.mubr.msk.bf16.vlgmr.msra.gmra.mrb[36].mxu1 %vm421_vm4, %v915_v14  ;;  %v1559_v54 = vpop.permute.xlu0 %1558  ;;  %v1509_v51 = vpop.permute.xlu1 %1508 }
 0x49d   :  { %11305 = vmatpush3.bf16.xpose.msra.mxu1 %v1364_v6  ;;  %11306 = vmatprep.mubr.msk.bf16.mxu1 %vm12680_vm3, %v12678_v30  ;;  %v1514_v63 = vsel %vm421_vm4, %v1509_v51, 0  ;;  %v1564_v59 = vsel %vm421_vm4, %v1559_v54, 0 }
 0x49e   :  { %11316 = vmatprep.subr.bf16.mxu1 %v12678_v30 }
 0x4a0   :  { %11301 = vmatmul.mubr.msk.bf16.vlgmr.msra.gmra.mrb[40].mxu0 %vm421_vm4, %v1307_v13  ;;  %v1557_v16 = vpop.permute.xlu0 %1556  ;;  %v1507_v57 = vpop.permute.xlu1 %1506 }
 0x4a1   :  { %11311 = vmatpush3.bf16.xpose.msra.mxu0 %v1414_v9  ;;  %11312 = vmatprep.mubr.msk.bf16.mxu0 %vm12680_vm3, %v12678_v30 }
 0x4a2   :  { %11322 = vmatprep.subr.bf16.mxu0 %v12678_v30 }
 0x4a4   :  { %11307 = vmatmul.mubr.msk.bf16.vlgmr.msra.gmra.mrb[40].mxu1 %vm421_vm4, %v1357_v15  ;;  %v1659_v53 = vpop.permute.xlu0 %1658  ;;  %v1609_v60 = vpop.permute.xlu1 %1608 }
 0x4a5   :  { %11317 = vmatpush3.bf16.xpose.msra.mxu1 %v1464_v52  ;;  %11318 = vmatprep.mubr.msk.bf16.mxu1 %vm12680_vm3, %v12678_v30  ;;  %v1614_v55 = vsel %vm421_vm4, %v1609_v60, 0  ;;  %v1664_v46 = vsel %vm421_vm4, %v1659_v53, 0 }
 0x4a6   :  { %11328 = vmatprep.subr.bf16.mxu1 %v12678_v30 }
 0x4a8   :  { %11313 = vmatmul.mubr.msk.bf16.vlgmr.msra.gmra.mrb[44].mxu0 %vm421_vm4, %v1407_v39  ;;  %v1657_v3 = vpop.permute.xlu0 %1656  ;;  %v1607_v5 = vpop.permute.xlu1 %1606 }
 0x4a9   :  { %11323 = vmatpush3.bf16.xpose.msra.mxu0 %v1514_v63  ;;  %11324 = vmatprep.mubr.msk.bf16.mxu0 %vm12680_vm3, %v12678_v30 }
 0x4aa   :  { %11334 = vmatprep.subr.bf16.mxu0 %v12678_v30 }
 0x4ac   :  { %11319 = vmatmul.mubr.msk.bf16.vlgmr.msra.gmra.mrb[44].mxu1 %vm421_vm4, %v1457_v35  ;;  %v1819_v4 = vpop.permute.xlu0 %1818  ;;  %v1867_v40 = vpop.permute.xlu1 %1866 }
 0x4ad   :  { %11329 = vmatpush3.bf16.xpose.msra.mxu1 %v1564_v59  ;;  %11330 = vmatprep.mubr.msk.bf16.mxu1 %vm12680_vm3, %v12678_v30  ;;  %v1824_v32 = vsel %vm921_vm5, %v1819_v4, 0  ;;  %v1872_v10 = vsel %vm921_vm5, %v1867_v40, 0 }
 0x4ae   :  { %11340 = vmatprep.subr.bf16.mxu1 %v12678_v30 }
 0x4b0   :  { %11325 = vmatmul.mubr.msk.bf16.vlgmr.msra.gmra.mrb[48].mxu0 %vm421_vm4, %v1507_v57 }
 0x4b1   :  { %11335 = vmatpush3.bf16.xpose.msra.mxu0 %v1614_v55  ;;  %11336 = vmatprep.mubr.msk.bf16.mxu0 %vm12680_vm3, %v12678_v30 }
 0x4b2   :  { %11346 = vmatprep.subr.bf16.mxu0 %v12678_v30 }
 0x4b4   :  { %11331 = vmatmul.mubr.msk.bf16.vlgmr.msra.gmra.mrb[48].mxu1 %vm421_vm4, %v1557_v16 }
 0x4b5   :  { %11341 = vmatpush3.bf16.xpose.msra.mxu1 %v1664_v46  ;;  %11342 = vmatprep.mubr.msk.bf16.mxu1 %vm12680_vm3, %v12678_v30 }
 0x4b6   :  { %11352 = vmatprep.subr.bf16.mxu1 %v12678_v30 }
 0x4b8   :  { %11337 = vmatmul.mubr.msk.bf16.vlgmr.msra.gmra.mrb[52].mxu0 %vm421_vm4, %v1607_v5 }
 0x4b9   :  { %11347 = vmatpush3.bf16.msra.mxu0 %v1824_v32  ;;  %11348 = vmatprep.mubr.msk.bf16.mxu0 %vm12680_vm3, %v12678_v30 }
 0x4ba   :  { %11358 = vmatprep.subr.bf16.mxu0 %v12678_v30 }
 0x4bc   :  { %11343 = vmatmul.mubr.msk.bf16.vlgmr.msra.gmra.mrb[52].mxu1 %vm421_vm4, %v1657_v3 }
 0x4bd   :  { %11353 = vmatpush3.bf16.msra.mxu1 %v1872_v10  ;;  %11354 = vmatprep.mubr.msk.bf16.mxu1 %vm12680_vm3, %v12678_v30 }
 0x4be   :  { %11364 = vmatprep.subr.bf16.mxu1 %v12678_v30 }
 0x526   :  { %v13231_v49 = vpop.f32.mrb[24].mxu0 }
 0x527   :  { %v11254_v44 = vpop.f32.mrb[25].mxu0 }
 0x528   :  { %v962_v47 = vpop.f32.mrb[26].mxu0 }
 0x529   :  { %v11255_v12 = vpop.f32.mrb[27].mxu0 }
 0x52a   :  { %v13233_v13 = vpop.f32.mrb[24].mxu1 }
 0x52b   :  { %v1301_v15 = vpack.c.bf16 %v13233_v13, %v13231_v49  ;;  %v11260_v22 = vpop.f32.mrb[25].mxu1 }
 0x52c   :  { %v1010_v7 = vpop.f32.mrb[26].mxu1 }
 0x52d   :  { %v11261_v26 = vpop.f32.mrb[27].mxu1 }
 0x52e   :  { %v13237_v28 = vpop.f32.mrb[28].mxu0 }
 0x52f   :  { %v11266_v33 = vpop.f32.mrb[29].mxu0 }
 0x530   :  { %v1058_v36 = vpop.f32.mrb[30].mxu0 }
 0x531   :  { %v11267_v34 = vpop.f32.mrb[31].mxu0 }
 0x532   :  { %v13239_v35 = vpop.f32.mrb[28].mxu1 }
 0x533   :  { %v1302_v38 = vpack.c.bf16 %v13239_v35, %v13237_v28  ;;  %v11272_v14 = vpop.f32.mrb[29].mxu1 }
 0x534   :  { %v1106_v39 = vpop.f32.mrb[30].mxu1 }
 0x535   :  { %v11273_v6 = vpop.f32.mrb[31].mxu1 }
 0x536   :  { %v13243_v54 = vpop.f32.mrb[32].mxu0 }
 0x537   :  { %v11278_v9 = vpop.f32.mrb[33].mxu0 }
 0x538   :  { %v1154_v51 = vpop.f32.mrb[34].mxu0 }
 0x539   :  { %v11279_v16 = vpop.f32.mrb[35].mxu0 }
 0x53a   :  { %v13245_v52 = vpop.f32.mrb[32].mxu1 }
 0x53b   :  { %v1303_v57 = vpack.c.bf16 %v13245_v52, %v13243_v54  ;;  %v11284_v63 = vpop.f32.mrb[33].mxu1 }
 0x53c   :  { %v1202_v53 = vpop.f32.mrb[34].mxu1 }
 0x53d   :  { %v11285_v59 = vpop.f32.mrb[35].mxu1 }
 0x56b   :  { %v13249_v60 = vpop.f32.mrb[36].mxu0 }
 0x56c   :  { %v11290_v3 = vpop.f32.mrb[37].mxu0 }
 0x56d   :  { %v1250_v55 = vpop.f32.mrb[38].mxu0 }
 0x56e   :  { %v11291_v5 = vpop.f32.mrb[39].mxu0 }
 0x56f   :  { %v13251_v46 = vpop.f32.mrb[36].mxu1 }
 0x570   :  { %v1304_v4 = vpack.c.bf16 %v13251_v46, %v13249_v60  ;;  %v11296_v32 = vpop.f32.mrb[37].mxu1 }
 0x571   :  { %v1298_v40 = vpop.f32.mrb[38].mxu1 }
 0x572   :  { %v11297_v10 = vpop.f32.mrb[39].mxu1 }
 0x573   :  { %v1350_v44 = vpop.f32.mrb[40].mxu0 }
 0x574   :  { %v1706_v47 = vmul.f32 0.35355338, %v1350_v44  ;;  %v11302_v12 = vpop.f32.mrb[41].mxu0 }
 0x575   :  { %v1353_v22 = vpop.f32.mrb[42].mxu0 }
 0x576   :  { %v11303_v7 = vpop.f32.mrb[43].mxu0  ;;  %v13256_v26 = vadd.f32 %v1706_v47, %v12985_v0 }
 0x577   :  { %v1400_v33 = vpop.f32.mrb[40].mxu1 }
 0x578   :  { %v1707_v36 = vmul.f32 0.35355338, %v1400_v33  ;;  %v11308_v34 = vpop.f32.mrb[41].mxu1  ;;  %v1722_v14 = vsel %vm421_vm4, %v13256_v26, -inf }
 0x579   :  { %1723 = vmax.xlane.f32.xlu1 %v1722_v14  ;;  %v1403_v39 = vpop.f32.mrb[42].mxu1 }
 0x57a   :  { %v11309_v6 = vpop.f32.mrb[43].mxu1  ;;  %v1715_v9 = vadd.f32 %v1707_v36, %v12993_v8 }
 0x57b   :  { %v1450_v51 = vpop.f32.mrb[44].mxu0 }
 0x57c   :  { %v1708_v16 = vmul.f32 0.35355338, %v1450_v51  ;;  %v11314_v63 = vpop.f32.mrb[45].mxu0  ;;  %v1725_v53 = vsel %vm421_vm4, %v1715_v9, -inf }
 0x57d   :  { %v1453_v59 = vpop.f32.mrb[46].mxu0  ;;  %1726 = vmax.xlane.f32.xlu0 %v1725_v53 }
 0x57e   :  { %v11315_v3 = vpop.f32.mrb[47].mxu0  ;;  %v1716_v55 = vadd.f32 %v1708_v16, %v13003_v20 }
 0x57f   :  { %v1500_v5 = vpop.f32.mrb[44].mxu1 }
 0x580   :  { %v1709_v32 = vmul.f32 0.35355338, %v1500_v5  ;;  %v11320_v40 = vpop.f32.mrb[45].mxu1  ;;  %v1728_v10 = vsel %vm421_vm4, %v1716_v55, -inf }
 0x581   :  { %1729 = vmax.xlane.f32.xlu0 %v1728_v10  ;;  %v1503_v44 = vpop.f32.mrb[46].mxu1 }
 0x582   :  { %v11321_v47 = vpop.f32.mrb[47].mxu1  ;;  %v13265_v12 = vadd.f32 %v1709_v32, %v13013_v37 }
 0x583   :  { %v1550_v22 = vpop.f32.mrb[48].mxu0 }
 0x584   :  { %v1710_v7 = vmul.f32 0.35355338, %v1550_v22  ;;  %v11326_v33 = vpop.f32.mrb[49].mxu0  ;;  %v1731_v36 = vsel %vm421_vm4, %v13265_v12, -inf }
 0x585   :  { %v1553_v34 = vpop.f32.mrb[50].mxu0  ;;  %1732 = vmax.xlane.f32.xlu1 %v1731_v36 }
 0x586   :  { %v11327_v14 = vpop.f32.mrb[51].mxu0  ;;  %v1718_v39 = vadd.f32 %v1710_v7, %v13026_v2 }
 0x587   :  { %v1600_v6 = vpop.f32.mrb[48].mxu1 }
 0x588   :  { %v1711_v51 = vmul.f32 0.35355338, %v1600_v6  ;;  %v11332_v16 = vpop.f32.mrb[49].mxu1  ;;  %v1734_v63 = vsel %vm421_vm4, %v1718_v39, -inf }
 0x589   :  { %1735 = vmax.xlane.f32.xlu0 %v1734_v63  ;;  %v1603_v53 = vpop.f32.mrb[50].mxu1 }
 0x58a   :  { %v11333_v59 = vpop.f32.mrb[51].mxu1  ;;  %v1719_v3 = vadd.f32 %v1711_v51, %v13034_v11 }
 0x58b   :  { %v1650_v5 = vpop.f32.mrb[52].mxu0 }
 0x58c   :  { %v1712_v32 = vmul.f32 0.35355338, %v1650_v5  ;;  %v11338_v40 = vpop.f32.mrb[53].mxu0  ;;  %v1737_v10 = vsel %vm421_vm4, %v1719_v3, -inf }
 0x58d   :  { %v1653_v44 = vpop.f32.mrb[54].mxu0  ;;  %1738 = vmax.xlane.f32.xlu1 %v1737_v10 }
 0x58e   :  { %v11339_v47 = vpop.f32.mrb[55].mxu0  ;;  %v1720_v22 = vadd.f32 %v1712_v32, %v13042_v31 }
 0x58f   :  { %v1700_v7 = vpop.f32.mrb[52].mxu1 }
 0x590   :  { %v1713_v33 = vmul.f32 0.35355338, %v1700_v7  ;;  %v11344_v36 = vpop.f32.mrb[53].mxu1  ;;  %v1740_v34 = vsel %vm421_vm4, %v1720_v22, -inf }
 0x591   :  { %1741 = vmax.xlane.f32.xlu0 %v1740_v34  ;;  %v1703_v14 = vpop.f32.mrb[54].mxu1 }
 0x592   :  { %v11345_v6 = vpop.f32.mrb[55].mxu1  ;;  %v1721_v51 = vadd.f32 %v1713_v33, %v13051_v43 }
 0x594   :  { %v1743_v16 = vsel %vm421_vm4, %v1721_v51, -inf }
 0x595   :  { %1744 = vmax.xlane.f32.xlu1 %v1743_v16 }
 0x5a6   :  { %1914 = vrot.lane.b32.xlu1 %v12871_v42, %s12686_s0 }
 0x5a7   :  { %1962 = vrot.lane.b32.xlu0 %v12880_v48, %s12686_s0 }
 0x606   :  { %v1724_v63 = vpop.xlane.xlu1 %1723 }
 0x607   :  { %v1746_v53 = vsub.f32 %v13256_v26, %v1724_v63 }
 0x609   :  { %v1754_v59 = vmul.f32 1.442695, %v1746_v53 }
 0x60a   :  { %v1727_v5 = vpop.xlane.xlu0 %1726 }
 0x60b   :  { %12285 = vpow2.f32 %v1754_v59  ;;  %v1747_v32 = vsub.f32 %v1715_v9, %v1727_v5 }
 0x60d   :  { %v1756_v40 = vmul.f32 1.442695, %v1747_v32 }
 0x60e   :  { %v1730_v10 = vpop.xlane.xlu0 %1729 }
 0x60f   :  { %12287 = vpow2.f32 %v1756_v40  ;;  %v1748_v44 = vsub.f32 %v1716_v55, %v1730_v10 }
 0x611   :  { %v1758_v47 = vmul.f32 1.442695, %v1748_v44 }
 0x612   :  { %v1733_v55 = vpop.xlane.xlu1 %1732 }
 0x613   :  { %12289 = vpow2.f32 %v1758_v47  ;;  %v1749_v14 = vsub.f32 %v13265_v12, %v1733_v55 }
 0x615   :  { %v13282_v7 = vpop.eup %12285  ;;  %v1760_v53 = vmul.f32 1.442695, %v1749_v14 }
 0x616   :  { %v1770_v33 = vsel %vm421_vm4, %v13282_v7, 0.0  ;;  %v1736_v6 = vpop.xlane.xlu0 %1735 }
 0x617   :  { %1771 = vadd.xlane.f32.xlu0 %v1770_v33  ;;  %v1750_v63 = vsub.f32 %v1718_v39, %v1736_v6  ;;  %12291 = vpow2.f32 %v1760_v53 }
 0x619   :  { %v13286_v36 = vpop.eup %12287  ;;  %v1762_v40 = vmul.f32 1.442695, %v1750_v63 }
 0x61a   :  { %v1773_v26 = vsel %vm421_vm4, %v13286_v36, 0.0  ;;  %v1739_v16 = vpop.xlane.xlu1 %1738 }
 0x61b   :  { %1774 = vadd.xlane.f32.xlu1 %v1773_v26  ;;  %v1751_v59 = vsub.f32 %v1719_v3, %v1739_v16  ;;  %12293 = vpow2.f32 %v1762_v40 }
 0x61d   :  { %v13290_v34 = vpop.eup %12289  ;;  %v1764_v44 = vmul.f32 1.442695, %v1751_v59 }
 0x61e   :  { %v1776_v9 = vsel %vm421_vm4, %v13290_v34, 0.0  ;;  %v1742_v5 = vpop.xlane.xlu0 %1741 }
 0x61f   :  { %1777 = vadd.xlane.f32.xlu0 %v1776_v9  ;;  %v1752_v10 = vsub.f32 %v1720_v22, %v1742_v5  ;;  %12295 = vpow2.f32 %v1764_v44 }
 0x621   :  { %v1766_v33 = vmul.f32 1.442695, %v1752_v10  ;;  %v13299_v9 = vpop.eup %12291 }
 0x622   :  { %v1745_v32 = vpop.xlane.xlu1 %1744  ;;  %v1779_v39 = vsel %vm421_vm4, %v13299_v9, 0.0  ;;  %v1963_v63 = vpop.permute.xlu0 %1962 }
 0x623   :  { %v1753_v47 = vsub.f32 %v1721_v51, %v1745_v32  ;;  %12297 = vpow2.f32 %v1766_v33 }
 0x625   :  { %v1768_v26 = vmul.f32 1.442695, %v1753_v47  ;;  %v13301_v12 = vpop.eup %12293 }
 0x626   :  { %v1782_v55 = vsel %vm421_vm4, %v13301_v12, 0.0  ;;  %v1915_v53 = vpop.permute.xlu1 %1914 }
 0x627   :  { %12299 = vpow2.f32 %v1768_v26  ;;  %v1920_v33 = vsel %vm921_vm5, %v1915_v53, 0 }
 0x629   :  { %v13305_v3 = vpop.eup %12295 }
 0x62a   :  { %v1785_v51 = vsel %vm421_vm4, %v13305_v3, 0.0 }
 0x62c   :  { %2010 = vrot.lane.b32.xlu1 %v12891_v58, %s12686_s0 }
 0x62d   :  { %v13307_v22 = vpop.eup %12297 }
 0x62e   :  { %v1788_v16 = vsel %vm421_vm4, %v13307_v22, 0.0 }
 0x631   :  { %v13313_v14 = vpop.eup %12299 }
 0x632   :  { %v1791_v6 = vsel %vm421_vm4, %v13313_v14, 0.0 }
 0x635   :  { %2058 = vrot.lane.b32.xlu0 %v12895_v62, %s12686_s0 }
 0x650   :  { %1780 = vadd.xlane.f32.xlu1 %v1779_v39 }
 0x654   :  { %1786 = vadd.xlane.f32.xlu1 %v1785_v51  ;;  %1783 = vadd.xlane.f32.xlu0 %v1782_v55  ;;  %v1968_v55 = vsel %vm921_vm5, %v1963_v63, 0 }
 0x658   :  { %1792 = vadd.xlane.f32.xlu1 %v1791_v6  ;;  %1789 = vadd.xlane.f32.xlu0 %v1788_v16 }
 0x669   :  { %2106 = vrot.lane.b32.xlu1 %v12893_v61, %s12686_s0 }
 0x66d   :  { %2369 = vrot.lane.b32.xlu1 %v12873_v45, %s12687_s21 }
 0x66e   :  { %2154 = vrot.lane.b32.xlu0 %v12899_v1, %s12686_s0 }
 0x671   :  { %2419 = vrot.lane.b32.xlu1 %v12885_v50, %s12687_s21 }
 0x672   :  { %2367 = vrot.lane.b32.xlu0 %v12873_v45, %s12688_s22 }
 0x675   :  { %2469 = vrot.lane.b32.xlu1 %v12871_v42, %s12687_s21 }
 0x676   :  { %2417 = vrot.lane.b32.xlu0 %v12885_v50, %s12688_s22 }
 0x679   :  { %2519 = vrot.lane.b32.xlu1 %v12880_v48, %s12687_s21 }
 0x67a   :  { %2467 = vrot.lane.b32.xlu0 %v12871_v42, %s12688_s22 }
 0x67d   :  { %2569 = vrot.lane.b32.xlu1 %v12891_v58, %s12687_s21 }
 0x67e   :  { %2517 = vrot.lane.b32.xlu0 %v12880_v48, %s12688_s22 }
 0x681   :  { %2567 = vrot.lane.b32.xlu1 %v12891_v58, %s12688_s22 }
 0x682   :  { %2619 = vrot.lane.b32.xlu0 %v12895_v62, %s12687_s21 }
 0x685   :  { %2669 = vrot.lane.b32.xlu1 %v12893_v61, %s12687_s21 }
 0x686   :  { %2617 = vrot.lane.b32.xlu0 %v12895_v62, %s12688_s22 }
 0x689   :  { %2667 = vrot.lane.b32.xlu1 %v12893_v61, %s12688_s22 }
 0x68a   :  { %2719 = vrot.lane.b32.xlu0 %v12899_v1, %s12687_s21 }
 0x68e   :  { %2717 = vrot.lane.b32.xlu0 %v12899_v1, %s12688_s22 }
 0x6a4   :  { %v1772_v59 = vpop.xlane.xlu0 %1771 }
 0x6a5   :  { %12301 = vrcp.f32 %v1772_v59 }
 0x6a8   :  { %v1775_v5 = vpop.xlane.xlu1 %1774 }
 0x6a9   :  { %12303 = vrcp.f32 %v1775_v5 }
 0x6ac   :  { %v1778_v32 = vpop.xlane.xlu0 %1777  ;;  %v2011_v6 = vpop.permute.xlu1 %2010 }
 0x6ad   :  { %12305 = vrcp.f32 %v1778_v32  ;;  %v2016_v16 = vsel %vm921_vm5, %v2011_v6, 0 }
 0x6af   :  { %v12302_v40 = vpop.eup %12301 }
 0x6b0   :  { %v1802_v10 = vmul.f32 %v12302_v40, %v13282_v7  ;;  %v2059_v63 = vpop.permute.xlu0 %2058 }
 0x6b2   :  { %v1810_v44 = vpack.c.bf16 %v1802_v10, %v1802_v10 }
 0x6b3   :  { %v12304_v47 = vpop.eup %12303 }
 0x6b4   :  { %11349 = vmatmul.mubr.msk.bf16.vlgmr.msra.gmra.mrb[56].mxu0 %vm421_vm4, %v1810_v44  ;;  %v1803_v26 = vmul.f32 %v12304_v47, %v13286_v36 }
 0x6b5   :  { %11359 = vmatpush3.bf16.msra.mxu0 %v1920_v33  ;;  %11360 = vmatprep.mubr.msk.bf16.mxu0 %vm12680_vm3, %v12678_v30 }
 0x6b6   :  { %v1811_v39 = vpack.c.bf16 %v1803_v26, %v1803_v26  ;;  %11370 = vmatprep.subr.bf16.mxu0 %v12678_v30  ;;  %v2064_v26 = vsel %vm921_vm5, %v2059_v63, 0 }
 0x6b7   :  { %v12306_v51 = vpop.eup %12305 }
 0x6b8   :  { %11355 = vmatmul.mubr.msk.bf16.vlgmr.msra.gmra.mrb[56].mxu1 %vm421_vm4, %v1811_v39  ;;  %v1804_v7 = vmul.f32 %v12306_v51, %v13290_v34 }
 0x6b9   :  { %11365 = vmatpush3.bf16.msra.mxu1 %v1968_v55  ;;  %11366 = vmatprep.mubr.msk.bf16.mxu1 %vm12680_vm3, %v12678_v30 }
 0x6ba   :  { %v1812_v36 = vpack.c.bf16 %v1804_v7, %v1804_v7  ;;  %11376 = vmatprep.subr.bf16.mxu1 %v12678_v30 }
 0x6bc   :  { %11361 = vmatmul.mubr.msk.bf16.vlgmr.msra.gmra.mrb[60].mxu0 %vm421_vm4, %v1812_v36 }
 0x6bd   :  { %11371 = vmatpush3.bf16.msra.mxu0 %v2016_v16  ;;  %11372 = vmatprep.mubr.msk.bf16.mxu0 %vm12680_vm3, %v12678_v30 }
 0x6be   :  { %11382 = vmatprep.subr.bf16.mxu0 %v12678_v30 }
 0x6dd   :  { %v1781_v34 = vpop.xlane.xlu1 %1780 }
 0x6de   :  { %12307 = vrcp.f32 %v1781_v34 }
 0x6e1   :  { %v1787_v53 = vpop.xlane.xlu1 %1786  ;;  %v1784_v59 = vpop.xlane.xlu0 %1783 }
 0x6e2   :  { %12309 = vrcp.f32 %v1787_v53 }
 0x6e3   :  { %12311 = vrcp.f32 %v1784_v59 }
 0x6e5   :  { %v1790_v5 = vpop.xlane.xlu0 %1789  ;;  %v1793_v32 = vpop.xlane.xlu1 %1792 }
 0x6e6   :  { %12313 = vrcp.f32 %v1790_v5 }
 0x6e7   :  { %12315 = vrcp.f32 %v1793_v32 }
 0x6e8   :  { %v12308_v40 = vpop.eup %12307 }
 0x6e9   :  { %v1805_v10 = vmul.f32 %v12308_v40, %v13299_v9  ;;  %v2107_v51 = vpop.permute.xlu1 %2106  ;;  %v2155_v36 = vpop.permute.xlu0 %2154 }
 0x6ea   :  { %v2112_v6 = vsel %vm921_vm5, %v2107_v51, 0  ;;  %v2160_v34 = vsel %vm921_vm5, %v2155_v36, 0  ;;  %v2206_v51 = vld [vmem:[%s15477_s6 + $0x4] sm:$0xf] }
 0x6eb   :  { %v1813_v44 = vpack.c.bf16 %v1805_v10, %v1805_v10 }
 0x6ec   :  { %v12310_v47 = vpop.eup %12309 }
 0x6ed   :  { %v12312_v33 = vpop.eup %12311  ;;  %11367 = vmatmul.mubr.msk.bf16.vlgmr.msra.gmra.mrb[60].mxu1 %vm421_vm4, %v1813_v44  ;;  %v1807_v55 = vmul.f32 %v12310_v47, %v13305_v3  ;;  %v2370_v59 = vpop.permute.xlu1 %2369 }
 0x6ee   :  { %11377 = vmatpush3.bf16.msra.mxu1 %v2064_v26  ;;  %v1806_v39 = vmul.f32 %v12312_v33, %v13301_v12  ;;  %11378 = vmatprep.mubr.msk.bf16.mxu1 %vm12680_vm3, %v12678_v30  ;;  %v2368_v32 = vpop.permute.xlu0 %2367 }
 0x6ef   :  { %11388 = vmatprep.subr.bf16.mxu1 %v12678_v30  ;;  %v1815_v16 = vpack.c.bf16 %v1807_v55, %v1807_v55 }
 0x6f0   :  { %v1814_v9 = vpack.c.bf16 %v1806_v39, %v1806_v39  ;;  %v12314_v7 = vpop.eup %12313 }
 0x6f1   :  { %v12316_v12 = vpop.eup %12315  ;;  %v1808_v63 = vmul.f32 %v12314_v7, %v13307_v22  ;;  %v2375_v22 = vsel %vm421_vm4, %v2370_v59, 0  ;;  %v2420_v40 = vpop.permute.xlu1 %2419 }
 0x6f2   :  { %11373 = vmatmul.mubr.msk.bf16.vlgmr.msra.gmra.mrb[64].mxu0 %vm421_vm4, %v1814_v9  ;;  %v1809_v3 = vmul.f32 %v12316_v12, %v13313_v14  ;;  %v2418_v14 = vpop.permute.xlu0 %2417  ;;  %v2425_v10 = vsel %vm421_vm4, %v2420_v40, 0 }
 0x6f3   :  { %11383 = vmatpush3.bf16.msra.mxu0 %v2112_v6  ;;  %11384 = vmatprep.mubr.msk.bf16.mxu0 %vm12680_vm3, %v12678_v30  ;;  %v1816_v53 = vpack.c.bf16 %v1808_v63, %v1808_v63  ;;  %v2220_v63 = vsel %vm921_vm5, %v2206_v51, 0 }
 0x6f4   :  { %v1817_v5 = vpack.c.bf16 %v1809_v3, %v1809_v3  ;;  %12171 = vmatprep.subr.msk.bf16.mxu0 %vm921_vm5, %v2206_v51 }
 0x6f5   :  { %11379 = vmatmul.mubr.msk.bf16.vlgmr.msra.gmra.mrb[64].mxu1 %vm421_vm4, %v1815_v16  ;;  %v2470_v44 = vpop.permute.xlu1 %2469 }
 0x6f6   :  { %11389 = vmatpush3.bf16.msra.mxu1 %v2160_v34  ;;  %11390 = vmatprep.mubr.msk.bf16.mxu1 %vm12680_vm3, %v12678_v30  ;;  %v2468_v47 = vpop.permute.xlu0 %2467  ;;  %v2475_v33 = vsel %vm421_vm4, %v2470_v44, 0  ;;  %v1305_v34 = vld [vmem:[%s15477_s6] sm:$0xf] }
 0x6f7   :  { %11414 = vmatprep.subr.bf16.mxu1 %v12678_v30 }
 0x6f9   :  { %v2520_v39 = vpop.permute.xlu1 %2519 }
 0x6fa   :  { %11385 = vmatmul.mubr.msk.bf16.vlgmr.msra.gmra.mrb[68].mxu0 %vm421_vm4, %v1816_v53  ;;  %v2518_v26 = vpop.permute.xlu0 %2517  ;;  %v2525_v55 = vsel %vm421_vm4, %v2520_v39, 0 }
 0x6fb   :  { %11395 = vmatpush3.bf16.msra.mxu0 %v2220_v63 }
 0x6fc   :  { %12172 = vmatprep.subr.msk.bf16.mxu0 %vm921_vm5, %v1305_v34 }
 0x6fd   :  { %11391 = vmatmul.mubr.msk.bf16.vlgmr.msra.gmra.mrb[68].mxu1 %vm421_vm4, %v1817_v5 }
 0x6fe   :  { %11416 = vmatprep.mubr.msk.bf16.mxu1 %vm12680_vm3, %v12678_v30  ;;  %v2620_v9 = vpop.permute.xlu0 %2619 }
 0x6ff   :  { %11415 = vmatpush3.bf16.xpose.msra.mxu1 %v2375_v22  ;;  %v2625_v6 = vsel %vm421_vm4, %v2620_v9, 0  ;;  %v2300_v9 = vsel %vm921_vm5, %v1305_v34, 0 }
 0x700   :  { %11420 = vmatprep.subr.bf16.mxu1 %v12678_v30 }
 0x702   :  { %v2618_v7 = vpop.permute.xlu0 %2617 }
 0x706   :  { %11417 = vmatmul.mubr.msk.bf16.vlgmr.msra.gmra.mrb[72].mxu1 %vm421_vm4, %v2368_v32  ;;  %v2720_v36 = vpop.permute.xlu0 %2719 }
 0x707   :  { %11421 = vmatpush3.bf16.xpose.msra.mxu1 %v2425_v10  ;;  %11422 = vmatprep.mubr.msk.bf16.mxu1 %vm12680_vm3, %v12678_v30  ;;  %v2725_v16 = vsel %vm421_vm4, %v2720_v36, 0 }
 0x708   :  { %11426 = vmatprep.subr.bf16.mxu1 %v12678_v30 }
 0x70a   :  { %v2718_v12 = vpop.permute.xlu0 %2717 }
 0x70e   :  { %11423 = vmatmul.mubr.msk.bf16.vlgmr.msra.gmra.mrb[76].mxu1 %vm421_vm4, %v2418_v14 }
 0x70f   :  { %11427 = vmatpush3.bf16.xpose.msra.mxu1 %v2475_v33  ;;  %11428 = vmatprep.mubr.msk.bf16.mxu1 %vm12680_vm3, %v12678_v30 }
 0x710   :  { %11432 = vmatprep.subr.bf16.mxu1 %v12678_v30 }
 0x716   :  { %11429 = vmatmul.mubr.msk.bf16.vlgmr.msra.gmra.mrb[80].mxu1 %vm421_vm4, %v2468_v47 }
 0x717   :  { %11433 = vmatpush3.bf16.xpose.msra.mxu1 %v2525_v55  ;;  %11434 = vmatprep.mubr.msk.bf16.mxu1 %vm12680_vm3, %v12678_v30 }
 0x718   :  { %11444 = vmatprep.subr.bf16.mxu1 %v12678_v30 }
 0x71e   :  { %11435 = vmatmul.mubr.msk.bf16.vlgmr.msra.gmra.mrb[84].mxu1 %vm421_vm4, %v2518_v26 }
 0x71f   :  { %11445 = vmatpush3.bf16.xpose.msra.mxu1 %v2625_v6  ;;  %11446 = vmatprep.mubr.msk.bf16.mxu1 %vm12680_vm3, %v12678_v30 }
 0x720   :  { %11456 = vmatprep.subr.bf16.mxu1 %v12678_v30 }
 0x726   :  { %11447 = vmatmul.mubr.msk.bf16.vlgmr.msra.gmra.mrb[88].mxu1 %vm421_vm4, %v2618_v7 }
 0x727   :  { %11457 = vmatpush3.bf16.xpose.msra.mxu1 %v2725_v16  ;;  %11458 = vmatprep.mubr.msk.bf16.mxu1 %vm12680_vm3, %v12678_v30 }
 0x728   :  { %11468 = vmatprep.subr.bf16.mxu1 %v12678_v30 }
 0x72e   :  { %11459 = vmatmul.mubr.msk.bf16.vlgmr.msra.gmra.mrb[92].mxu1 %vm421_vm4, %v2718_v12 }
 0x72f   :  { %11470 = vmatprep.mubr.msk.bf16.mxu1 %vm12680_vm3, %v12678_v30 }
 0x787   :  { %v1860_v3 = vpop.f32.mrb[56].mxu0 }
 0x788   :  { %v11350_v53 = vpop.f32.mrb[57].mxu0 }
 0x789   :  { %v1863_v59 = vpop.f32.mrb[58].mxu0 }
 0x78a   :  { %v11351_v5 = vpop.f32.mrb[59].mxu0 }
 0x78b   :  { %v1908_v22 = vpop.f32.mrb[56].mxu1 }
 0x78c   :  { %v2202_v32 = vpack.c.bf16 %v1908_v22, %v1860_v3  ;;  %v11356_v40 = vpop.f32.mrb[57].mxu1 }
 0x78d   :  { %v1911_v14 = vpop.f32.mrb[58].mxu1 }
 0x78e   :  { %v11357_v10 = vpop.f32.mrb[59].mxu1  ;;  %11396 = vmatprep.mubr.msk.bf16.mxu0 %vm421_vm4, %v2202_v32 }
 0x78f   :  { %v1956_v44 = vpop.f32.mrb[60].mxu0 }
 0x790   :  { %v11362_v47 = vpop.f32.mrb[61].mxu0 }
 0x791   :  { %v1959_v33 = vpop.f32.mrb[62].mxu0 }
 0x792   :  { %v11363_v26 = vpop.f32.mrb[63].mxu0 }
 0x7c0   :  { %v2004_v39 = vpop.f32.mrb[60].mxu1 }
 0x7c1   :  { %v2203_v51 = vpack.c.bf16 %v2004_v39, %v1956_v44  ;;  %v11368_v55 = vpop.f32.mrb[61].mxu1  ;;  %v2570_v39 = vpop.permute.xlu1 %2569 }
 0x7c2   :  { %v2007_v7 = vpop.f32.mrb[62].mxu1 }
 0x7c3   :  { %v11369_v6 = vpop.f32.mrb[63].mxu1  ;;  %11397 = vmatmul.mubr.msk.bf16.vlgmr.msra.gmra.mrb[72].mxu0 %vm421_vm4, %v2203_v51  ;;  %v2575_v7 = vsel %vm421_vm4, %v2570_v39, 0 }
 0x7c4   :  { %11405 = vmatpush3.bf16.msra.mxu0 %v2300_v9 }
 0x7c5   :  { %v2052_v36 = vpop.f32.mrb[64].mxu0  ;;  %11438 = vmatprep.subr.bf16.mxu0 %v12678_v30  ;;  %v2568_v28 = vpop.permute.xlu1 %2567 }
 0x7c6   :  { %v11374_v16 = vpop.f32.mrb[65].mxu0 }
 0x7c7   :  { %v2055_v12 = vpop.f32.mrb[66].mxu0 }
 0x7c8   :  { %v11375_v63 = vpop.f32.mrb[67].mxu0  ;;  %v2100_v3 = vpop.f32.mrb[64].mxu1 }
 0x7c9   :  { %v2204_v53 = vpack.c.bf16 %v2100_v3, %v2052_v36  ;;  %v11380_v59 = vpop.f32.mrb[65].mxu1  ;;  %v2670_v12 = vpop.permute.xlu1 %2669 }
 0x7ca   :  { %v2103_v5 = vpop.f32.mrb[66].mxu1  ;;  %v2675_v59 = vsel %vm421_vm4, %v2670_v12, 0 }
 0x7cb   :  { %v11381_v22 = vpop.f32.mrb[67].mxu1  ;;  %11400 = vmatprep.mubr.msk.bf16.mxu0 %vm421_vm4, %v2204_v53 }
 0x7cd   :  { %v2148_v32 = vpop.f32.mrb[68].mxu0 }
 0x7ce   :  { %v11386_v34 = vpop.f32.mrb[69].mxu0 }
 0x7cf   :  { %v2151_v40 = vpop.f32.mrb[70].mxu0 }
 0x7d0   :  { %v11387_v14 = vpop.f32.mrb[71].mxu0  ;;  %v2196_v10 = vpop.f32.mrb[68].mxu1 }
 0x7d1   :  { %v2205_v44 = vpack.c.bf16 %v2196_v10, %v2148_v32  ;;  %v11392_v47 = vpop.f32.mrb[69].mxu1  ;;  %v2668_v32 = vpop.permute.xlu1 %2667 }
 0x7d2   :  { %v2199_v33 = vpop.f32.mrb[70].mxu1 }
 0x7d3   :  { %v11393_v26 = vpop.f32.mrb[71].mxu1  ;;  %11401 = vmatmul.mubr.msk.bf16.gmra.mrb[76].mxu0 %vm421_vm4, %v2205_v44 }
 0x7d4   :  { %11406 = vmatprep.mubr.msk.bf16.mxu0 %vm421_vm4, %v1301_v15 }
 0x7d9   :  { %v2411_v51 = vpop.f32.mrb[72].mxu1 }
 0x7da   :  { %v2767_v55 = vmul.f32 0.35355338, %v2411_v51  ;;  %v11418_v9 = vpop.f32.mrb[73].mxu1 }
 0x7db   :  { %v2414_v6 = vpop.f32.mrb[74].mxu1  ;;  %11407 = vmatmul.mubr.msk.bf16.vlgmr.msra.gmra.mrb[72].mxu0 %vm421_vm4, %v1302_v38 }
 0x7dc   :  { %v11419_v36 = vpop.f32.mrb[75].mxu1  ;;  %11439 = vmatpush3.bf16.xpose.msra.mxu0 %v2575_v7  ;;  %11410 = vmatprep.mubr.msk.bf16.mxu0 %vm421_vm4, %v1303_v57  ;;  %v13455_v49 = vadd.f32 %v2767_v55, %v12985_v0 }
 0x7dd   :  { %11450 = vmatprep.subr.bf16.mxu0 %v12678_v30 }
 0x7de   :  { %v2783_v13 = vsel %vm421_vm4, %v13455_v49, -inf }
 0x7df   :  { %2784 = vmax.xlane.f32.xlu1 %v2783_v13 }
 0x7e1   :  { %v2461_v15 = vpop.f32.mrb[76].mxu1 }
 0x7e2   :  { %v2768_v35 = vmul.f32 0.35355338, %v2461_v15  ;;  %v11424_v38 = vpop.f32.mrb[77].mxu1 }
 0x7e3   :  { %v2464_v16 = vpop.f32.mrb[78].mxu1  ;;  %11411 = vmatmul.mubr.msk.bf16.gmra.mrb[76].mxu0 %vm421_vm4, %v1304_v4 }
 0x7e4   :  { %v11425_v54 = vpop.f32.mrb[79].mxu1  ;;  %v2776_v52 = vadd.f32 %v2768_v35, %v12993_v8  ;;  %11440 = vmatprep.mubr.msk.bf16.mxu0 %vm12680_vm3, %v12678_v30 }
 0x7e6   :  { %v2786_v57 = vsel %vm421_vm4, %v2776_v52, -inf }
 0x7e7   :  { %2787 = vmax.xlane.f32.xlu0 %v2786_v57 }
 0x7e9   :  { %v2511_v63 = vpop.f32.mrb[80].mxu1 }
 0x7ea   :  { %v2769_v3 = vmul.f32 0.35355338, %v2511_v63  ;;  %v11430_v53 = vpop.f32.mrb[81].mxu1 }
 0x7eb   :  { %v2514_v5 = vpop.f32.mrb[82].mxu1  ;;  %11441 = vmatmul.mubr.msk.bf16.vlgmr.msra.gmra.mrb[80].mxu0 %vm421_vm4, %v2568_v28 }
 0x7ec   :  { %v13471_v60 = vadd.f32 %v2769_v3, %v13003_v20  ;;  %v11431_v46 = vpop.f32.mrb[83].mxu1  ;;  %11451 = vmatpush3.bf16.xpose.msra.mxu0 %v2675_v59  ;;  %11452 = vmatprep.mubr.msk.bf16.mxu0 %vm12680_vm3, %v12678_v30 }
 0x7ed   :  { %11462 = vmatprep.subr.bf16.mxu0 %v12678_v30 }
 0x7ee   :  { %v2789_v4 = vsel %vm421_vm4, %v13471_v60, -inf }
 0x7ef   :  { %2790 = vmax.xlane.f32.xlu0 %v2789_v4 }
 0x7f1   :  { %v2561_v22 = vpop.f32.mrb[84].mxu1 }
 0x7f2   :  { %v2770_v34 = vmul.f32 0.35355338, %v2561_v22  ;;  %v11436_v40 = vpop.f32.mrb[85].mxu1 }
 0x7f3   :  { %v2564_v14 = vpop.f32.mrb[86].mxu1  ;;  %11453 = vmatmul.mubr.msk.bf16.vlgmr.msra.gmra.mrb[84].mxu0 %vm421_vm4, %v2668_v32 }
 0x7f4   :  { %v2778_v10 = vadd.f32 %v2770_v34, %v13013_v37  ;;  %v11437_v44 = vpop.f32.mrb[87].mxu1  ;;  %11464 = vmatprep.mubr.msk.bf16.mxu0 %vm12680_vm3, %v12678_v30 }
 0x7f6   :  { %v2792_v47 = vsel %vm421_vm4, %v2778_v10, -inf }
 0x7f7   :  { %2793 = vmax.xlane.f32.xlu1 %v2792_v47 }
 0x7f9   :  { %v2661_v33 = vpop.f32.mrb[88].mxu1 }
 0x7fa   :  { %v2772_v26 = vmul.f32 0.35355338, %v2661_v33  ;;  %v11448_v39 = vpop.f32.mrb[89].mxu1 }
 0x7fb   :  { %v2664_v51 = vpop.f32.mrb[90].mxu1 }
 0x7fc   :  { %v2780_v55 = vadd.f32 %v2772_v26, %v13034_v11  ;;  %v11449_v9 = vpop.f32.mrb[91].mxu1 }
 0x7fe   :  { %v2798_v7 = vsel %vm421_vm4, %v2780_v55, -inf }
 0x7ff   :  { %2799 = vmax.xlane.f32.xlu1 %v2798_v7 }
 0x801   :  { %v2761_v6 = vpop.f32.mrb[92].mxu1 }
 0x802   :  { %v2774_v36 = vmul.f32 0.35355338, %v2761_v6  ;;  %v11460_v13 = vpop.f32.mrb[93].mxu1 }
 0x803   :  { %v2764_v15 = vpop.f32.mrb[94].mxu1 }
 0x804   :  { %v2782_v28 = vadd.f32 %v2774_v36, %v13051_v43  ;;  %v11461_v35 = vpop.f32.mrb[95].mxu1 }
 0x806   :  { %v2804_v38 = vsel %vm421_vm4, %v2782_v28, -inf }
 0x807   :  { %2805 = vmax.xlane.f32.xlu1 %v2804_v38 }
 0x86c   :  { %v2785_v12 = vpop.xlane.xlu1 %2784 }
 0x86d   :  { %v2807_v26 = vsub.f32 %v13455_v49, %v2785_v12 }
 0x86f   :  { %v2815_v51 = vmul.f32 1.442695, %v2807_v26 }
 0x874   :  { %v2788_v16 = vpop.xlane.xlu0 %2787 }
 0x875   :  { %v2808_v54 = vsub.f32 %v2776_v52, %v2788_v16 }
 0x877   :  { %v2817_v57 = vmul.f32 1.442695, %v2808_v54 }
 0x879   :  { %12317 = vpow2.f32 %v2817_v57 }
 0x87c   :  { %v2791_v39 = vpop.xlane.xlu0 %2790 }
 0x883   :  { %v13487_v63 = vpop.eup %12317 }
 0x884   :  { %v2794_v3 = vpop.xlane.xlu1 %2793  ;;  %v2834_v53 = vsel %vm421_vm4, %v13487_v63, 0.0 }
 0x885   :  { %v2810_v59 = vsub.f32 %v2778_v10, %v2794_v3  ;;  %2835 = vadd.xlane.f32.xlu1 %v2834_v53 }
 0x887   :  { %v2821_v5 = vmul.f32 1.442695, %v2810_v59 }
 0x889   :  { %12319 = vpow2.f32 %v2821_v5 }
 0x88c   :  { %v2800_v46 = vpop.xlane.xlu1 %2799 }
 0x88d   :  { %v2812_v4 = vsub.f32 %v2780_v55, %v2800_v46  ;;  %v2809_v55 = vsub.f32 %v13471_v60, %v2791_v39 }
 0x88f   :  { %v2825_v22 = vmul.f32 1.442695, %v2812_v4 }
 0x891   :  { %12321 = vpow2.f32 %v2825_v22 }
 0x893   :  { %v13491_v32 = vpop.eup %12319 }
 0x894   :  { %v2806_v52 = vpop.xlane.xlu1 %2805  ;;  %v2840_v34 = vsel %vm421_vm4, %v13491_v32, 0.0 }
 0x895   :  { %v2814_v40 = vsub.f32 %v2782_v28, %v2806_v52  ;;  %2841 = vadd.xlane.f32.xlu1 %v2840_v34  ;;  %v2819_v28 = vmul.f32 1.442695, %v2809_v55 }
 0x897   :  { %v2829_v14 = vmul.f32 1.442695, %v2814_v40 }
 0x899   :  { %12323 = vpow2.f32 %v2829_v14 }
 0x89a   :  { %12325 = vpow2.f32 %v2815_v51 }
 0x89b   :  { %v13495_v44 = vpop.eup %12321  ;;  %12327 = vpow2.f32 %v2819_v28 }
 0x89c   :  { %v2846_v10 = vsel %vm421_vm4, %v13495_v44, 0.0 }
 0x89d   :  { %2847 = vadd.xlane.f32.xlu1 %v2846_v10 }
 0x8a3   :  { %v13499_v47 = vpop.eup %12323 }
 0x8a4   :  { %v2852_v33 = vsel %vm421_vm4, %v13499_v47, 0.0  ;;  %v12326_v3 = vpop.eup %12325 }
 0x8a5   :  { %2853 = vadd.xlane.f32.xlu1 %v2852_v33  ;;  %v2831_v53 = vsel %vm421_vm4, %v12326_v3, 0.0  ;;  %v13524_v59 = vpop.eup %12327 }
 0x8a6   :  { %v2837_v5 = vsel %vm421_vm4, %v13524_v59, 0.0 }
 0x8b6   :  { %2927 = vrot.lane.b32.xlu1 %v12885_v50, %s12689_s25 }
 0x8ba   :  { %2975 = vrot.lane.b32.xlu1 %v12871_v42, %s12689_s25 }
 0x8be   :  { %3071 = vrot.lane.b32.xlu1 %v12891_v58, %s12689_s25  ;;  %v2611_v9 = vpop.f32.mrb[80].mxu0 }
 0x8bf   :  { %v2771_v7 = vmul.f32 0.35355338, %v2611_v9  ;;  %v11442_v6 = vpop.f32.mrb[81].mxu0 }
 0x8c0   :  { %v2614_v36 = vpop.f32.mrb[82].mxu0 }
 0x8c1   :  { %v2779_v13 = vadd.f32 %v2771_v7, %v13026_v2  ;;  %v11443_v15 = vpop.f32.mrb[83].mxu0 }
 0x8c2   :  { %3167 = vrot.lane.b32.xlu1 %v12893_v61, %s12689_s25 }
 0x8c3   :  { %v2795_v49 = vsel %vm421_vm4, %v2779_v13, -inf }
 0x8c4   :  { %2796 = vmax.xlane.f32.xlu0 %v2795_v49 }
 0x8c6   :  { %3358 = vrot.lane.b32.xlu1 %v12873_v45, %s12690_s27  ;;  %v2711_v60 = vpop.f32.mrb[84].mxu0 }
 0x8c7   :  { %v2773_v35 = vmul.f32 0.35355338, %v2711_v60  ;;  %v11454_v38 = vpop.f32.mrb[85].mxu0 }
 0x8c8   :  { %v2714_v16 = vpop.f32.mrb[86].mxu0 }
 0x8c9   :  { %v2781_v54 = vadd.f32 %v2773_v35, %v13042_v31  ;;  %v11455_v57 = vpop.f32.mrb[87].mxu0 }
 0x8ca   :  { %3408 = vrot.lane.b32.xlu1 %v12885_v50, %s12690_s27 }
 0x8cb   :  { %v2801_v12 = vsel %vm421_vm4, %v2781_v54, -inf }
 0x8cc   :  { %2802 = vmax.xlane.f32.xlu0 %v2801_v12 }
 0x8ce   :  { %3458 = vrot.lane.b32.xlu1 %v12871_v42, %s12690_s27 }
 0x8d0   :  { %2832 = vadd.xlane.f32.xlu0 %v2831_v53 }
 0x8d2   :  { %3456 = vrot.lane.b32.xlu1 %v12871_v42, %s12691_s28 }
 0x8d4   :  { %2838 = vadd.xlane.f32.xlu0 %v2837_v5 }
 0x8d6   :  { %3558 = vrot.lane.b32.xlu1 %v12891_v58, %s12690_s27 }
 0x8da   :  { %3556 = vrot.lane.b32.xlu1 %v12891_v58, %s12691_s28 }
 0x8de   :  { %3658 = vrot.lane.b32.xlu1 %v12893_v61, %s12690_s27 }
 0x8e2   :  { %3656 = vrot.lane.b32.xlu1 %v12893_v61, %s12691_s28 }
 0x8ea   :  { %2879 = vrot.lane.b32.xlu0 %v12873_v45, %s12689_s25 }
 0x8ee   :  { %3023 = vrot.lane.b32.xlu0 %v12880_v48, %s12689_s25 }
 0x8f2   :  { %3119 = vrot.lane.b32.xlu0 %v12895_v62, %s12689_s25 }
 0x912   :  { %v2836_v46 = vpop.xlane.xlu1 %2835 }
 0x913   :  { %12329 = vrcp.f32 %v2836_v46 }
 0x91d   :  { %v12330_v52 = vpop.eup %12329 }
 0x91e   :  { %v2864_v40 = vmul.f32 %v12330_v52, %v13487_v63 }
 0x920   :  { %v2872_v33 = vpack.c.bf16 %v2864_v40, %v2864_v40 }
 0x922   :  { %v2842_v4 = vpop.xlane.xlu1 %2841 }
 0x92a   :  { %v2848_v22 = vpop.xlane.xlu1 %2847 }
 0x932   :  { %v13544_v34 = vpop.xlane.xlu1 %2853 }
 0x936   :  { %v2928_v14 = vpop.permute.xlu1 %2927 }
 0x937   :  { %v2933_v10 = vsel %vm921_vm5, %v2928_v14, 0 }
 0x938   :  { %11469 = vmatpush3.bf16.msra.mxu1 %v2933_v10 }
 0x939   :  { %11480 = vmatprep.subr.bf16.mxu1 %v12678_v30 }
 0x93a   :  { %v2976_v53 = vpop.permute.xlu1 %2975 }
 0x93b   :  { %11471 = vmatmul.mubr.msk.bf16.vlgmr.msra.gmra.mrb[96].mxu1 %vm421_vm4, %v2872_v33 }
 0x93c   :  { %11482 = vmatprep.mubr.msk.bf16.mxu1 %vm12680_vm3, %v12678_v30 }
 0x93e   :  { %v3072_v10 = vpop.permute.xlu1 %3071 }
 0x951   :  { %v2797_v26 = vpop.xlane.xlu0 %2796 }
 0x952   :  { %v2811_v39 = vsub.f32 %v2779_v13, %v2797_v26 }
 0x954   :  { %v2823_v51 = vmul.f32 1.442695, %v2811_v39  ;;  %v3077_v39 = vsel %vm921_vm5, %v3072_v10, 0 }
 0x956   :  { %12331 = vpow2.f32 %v2823_v51 }
 0x957   :  { %12333 = vrcp.f32 %v2842_v4 }
 0x959   :  { %v2803_v55 = vpop.xlane.xlu0 %2802 }
 0x95a   :  { %v2813_v9 = vsub.f32 %v2781_v54, %v2803_v55 }
 0x95c   :  { %v2827_v63 = vmul.f32 1.442695, %v2813_v9 }
 0x95d   :  { %v2833_v7 = vpop.xlane.xlu0 %2832 }
 0x95e   :  { %12335 = vpow2.f32 %v2827_v63 }
 0x95f   :  { %12337 = vrcp.f32 %v2833_v7 }
 0x960   :  { %v13552_v6 = vpop.eup %12331  ;;  %12339 = vrcp.f32 %v2848_v22 }
 0x961   :  { %v2839_v36 = vpop.xlane.xlu0 %2838  ;;  %v2843_v15 = vsel %vm421_vm4, %v13552_v6, 0.0  ;;  %v12334_v28 = vpop.eup %12333 }
 0x962   :  { %2844 = vadd.xlane.f32.xlu0 %v2843_v15  ;;  %12341 = vrcp.f32 %v2839_v36  ;;  %v2866_v35 = vmul.f32 %v12334_v28, %v13491_v32  ;;  %v2981_v32 = vsel %vm921_vm5, %v2976_v53, 0  ;;  %v3168_v36 = vpop.permute.xlu1 %3167 }
 0x963   :  { %12343 = vrcp.f32 %v13544_v34  ;;  %v3173_v34 = vsel %vm921_vm5, %v3168_v36, 0 }
 0x964   :  { %v2874_v4 = vpack.c.bf16 %v2866_v35, %v2866_v35 }
 0x965   :  { %v2880_v13 = vpop.permute.xlu0 %2879 }
 0x966   :  { %v2885_v49 = vsel %vm921_vm5, %v2880_v13, 0  ;;  %v3359_v35 = vpop.permute.xlu1 %3358 }
 0x967   :  { %11463 = vmatpush3.bf16.msra.mxu0 %v2885_v49 }
 0x968   :  { %v13557_v60 = vpop.eup %12335  ;;  %11474 = vmatprep.subr.bf16.mxu0 %v12678_v30 }
 0x969   :  { %v12338_v38 = vpop.eup %12337  ;;  %v3024_v16 = vpop.permute.xlu0 %3023  ;;  %v2849_v54 = vsel %vm421_vm4, %v13557_v60, 0.0 }
 0x96a   :  { %v3029_v57 = vsel %vm921_vm5, %v3024_v16, 0  ;;  %2850 = vadd.xlane.f32.xlu0 %v2849_v54  ;;  %v2863_v12 = vmul.f32 %v12338_v38, %v12326_v3  ;;  %v12340_v5 = vpop.eup %12339  ;;  %v3364_v54 = vsel %vm421_vm4, %v3359_v35, 0  ;;  %v3409_v53 = vpop.permute.xlu1 %3408 }
 0x96b   :  { %11481 = vmatpush3.bf16.msra.mxu1 %v3029_v57  ;;  %v2868_v14 = vmul.f32 %v12340_v5, %v13495_v44 }
 0x96c   :  { %v2871_v46 = vpack.c.bf16 %v2863_v12, %v2863_v12  ;;  %11492 = vmatprep.subr.bf16.mxu1 %v12678_v30  ;;  %v12342_v22 = vpop.eup %12341 }
 0x96d   :  { %v3120_v52 = vpop.permute.xlu0 %3119  ;;  %v2865_v3 = vmul.f32 %v12342_v22, %v13524_v59  ;;  %v2876_v26 = vpack.c.bf16 %v2868_v14, %v2868_v14  ;;  %v12344_v59 = vpop.eup %12343 }
 0x96e   :  { %11465 = vmatmul.mubr.msk.bf16.vlgmr.msra.gmra.mrb[88].mxu0 %vm421_vm4, %v2871_v46  ;;  %v3125_v40 = vsel %vm921_vm5, %v3120_v52, 0  ;;  %11483 = vmatmul.mubr.msk.bf16.vlgmr.msra.gmra.mrb[100].mxu1 %vm421_vm4, %v2874_v4  ;;  %v2870_v9 = vmul.f32 %v12344_v59, %v13499_v47  ;;  %v3267_v47 = vld [vmem:[%s15477_s6 + $0x8] sm:$0xf]  ;;  %v3414_v46 = vsel %vm421_vm4, %v3409_v53, 0 }
 0x96f   :  { %11475 = vmatpush3.bf16.msra.mxu0 %v2981_v32  ;;  %11493 = vmatpush3.bf16.msra.mxu1 %v3125_v40  ;;  %v2873_v33 = vpack.c.bf16 %v2865_v3, %v2865_v3  ;;  %v3281_v12 = vsel %vm921_vm5, %v3267_v47, 0 }
 0x970   :  { %11476 = vmatprep.mubr.msk.bf16.mxu0 %vm12680_vm3, %v12678_v30  ;;  %11486 = vmatprep.subr.bf16.mxu0 %v12678_v30  ;;  %v2878_v13 = vpack.c.bf16 %v2870_v9, %v2870_v9 }
 0x971   :  { %11494 = vmatprep.mubr.msk.bf16.mxu1 %vm12680_vm3, %v12678_v30  ;;  %11504 = vmatprep.subr.bf16.mxu1 %v12678_v30 }
 0x976   :  { %11477 = vmatmul.mubr.msk.bf16.vlgmr.msra.gmra.mrb[92].mxu0 %vm421_vm4, %v2873_v33  ;;  %11495 = vmatmul.mubr.msk.bf16.vlgmr.msra.gmra.mrb[104].mxu1 %vm421_vm4, %v2876_v26 }
 0x977   :  { %11487 = vmatpush3.bf16.msra.mxu0 %v3077_v39  ;;  %11488 = vmatprep.mubr.msk.bf16.mxu0 %vm12680_vm3, %v12678_v30 }
 0x978   :  { %11498 = vmatprep.subr.bf16.mxu0 %v12678_v30  ;;  %11506 = vmatprep.mubr.msk.bf16.mxu1 %vm12680_vm3, %v12678_v30 }
 0x980   :  { %3215 = vrot.lane.b32.xlu0 %v12899_v1, %s12689_s25 }
 0x984   :  { %3356 = vrot.lane.b32.xlu0 %v12873_v45, %s12691_s28 }
 0x988   :  { %3406 = vrot.lane.b32.xlu0 %v12885_v50, %s12691_s28 }
 0x98c   :  { %3508 = vrot.lane.b32.xlu0 %v12880_v48, %s12690_s27 }
 0x990   :  { %3506 = vrot.lane.b32.xlu0 %v12880_v48, %s12691_s28 }
 0x994   :  { %3608 = vrot.lane.b32.xlu0 %v12895_v62, %s12690_s27 }
 0x998   :  { %3606 = vrot.lane.b32.xlu0 %v12895_v62, %s12691_s28 }
 0x99c   :  { %3708 = vrot.lane.b32.xlu0 %v12899_v1, %s12690_s27 }
 0x9a0   :  { %3706 = vrot.lane.b32.xlu0 %v12899_v1, %s12691_s28 }
 0x9ef   :  { %v2845_v44 = vpop.xlane.xlu0 %2844 }
 0x9f0   :  { %12345 = vrcp.f32 %v2845_v44 }
 0x9f7   :  { %v2851_v51 = vpop.xlane.xlu0 %2850 }
 0x9f8   :  { %12347 = vrcp.f32 %v2851_v51 }
 0x9fa   :  { %v12346_v55 = vpop.eup %12345 }
 0x9fb   :  { %v3216_v63 = vpop.permute.xlu0 %3215  ;;  %v2867_v7 = vmul.f32 %v12346_v55, %v13552_v6 }
 0x9fc   :  { %v3221_v15 = vsel %vm921_vm5, %v3216_v63, 0 }
 0x9fd   :  { %11505 = vmatpush3.bf16.msra.mxu1 %v3221_v15  ;;  %v2875_v28 = vpack.c.bf16 %v2867_v7, %v2867_v7 }
 0x9fe   :  { %11520 = vmatprep.subr.bf16.mxu1 %v12678_v30 }
 0x9ff   :  { %11489 = vmatmul.mubr.msk.bf16.vlgmr.msra.gmra.mrb[96].mxu0 %vm421_vm4, %v2875_v28  ;;  %v3357_v49 = vpop.permute.xlu0 %3356  ;;  %v3459_v28 = vpop.permute.xlu1 %3458 }
 0xa00   :  { %11499 = vmatpush3.bf16.msra.mxu0 %v3173_v34  ;;  %11507 = vmatmul.mubr.msk.bf16.vlgmr.msra.gmra.mrb[108].mxu1 %vm421_vm4, %v2878_v13 }
 0xa01   :  { %11500 = vmatprep.mubr.msk.bf16.mxu0 %vm12680_vm3, %v12678_v30  ;;  %11522 = vmatprep.mubr.msk.bf16.mxu1 %vm12680_vm3, %v12678_v30 }
 0xa02   :  { %v12348_v6 = vpop.eup %12347  ;;  %12173 = vmatprep.subr.msk.bf16.mxu0 %vm921_vm5, %v3267_v47 }
 0xa03   :  { %v2869_v38 = vmul.f32 %v12348_v6, %v13557_v60  ;;  %v3407_v16 = vpop.permute.xlu0 %3406 }
 0xa05   :  { %v2877_v57 = vpack.c.bf16 %v2869_v38, %v2869_v38 }
 0xa06   :  { %11521 = vmatpush3.bf16.xpose.msra.mxu1 %v3364_v54 }
 0xa07   :  { %11501 = vmatmul.mubr.msk.bf16.vlgmr.msra.gmra.mrb[100].mxu0 %vm421_vm4, %v2877_v57  ;;  %11526 = vmatprep.subr.bf16.mxu1 %v12678_v30  ;;  %v3509_v5 = vpop.permute.xlu0 %3508 }
 0xa08   :  { %11511 = vmatpush3.bf16.msra.mxu0 %v3281_v12  ;;  %v3514_v40 = vsel %vm421_vm4, %v3509_v5, 0 }
 0xa09   :  { %11532 = vmatprep.subr.bf16.mxu0 %v12678_v30 }
 0xa0b   :  { %v3507_v22 = vpop.permute.xlu0 %3506 }
 0xa0d   :  { %11523 = vmatmul.mubr.msk.bf16.vlgmr.msra.gmra.mrb[112].mxu1 %vm421_vm4, %v3357_v49 }
 0xa0e   :  { %v2969_v60 = vpop.f32.mrb[96].mxu1  ;;  %11527 = vmatpush3.bf16.xpose.msra.mxu1 %v3414_v46  ;;  %11528 = vmatprep.mubr.msk.bf16.mxu1 %vm12680_vm3, %v12678_v30 }
 0xa0f   :  { %v11472_v4 = vpop.f32.mrb[97].mxu1  ;;  %11538 = vmatprep.subr.bf16.mxu1 %v12678_v30  ;;  %v3609_v3 = vpop.permute.xlu0 %3608 }
 0xa10   :  { %v2972_v52 = vpop.f32.mrb[98].mxu1  ;;  %v3614_v10 = vsel %vm421_vm4, %v3609_v3, 0 }
 0xa11   :  { %v11473_v32 = vpop.f32.mrb[99].mxu1 }
 0xa13   :  { %v3607_v14 = vpop.permute.xlu0 %3606 }
 0xa15   :  { %11529 = vmatmul.mubr.msk.bf16.vlgmr.msra.gmra.mrb[116].mxu1 %vm421_vm4, %v3407_v16  ;;  %v3464_v16 = vsel %vm421_vm4, %v3459_v28, 0 }
 0xa16   :  { %11539 = vmatpush3.bf16.xpose.msra.mxu1 %v3514_v40  ;;  %11540 = vmatprep.mubr.msk.bf16.mxu1 %vm12680_vm3, %v12678_v30  ;;  %v3457_v40 = vpop.permute.xlu1 %3456 }
 0xa17   :  { %11550 = vmatprep.subr.bf16.mxu1 %v12678_v30  ;;  %v3709_v33 = vpop.permute.xlu0 %3708 }
 0xa18   :  { %v3714_v26 = vsel %vm421_vm4, %v3709_v33, 0 }
 0xa1b   :  { %v3707_v39 = vpop.permute.xlu0 %3706 }
 0xa1d   :  { %11541 = vmatmul.mubr.msk.bf16.vlgmr.msra.gmra.mrb[120].mxu1 %vm421_vm4, %v3507_v22 }
 0xa1e   :  { %11551 = vmatpush3.bf16.xpose.msra.mxu1 %v3614_v10  ;;  %11552 = vmatprep.mubr.msk.bf16.mxu1 %vm12680_vm3, %v12678_v30 }
 0xa1f   :  { %11562 = vmatprep.subr.bf16.mxu1 %v12678_v30 }
 0xa25   :  { %11553 = vmatmul.mubr.msk.bf16.vlgmr.msra.gmra.mrb[124].mxu1 %vm421_vm4, %v3607_v14 }
 0xa26   :  { %11563 = vmatpush3.bf16.xpose.msra.mxu1 %v3714_v26  ;;  %11564 = vmatprep.mubr.msk.bf16.mxu1 %vm12680_vm3, %v12678_v30 }
 0xa27   :  { %11574 = vmatprep.subr.bf16.mxu1 %v12678_v30 }
 0xa2d   :  { %11565 = vmatmul.mubr.msk.bf16.vlgmr.msra.gmra.mrb[128].mxu1 %vm421_vm4, %v3707_v39  ;;  %v3559_v39 = vpop.permute.xlu1 %3558 }
 0xa2e   :  { %11576 = vmatprep.mubr.msk.bf16.mxu1 %vm12680_vm3, %v12678_v30 }
 0xa41   :  { %v2921_v44 = vpop.f32.mrb[88].mxu0  ;;  %v3065_v59 = vpop.f32.mrb[100].mxu1 }
 0xa42   :  { %v3263_v51 = vpack.c.bf16 %v2969_v60, %v2921_v44  ;;  %v11466_v55 = vpop.f32.mrb[89].mxu0  ;;  %v11484_v9 = vpop.f32.mrb[101].mxu1 }
 0xa43   :  { %v2924_v63 = vpop.f32.mrb[90].mxu0  ;;  %v3068_v7 = vpop.f32.mrb[102].mxu1 }
 0xa44   :  { %v11467_v36 = vpop.f32.mrb[91].mxu0  ;;  %11512 = vmatprep.mubr.msk.bf16.mxu0 %vm421_vm4, %v3263_v51  ;;  %v11485_v15 = vpop.f32.mrb[103].mxu1 }
 0xa45   :  { %v3557_v7 = vpop.permute.xlu1 %3556  ;;  %v3564_v36 = vsel %vm421_vm4, %v3559_v39, 0 }
 0xa49   :  { %v3017_v13 = vpop.f32.mrb[92].mxu0  ;;  %v3161_v34 = vpop.f32.mrb[104].mxu1 }
 0xa4a   :  { %v3264_v49 = vpack.c.bf16 %v3065_v59, %v3017_v13  ;;  %v11478_v47 = vpop.f32.mrb[93].mxu0  ;;  %v11496_v6 = vpop.f32.mrb[105].mxu1 }
 0xa4b   :  { %v3020_v35 = vpop.f32.mrb[94].mxu0  ;;  %v3164_v38 = vpop.f32.mrb[106].mxu1 }
 0xa4c   :  { %v11479_v54 = vpop.f32.mrb[95].mxu0  ;;  %11513 = vmatmul.mubr.msk.bf16.vlgmr.msra.gmra.mrb[72].mxu0 %vm421_vm4, %v3264_v49  ;;  %v11497_v57 = vpop.f32.mrb[107].mxu1 }
 0xa4d   :  { %11533 = vmatpush3.bf16.xpose.msra.mxu0 %v3464_v16  ;;  %v3659_v49 = vpop.permute.xlu1 %3658 }
 0xa4e   :  { %11544 = vmatprep.subr.bf16.mxu0 %v12678_v30  ;;  %v3664_v38 = vsel %vm421_vm4, %v3659_v49, 0 }
 0xad2   :  { %v3113_v12 = vpop.f32.mrb[96].mxu0 }
 0xad3   :  { %v3265_v53 = vpack.c.bf16 %v3161_v34, %v3113_v12  ;;  %v11490_v5 = vpop.f32.mrb[97].mxu0  ;;  %v3257_v46 = vpop.f32.mrb[108].mxu1 }
 0xad4   :  { %v3116_v60 = vpop.f32.mrb[98].mxu0  ;;  %v11508_v4 = vpop.f32.mrb[109].mxu1 }
 0xad5   :  { %v11491_v22 = vpop.f32.mrb[99].mxu0  ;;  %v3260_v52 = vpop.f32.mrb[110].mxu1  ;;  %11516 = vmatprep.mubr.msk.bf16.mxu0 %vm421_vm4, %v3265_v53 }
 0xad6   :  { %v11509_v32 = vpop.f32.mrb[111].mxu1  ;;  %v3657_v60 = vpop.permute.xlu1 %3656 }
 0xada   :  { %v3209_v3 = vpop.f32.mrb[100].mxu0 }
 0xadb   :  { %v3266_v14 = vpack.c.bf16 %v3257_v46, %v3209_v3  ;;  %v11502_v10 = vpop.f32.mrb[101].mxu0 }
 0xadc   :  { %v3212_v33 = vpop.f32.mrb[102].mxu0 }
 0xadd   :  { %v11503_v26 = vpop.f32.mrb[103].mxu0  ;;  %11517 = vmatmul.mubr.msk.bf16.gmra.mrb[76].mxu0 %vm421_vm4, %v3266_v14 }
 0xade   :  { %11534 = vmatprep.mubr.msk.bf16.mxu0 %vm12680_vm3, %v12678_v30 }
 0xae0   :  { %v3400_v44 = vpop.f32.mrb[112].mxu1 }
 0xae1   :  { %v3756_v59 = vmul.f32 0.35355338, %v3400_v44  ;;  %v11524_v51 = vpop.f32.mrb[113].mxu1 }
 0xae2   :  { %v3403_v55 = vpop.f32.mrb[114].mxu1 }
 0xae3   :  { %v3764_v9 = vadd.f32 %v3756_v59, %v12985_v0  ;;  %v11525_v63 = vpop.f32.mrb[115].mxu1 }
 0xae5   :  { %11535 = vmatmul.mubr.msk.bf16.vlgmr.msra.gmra.mrb[104].mxu0 %vm421_vm4, %v3457_v40  ;;  %v3772_v15 = vsel %vm421_vm4, %v3764_v9, -inf }
 0xae6   :  { %11545 = vmatpush3.bf16.xpose.msra.mxu0 %v3564_v36  ;;  %3773 = vmax.xlane.f32.xlu1 %v3772_v15 }
 0xae7   :  { %11546 = vmatprep.mubr.msk.bf16.mxu0 %vm12680_vm3, %v12678_v30  ;;  %11556 = vmatprep.subr.bf16.mxu0 %v12678_v30 }
 0xae8   :  { %v3450_v28 = vpop.f32.mrb[116].mxu1 }
 0xae9   :  { %v3757_v13 = vmul.f32 0.35355338, %v3450_v28  ;;  %v11530_v34 = vpop.f32.mrb[117].mxu1 }
 0xaea   :  { %v3453_v47 = vpop.f32.mrb[118].mxu1 }
 0xaeb   :  { %v3765_v6 = vadd.f32 %v3757_v13, %v12993_v8  ;;  %v11531_v35 = vpop.f32.mrb[119].mxu1 }
 0xaed   :  { %11547 = vmatmul.mubr.msk.bf16.vlgmr.msra.gmra.mrb[108].mxu0 %vm421_vm4, %v3557_v7  ;;  %v3775_v16 = vsel %vm421_vm4, %v3765_v6, -inf }
 0xaee   :  { %11557 = vmatpush3.bf16.xpose.msra.mxu0 %v3664_v38  ;;  %3776 = vmax.xlane.f32.xlu0 %v3775_v16 }
 0xaef   :  { %11558 = vmatprep.mubr.msk.bf16.mxu0 %vm12680_vm3, %v12678_v30  ;;  %11568 = vmatprep.subr.bf16.mxu0 %v12678_v30 }
 0xaf0   :  { %v3550_v54 = vpop.f32.mrb[120].mxu1 }
 0xaf1   :  { %v3759_v57 = vmul.f32 0.35355338, %v3550_v54  ;;  %v11542_v12 = vpop.f32.mrb[121].mxu1 }
 0xaf2   :  { %v3553_v53 = vpop.f32.mrb[122].mxu1 }
 0xaf3   :  { %v3767_v5 = vadd.f32 %v3759_v57, %v13013_v37  ;;  %v11543_v46 = vpop.f32.mrb[123].mxu1 }
 0xaf5   :  { %11559 = vmatmul.mubr.msk.bf16.vlgmr.msra.gmra.mrb[112].mxu0 %vm421_vm4, %v3657_v60  ;;  %v3781_v4 = vsel %vm421_vm4, %v3767_v5, -inf }
 0xaf6   :  { %3782 = vmax.xlane.f32.xlu1 %v3781_v4  ;;  %11570 = vmatprep.mubr.msk.bf16.mxu0 %vm12680_vm3, %v12678_v30 }
 0xaf8   :  { %v3650_v22 = vpop.f32.mrb[124].mxu1 }
 0xaf9   :  { %v3761_v52 = vmul.f32 0.35355338, %v3650_v22  ;;  %v11554_v32 = vpop.f32.mrb[125].mxu1 }
 0xafa   :  { %v3653_v40 = vpop.f32.mrb[126].mxu1 }
 0xafb   :  { %v3769_v3 = vadd.f32 %v3761_v52, %v13034_v11  ;;  %v11555_v14 = vpop.f32.mrb[127].mxu1 }
 0xafd   :  { %v3787_v10 = vsel %vm421_vm4, %v3769_v3, -inf }
 0xafe   :  { %3788 = vmax.xlane.f32.xlu1 %v3787_v10 }
 0xb00   :  { %v3750_v33 = vpop.f32.mrb[128].mxu1 }
 0xb01   :  { %v3763_v26 = vmul.f32 0.35355338, %v3750_v33  ;;  %v11566_v39 = vpop.f32.mrb[129].mxu1 }
 0xb02   :  { %v3753_v44 = vpop.f32.mrb[130].mxu1 }
 0xb03   :  { %v3771_v59 = vadd.f32 %v3763_v26, %v13051_v43  ;;  %v11567_v51 = vpop.f32.mrb[131].mxu1 }
 0xb04   :  { %3868 = vrot.lane.b32.xlu0 %v12873_v45, %s15494_s24 }
 0xb05   :  { %v3793_v55 = vsel %vm421_vm4, %v3771_v59, -inf }
 0xb06   :  { %3794 = vmax.xlane.f32.xlu1 %v3793_v55 }
 0xb17   :  { %3916 = vrot.lane.b32.xlu1 %v12885_v50, %s15494_s24 }
 0xb1b   :  { %3964 = vrot.lane.b32.xlu1 %v12871_v42, %s15494_s24 }
 0xb73   :  { %v3774_v63 = vpop.xlane.xlu1 %3773 }
 0xb74   :  { %v3796_v7 = vsub.f32 %v3764_v9, %v3774_v63 }
 0xb76   :  { %v3804_v36 = vmul.f32 1.442695, %v3796_v7 }
 0xb78   :  { %12349 = vpow2.f32 %v3804_v36 }
 0xb7b   :  { %v3777_v15 = vpop.xlane.xlu0 %3776 }
 0xb7c   :  { %v3797_v28 = vsub.f32 %v3765_v6, %v3777_v15 }
 0xb7e   :  { %v3806_v13 = vmul.f32 1.442695, %v3797_v28 }
 0xb7f   :  { %v3869_v34 = vpop.permute.xlu0 %3868 }
 0xb80   :  { %12351 = vpow2.f32 %v3806_v13  ;;  %v3874_v45 = vsel %vm921_vm5, %v3869_v34, 0 }
 0xb81   :  { %11569 = vmatpush3.bf16.msra.mxu0 %v3874_v45 }
 0xb82   :  { %v13686_v49 = vpop.eup %12349  ;;  %11580 = vmatprep.subr.bf16.mxu0 %v12678_v30 }
 0xb83   :  { %v3783_v50 = vpop.xlane.xlu1 %3782  ;;  %v3820_v42 = vsel %vm421_vm4, %v13686_v49, 0.0 }
 0xb84   :  { %v3799_v47 = vsub.f32 %v3767_v5, %v3783_v50  ;;  %3821 = vadd.xlane.f32.xlu0 %v3820_v42 }
 0xb86   :  { %v3810_v9 = vmul.f32 1.442695, %v3799_v47 }
 0xb88   :  { %12353 = vpow2.f32 %v3810_v9 }
 0xb8a   :  { %v13691_v35 = vpop.eup %12351 }
 0xb8b   :  { %v3789_v6 = vpop.xlane.xlu1 %3788  ;;  %v3823_v38 = vsel %vm421_vm4, %v13691_v35, 0.0 }
 0xb8c   :  { %v3801_v16 = vsub.f32 %v3769_v3, %v3789_v6  ;;  %3824 = vadd.xlane.f32.xlu1 %v3823_v38 }
 0xb8e   :  { %v3814_v54 = vmul.f32 1.442695, %v3801_v16 }
 0xb90   :  { %12355 = vpow2.f32 %v3814_v54 }
 0xb92   :  { %v13695_v57 = vpop.eup %12353 }
 0xb93   :  { %v3795_v12 = vpop.xlane.xlu1 %3794  ;;  %v3829_v53 = vsel %vm421_vm4, %v13695_v57, 0.0 }
 0xb94   :  { %v3803_v5 = vsub.f32 %v3771_v59, %v3795_v12  ;;  %3830 = vadd.xlane.f32.xlu1 %v3829_v53 }
 0xb96   :  { %v3818_v46 = vmul.f32 1.442695, %v3803_v5 }
 0xb97   :  { %v3917_v60 = vpop.permute.xlu1 %3916 }
 0xb98   :  { %12357 = vpow2.f32 %v3818_v46  ;;  %v3922_v4 = vsel %vm921_vm5, %v3917_v60, 0 }
 0xb99   :  { %11575 = vmatpush3.bf16.msra.mxu1 %v3922_v4 }
 0xb9a   :  { %v13700_v22 = vpop.eup %12355  ;;  %11586 = vmatprep.subr.bf16.mxu1 %v12678_v30 }
 0xb9b   :  { %v3835_v52 = vsel %vm421_vm4, %v13700_v22, 0.0  ;;  %v3965_v47 = vpop.permute.xlu1 %3964 }
 0xb9c   :  { %3836 = vadd.xlane.f32.xlu1 %v3835_v52  ;;  %v3970_v54 = vsel %vm921_vm5, %v3965_v47, 0 }
 0xba2   :  { %v13705_v32 = vpop.eup %12357 }
 0xba3   :  { %v3841_v40 = vsel %vm421_vm4, %v13705_v32, 0.0 }
 0xba4   :  { %3842 = vadd.xlane.f32.xlu1 %v3841_v40 }
 0xbb5   :  { %4060 = vrot.lane.b32.xlu1 %v12891_v58, %s15494_s24 }
 0xbb8   :  { %v3500_v3 = vpop.f32.mrb[104].mxu0 }
 0xbb9   :  { %v3758_v14 = vmul.f32 0.35355338, %v3500_v3  ;;  %v11536_v10 = vpop.f32.mrb[105].mxu0  ;;  %4156 = vrot.lane.b32.xlu1 %v12893_v61, %s15494_s24 }
 0xbba   :  { %v3503_v33 = vpop.f32.mrb[106].mxu0 }
 0xbbb   :  { %v3766_v26 = vadd.f32 %v3758_v14, %v13003_v20  ;;  %v11537_v39 = vpop.f32.mrb[107].mxu0 }
 0xbbd   :  { %v3778_v44 = vsel %vm421_vm4, %v3766_v26, -inf }
 0xbbe   :  { %3779 = vmax.xlane.f32.xlu0 %v3778_v44 }
 0xbc0   :  { %v3600_v59 = vpop.f32.mrb[108].mxu0 }
 0xbc1   :  { %v3760_v51 = vmul.f32 0.35355338, %v3600_v59  ;;  %v11548_v55 = vpop.f32.mrb[109].mxu0 }
 0xbc2   :  { %v3603_v63 = vpop.f32.mrb[110].mxu0 }
 0xbc3   :  { %v3768_v7 = vadd.f32 %v3760_v51, %v13026_v2  ;;  %v11549_v58 = vpop.f32.mrb[111].mxu0 }
 0xbc5   :  { %v3784_v36 = vsel %vm421_vm4, %v3768_v7, -inf }
 0xbc6   :  { %3785 = vmax.xlane.f32.xlu0 %v3784_v36 }
 0xbc8   :  { %v3700_v15 = vpop.f32.mrb[112].mxu0 }
 0xbc9   :  { %v3762_v28 = vmul.f32 0.35355338, %v3700_v15  ;;  %v11560_v61 = vpop.f32.mrb[113].mxu0 }
 0xbca   :  { %v3703_v13 = vpop.f32.mrb[114].mxu0 }
 0xbcb   :  { %v3770_v34 = vadd.f32 %v3762_v28, %v13042_v31  ;;  %v11561_v45 = vpop.f32.mrb[115].mxu0 }
 0xbcd   :  { %v3790_v50 = vsel %vm421_vm4, %v3770_v34, -inf }
 0xbce   :  { %3791 = vmax.xlane.f32.xlu0 %v3790_v50 }
 0xbe4   :  { %4012 = vrot.lane.b32.xlu0 %v12880_v48, %s15494_s24 }
 0xc11   :  { %v3822_v42 = vpop.xlane.xlu0 %3821 }
 0xc12   :  { %12359 = vrcp.f32 %v3822_v42 }
 0xc19   :  { %v3825_v9 = vpop.xlane.xlu1 %3824 }
 0xc1a   :  { %12361 = vrcp.f32 %v3825_v9 }
 0xc1c   :  { %v12360_v6 = vpop.eup %12359 }
 0xc1d   :  { %v3852_v38 = vmul.f32 %v12360_v6, %v13686_v49 }
 0xc1f   :  { %v3860_v16 = vpack.c.bf16 %v3852_v38, %v3852_v38 }
 0xc21   :  { %11571 = vmatmul.mubr.msk.bf16.vlgmr.msra.gmra.mrb[116].mxu0 %vm421_vm4, %v3860_v16  ;;  %v3831_v46 = vpop.xlane.xlu1 %3830 }
 0xc22   :  { %11581 = vmatpush3.bf16.msra.mxu0 %v3970_v54  ;;  %11582 = vmatprep.mubr.msk.bf16.mxu0 %vm12680_vm3, %v12678_v30 }
 0xc23   :  { %11592 = vmatprep.subr.bf16.mxu0 %v12678_v30 }
 0xc24   :  { %v12362_v48 = vpop.eup %12361 }
 0xc25   :  { %v3853_v12 = vmul.f32 %v12362_v48, %v13691_v35 }
 0xc27   :  { %v3861_v53 = vpack.c.bf16 %v3853_v12, %v3853_v12 }
 0xc29   :  { %11577 = vmatmul.mubr.msk.bf16.vlgmr.msra.gmra.mrb[132].mxu1 %vm421_vm4, %v3861_v53  ;;  %v3837_v36 = vpop.xlane.xlu1 %3836 }
 0xc2a   :  { %11588 = vmatprep.mubr.msk.bf16.mxu1 %vm12680_vm3, %v12678_v30 }
 0xc31   :  { %v3843_v13 = vpop.xlane.xlu1 %3842 }
 0xc35   :  { %v4061_v47 = vpop.permute.xlu1 %4060 }
 0xc36   :  { %v4066_v38 = vsel %vm921_vm5, %v4061_v47, 0 }
 0xc4b   :  { %v3780_v49 = vpop.xlane.xlu0 %3779 }
 0xc4c   :  { %v3798_v5 = vsub.f32 %v3766_v26, %v3780_v49 }
 0xc4e   :  { %v3808_v60 = vmul.f32 1.442695, %v3798_v5 }
 0xc50   :  { %12363 = vpow2.f32 %v3808_v60 }
 0xc51   :  { %12365 = vrcp.f32 %v3831_v46 }
 0xc53   :  { %v3786_v4 = vpop.xlane.xlu0 %3785 }
 0xc54   :  { %v3800_v26 = vsub.f32 %v3768_v7, %v3786_v4 }
 0xc56   :  { %v3812_v44 = vmul.f32 1.442695, %v3800_v26 }
 0xc58   :  { %12367 = vpow2.f32 %v3812_v44 }
 0xc5a   :  { %v12364_v52 = vpop.eup %12363 }
 0xc5b   :  { %v12366_v40 = vpop.eup %12365  ;;  %v3792_v3 = vpop.xlane.xlu0 %3791  ;;  %v3826_v14 = vsel %vm421_vm4, %v12364_v52, 0.0 }
 0xc5c   :  { %3827 = vadd.xlane.f32.xlu0 %v3826_v14  ;;  %v3855_v35 = vmul.f32 %v12366_v40, %v13695_v57  ;;  %v3802_v59 = vsub.f32 %v3770_v34, %v3792_v3 }
 0xc5e   :  { %v3863_v39 = vpack.c.bf16 %v3855_v35, %v3855_v35  ;;  %v3816_v57 = vmul.f32 1.442695, %v3802_v59  ;;  %v4157_v35 = vpop.permute.xlu1 %4156 }
 0xc5f   :  { %v4013_v10 = vpop.permute.xlu0 %4012 }
 0xc60   :  { %v4018_v33 = vsel %vm921_vm5, %v4013_v10, 0  ;;  %12369 = vpow2.f32 %v3816_v57 }
 0xc61   :  { %11587 = vmatpush3.bf16.msra.mxu1 %v4018_v33  ;;  %12371 = vrcp.f32 %v3837_v36 }
 0xc62   :  { %11598 = vmatprep.subr.bf16.mxu1 %v12678_v30  ;;  %v12368_v51 = vpop.eup %12367 }
 0xc63   :  { %v3832_v55 = vsel %vm421_vm4, %v12368_v51, 0.0 }
 0xc64   :  { %11589 = vmatmul.mubr.msk.bf16.vlgmr.msra.gmra.mrb[136].mxu1 %vm421_vm4, %v3863_v39  ;;  %v4162_v39 = vsel %vm921_vm5, %v4157_v35, 0 }
 0xc65   :  { %11600 = vmatprep.mubr.msk.bf16.mxu1 %vm12680_vm3, %v12678_v30 }
 0xc6a   :  { %v12370_v63 = vpop.eup %12369 }
 0xc6b   :  { %v3838_v58 = vsel %vm421_vm4, %v12370_v63, 0.0 }
 0xc72   :  { %4108 = vrot.lane.b32.xlu0 %v12895_v62, %s15494_s24  ;;  %v12372_v62 = vpop.eup %12371 }
 0xc73   :  { %v3857_v15 = vmul.f32 %v12372_v62, %v13700_v22 }
 0xc75   :  { %v3865_v34 = vpack.c.bf16 %v3857_v15, %v3857_v15 }
 0xc91   :  { %3833 = vadd.xlane.f32.xlu0 %v3832_v55  ;;  %v4256_v55 = vld [vmem:[%s15477_s6 + $0xc] sm:$0xf] }
 0xc95   :  { %3839 = vadd.xlane.f32.xlu0 %v3838_v58  ;;  %v4270_v58 = vsel %vm921_vm5, %v4256_v55, 0 }
 0xcab   :  { %4204 = vrot.lane.b32.xlu0 %v12899_v1, %s15494_s24 }
 0xce9   :  { %v3828_v7 = vpop.xlane.xlu0 %3827 }
 0xcea   :  { %12373 = vrcp.f32 %v3828_v7 }
 0xceb   :  { %12375 = vrcp.f32 %v3843_v13 }
 0xced   :  { %v4109_v28 = vpop.permute.xlu0 %4108 }
 0xcee   :  { %v4114_v61 = vsel %vm921_vm5, %v4109_v28, 0 }
 0xcef   :  { %11599 = vmatpush3.bf16.msra.mxu1 %v4114_v61 }
 0xcf0   :  { %11610 = vmatprep.subr.bf16.mxu1 %v12678_v30 }
 0xcf2   :  { %11601 = vmatmul.mubr.msk.bf16.vlgmr.msra.gmra.mrb[140].mxu1 %vm421_vm4, %v3865_v34 }
 0xcf3   :  { %11612 = vmatprep.mubr.msk.bf16.mxu1 %vm12680_vm3, %v12678_v30 }
 0xcf4   :  { %v12374_v1 = vpop.eup %12373  ;;  %v3910_v45 = vpop.f32.mrb[116].mxu0 }
 0xcf5   :  { %v11572_v50 = vpop.f32.mrb[117].mxu0  ;;  %v3854_v42 = vmul.f32 %v12374_v1, %v12364_v52  ;;  %v12376_v5 = vpop.eup %12375 }
 0xcf6   :  { %v3913_v9 = vpop.f32.mrb[118].mxu0  ;;  %v3859_v60 = vmul.f32 %v12376_v5, %v13705_v32 }
 0xcf7   :  { %v11573_v22 = vpop.f32.mrb[119].mxu0  ;;  %v3862_v6 = vpack.c.bf16 %v3854_v42, %v3854_v42 }
 0xcf8   :  { %v3867_v3 = vpack.c.bf16 %v3859_v60, %v3859_v60 }
 0xcf9   :  { %11583 = vmatmul.mubr.msk.bf16.vlgmr.msra.gmra.mrb[120].mxu0 %vm421_vm4, %v3862_v6 }
 0xcfa   :  { %11593 = vmatpush3.bf16.msra.mxu0 %v4066_v38  ;;  %11594 = vmatprep.mubr.msk.bf16.mxu0 %vm12680_vm3, %v12678_v30 }
 0xcfb   :  { %11604 = vmatprep.subr.bf16.mxu0 %v12678_v30 }
 0xcfc   :  { %v3958_v16 = vpop.f32.mrb[132].mxu1 }
 0xcfd   :  { %v4252_v54 = vpack.c.bf16 %v3958_v16, %v3910_v45  ;;  %v11578_v48 = vpop.f32.mrb[133].mxu1 }
 0xcfe   :  { %v3961_v12 = vpop.f32.mrb[134].mxu1 }
 0xcff   :  { %v11579_v53 = vpop.f32.mrb[135].mxu1 }
 0xd1e   :  { %v3834_v49 = vpop.xlane.xlu0 %3833 }
 0xd1f   :  { %12377 = vrcp.f32 %v3834_v49 }
 0xd22   :  { %v3840_v46 = vpop.xlane.xlu0 %3839 }
 0xd23   :  { %12379 = vrcp.f32 %v3840_v46  ;;  %v10642_v46 = vld [vmem:[%s15478_s7] ss:$0 sm:$0xff] }
 0xd26   :  { %v4205_v4 = vpop.permute.xlu0 %4204 }
 0xd27   :  { %v4210_v52 = vsel %vm921_vm5, %v4205_v4, 0 }
 0xd28   :  { %11611 = vmatpush3.bf16.msra.mxu1 %v4210_v52 }
 0xd29   :  { %v12378_v40 = vpop.eup %12377 }
 0xd2a   :  { %v3856_v14 = vmul.f32 %v12378_v40, %v12368_v51 }
 0xd2b   :  { %11613 = vmatmul.mubr.msk.bf16.vlgmr.msra.gmra.mrb[144].mxu1 %vm421_vm4, %v3867_v3 }
 0xd2c   :  { %v3864_v10 = vpack.c.bf16 %v3856_v14, %v3856_v14 }
 0xd2d   :  { %v12380_v33 = vpop.eup %12379 }
 0xd2e   :  { %11595 = vmatmul.mubr.msk.bf16.vlgmr.msra.gmra.mrb[124].mxu0 %vm421_vm4, %v3864_v10  ;;  %v3858_v32 = vmul.f32 %v12380_v33, %v12370_v63 }
 0xd2f   :  { %11605 = vmatpush3.bf16.msra.mxu0 %v4162_v39  ;;  %11606 = vmatprep.mubr.msk.bf16.mxu0 %vm12680_vm3, %v12678_v30 }
 0xd30   :  { %v3866_v26 = vpack.c.bf16 %v3858_v32, %v3858_v32  ;;  %12174 = vmatprep.subr.msk.bf16.mxu0 %vm921_vm5, %v4256_v55 }
 0xd36   :  { %11607 = vmatmul.mubr.msk.bf16.vlgmr.msra.gmra.mrb[128].mxu0 %vm421_vm4, %v3866_v26 }
 0xd37   :  { %v4054_v44 = vpop.f32.mrb[136].mxu1  ;;  %11618 = vmatprep.mubr.msk.bf16.mxu0 %vm421_vm4, %v4252_v54  ;;  %11617 = vmatpush3.bf16.msra.mxu0 %v4270_v58 }
 0xd38   :  { %v11590_v59 = vpop.f32.mrb[137].mxu1  ;;  %11638 = vmatprep.subr.bf16.mxu0 %v12678_v30 }
 0xd39   :  { %v4057_v57 = vpop.f32.mrb[138].mxu1 }
 0xd3a   :  { %v11591_v51 = vpop.f32.mrb[139].mxu1 }
 0xdc5   :  { %v4150_v63 = vpop.f32.mrb[140].mxu1 }
 0xdc6   :  { %v11602_v36 = vpop.f32.mrb[141].mxu1 }
 0xdc7   :  { %v4153_v62 = vpop.f32.mrb[142].mxu1 }
 0xdc8   :  { %v11603_v7 = vpop.f32.mrb[143].mxu1 }
 0xdcc   :  { %v4006_v15 = vpop.f32.mrb[120].mxu0 }
 0xdcd   :  { %v4253_v28 = vpack.c.bf16 %v4054_v44, %v4006_v15  ;;  %v11584_v61 = vpop.f32.mrb[121].mxu0 }
 0xdce   :  { %v4009_v13 = vpop.f32.mrb[122].mxu0 }
 0xdcf   :  { %v11585_v34 = vpop.f32.mrb[123].mxu0  ;;  %11619 = vmatmul.mubr.msk.bf16.vlgmr.msra.gmra.mrb[72].mxu0 %vm421_vm4, %v4253_v28 }
 0xdfe   :  { %v4246_v1 = vpop.f32.mrb[144].mxu1 }
 0xdff   :  { %v11614_v45 = vpop.f32.mrb[145].mxu1 }
 0xe00   :  { %v4249_v50 = vpop.f32.mrb[146].mxu1 }
 0xe01   :  { %v4102_v42 = vpop.f32.mrb[124].mxu0  ;;  %v11615_v47 = vpop.f32.mrb[147].mxu1 }
 0xe02   :  { %v4254_v9 = vpack.c.bf16 %v4150_v63, %v4102_v42  ;;  %v11596_v22 = vpop.f32.mrb[125].mxu0 }
 0xe03   :  { %v4105_v6 = vpop.f32.mrb[126].mxu0 }
 0xe04   :  { %v11597_v38 = vpop.f32.mrb[127].mxu0  ;;  %11622 = vmatprep.mubr.msk.bf16.mxu0 %vm421_vm4, %v4254_v9 }
 0xe09   :  { %v4198_v16 = vpop.f32.mrb[128].mxu0 }
 0xe0a   :  { %v4255_v54 = vpack.c.bf16 %v4246_v1, %v4198_v16  ;;  %v11608_v48 = vpop.f32.mrb[129].mxu0 }
 0xe0b   :  { %v4201_v12 = vpop.f32.mrb[130].mxu0 }
 0xe0c   :  { %v11609_v53 = vpop.f32.mrb[131].mxu0  ;;  %11623 = vmatmul.mubr.msk.bf16.gmra.mrb[76].mxu0 %vm421_vm4, %v4255_v54 }
 0xe0d   :  { %11640 = vmatprep.mubr.msk.bf16.mxu0 %vm12680_vm3, %v12678_v30 }
 0xea2   :  { %v11620_v49 = vpop.f32.mrb[72].mxu0 }
 0xea3   :  { %v4347_v5 = vadd.f32 %v11620_v49, %v12829_v17  ;;  %v4306_v60 = vpop.f32.mrb[73].mxu0 }
 0xea4   :  { %v4345_v4 = vadd.f32 %v4306_v60, %v12831_v18  ;;  %v11621_v52 = vpop.f32.mrb[74].mxu0 }
 0xea5   :  { %v4348_v40 = vadd.f32 %v11621_v52, %v12833_v19  ;;  %v4309_v3 = vpop.f32.mrb[75].mxu0  ;;  %v4362_v17 = vadd.f32 %v10642_v46, %v4347_v5  ;;  %v12223_v5 = vld [vmem:[%s15501_s19 + $0x10] sm:$0xff]  }
 0xea6   :  { %v4360_v14 = vadd.f32 %v10642_v46, %v4345_v4  ;;  %v4346_v35 = vadd.f32 %v4309_v3, %v12837_v21  ;;  %11626 = vmatprep.subr.bf16.mxu1 %v12223_v5 }
 0xea7   :  { %v4363_v10 = vadd.f32 %v10642_v46, %v4348_v40  ;;  %v4374_v18 = vsel %vm317_vm2, %v4362_v17, 0.0  ;;  %11627 = vmatpush3.bf16.msra.mxu1 %v12223_v5 }
 0xea8   :  { %v4361_v33 = vadd.f32 %v10642_v46, %v4346_v35  ;;  %v4368_v39 = vsel %vm317_vm2, %v4360_v14, 0.0 }
 0xea9   :  { %4369 = vadd.xlane.f32.xlu1 %v4368_v39  ;;  %v4377_v26 = vsel %vm317_vm2, %v4363_v10, 0.0 }
 0xeaa   :  { %v4371_v32 = vsel %vm317_vm2, %v4361_v33, 0.0 }
 0xeab   :  { %4372 = vadd.xlane.f32.xlu0 %v4371_v32 }
 0xead   :  { %4378 = vadd.xlane.f32.xlu1 %v4377_v26 }
 0xeaf   :  { %4375 = vadd.xlane.f32.xlu0 %v4374_v18 }
 0xedf   :  { %v11624_v19 = vpop.f32.mrb[76].mxu0 }
 0xee0   :  { %v4351_v44 = vadd.f32 %v11624_v19, %v12843_v23  ;;  %v4322_v59 = vpop.f32.mrb[77].mxu0 }
 0xee1   :  { %v4349_v21 = vadd.f32 %v4322_v59, %v12845_v24  ;;  %v11625_v57 = vpop.f32.mrb[78].mxu0 }
 0xee2   :  { %v4366_v51 = vadd.f32 %v10642_v46, %v4351_v44  ;;  %v4352_v55 = vadd.f32 %v11625_v57, %v12847_v25  ;;  %v4325_v58 = vpop.f32.mrb[79].mxu0 }
 0xee3   :  { %v4364_v63 = vadd.f32 %v10642_v46, %v4349_v21  ;;  %v4350_v36 = vadd.f32 %v4325_v58, %v12851_v27 }
 0xee4   :  { %v4367_v62 = vadd.f32 %v10642_v46, %v4352_v55  ;;  %v4386_v23 = vsel %vm317_vm2, %v4366_v51, 0.0 }
 0xee5   :  { %v4365_v7 = vadd.f32 %v10642_v46, %v4350_v36  ;;  %v4380_v15 = vsel %vm317_vm2, %v4364_v63, 0.0  ;;  %v12224_v46 = vld [vmem:[%s15501_s19 + $0x18] sm:$0xff]  }
 0xee6   :  { %4381 = vadd.xlane.f32.xlu0 %v4380_v15  ;;  %v4389_v24 = vsel %vm317_vm2, %v4367_v62, 0.0  ;;  %11628 = vmatprep.subr.bf16.mxu1 %v12224_v46 }
 0xee7   :  { %v4383_v28 = vsel %vm317_vm2, %v4365_v7, 0.0  ;;  %11629 = vmatpush3.bf16.msra.mxu1 %v12224_v46 }
 0xee8   :  { %4384 = vadd.xlane.f32.xlu1 %v4383_v28  ;;  %11644 = vmatprep.subr.bf16.mxu1 %v12678_v30 }
 0xeea   :  { %4387 = vadd.xlane.f32.xlu0 %v4386_v23 }
 0xeec   :  { %4390 = vadd.xlane.f32.xlu1 %v4389_v24 }
 0xf36   :  { %v4370_v61 = vpop.xlane.xlu1 %4369 }
 0xf37   :  { %v4393_v25 = vmul.f32 0.03125, %v4370_v61 }
 0xf38   :  { %v4373_v13 = vpop.xlane.xlu0 %4372 }
 0xf39   :  { %v13794_v34 = vsub.f32 %v4360_v14, %v4393_v25  ;;  %v4394_v27 = vmul.f32 0.03125, %v4373_v13 }
 0xf3a   :  { %v4379_v1 = vpop.xlane.xlu1 %4378 }
 0xf3b   :  { %v13796_v45 = vsub.f32 %v4361_v33, %v4394_v27  ;;  %v4396_v50 = vmul.f32 0.03125, %v4379_v1  ;;  %v4409_v42 = vmul.f32 %v13794_v34, %v13794_v34  ;;  %v10643_v27 = vld [vmem:[%s15479_s8] ss:$0 sm:$0xff] }
 0xf3c   :  { %v4376_v47 = vpop.xlane.xlu0 %4375 }
 0xf3d   :  { %v13800_v9 = vsub.f32 %v4363_v10, %v4396_v50  ;;  %v4395_v22 = vmul.f32 0.03125, %v4376_v47  ;;  %v4417_v6 = vsel %vm317_vm2, %v4409_v42, 0.0  ;;  %v4410_v38 = vmul.f32 %v13796_v45, %v13796_v45 }
 0xf3e   :  { %4418 = vadd.xlane.f32.xlu0 %v4417_v6 }
 0xf3f   :  { %v13805_v16 = vsub.f32 %v4362_v17, %v4395_v22  ;;  %v4420_v54 = vsel %vm317_vm2, %v4410_v38, 0.0  ;;  %v4412_v48 = vmul.f32 %v13800_v9, %v13800_v9  ;;  %v10644_v22 = vld [vmem:[%s15480_s9] ss:$0 sm:$0xff] }
 0xf40   :  { %4421 = vadd.xlane.f32.xlu1 %v4420_v54 }
 0xf41   :  { %v4411_v12 = vmul.f32 %v13805_v16, %v13805_v16  ;;  %v4426_v53 = vsel %vm317_vm2, %v4412_v48, 0.0 }
 0xf43   :  { %v4423_v49 = vsel %vm317_vm2, %v4411_v12, 0.0 }
 0xf44   :  { %4427 = vadd.xlane.f32.xlu1 %v4426_v53  ;;  %4424 = vadd.xlane.f32.xlu0 %v4423_v49 }
 0xf73   :  { %v4382_v60 = vpop.xlane.xlu0 %4381 }
 0xf74   :  { %v4397_v4 = vmul.f32 0.03125, %v4382_v60 }
 0xf75   :  { %v4385_v52 = vpop.xlane.xlu1 %4384 }
 0xf76   :  { %v13821_v40 = vsub.f32 %v4364_v63, %v4397_v4  ;;  %v4398_v3 = vmul.f32 0.03125, %v4385_v52 }
 0xf77   :  { %v4388_v14 = vpop.xlane.xlu0 %4387 }
 0xf78   :  { %v13823_v35 = vsub.f32 %v4365_v7, %v4398_v3  ;;  %v4399_v10 = vmul.f32 0.03125, %v4388_v14  ;;  %v4413_v33 = vmul.f32 %v13821_v40, %v13821_v40 }
 0xf79   :  { %v4391_v39 = vpop.xlane.xlu1 %4390 }
 0xf7a   :  { %v13827_v17 = vsub.f32 %v4366_v51, %v4399_v10  ;;  %v4400_v32 = vmul.f32 0.03125, %v4391_v39  ;;  %v4429_v26 = vsel %vm317_vm2, %v4413_v33, 0.0  ;;  %v4414_v18 = vmul.f32 %v13823_v35, %v13823_v35 }
 0xf7b   :  { %4430 = vadd.xlane.f32.xlu0 %v4429_v26 }
 0xf7c   :  { %v13832_v19 = vsub.f32 %v4367_v62, %v4400_v32  ;;  %v4432_v44 = vsel %vm317_vm2, %v4414_v18, 0.0  ;;  %v4415_v59 = vmul.f32 %v13827_v17, %v13827_v17 }
 0xf7d   :  { %4433 = vadd.xlane.f32.xlu1 %v4432_v44 }
 0xf7e   :  { %v4435_v21 = vsel %vm317_vm2, %v4415_v59, 0.0  ;;  %v4416_v57 = vmul.f32 %v13832_v19, %v13832_v19 }
 0xf7f   :  { %4436 = vadd.xlane.f32.xlu0 %v4435_v21 }
 0xf80   :  { %v4438_v51 = vsel %vm317_vm2, %v4416_v57, 0.0 }
 0xf81   :  { %4439 = vadd.xlane.f32.xlu1 %v4438_v51 }
 0xfcb   :  { %v4419_v55 = vpop.xlane.xlu0 %4418 }
 0xfcc   :  { %v4441_v58 = vmul.f32 0.03125, %v4419_v55 }
 0xfcd   :  { %v4422_v63 = vpop.xlane.xlu1 %4421 }
 0xfce   :  { %v4449_v36 = vadd.f32 1e-05, %v4441_v58  ;;  %v4442_v62 = vmul.f32 0.03125, %v4422_v63 }
 0xfd0   :  { %12381 = vrsqrt.f32 %v4449_v36  ;;  %v4450_v7 = vadd.f32 1e-05, %v4442_v62 }
 0xfd1   :  { %v4428_v15 = vpop.xlane.xlu1 %4427  ;;  %v4425_v28 = vpop.xlane.xlu0 %4424 }
 0xfd2   :  { %12383 = vrsqrt.f32 %v4450_v7  ;;  %v4444_v23 = vmul.f32 0.03125, %v4428_v15  ;;  %v4443_v24 = vmul.f32 0.03125, %v4425_v28 }
 0xfd4   :  { %v4452_v61 = vadd.f32 1e-05, %v4444_v23  ;;  %v4451_v25 = vadd.f32 1e-05, %v4443_v24 }
 0xfd6   :  { %12385 = vrsqrt.f32 %v4452_v61 }
 0xfd7   :  { %12387 = vrsqrt.f32 %v4451_v25 }
 0xfda   :  { %v12382_v13 = vpop.eup %12381 }
 0xfdb   :  { %v4465_v1 = vmul.f32 %v12382_v13, %v13794_v34 }
 0xfdc   :  { %v12384_v50 = vpop.eup %12383 }
 0xfdd   :  { %v4466_v42 = vmul.f32 %v12384_v50, %v13796_v45  ;;  %v4480_v47 = vmul.f32 %v10643_v27, %v4465_v1 }
 0xfdf   :  { %v4481_v6 = vmul.f32 %v10643_v27, %v4466_v42  ;;  %v13850_v12 = vadd.f32 %v10644_v22, %v4480_v47 }
 0xfe0   :  { %v12386_v38 = vpop.eup %12385 }
 0xfe1   :  { %v12388_v54 = vpop.eup %12387  ;;  %v4468_v48 = vmul.f32 %v12386_v38, %v13800_v9  ;;  %v13852_v53 = vadd.f32 %v10644_v22, %v4481_v6 }
 0xfe2   :  { %v4467_v49 = vmul.f32 %v12388_v54, %v13805_v16 }
 0xfe3   :  { %v4483_v34 = vmul.f32 %v10643_v27, %v4468_v48  ;;  %v4503_v45 = vpack.c.bf16 %v13852_v53, %v13850_v12 }
 0xfe4   :  { %v4482_v5 = vmul.f32 %v10643_v27, %v4467_v49 }
 0xfe5   :  { %11630 = vmatprep.mubr.msk.bf16.mxu1 %vm317_vm2, %v4503_v45  ;;  %v13858_v46 = vadd.f32 %v10644_v22, %v4483_v34 }
 0xfe6   :  { %v13860_v60 = vadd.f32 %v10644_v22, %v4482_v5 }
 0xfe8   :  { %v4504_v9 = vpack.c.bf16 %v13858_v46, %v13860_v60 }
 0xfea   :  { %11631 = vmatmul.mubr.msk.bf16.vlgmr.msra.gmra.mrb[148].mxu1 %vm317_vm2, %v4504_v9 }
0x1008   :  { %v4431_v4 = vpop.xlane.xlu0 %4430 }
0x1009   :  { %v4445_v52 = vmul.f32 0.03125, %v4431_v4 }
0x100a   :  { %v4434_v3 = vpop.xlane.xlu1 %4433 }
0x100b   :  { %v4453_v16 = vadd.f32 1e-05, %v4445_v52  ;;  %v4446_v14 = vmul.f32 0.03125, %v4434_v3 }
0x100c   :  { %v4437_v10 = vpop.xlane.xlu0 %4436 }
0x100d   :  { %12389 = vrsqrt.f32 %v4453_v16  ;;  %v4454_v33 = vadd.f32 1e-05, %v4446_v14  ;;  %v4447_v39 = vmul.f32 0.03125, %v4437_v10 }
0x100e   :  { %v4440_v32 = vpop.xlane.xlu1 %4439 }
0x100f   :  { %12391 = vrsqrt.f32 %v4454_v33  ;;  %v4455_v26 = vadd.f32 1e-05, %v4447_v39  ;;  %v4448_v18 = vmul.f32 0.03125, %v4440_v32 }
0x1011   :  { %12393 = vrsqrt.f32 %v4455_v26  ;;  %v4456_v44 = vadd.f32 1e-05, %v4448_v18 }
0x1013   :  { %12395 = vrsqrt.f32 %v4456_v44 }
0x1017   :  { %v12390_v59 = vpop.eup %12389 }
0x1018   :  { %v4469_v21 = vmul.f32 %v12390_v59, %v13821_v40 }
0x1019   :  { %v12392_v57 = vpop.eup %12391 }
0x101a   :  { %v4470_v51 = vmul.f32 %v12392_v57, %v13823_v35  ;;  %v4484_v55 = vmul.f32 %v10643_v27, %v4469_v21 }
0x101b   :  { %v12394_v58 = vpop.eup %12393 }
0x101c   :  { %v4485_v63 = vmul.f32 %v10643_v27, %v4470_v51  ;;  %v4471_v36 = vmul.f32 %v12394_v58, %v13827_v17  ;;  %v13868_v7 = vadd.f32 %v10644_v22, %v4484_v55 }
0x101d   :  { %v12396_v62 = vpop.eup %12395 }
0x101e   :  { %v13870_v15 = vadd.f32 %v10644_v22, %v4485_v63  ;;  %v4472_v28 = vmul.f32 %v12396_v62, %v13832_v19  ;;  %v4486_v23 = vmul.f32 %v10643_v27, %v4471_v36  ;;  %v10650_v19 = vld [vmem:[%s15475_s5 + $0x1] ss:$0 sm:$0xff] }
0x1020   :  { %v4505_v24 = vpack.c.bf16 %v13870_v15, %v13868_v7  ;;  %v4487_v40 = vmul.f32 %v10643_v27, %v4472_v28  ;;  %v13876_v35 = vadd.f32 %v10644_v22, %v4486_v23 }
0x1022   :  { %11634 = vmatprep.mubr.msk.bf16.mxu1 %vm317_vm2, %v4505_v24  ;;  %v13878_v61 = vadd.f32 %v10644_v22, %v4487_v40 }
0x1024   :  { %v4506_v17 = vpack.c.bf16 %v13878_v61, %v13876_v35 }
0x1026   :  { %11635 = vmatmul.mubr.msk.bf16.gmra.mrb[152].mxu1 %vm317_vm2, %v4506_v17 }
0x1027   :  { %11646 = vmatprep.mubr.msk.bf16.mxu1 %vm12680_vm3, %v12678_v30 }
0x10bd   :  { %v11632_v25 = vpop.f32.mrb[148].mxu1 }
0x10be   :  { %v4578_v13 = vpop.f32.mrb[149].mxu1  ;;  %v4587_v6 = vadd.f32 %v11632_v25, %v10650_v19 }
0x10bf   :  { %v4579_v27 = vadd.f32 %v10650_v19, %v4578_v13  ;;  %v11633_v1 = vpop.f32.mrb[150].mxu1 }
0x10c0   :  { %v4581_v50 = vpop.f32.mrb[151].mxu1  ;;  %v4590_v47 = vadd.f32 %v11633_v1, %v10650_v19  ;;  %v13898_v48 = vpack.c.bf16 %v4587_v6, %v4587_v6 }
0x10c1   :  { %v13888_v42 = vpack.c.bf16 %v4579_v27, %v4579_v27  ;;  %v4582_v22 = vadd.f32 %v10650_v19, %v4581_v50 }
0x10c2   :  { %v13894_v54 = vpack.c.bf16 %v4590_v47, %v4590_v47 }
0x10c3   :  { %v13890_v38 = vpack.c.bf16 %v4582_v22, %v4582_v22  ;;  %4633 = vrot.lane.b32.xlu0 %v13888_v42, %s12681_s26 }
0x10c5   :  { %4681 = vrot.lane.b32.xlu1 %v13890_v38, %s12681_s26 }
0x10c7   :  { %4777 = vrot.lane.b32.xlu0 %v13894_v54, %s12681_s26 }
0x10c9   :  { %4729 = vrot.lane.b32.xlu1 %v13898_v48, %s12681_s26 }
0x10f9   :  { %v11636_v49 = vpop.f32.mrb[152].mxu1 }
0x10fa   :  { %v4603_v34 = vadd.f32 %v11636_v49, %v10650_v19  ;;  %v4594_v45 = vpop.f32.mrb[153].mxu1 }
0x10fb   :  { %v4595_v5 = vadd.f32 %v10650_v19, %v4594_v45  ;;  %v11637_v9 = vpop.f32.mrb[154].mxu1 }
0x10fc   :  { %v4606_v4 = vadd.f32 %v11637_v9, %v10650_v19  ;;  %v4597_v52 = vpop.f32.mrb[155].mxu1  ;;  %v13910_v10 = vpack.c.bf16 %v4603_v34, %v4603_v34 }
0x10fd   :  { %v13904_v3 = vpack.c.bf16 %v4595_v5, %v4595_v5  ;;  %v4598_v16 = vadd.f32 %v10650_v19, %v4597_v52 }
0x10fe   :  { %v13914_v33 = vpack.c.bf16 %v4606_v4, %v4606_v4 }
0x10ff   :  { %v13906_v14 = vpack.c.bf16 %v4598_v16, %v4598_v16  ;;  %4825 = vrot.lane.b32.xlu1 %v13904_v3, %s12681_s26 }
0x1101   :  { %4873 = vrot.lane.b32.xlu0 %v13906_v14, %s12681_s26 }
0x1103   :  { %4921 = vrot.lane.b32.xlu1 %v13910_v10, %s12681_s26 }
0x1105   :  { %4969 = vrot.lane.b32.xlu0 %v13914_v33, %s12681_s26 }
0x1107   :  { %5177 = vrot.lane.b32.xlu1 %v13890_v38, %s12682_s29 }
0x1109   :  { %5129 = vrot.lane.b32.xlu0 %v13888_v42, %s12682_s29 }
0x110b   :  { %5225 = vrot.lane.b32.xlu1 %v13898_v48, %s12682_s29 }
0x110d   :  { %5273 = vrot.lane.b32.xlu0 %v13894_v54, %s12682_s29 }
0x110f   :  { %5321 = vrot.lane.b32.xlu1 %v13904_v3, %s12682_s29 }
0x1135   :  { %v4634_v39 = vpop.permute.xlu0 %4633 }
0x1136   :  { %v4639_v32 = vsel %vm421_vm4, %v4634_v39, 0 }
0x1137   :  { %v4682_v26 = vpop.permute.xlu1 %4681  ;;  %11639 = vmatpush3.bf16.xpose.msra.mxu0 %v4639_v32 }
0x1138   :  { %v4687_v18 = vsel %vm421_vm4, %v4682_v26, 0  ;;  %11650 = vmatprep.subr.bf16.mxu0 %v12678_v30 }
0x1139   :  { %11645 = vmatpush3.bf16.xpose.msra.mxu1 %v4687_v18  ;;  %v4778_v59 = vpop.permute.xlu0 %4777 }
0x113a   :  { %11656 = vmatprep.subr.bf16.mxu1 %v12678_v30  ;;  %v4783_v57 = vsel %vm421_vm4, %v4778_v59, 0 }
0x113b   :  { %v4730_v44 = vpop.permute.xlu1 %4729 }
0x113c   :  { %v4735_v21 = vsel %vm421_vm4, %v4730_v44, 0 }
0x113e   :  { %11641 = vmatmul.mubr.msk.bf16.vlgmr.msra.gmra.mrb[132].mxu0 %vm421_vm4, %v13888_v42 }
0x113f   :  { %11651 = vmatpush3.bf16.xpose.msra.mxu0 %v4735_v21  ;;  %11652 = vmatprep.mubr.msk.bf16.mxu0 %vm12680_vm3, %v12678_v30 }
0x1140   :  { %11647 = vmatmul.mubr.msk.bf16.vlgmr.msra.gmra.mrb[156].mxu1 %vm421_vm4, %v13890_v38  ;;  %11662 = vmatprep.subr.bf16.mxu0 %v12678_v30 }
0x1141   :  { %11657 = vmatpush3.bf16.xpose.msra.mxu1 %v4783_v57  ;;  %11658 = vmatprep.mubr.msk.bf16.mxu1 %vm12680_vm3, %v12678_v30 }
0x1142   :  { %11668 = vmatprep.subr.bf16.mxu1 %v12678_v30 }
0x1146   :  { %11653 = vmatmul.mubr.msk.bf16.vlgmr.msra.gmra.mrb[136].mxu0 %vm421_vm4, %v13898_v48 }
0x1147   :  { %11664 = vmatprep.mubr.msk.bf16.mxu0 %vm12680_vm3, %v12678_v30 }
0x1148   :  { %11659 = vmatmul.mubr.msk.bf16.vlgmr.msra.gmra.mrb[160].mxu1 %vm421_vm4, %v13894_v54 }
0x1149   :  { %11670 = vmatprep.mubr.msk.bf16.mxu1 %vm12680_vm3, %v12678_v30 }
0x1171   :  { %v4826_v51 = vpop.permute.xlu1 %4825 }
0x1172   :  { %v4831_v55 = vsel %vm421_vm4, %v4826_v51, 0 }
0x1173   :  { %11663 = vmatpush3.bf16.xpose.msra.mxu0 %v4831_v55  ;;  %v4874_v58 = vpop.permute.xlu0 %4873 }
0x1174   :  { %v4879_v63 = vsel %vm421_vm4, %v4874_v58, 0  ;;  %11674 = vmatprep.subr.bf16.mxu0 %v12678_v30 }
0x1175   :  { %11669 = vmatpush3.bf16.xpose.msra.mxu1 %v4879_v63  ;;  %v4922_v36 = vpop.permute.xlu1 %4921 }
0x1176   :  { %11680 = vmatprep.subr.bf16.mxu1 %v12678_v30  ;;  %v4927_v28 = vsel %vm421_vm4, %v4922_v36, 0 }
0x1177   :  { %v4970_v62 = vpop.permute.xlu0 %4969 }
0x1178   :  { %v4975_v23 = vsel %vm421_vm4, %v4970_v62, 0 }
0x1179   :  { %v5178_v40 = vpop.permute.xlu1 %5177 }
0x117a   :  { %11665 = vmatmul.mubr.msk.bf16.vlgmr.msra.gmra.mrb[140].mxu0 %vm421_vm4, %v13904_v3  ;;  %v5183_v19 = vsel %vm921_vm5, %v5178_v40, 0 }
0x117b   :  { %11675 = vmatpush3.bf16.xpose.msra.mxu0 %v4927_v28  ;;  %11676 = vmatprep.mubr.msk.bf16.mxu0 %vm12680_vm3, %v12678_v30  ;;  %v5130_v24 = vpop.permute.xlu0 %5129 }
0x117c   :  { %11671 = vmatmul.mubr.msk.bf16.vlgmr.msra.gmra.mrb[164].mxu1 %vm421_vm4, %v13906_v14  ;;  %11686 = vmatprep.subr.bf16.mxu0 %v12678_v30  ;;  %v5135_v17 = vsel %vm921_vm5, %v5130_v24, 0 }
0x117d   :  { %11681 = vmatpush3.bf16.xpose.msra.mxu1 %v4975_v23  ;;  %11682 = vmatprep.mubr.msk.bf16.mxu1 %vm12680_vm3, %v12678_v30 }
0x117e   :  { %11692 = vmatprep.subr.bf16.mxu1 %v12678_v30 }
0x1182   :  { %11677 = vmatmul.mubr.msk.bf16.vlgmr.msra.gmra.mrb[144].mxu0 %vm421_vm4, %v13910_v10 }
0x1183   :  { %11687 = vmatpush3.bf16.msra.mxu0 %v5135_v17  ;;  %11688 = vmatprep.mubr.msk.bf16.mxu0 %vm12680_vm3, %v12678_v30 }
0x1184   :  { %11683 = vmatmul.mubr.msk.bf16.vlgmr.msra.gmra.mrb[168].mxu1 %vm421_vm4, %v13914_v33  ;;  %11698 = vmatprep.subr.bf16.mxu0 %v12678_v30 }
0x1185   :  { %11693 = vmatpush3.bf16.msra.mxu1 %v5183_v19  ;;  %11694 = vmatprep.mubr.msk.bf16.mxu1 %vm12680_vm3, %v12678_v30 }
0x1186   :  { %11704 = vmatprep.subr.bf16.mxu1 %v12678_v30 }
0x1211   :  { %v4675_v25 = vpop.f32.mrb[132].mxu0 }
0x1212   :  { %v5017_v13 = vmul.f32 0.35355338, %v4675_v25  ;;  %v11642_v27 = vpop.f32.mrb[133].mxu0 }
0x1213   :  { %v4678_v1 = vpop.f32.mrb[134].mxu0  ;;  %v4723_v50 = vpop.f32.mrb[156].mxu1 }
0x1214   :  { %v13983_v47 = vadd.f32 %v5017_v13, %v12985_v0  ;;  %v5018_v22 = vmul.f32 0.35355338, %v4723_v50  ;;  %v11643_v6 = vpop.f32.mrb[135].mxu0  ;;  %v11648_v49 = vpop.f32.mrb[157].mxu1 }
0x1215   :  { %v4726_v34 = vpop.f32.mrb[158].mxu1 }
0x1216   :  { %v13986_v45 = vadd.f32 %v5018_v22, %v12993_v8  ;;  %v11649_v5 = vpop.f32.mrb[159].mxu1  ;;  %v5033_v9 = vsel %vm421_vm4, %v13983_v47, -inf }
0x1217   :  { %5034 = vmax.xlane.f32.xlu1 %v5033_v9 }
0x1218   :  { %v5036_v4 = vsel %vm421_vm4, %v13986_v45, -inf }
0x1219   :  { %5037 = vmax.xlane.f32.xlu0 %v5036_v4  ;;  %v4771_v52 = vpop.f32.mrb[136].mxu0 }
0x121a   :  { %v5019_v16 = vmul.f32 0.35355338, %v4771_v52  ;;  %v11654_v39 = vpop.f32.mrb[137].mxu0 }
0x121b   :  { %v4774_v32 = vpop.f32.mrb[138].mxu0  ;;  %v4819_v26 = vpop.f32.mrb[160].mxu1 }
0x121c   :  { %v5027_v18 = vadd.f32 %v5019_v16, %v13003_v20  ;;  %v5020_v44 = vmul.f32 0.35355338, %v4819_v26  ;;  %v11655_v59 = vpop.f32.mrb[139].mxu0  ;;  %v11660_v21 = vpop.f32.mrb[161].mxu1 }
0x121d   :  { %v4822_v57 = vpop.f32.mrb[162].mxu1 }
0x121e   :  { %v5028_v51 = vadd.f32 %v5020_v44, %v13013_v37  ;;  %v11661_v55 = vpop.f32.mrb[163].mxu1  ;;  %v5039_v58 = vsel %vm421_vm4, %v5027_v18, -inf  ;;  %v14014_v57 = vpop.permute.xlu1 %5225 }
0x121f   :  { %5040 = vmax.xlane.f32.xlu0 %v5039_v58  ;;  %v14018_v58 = vpop.permute.xlu0 %5273 }
0x1220   :  { %v5042_v63 = vsel %vm421_vm4, %v5028_v51, -inf }
0x1221   :  { %5043 = vmax.xlane.f32.xlu1 %v5042_v63 }
0x1222   :  { %v14016_v55 = vpop.permute.xlu1 %5321 }
0x124d   :  { %v4867_v36 = vpop.f32.mrb[140].mxu0 }
0x124e   :  { %v5021_v62 = vmul.f32 0.35355338, %v4867_v36  ;;  %v11666_v28 = vpop.f32.mrb[141].mxu0 }
0x124f   :  { %v4870_v23 = vpop.f32.mrb[142].mxu0  ;;  %v4915_v24 = vpop.f32.mrb[164].mxu1 }
0x1250   :  { %v13997_v40 = vadd.f32 %v5021_v62, %v13026_v2  ;;  %v5022_v17 = vmul.f32 0.35355338, %v4915_v24  ;;  %v11667_v19 = vpop.f32.mrb[143].mxu0  ;;  %v11672_v25 = vpop.f32.mrb[165].mxu1 }
0x1251   :  { %v4918_v13 = vpop.f32.mrb[166].mxu1 }
0x1252   :  { %v5030_v27 = vadd.f32 %v5022_v17, %v13034_v11  ;;  %v11673_v1 = vpop.f32.mrb[167].mxu1  ;;  %v5045_v50 = vsel %vm421_vm4, %v13997_v40, -inf }
0x1253   :  { %5046 = vmax.xlane.f32.xlu0 %v5045_v50 }
0x1254   :  { %v5048_v22 = vsel %vm421_vm4, %v5030_v27, -inf }
0x1255   :  { %v4963_v6 = vpop.f32.mrb[144].mxu0  ;;  %5049 = vmax.xlane.f32.xlu1 %v5048_v22 }
0x1256   :  { %v5023_v49 = vmul.f32 0.35355338, %v4963_v6  ;;  %v11678_v34 = vpop.f32.mrb[145].mxu0 }
0x1257   :  { %v4966_v5 = vpop.f32.mrb[146].mxu0  ;;  %v5011_v9 = vpop.f32.mrb[168].mxu1 }
0x1258   :  { %v14004_v4 = vadd.f32 %v5023_v49, %v13042_v31  ;;  %v5024_v52 = vmul.f32 0.35355338, %v5011_v9  ;;  %v11679_v16 = vpop.f32.mrb[147].mxu0  ;;  %v11684_v39 = vpop.f32.mrb[169].mxu1 }
0x1259   :  { %v5014_v32 = vpop.f32.mrb[170].mxu1 }
0x125a   :  { %v5032_v26 = vadd.f32 %v5024_v52, %v13051_v43  ;;  %v11685_v44 = vpop.f32.mrb[171].mxu1  ;;  %v5051_v59 = vsel %vm421_vm4, %v14004_v4, -inf }
0x125b   :  { %5052 = vmax.xlane.f32.xlu0 %v5051_v59 }
0x125c   :  { %v5054_v21 = vsel %vm421_vm4, %v5032_v26, -inf }
0x125d   :  { %5055 = vmax.xlane.f32.xlu1 %v5054_v21 }
0x126e   :  { %5417 = vrot.lane.b32.xlu1 %v13910_v10, %s12682_s29 }
0x1271   :  { %5369 = vrot.lane.b32.xlu0 %v13906_v14, %s12682_s29 }
0x12a4   :  { %v5035_v63 = vpop.xlane.xlu1 %5034 }
0x12a5   :  { %v5057_v36 = vsub.f32 %v13983_v47, %v5035_v63 }
0x12a6   :  { %v5038_v62 = vpop.xlane.xlu0 %5037 }
0x12a7   :  { %v5065_v28 = vmul.f32 1.442695, %v5057_v36  ;;  %v5058_v23 = vsub.f32 %v13986_v45, %v5038_v62 }
0x12a9   :  { %12397 = vpow2.f32 %v5065_v28  ;;  %v5067_v24 = vmul.f32 1.442695, %v5058_v23 }
0x12ab   :  { %12399 = vpow2.f32 %v5067_v24 }
0x12ac   :  { %v5041_v17 = vpop.xlane.xlu0 %5040 }
0x12ad   :  { %v5059_v19 = vsub.f32 %v5027_v18, %v5041_v17 }
0x12ae   :  { %v5044_v25 = vpop.xlane.xlu1 %5043 }
0x12af   :  { %v5069_v13 = vmul.f32 1.442695, %v5059_v19  ;;  %v5060_v1 = vsub.f32 %v5028_v51, %v5044_v25 }
0x12b1   :  { %12401 = vpow2.f32 %v5069_v13  ;;  %v5071_v50 = vmul.f32 1.442695, %v5060_v1 }
0x12b3   :  { %v14022_v22 = vpop.eup %12397  ;;  %12403 = vpow2.f32 %v5071_v50 }
0x12b4   :  { %v5081_v47 = vsel %vm421_vm4, %v14022_v22, 0.0 }
0x12b5   :  { %v14026_v6 = vpop.eup %12399  ;;  %5082 = vadd.xlane.f32.xlu0 %v5081_v47 }
0x12b6   :  { %v5084_v45 = vsel %vm421_vm4, %v14026_v6, 0.0 }
0x12b7   :  { %5085 = vadd.xlane.f32.xlu1 %v5084_v45 }
0x12bb   :  { %v14030_v49 = vpop.eup %12401 }
0x12bc   :  { %v5087_v18 = vsel %vm421_vm4, %v14030_v49, 0.0 }
0x12bd   :  { %v14034_v51 = vpop.eup %12403  ;;  %5088 = vadd.xlane.f32.xlu0 %v5087_v18 }
0x12be   :  { %v5090_v34 = vsel %vm421_vm4, %v14034_v51, 0.0 }
0x12bf   :  { %5091 = vadd.xlane.f32.xlu1 %v5090_v34 }
0x12e0   :  { %v5047_v5 = vpop.xlane.xlu0 %5046 }
0x12e1   :  { %v5061_v9 = vsub.f32 %v13997_v40, %v5047_v5 }
0x12e2   :  { %v5050_v52 = vpop.xlane.xlu1 %5049 }
0x12e3   :  { %v5073_v16 = vmul.f32 1.442695, %v5061_v9  ;;  %v5062_v39 = vsub.f32 %v5030_v27, %v5050_v52  ;;  %v5231_v52 = vsel %vm921_vm5, %v14014_v57, 0 }
0x12e5   :  { %12405 = vpow2.f32 %v5073_v16  ;;  %v5075_v32 = vmul.f32 1.442695, %v5062_v39 }
0x12e7   :  { %12407 = vpow2.f32 %v5075_v32 }
0x12e8   :  { %v5053_v40 = vpop.xlane.xlu0 %5052 }
0x12e9   :  { %v5063_v36 = vsub.f32 %v14004_v4, %v5053_v40 }
0x12ea   :  { %v5056_v27 = vpop.xlane.xlu1 %5055 }
0x12eb   :  { %v5064_v62 = vsub.f32 %v5032_v26, %v5056_v27  ;;  %v5077_v28 = vmul.f32 1.442695, %v5063_v36 }
0x12ec   :  { %v5370_v4 = vpop.permute.xlu0 %5369 }
0x12ed   :  { %v5079_v23 = vmul.f32 1.442695, %v5064_v62  ;;  %12409 = vpow2.f32 %v5077_v28 }
0x12ee   :  { %v14066_v26 = vpop.permute.xlu1 %5417 }
0x12ef   :  { %v14039_v44 = vpop.eup %12405  ;;  %12411 = vpow2.f32 %v5079_v23 }
0x12f0   :  { %v5093_v59 = vsel %vm421_vm4, %v14039_v44, 0.0 }
0x12f1   :  { %v14043_v21 = vpop.eup %12407  ;;  %5094 = vadd.xlane.f32.xlu0 %v5093_v59  ;;  %v5327_v59 = vsel %vm921_vm5, %v14016_v55, 0 }
0x12f2   :  { %v5096_v63 = vsel %vm421_vm4, %v14043_v21, 0.0 }
0x12f3   :  { %5097 = vadd.xlane.f32.xlu1 %v5096_v63 }
0x12f7   :  { %v14052_v24 = vpop.eup %12409 }
0x12f8   :  { %v5099_v19 = vsel %vm421_vm4, %v14052_v24, 0.0 }
0x12f9   :  { %v14054_v17 = vpop.eup %12411 }
0x12fa   :  { %v5102_v25 = vsel %vm421_vm4, %v14054_v17, 0.0 }
0x1304   :  { %5521 = vrot.lane.b32.xlu1 %v13888_v42, %s12684_s30 }
0x1307   :  { %5465 = vrot.lane.b32.xlu0 %v13914_v33, %s12682_s29 }
0x1326   :  { %5100 = vadd.xlane.f32.xlu0 %v5099_v19  ;;  %v5423_v19 = vsel %vm921_vm5, %v14066_v26, 0 }
0x1328   :  { %5103 = vadd.xlane.f32.xlu1 %v5102_v25 }
0x1339   :  { %5519 = vrot.lane.b32.xlu1 %v13888_v42, %s12685_s3 }
0x133c   :  { %5571 = vrot.lane.b32.xlu0 %v13890_v38, %s12684_s30 }
0x133d   :  { %5621 = vrot.lane.b32.xlu1 %v13898_v48, %s12684_s30 }
0x1340   :  { %5569 = vrot.lane.b32.xlu0 %v13890_v38, %s12685_s3 }
0x1341   :  { %5619 = vrot.lane.b32.xlu1 %v13898_v48, %s12685_s3 }
0x1342   :  { %v5083_v13 = vpop.xlane.xlu0 %5082 }
0x1343   :  { %12413 = vrcp.f32 %v5083_v13 }
0x1344   :  { %v5086_v1 = vpop.xlane.xlu1 %5085  ;;  %5671 = vrot.lane.b32.xlu0 %v13894_v54, %s12684_s30 }
0x1345   :  { %12415 = vrcp.f32 %v5086_v1  ;;  %5721 = vrot.lane.b32.xlu1 %v13904_v3, %s12684_s30 }
0x1348   :  { %5669 = vrot.lane.b32.xlu0 %v13894_v54, %s12685_s3 }
0x1349   :  { %5719 = vrot.lane.b32.xlu1 %v13904_v3, %s12685_s3 }
0x134a   :  { %v5089_v50 = vpop.xlane.xlu0 %5088 }
0x134b   :  { %12417 = vrcp.f32 %v5089_v50 }
0x134c   :  { %v5092_v47 = vpop.xlane.xlu1 %5091  ;;  %5771 = vrot.lane.b32.xlu0 %v13906_v14, %s12684_s30 }
0x134d   :  { %v12414_v45 = vpop.eup %12413  ;;  %12419 = vrcp.f32 %v5092_v47  ;;  %5821 = vrot.lane.b32.xlu1 %v13910_v10, %s12684_s30 }
0x134e   :  { %v5113_v18 = vmul.f32 %v12414_v45, %v14022_v22  ;;  %v5279_v22 = vsel %vm921_vm5, %v14018_v58, 0 }
0x134f   :  { %v12416_v34 = vpop.eup %12415 }
0x1350   :  { %5769 = vrot.lane.b32.xlu0 %v13906_v14, %s12685_s3  ;;  %v5121_v5 = vpack.c.bf16 %v5113_v18, %v5113_v18  ;;  %v5114_v9 = vmul.f32 %v12416_v34, %v14026_v6 }
0x1351   :  { %5819 = vrot.lane.b32.xlu1 %v13910_v10, %s12685_s3 }
0x1352   :  { %11689 = vmatmul.mubr.msk.bf16.vlgmr.msra.gmra.mrb[148].mxu0 %vm421_vm4, %v5121_v5  ;;  %v5122_v16 = vpack.c.bf16 %v5114_v9, %v5114_v9 }
0x1353   :  { %11699 = vmatpush3.bf16.msra.mxu0 %v5231_v52  ;;  %11700 = vmatprep.mubr.msk.bf16.mxu0 %vm12680_vm3, %v12678_v30 }
0x1354   :  { %11695 = vmatmul.mubr.msk.bf16.vlgmr.msra.gmra.mrb[172].mxu1 %vm421_vm4, %v5122_v16  ;;  %5871 = vrot.lane.b32.xlu0 %v13914_v33, %s12684_s30 }
0x1355   :  { %v12418_v6 = vpop.eup %12417  ;;  %11705 = vmatpush3.bf16.msra.mxu1 %v5279_v22  ;;  %6079 = vrot.lane.b32.xlu1 %v13890_v38, %s12686_s0 }
0x1356   :  { %11710 = vmatprep.subr.bf16.mxu0 %v12678_v30  ;;  %v5115_v57 = vmul.f32 %v12418_v6, %v14030_v49  ;;  %11706 = vmatprep.mubr.msk.bf16.mxu1 %vm12680_vm3, %v12678_v30  ;;  %v5375_v49 = vsel %vm921_vm5, %v5370_v4, 0 }
0x1357   :  { %v12420_v39 = vpop.eup %12419  ;;  %11716 = vmatprep.subr.bf16.mxu1 %v12678_v30 }
0x1358   :  { %5869 = vrot.lane.b32.xlu0 %v13914_v33, %s12685_s3  ;;  %v5123_v58 = vpack.c.bf16 %v5115_v57, %v5115_v57  ;;  %v5116_v32 = vmul.f32 %v12420_v39, %v14034_v51 }
0x135a   :  { %11701 = vmatmul.mubr.msk.bf16.vlgmr.msra.gmra.mrb[152].mxu0 %vm421_vm4, %v5123_v58  ;;  %v5124_v63 = vpack.c.bf16 %v5116_v32, %v5116_v32 }
0x135b   :  { %11711 = vmatpush3.bf16.msra.mxu0 %v5327_v59  ;;  %11712 = vmatprep.mubr.msk.bf16.mxu0 %vm12680_vm3, %v12678_v30 }
0x135c   :  { %11707 = vmatmul.mubr.msk.bf16.vlgmr.msra.gmra.mrb[176].mxu1 %vm421_vm4, %v5124_v63  ;;  %6031 = vrot.lane.b32.xlu0 %v13888_v42, %s12686_s0 }
0x135d   :  { %11717 = vmatpush3.bf16.msra.mxu1 %v5375_v49  ;;  %11722 = vmatprep.subr.bf16.mxu0 %v12678_v30 }
0x135e   :  { %11718 = vmatprep.mubr.msk.bf16.mxu1 %vm12680_vm3, %v12678_v30  ;;  %11728 = vmatprep.subr.bf16.mxu1 %v12678_v30 }
0x137e   :  { %v5095_v55 = vpop.xlane.xlu0 %5094 }
0x137f   :  { %12421 = vrcp.f32 %v5095_v55 }
0x1380   :  { %v5098_v51 = vpop.xlane.xlu1 %5097 }
0x1381   :  { %12423 = vrcp.f32 %v5098_v51 }
0x1382   :  { %v5466_v23 = vpop.permute.xlu0 %5465 }
0x1383   :  { %v5471_v4 = vsel %vm921_vm5, %v5466_v23, 0 }
0x1389   :  { %v12422_v40 = vpop.eup %12421 }
0x138a   :  { %v5117_v27 = vmul.f32 %v12422_v40, %v14039_v44  ;;  %v5522_v44 = vpop.permute.xlu1 %5521 }
0x138b   :  { %v12424_v36 = vpop.eup %12423  ;;  %v5527_v16 = vsel %vm421_vm4, %v5522_v44, 0 }
0x138c   :  { %v5125_v62 = vpack.c.bf16 %v5117_v27, %v5117_v27  ;;  %v5118_v28 = vmul.f32 %v12424_v36, %v14043_v21 }
0x138e   :  { %11713 = vmatmul.mubr.msk.bf16.vlgmr.msra.gmra.mrb[156].mxu0 %vm421_vm4, %v5125_v62  ;;  %v5126_v25 = vpack.c.bf16 %v5118_v28, %v5118_v28 }
0x138f   :  { %11723 = vmatpush3.bf16.msra.mxu0 %v5423_v19  ;;  %11724 = vmatprep.mubr.msk.bf16.mxu0 %vm12680_vm3, %v12678_v30 }
0x1390   :  { %11719 = vmatmul.mubr.msk.bf16.vlgmr.msra.gmra.mrb[180].mxu1 %vm421_vm4, %v5126_v25  ;;  %11734 = vmatprep.subr.bf16.mxu0 %v12678_v30 }
0x1391   :  { %11729 = vmatpush3.bf16.msra.mxu1 %v5471_v4  ;;  %11730 = vmatprep.mubr.msk.bf16.mxu1 %vm12680_vm3, %v12678_v30 }
0x1392   :  { %11740 = vmatprep.subr.bf16.mxu1 %v12678_v30 }
0x13b3   :  { %v5101_v21 = vpop.xlane.xlu0 %5100 }
0x13b4   :  { %12425 = vrcp.f32 %v5101_v21 }
0x13b5   :  { %v5104_v26 = vpop.xlane.xlu1 %5103 }
0x13b6   :  { %12427 = vrcp.f32 %v5104_v26 }
0x13b7   :  { %v5572_v13 = vpop.permute.xlu0 %5571 }
0x13b8   :  { %v5577_v39 = vsel %vm421_vm4, %v5572_v13, 0 }
0x13b9   :  { %v5520_v1 = vpop.permute.xlu1 %5519 }
0x13bb   :  { %v5570_v50 = vpop.permute.xlu0 %5569 }
0x13bd   :  { %v5622_v45 = vpop.permute.xlu1 %5621 }
0x13be   :  { %v12426_v47 = vpop.eup %12425  ;;  %v5627_v58 = vsel %vm421_vm4, %v5622_v45, 0 }
0x13bf   :  { %v5672_v18 = vpop.permute.xlu0 %5671  ;;  %v5119_v34 = vmul.f32 %v12426_v47, %v14052_v24 }
0x13c0   :  { %v12428_v5 = vpop.eup %12427  ;;  %v5677_v32 = vsel %vm421_vm4, %v5672_v18, 0 }
0x13c1   :  { %v5127_v9 = vpack.c.bf16 %v5119_v34, %v5119_v34  ;;  %v5120_v52 = vmul.f32 %v12428_v5, %v14054_v17  ;;  %v5620_v57 = vpop.permute.xlu1 %5619 }
0x13c3   :  { %11725 = vmatmul.mubr.msk.bf16.vlgmr.msra.gmra.mrb[160].mxu0 %vm421_vm4, %v5127_v9  ;;  %v5670_v22 = vpop.permute.xlu0 %5669  ;;  %v5128_v6 = vpack.c.bf16 %v5120_v52, %v5120_v52 }
0x13c4   :  { %11735 = vmatpush3.bf16.xpose.msra.mxu0 %v5527_v16  ;;  %11736 = vmatprep.mubr.msk.bf16.mxu0 %vm12680_vm3, %v12678_v30 }
0x13c5   :  { %11731 = vmatmul.mubr.msk.bf16.vlgmr.msra.gmra.mrb[184].mxu1 %vm421_vm4, %v5128_v6  ;;  %11746 = vmatprep.subr.bf16.mxu0 %v12678_v30  ;;  %v5722_v17 = vpop.permute.xlu1 %5721 }
0x13c6   :  { %11741 = vmatpush3.bf16.xpose.msra.mxu1 %v5577_v39  ;;  %11742 = vmatprep.mubr.msk.bf16.mxu1 %vm12680_vm3, %v12678_v30  ;;  %v5727_v49 = vsel %vm421_vm4, %v5722_v17, 0 }
0x13c7   :  { %11752 = vmatprep.subr.bf16.mxu1 %v12678_v30  ;;  %v5772_v24 = vpop.permute.xlu0 %5771 }
0x13c8   :  { %v5777_v51 = vsel %vm421_vm4, %v5772_v24, 0 }
0x13c9   :  { %v5720_v63 = vpop.permute.xlu1 %5719 }
0x13cb   :  { %11737 = vmatmul.mubr.msk.bf16.vlgmr.msra.gmra.mrb[164].mxu0 %vm421_vm4, %v5520_v1  ;;  %v5770_v59 = vpop.permute.xlu0 %5769 }
0x13cc   :  { %11747 = vmatpush3.bf16.xpose.msra.mxu0 %v5627_v58  ;;  %11748 = vmatprep.mubr.msk.bf16.mxu0 %vm12680_vm3, %v12678_v30 }
0x13cd   :  { %11743 = vmatmul.mubr.msk.bf16.vlgmr.msra.gmra.mrb[188].mxu1 %vm421_vm4, %v5570_v50  ;;  %11758 = vmatprep.subr.bf16.mxu0 %v12678_v30  ;;  %v5822_v40 = vpop.permute.xlu1 %5821 }
0x13ce   :  { %11753 = vmatpush3.bf16.xpose.msra.mxu1 %v5677_v32  ;;  %11754 = vmatprep.mubr.msk.bf16.mxu1 %vm12680_vm3, %v12678_v30  ;;  %v5827_v36 = vsel %vm421_vm4, %v5822_v40, 0 }
0x13cf   :  { %11764 = vmatprep.subr.bf16.mxu1 %v12678_v30  ;;  %v5872_v55 = vpop.permute.xlu0 %5871 }
0x13d0   :  { %v5877_v28 = vsel %vm421_vm4, %v5872_v55, 0 }
0x13d1   :  { %v5820_v62 = vpop.permute.xlu1 %5819 }
0x13d3   :  { %11749 = vmatmul.mubr.msk.bf16.vlgmr.msra.gmra.mrb[168].mxu0 %vm421_vm4, %v5620_v57  ;;  %v5870_v27 = vpop.permute.xlu0 %5869 }
0x13d4   :  { %11759 = vmatpush3.bf16.xpose.msra.mxu0 %v5727_v49  ;;  %11760 = vmatprep.mubr.msk.bf16.mxu0 %vm12680_vm3, %v12678_v30 }
0x13d5   :  { %11755 = vmatmul.mubr.msk.bf16.vlgmr.msra.gmra.mrb[192].mxu1 %vm421_vm4, %v5670_v22  ;;  %11770 = vmatprep.subr.bf16.mxu0 %v12678_v30  ;;  %v6080_v19 = vpop.permute.xlu1 %6079 }
0x13d6   :  { %11765 = vmatpush3.bf16.xpose.msra.mxu1 %v5777_v51  ;;  %11766 = vmatprep.mubr.msk.bf16.mxu1 %vm12680_vm3, %v12678_v30  ;;  %v6085_v4 = vsel %vm921_vm5, %v6080_v19, 0 }
0x13d7   :  { %11776 = vmatprep.subr.bf16.mxu1 %v12678_v30  ;;  %v6032_v23 = vpop.permute.xlu0 %6031 }
0x13d8   :  { %v6037_v25 = vsel %vm921_vm5, %v6032_v23, 0 }
0x13db   :  { %11761 = vmatmul.mubr.msk.bf16.vlgmr.msra.gmra.mrb[172].mxu0 %vm421_vm4, %v5720_v63 }
0x13dc   :  { %11771 = vmatpush3.bf16.xpose.msra.mxu0 %v5827_v36  ;;  %11772 = vmatprep.mubr.msk.bf16.mxu0 %vm12680_vm3, %v12678_v30 }
0x13dd   :  { %11767 = vmatmul.mubr.msk.bf16.vlgmr.msra.gmra.mrb[196].mxu1 %vm421_vm4, %v5770_v59  ;;  %11782 = vmatprep.subr.bf16.mxu0 %v12678_v30 }
0x13de   :  { %11777 = vmatpush3.bf16.xpose.msra.mxu1 %v5877_v28  ;;  %11778 = vmatprep.mubr.msk.bf16.mxu1 %vm12680_vm3, %v12678_v30 }
0x13df   :  { %11788 = vmatprep.subr.bf16.mxu1 %v12678_v30 }
0x13e3   :  { %11773 = vmatmul.mubr.msk.bf16.vlgmr.msra.gmra.mrb[176].mxu0 %vm421_vm4, %v5820_v62 }
0x13e4   :  { %11783 = vmatpush3.bf16.msra.mxu0 %v6037_v25  ;;  %11784 = vmatprep.mubr.msk.bf16.mxu0 %vm12680_vm3, %v12678_v30 }
0x13e5   :  { %11779 = vmatmul.mubr.msk.bf16.vlgmr.msra.gmra.mrb[200].mxu1 %vm421_vm4, %v5870_v27  ;;  %11794 = vmatprep.subr.bf16.mxu0 %v12678_v30 }
0x13e6   :  { %11789 = vmatpush3.bf16.msra.mxu1 %v6085_v4  ;;  %11790 = vmatprep.mubr.msk.bf16.mxu1 %vm12680_vm3, %v12678_v30 }
0x13e7   :  { %11800 = vmatprep.subr.bf16.mxu1 %v12678_v30 }
0x1425   :  { %v14188_v44 = vpop.f32.mrb[148].mxu0 }
0x1426   :  { %v11690_v21 = vpop.f32.mrb[149].mxu0 }
0x1427   :  { %v5174_v26 = vpop.f32.mrb[150].mxu0  ;;  %v14190_v13 = vpop.f32.mrb[172].mxu1 }
0x1428   :  { %v5513_v1 = vpack.c.bf16 %v14190_v13, %v14188_v44  ;;  %v11691_v50 = vpop.f32.mrb[151].mxu0  ;;  %v11696_v47 = vpop.f32.mrb[173].mxu1 }
0x1429   :  { %v5222_v45 = vpop.f32.mrb[174].mxu1 }
0x142a   :  { %v11697_v18 = vpop.f32.mrb[175].mxu1 }
0x142d   :  { %v14194_v34 = vpop.f32.mrb[152].mxu0 }
0x142e   :  { %v11702_v5 = vpop.f32.mrb[153].mxu0 }
0x142f   :  { %v5270_v9 = vpop.f32.mrb[154].mxu0  ;;  %v14196_v52 = vpop.f32.mrb[176].mxu1 }
0x1430   :  { %v5514_v16 = vpack.c.bf16 %v14196_v52, %v14194_v34  ;;  %v11703_v22 = vpop.f32.mrb[155].mxu0  ;;  %v11708_v6 = vpop.f32.mrb[177].mxu1 }
0x1431   :  { %v5318_v57 = vpop.f32.mrb[178].mxu1 }
0x1432   :  { %v11709_v39 = vpop.f32.mrb[179].mxu1 }
0x1461   :  { %v14200_v24 = vpop.f32.mrb[156].mxu0 }
0x1462   :  { %v11714_v17 = vpop.f32.mrb[157].mxu0 }
0x1463   :  { %v5366_v58 = vpop.f32.mrb[158].mxu0  ;;  %v14202_v32 = vpop.f32.mrb[180].mxu1 }
0x1464   :  { %v5515_v59 = vpack.c.bf16 %v14202_v32, %v14200_v24  ;;  %v11715_v63 = vpop.f32.mrb[159].mxu0  ;;  %v11720_v49 = vpop.f32.mrb[181].mxu1 }
0x1465   :  { %v5414_v55 = vpop.f32.mrb[182].mxu1 }
0x1466   :  { %v11721_v51 = vpop.f32.mrb[183].mxu1 }
0x1496   :  { %v14206_v40 = vpop.f32.mrb[160].mxu0 }
0x1497   :  { %v11726_v27 = vpop.f32.mrb[161].mxu0 }
0x1498   :  { %v5462_v36 = vpop.f32.mrb[162].mxu0  ;;  %v14208_v62 = vpop.f32.mrb[184].mxu1 }
0x1499   :  { %v5516_v28 = vpack.c.bf16 %v14208_v62, %v14206_v40  ;;  %v11727_v23 = vpop.f32.mrb[163].mxu0  ;;  %v11732_v19 = vpop.f32.mrb[185].mxu1 }
0x149a   :  { %v5510_v25 = vpop.f32.mrb[186].mxu1 }
0x149b   :  { %v11733_v4 = vpop.f32.mrb[187].mxu1 }
0x149e   :  { %v5563_v21 = vpop.f32.mrb[164].mxu0 }
0x149f   :  { %v5919_v26 = vmul.f32 0.35355338, %v5563_v21  ;;  %v11738_v50 = vpop.f32.mrb[165].mxu0 }
0x14a0   :  { %v5566_v47 = vpop.f32.mrb[166].mxu0  ;;  %v5613_v45 = vpop.f32.mrb[188].mxu1 }
0x14a1   :  { %v14213_v18 = vadd.f32 %v5919_v26, %v12985_v0  ;;  %v5920_v5 = vmul.f32 0.35355338, %v5613_v45  ;;  %v11739_v9 = vpop.f32.mrb[167].mxu0  ;;  %v11744_v22 = vpop.f32.mrb[189].mxu1 }
0x14a2   :  { %v5616_v6 = vpop.f32.mrb[190].mxu1 }
0x14a3   :  { %v5928_v57 = vadd.f32 %v5920_v5, %v12993_v8  ;;  %v11745_v39 = vpop.f32.mrb[191].mxu1  ;;  %v5935_v17 = vsel %vm421_vm4, %v14213_v18, -inf }
0x14a4   :  { %5936 = vmax.xlane.f32.xlu1 %v5935_v17 }
0x14a5   :  { %v5938_v58 = vsel %vm421_vm4, %v5928_v57, -inf }
0x14a6   :  { %v5663_v63 = vpop.f32.mrb[168].mxu0  ;;  %5939 = vmax.xlane.f32.xlu0 %v5938_v58 }
0x14a7   :  { %v5921_v49 = vmul.f32 0.35355338, %v5663_v63  ;;  %v11750_v55 = vpop.f32.mrb[169].mxu0 }
0x14a8   :  { %v5666_v51 = vpop.f32.mrb[170].mxu0  ;;  %v5713_v27 = vpop.f32.mrb[192].mxu1 }
0x14a9   :  { %v5929_v36 = vadd.f32 %v5921_v49, %v13003_v20  ;;  %v5922_v23 = vmul.f32 0.35355338, %v5713_v27  ;;  %v11751_v19 = vpop.f32.mrb[171].mxu0  ;;  %v11756_v25 = vpop.f32.mrb[193].mxu1 }
0x14aa   :  { %v5716_v4 = vpop.f32.mrb[194].mxu1 }
0x14ab   :  { %v14221_v21 = vadd.f32 %v5922_v23, %v13013_v37  ;;  %v11757_v26 = vpop.f32.mrb[195].mxu1  ;;  %v5941_v50 = vsel %vm421_vm4, %v5929_v36, -inf }
0x14ac   :  { %5942 = vmax.xlane.f32.xlu0 %v5941_v50 }
0x14ad   :  { %v5944_v47 = vsel %vm421_vm4, %v14221_v21, -inf }
0x14ae   :  { %v5763_v45 = vpop.f32.mrb[172].mxu0  ;;  %5945 = vmax.xlane.f32.xlu1 %v5944_v47 }
0x14af   :  { %v5923_v5 = vmul.f32 0.35355338, %v5763_v45  ;;  %v11762_v9 = vpop.f32.mrb[173].mxu0 }
0x14b0   :  { %v5766_v22 = vpop.f32.mrb[174].mxu0  ;;  %v5813_v6 = vpop.f32.mrb[196].mxu1 }
0x14b1   :  { %v14227_v39 = vadd.f32 %v5923_v5, %v13026_v2  ;;  %v5924_v17 = vmul.f32 0.35355338, %v5813_v6  ;;  %v11763_v58 = vpop.f32.mrb[175].mxu0  ;;  %v11768_v63 = vpop.f32.mrb[197].mxu1 }
0x14b2   :  { %v5816_v49 = vpop.f32.mrb[198].mxu1 }
0x14b3   :  { %v5932_v55 = vadd.f32 %v5924_v17, %v13034_v11  ;;  %v11769_v51 = vpop.f32.mrb[199].mxu1  ;;  %v5947_v27 = vsel %vm421_vm4, %v14227_v39, -inf }
0x14b4   :  { %5948 = vmax.xlane.f32.xlu0 %v5947_v27 }
0x14b5   :  { %v5950_v23 = vsel %vm421_vm4, %v5932_v55, -inf }
0x14b6   :  { %v5863_v19 = vpop.f32.mrb[176].mxu0  ;;  %5951 = vmax.xlane.f32.xlu1 %v5950_v23 }
0x14b7   :  { %v5925_v25 = vmul.f32 0.35355338, %v5863_v19  ;;  %v11774_v4 = vpop.f32.mrb[177].mxu0 }
0x14b8   :  { %v5866_v26 = vpop.f32.mrb[178].mxu0  ;;  %v5913_v50 = vpop.f32.mrb[200].mxu1 }
0x14b9   :  { %v5933_v47 = vadd.f32 %v5925_v25, %v13042_v31  ;;  %v5926_v45 = vmul.f32 0.35355338, %v5913_v50  ;;  %v11775_v5 = vpop.f32.mrb[179].mxu0  ;;  %v11780_v9 = vpop.f32.mrb[201].mxu1 }
0x14ba   :  { %v5916_v22 = vpop.f32.mrb[202].mxu1 }
0x14bb   :  { %v5934_v6 = vadd.f32 %v5926_v45, %v13051_v43  ;;  %v11781_v17 = vpop.f32.mrb[203].mxu1  ;;  %v5953_v58 = vsel %vm421_vm4, %v5933_v47, -inf }
0x14bc   :  { %5954 = vmax.xlane.f32.xlu0 %v5953_v58 }
0x14bd   :  { %v5956_v63 = vsel %vm421_vm4, %v5934_v6, -inf }
0x14be   :  { %5957 = vmax.xlane.f32.xlu1 %v5956_v63 }
0x14cf   :  { %6127 = vrot.lane.b32.xlu1 %v13898_v48, %s12686_s0 }
0x14d2   :  { %6175 = vrot.lane.b32.xlu0 %v13894_v54, %s12686_s0 }
0x1531   :  { %v5937_v49 = vpop.xlane.xlu1 %5936 }
0x1532   :  { %v5959_v51 = vsub.f32 %v14213_v18, %v5937_v49 }
0x1533   :  { %v5940_v27 = vpop.xlane.xlu0 %5939 }
0x1534   :  { %v5967_v23 = vmul.f32 1.442695, %v5959_v51  ;;  %v5960_v19 = vsub.f32 %v5928_v57, %v5940_v27 }
0x1536   :  { %12429 = vpow2.f32 %v5967_v23  ;;  %v5969_v25 = vmul.f32 1.442695, %v5960_v19 }
0x1538   :  { %12431 = vpow2.f32 %v5969_v25 }
0x1539   :  { %v5943_v4 = vpop.xlane.xlu0 %5942 }
0x153a   :  { %v5961_v26 = vsub.f32 %v5929_v36, %v5943_v4 }
0x153b   :  { %v5946_v36 = vpop.xlane.xlu1 %5945 }
0x153c   :  { %v5971_v50 = vmul.f32 1.442695, %v5961_v26  ;;  %v5962_v17 = vsub.f32 %v14221_v21, %v5946_v36 }
0x153e   :  { %12433 = vpow2.f32 %v5971_v50  ;;  %v5973_v49 = vmul.f32 1.442695, %v5962_v17 }
0x1540   :  { %v14242_v45 = vpop.eup %12429  ;;  %12435 = vpow2.f32 %v5973_v49 }
0x1541   :  { %v5983_v5 = vsel %vm421_vm4, %v14242_v45, 0.0  ;;  %v5949_v63 = vpop.xlane.xlu0 %5948 }
0x1542   :  { %v14246_v9 = vpop.eup %12431  ;;  %5984 = vadd.xlane.f32.xlu0 %v5983_v5  ;;  %v5963_v23 = vsub.f32 %v14227_v39, %v5949_v63 }
0x1543   :  { %v5986_v18 = vsel %vm421_vm4, %v14246_v9, 0.0  ;;  %v5952_v58 = vpop.xlane.xlu1 %5951 }
0x1544   :  { %5987 = vadd.xlane.f32.xlu1 %v5986_v18  ;;  %v5964_v51 = vsub.f32 %v5932_v55, %v5952_v58  ;;  %v5975_v26 = vmul.f32 1.442695, %v5963_v23 }
0x1546   :  { %v5977_v25 = vmul.f32 1.442695, %v5964_v51 }
0x1548   :  { %v14250_v57 = vpop.eup %12433  ;;  %12437 = vpow2.f32 %v5977_v25 }
0x1549   :  { %v5989_v22 = vsel %vm421_vm4, %v14250_v57, 0.0  ;;  %v5955_v19 = vpop.xlane.xlu0 %5954  ;;  %12439 = vpow2.f32 %v5975_v26 }
0x154a   :  { %5990 = vadd.xlane.f32.xlu0 %v5989_v22  ;;  %v5965_v50 = vsub.f32 %v5933_v47, %v5955_v19  ;;  %v14260_v22 = vpop.eup %12435 }
0x154b   :  { %v5958_v27 = vpop.xlane.xlu1 %5957  ;;  %v5992_v21 = vsel %vm421_vm4, %v14260_v22, 0.0 }
0x154c   :  { %v5966_v4 = vsub.f32 %v5934_v6, %v5958_v27  ;;  %v5979_v18 = vmul.f32 1.442695, %v5965_v50 }
0x154d   :  { %v6176_v49 = vpop.permute.xlu0 %6175 }
0x154e   :  { %v5981_v5 = vmul.f32 1.442695, %v5966_v4 }
0x154f   :  { %v6128_v51 = vpop.permute.xlu1 %6127 }
0x1550   :  { %12441 = vpow2.f32 %v5981_v5 }
0x1551   :  { %12443 = vpow2.f32 %v5979_v18  ;;  %v6133_v18 = vsel %vm921_vm5, %v6128_v51, 0 }
0x1552   :  { %v14264_v55 = vpop.eup %12437 }
0x1553   :  { %v14266_v39 = vpop.eup %12439  ;;  %v5998_v6 = vsel %vm421_vm4, %v14264_v55, 0.0 }
0x1554   :  { %v5995_v36 = vsel %vm421_vm4, %v14266_v39, 0.0 }
0x1555   :  { %6223 = vrot.lane.b32.xlu1 %v13904_v3, %s12686_s0 }
0x155a   :  { %v14270_v47 = vpop.eup %12441 }
0x155b   :  { %v14274_v17 = vpop.eup %12443  ;;  %v6004_v58 = vsel %vm421_vm4, %v14270_v47, 0.0 }
0x155c   :  { %v6001_v63 = vsel %vm421_vm4, %v14274_v17, 0.0 }
0x1560   :  { %6271 = vrot.lane.b32.xlu0 %v13906_v14, %s12686_s0 }
0x1579   :  { %5993 = vadd.xlane.f32.xlu1 %v5992_v21 }
0x157d   :  { %5999 = vadd.xlane.f32.xlu1 %v5998_v6  ;;  %v6181_v6 = vsel %vm921_vm5, %v6176_v49, 0 }
0x157f   :  { %5996 = vadd.xlane.f32.xlu0 %v5995_v36 }
0x1581   :  { %6005 = vadd.xlane.f32.xlu1 %v6004_v58 }
0x1583   :  { %6002 = vadd.xlane.f32.xlu0 %v6001_v63 }
0x1592   :  { %6319 = vrot.lane.b32.xlu1 %v13910_v10, %s12686_s0 }
0x1596   :  { %6582 = vrot.lane.b32.xlu1 %v13888_v42, %s12687_s21 }
0x1599   :  { %6367 = vrot.lane.b32.xlu0 %v13914_v33, %s12686_s0 }
0x159a   :  { %6632 = vrot.lane.b32.xlu1 %v13890_v38, %s12687_s21 }
0x159d   :  { %6580 = vrot.lane.b32.xlu0 %v13888_v42, %s12688_s22 }
0x159e   :  { %6682 = vrot.lane.b32.xlu1 %v13898_v48, %s12687_s21 }
0x15a1   :  { %6630 = vrot.lane.b32.xlu0 %v13890_v38, %s12688_s22 }
0x15a2   :  { %6732 = vrot.lane.b32.xlu1 %v13894_v54, %s12687_s21 }
0x15a5   :  { %6680 = vrot.lane.b32.xlu0 %v13898_v48, %s12688_s22 }
0x15a6   :  { %6782 = vrot.lane.b32.xlu1 %v13904_v3, %s12687_s21 }
0x15a9   :  { %6730 = vrot.lane.b32.xlu0 %v13894_v54, %s12688_s22 }
0x15aa   :  { %6780 = vrot.lane.b32.xlu1 %v13904_v3, %s12688_s22 }
0x15ad   :  { %6832 = vrot.lane.b32.xlu0 %v13906_v14, %s12687_s21 }
0x15ae   :  { %6882 = vrot.lane.b32.xlu1 %v13910_v10, %s12687_s21 }
0x15b1   :  { %6830 = vrot.lane.b32.xlu0 %v13906_v14, %s12688_s22 }
0x15b2   :  { %6880 = vrot.lane.b32.xlu1 %v13910_v10, %s12688_s22 }
0x15b5   :  { %6932 = vrot.lane.b32.xlu0 %v13914_v33, %s12687_s21 }
0x15b9   :  { %6930 = vrot.lane.b32.xlu0 %v13914_v33, %s12688_s22 }
0x15cf   :  { %v5985_v27 = vpop.xlane.xlu0 %5984 }
0x15d0   :  { %12445 = vrcp.f32 %v5985_v27 }
0x15d1   :  { %v5988_v23 = vpop.xlane.xlu1 %5987 }
0x15d2   :  { %12447 = vrcp.f32 %v5988_v23 }
0x15d5   :  { %v6224_v36 = vpop.permute.xlu1 %6223 }
0x15d6   :  { %v6229_v63 = vsel %vm921_vm5, %v6224_v36, 0 }
0x15d7   :  { %v5991_v19 = vpop.xlane.xlu0 %5990 }
0x15d8   :  { %12449 = vrcp.f32 %v5991_v19 }
0x15da   :  { %v12446_v25 = vpop.eup %12445 }
0x15db   :  { %v6015_v4 = vmul.f32 %v12446_v25, %v14242_v45  ;;  %v6272_v51 = vpop.permute.xlu0 %6271 }
0x15dc   :  { %v12448_v26 = vpop.eup %12447 }
0x15dd   :  { %v6023_v50 = vpack.c.bf16 %v6015_v4, %v6015_v4  ;;  %v6016_v5 = vmul.f32 %v12448_v26, %v14246_v9 }
0x15df   :  { %11785 = vmatmul.mubr.msk.bf16.vlgmr.msra.gmra.mrb[180].mxu0 %vm421_vm4, %v6023_v50  ;;  %v6024_v21 = vpack.c.bf16 %v6016_v5, %v6016_v5  ;;  %v6277_v5 = vsel %vm921_vm5, %v6272_v51, 0 }
0x15e0   :  { %11795 = vmatpush3.bf16.msra.mxu0 %v6133_v18  ;;  %11796 = vmatprep.mubr.msk.bf16.mxu0 %vm12680_vm3, %v12678_v30 }
0x15e1   :  { %11791 = vmatmul.mubr.msk.bf16.vlgmr.msra.gmra.mrb[204].mxu1 %vm421_vm4, %v6024_v21  ;;  %11806 = vmatprep.subr.bf16.mxu0 %v12678_v30 }
0x15e2   :  { %v12450_v45 = vpop.eup %12449  ;;  %11801 = vmatpush3.bf16.msra.mxu1 %v6181_v6  ;;  %11802 = vmatprep.mubr.msk.bf16.mxu1 %vm12680_vm3, %v12678_v30 }
0x15e3   :  { %v6017_v9 = vmul.f32 %v12450_v45, %v14250_v57  ;;  %11812 = vmatprep.subr.bf16.mxu1 %v12678_v30 }
0x15e5   :  { %v6025_v58 = vpack.c.bf16 %v6017_v9, %v6017_v9 }
0x15e7   :  { %11797 = vmatmul.mubr.msk.bf16.vlgmr.msra.gmra.mrb[184].mxu0 %vm421_vm4, %v6025_v58 }
0x15e8   :  { %11807 = vmatpush3.bf16.msra.mxu0 %v6229_v63  ;;  %11808 = vmatprep.mubr.msk.bf16.mxu0 %vm12680_vm3, %v12678_v30 }
0x15e9   :  { %11818 = vmatprep.subr.bf16.mxu0 %v12678_v30 }
0x1606   :  { %v5994_v49 = vpop.xlane.xlu1 %5993 }
0x1607   :  { %12451 = vrcp.f32 %v5994_v49 }
0x160a   :  { %v6000_v27 = vpop.xlane.xlu1 %5999 }
0x160b   :  { %12453 = vrcp.f32 %v6000_v27 }
0x160c   :  { %v5997_v57 = vpop.xlane.xlu0 %5996 }
0x160d   :  { %12455 = vrcp.f32 %v5997_v57 }
0x160e   :  { %v6006_v23 = vpop.xlane.xlu1 %6005 }
0x1610   :  { %v6003_v19 = vpop.xlane.xlu0 %6002 }
0x1611   :  { %v12452_v25 = vpop.eup %12451  ;;  %12457 = vrcp.f32 %v6003_v19 }
0x1612   :  { %v6018_v4 = vmul.f32 %v12452_v25, %v14260_v22  ;;  %12459 = vrcp.f32 %v6006_v23  ;;  %v6320_v45 = vpop.permute.xlu1 %6319 }
0x1613   :  { %v6325_v58 = vsel %vm921_vm5, %v6320_v45, 0 }
0x1614   :  { %v6026_v26 = vpack.c.bf16 %v6018_v4, %v6018_v4  ;;  %v6368_v36 = vpop.permute.xlu0 %6367 }
0x1615   :  { %v12454_v50 = vpop.eup %12453 }
0x1616   :  { %11803 = vmatmul.mubr.msk.bf16.vlgmr.msra.gmra.mrb[208].mxu1 %vm421_vm4, %v6026_v26  ;;  %v6020_v6 = vmul.f32 %v12454_v50, %v14264_v55  ;;  %v6583_v57 = vpop.permute.xlu1 %6582 }
0x1617   :  { %v12456_v18 = vpop.eup %12455  ;;  %11813 = vmatpush3.bf16.msra.mxu1 %v6277_v5  ;;  %11814 = vmatprep.mubr.msk.bf16.mxu1 %vm12680_vm3, %v12678_v30  ;;  %v6588_v19 = vsel %vm421_vm4, %v6583_v57, 0 }
0x1618   :  { %v6019_v21 = vmul.f32 %v12456_v18, %v14266_v39  ;;  %11824 = vmatprep.subr.bf16.mxu1 %v12678_v30  ;;  %v6028_v63 = vpack.c.bf16 %v6020_v6, %v6020_v6  ;;  %v6373_v39 = vsel %vm921_vm5, %v6368_v36, 0  ;;  %v10698_v6 = vld [vmem:[%s15477_s6 + $0x14] sm:$0xf] }
0x161a   :  { %v6027_v22 = vpack.c.bf16 %v6019_v21, %v6019_v21  ;;  %v6633_v25 = vpop.permute.xlu1 %6632 }
0x161b   :  { %v12458_v9 = vpop.eup %12457  ;;  %v6638_v4 = vsel %vm421_vm4, %v6633_v25, 0 }
0x161c   :  { %11809 = vmatmul.mubr.msk.bf16.vlgmr.msra.gmra.mrb[188].mxu0 %vm421_vm4, %v6027_v22  ;;  %v12460_v49 = vpop.eup %12459  ;;  %v6021_v55 = vmul.f32 %v12458_v9, %v14274_v17  ;;  %v6581_v17 = vpop.permute.xlu0 %6580 }
0x161d   :  { %11819 = vmatpush3.bf16.msra.mxu0 %v6325_v58  ;;  %11820 = vmatprep.mubr.msk.bf16.mxu0 %vm12680_vm3, %v12678_v30  ;;  %v6022_v51 = vmul.f32 %v12460_v49, %v14270_v47 }
0x161e   :  { %11815 = vmatmul.mubr.msk.bf16.vlgmr.msra.gmra.mrb[212].mxu1 %vm421_vm4, %v6028_v63  ;;  %v6029_v27 = vpack.c.bf16 %v6021_v55, %v6021_v55  ;;  %v6683_v26 = vpop.permute.xlu1 %6682  ;;  %12175 = vmatprep.subr.msk.bf16.mxu0 %vm921_vm5, %v10698_v6  ;;  %v10681_v55 = vld [vmem:[%s15477_s6 + $0x10] sm:$0xf] }
0x161f   :  { %11825 = vmatpush3.bf16.msra.mxu1 %v6373_v39  ;;  %11826 = vmatprep.mubr.msk.bf16.mxu1 %vm12680_vm3, %v12678_v30  ;;  %v6030_v23 = vpack.c.bf16 %v6022_v51, %v6022_v51  ;;  %v6688_v5 = vsel %vm421_vm4, %v6683_v26, 0  ;;  %v6433_v39 = vsel %vm921_vm5, %v10698_v6, 0 }
0x1620   :  { %11850 = vmatprep.subr.bf16.mxu1 %v12678_v30  ;;  %v6631_v47 = vpop.permute.xlu0 %6630 }
0x1622   :  { %v6733_v21 = vpop.permute.xlu1 %6732 }
0x1623   :  { %v6738_v45 = vsel %vm421_vm4, %v6733_v21, 0 }
0x1624   :  { %11821 = vmatmul.mubr.msk.bf16.vlgmr.msra.gmra.mrb[192].mxu0 %vm421_vm4, %v6029_v27  ;;  %v6681_v50 = vpop.permute.xlu0 %6680 }
0x1625   :  { %11831 = vmatpush3.bf16.msra.mxu0 %v6433_v39 }
0x1626   :  { %11827 = vmatmul.mubr.msk.bf16.vlgmr.msra.gmra.mrb[216].mxu1 %vm421_vm4, %v6030_v23  ;;  %12176 = vmatprep.subr.msk.bf16.mxu0 %vm921_vm5, %v10681_v55 }
0x1627   :  { %11852 = vmatprep.mubr.msk.bf16.mxu1 %vm12680_vm3, %v12678_v30 }
0x1628   :  { %11851 = vmatpush3.bf16.xpose.msra.mxu1 %v6588_v19  ;;  %v6731_v18 = vpop.permute.xlu0 %6730 }
0x1629   :  { %11856 = vmatprep.subr.bf16.mxu1 %v12678_v30 }
0x162c   :  { %v6833_v22 = vpop.permute.xlu0 %6832 }
0x162d   :  { %v6838_v36 = vsel %vm421_vm4, %v6833_v22, 0  ;;  %v6513_v22 = vsel %vm921_vm5, %v10681_v55, 0 }
0x162f   :  { %11853 = vmatmul.mubr.msk.bf16.vlgmr.msra.gmra.mrb[220].mxu1 %vm421_vm4, %v6581_v17 }
0x1630   :  { %11857 = vmatpush3.bf16.xpose.msra.mxu1 %v6638_v4  ;;  %11858 = vmatprep.mubr.msk.bf16.mxu1 %vm12680_vm3, %v12678_v30  ;;  %v6831_v9 = vpop.permute.xlu0 %6830 }
0x1631   :  { %11862 = vmatprep.subr.bf16.mxu1 %v12678_v30 }
0x1634   :  { %v6933_v58 = vpop.permute.xlu0 %6932 }
0x1635   :  { %v6938_v63 = vsel %vm421_vm4, %v6933_v58, 0 }
0x1637   :  { %11859 = vmatmul.mubr.msk.bf16.vlgmr.msra.gmra.mrb[224].mxu1 %vm421_vm4, %v6631_v47 }
0x1638   :  { %11863 = vmatpush3.bf16.xpose.msra.mxu1 %v6688_v5  ;;  %11864 = vmatprep.mubr.msk.bf16.mxu1 %vm12680_vm3, %v12678_v30  ;;  %v6931_v49 = vpop.permute.xlu0 %6930 }
0x1639   :  { %11868 = vmatprep.subr.bf16.mxu1 %v12678_v30 }
0x163f   :  { %11865 = vmatmul.mubr.msk.bf16.vlgmr.msra.gmra.mrb[228].mxu1 %vm421_vm4, %v6681_v50 }
0x1640   :  { %11869 = vmatpush3.bf16.xpose.msra.mxu1 %v6738_v45  ;;  %11870 = vmatprep.mubr.msk.bf16.mxu1 %vm12680_vm3, %v12678_v30 }
0x1641   :  { %11880 = vmatprep.subr.bf16.mxu1 %v12678_v30 }
0x1647   :  { %11871 = vmatmul.mubr.msk.bf16.vlgmr.msra.gmra.mrb[232].mxu1 %vm421_vm4, %v6731_v18 }
0x1648   :  { %11881 = vmatpush3.bf16.xpose.msra.mxu1 %v6838_v36  ;;  %11882 = vmatprep.mubr.msk.bf16.mxu1 %vm12680_vm3, %v12678_v30 }
0x1649   :  { %11892 = vmatprep.subr.bf16.mxu1 %v12678_v30 }
0x164f   :  { %11883 = vmatmul.mubr.msk.bf16.vlgmr.msra.gmra.mrb[236].mxu1 %vm421_vm4, %v6831_v9 }
0x1650   :  { %11893 = vmatpush3.bf16.xpose.msra.mxu1 %v6938_v63  ;;  %11894 = vmatprep.mubr.msk.bf16.mxu1 %vm12680_vm3, %v12678_v30 }
0x1651   :  { %11904 = vmatprep.subr.bf16.mxu1 %v12678_v30 }
0x1657   :  { %11895 = vmatmul.mubr.msk.bf16.vlgmr.msra.gmra.mrb[240].mxu1 %vm421_vm4, %v6931_v49 }
0x1658   :  { %11906 = vmatprep.mubr.msk.bf16.mxu1 %vm12680_vm3, %v12678_v30 }
0x16b2   :  { %v6073_v51 = vpop.f32.mrb[180].mxu0 }
0x16b3   :  { %v11786_v27 = vpop.f32.mrb[181].mxu0 }
0x16b4   :  { %v6076_v57 = vpop.f32.mrb[182].mxu0  ;;  %v6121_v23 = vpop.f32.mrb[204].mxu1 }
0x16b5   :  { %v6415_v19 = vpack.c.bf16 %v6121_v23, %v6073_v51  ;;  %v11787_v17 = vpop.f32.mrb[183].mxu0  ;;  %v11792_v25 = vpop.f32.mrb[205].mxu1 }
0x16b6   :  { %v6124_v47 = vpop.f32.mrb[206].mxu1 }
0x16b7   :  { %v11793_v4 = vpop.f32.mrb[207].mxu1  ;;  %11832 = vmatprep.mubr.msk.bf16.mxu0 %vm421_vm4, %v6415_v19 }
0x16ba   :  { %v6169_v26 = vpop.f32.mrb[184].mxu0 }
0x16bb   :  { %v11798_v50 = vpop.f32.mrb[185].mxu0 }
0x16bc   :  { %v6172_v5 = vpop.f32.mrb[186].mxu0 }
0x16bd   :  { %v11799_v18 = vpop.f32.mrb[187].mxu0 }
0x16e9   :  { %v6217_v21 = vpop.f32.mrb[208].mxu1 }
0x16ea   :  { %v6416_v6 = vpack.c.bf16 %v6217_v21, %v6169_v26  ;;  %v11804_v45 = vpop.f32.mrb[209].mxu1  ;;  %v6783_v21 = vpop.permute.xlu1 %6782 }
0x16eb   :  { %v6220_v9 = vpop.f32.mrb[210].mxu1 }
0x16ec   :  { %v11805_v36 = vpop.f32.mrb[211].mxu1  ;;  %11833 = vmatmul.mubr.msk.bf16.vlgmr.msra.gmra.mrb[196].mxu0 %vm421_vm4, %v6416_v6  ;;  %v6788_v9 = vsel %vm421_vm4, %v6783_v21, 0 }
0x16ed   :  { %11841 = vmatpush3.bf16.msra.mxu0 %v6513_v22 }
0x16ee   :  { %11874 = vmatprep.subr.bf16.mxu0 %v12678_v30 }
0x16ef   :  { %v6265_v58 = vpop.f32.mrb[188].mxu0 }
0x16f0   :  { %v11810_v63 = vpop.f32.mrb[189].mxu0 }
0x16f1   :  { %v6268_v49 = vpop.f32.mrb[190].mxu0  ;;  %v6313_v39 = vpop.f32.mrb[212].mxu1 }
0x16f2   :  { %v6417_v51 = vpack.c.bf16 %v6313_v39, %v6265_v58  ;;  %v11811_v27 = vpop.f32.mrb[191].mxu0  ;;  %v11816_v57 = vpop.f32.mrb[213].mxu1 }
0x16f3   :  { %v6316_v23 = vpop.f32.mrb[214].mxu1 }
0x16f4   :  { %v11817_v19 = vpop.f32.mrb[215].mxu1  ;;  %11836 = vmatprep.mubr.msk.bf16.mxu0 %vm421_vm4, %v6417_v51 }
0x16f7   :  { %v6361_v17 = vpop.f32.mrb[192].mxu0 }
0x16f8   :  { %v11822_v55 = vpop.f32.mrb[193].mxu0 }
0x16f9   :  { %v6364_v25 = vpop.f32.mrb[194].mxu0  ;;  %v6409_v47 = vpop.f32.mrb[216].mxu1 }
0x16fa   :  { %v6418_v4 = vpack.c.bf16 %v6409_v47, %v6361_v17  ;;  %v11823_v26 = vpop.f32.mrb[195].mxu0  ;;  %v11828_v50 = vpop.f32.mrb[217].mxu1 }
0x16fb   :  { %v6412_v5 = vpop.f32.mrb[218].mxu1 }
0x16fc   :  { %v11829_v18 = vpop.f32.mrb[219].mxu1  ;;  %11837 = vmatmul.mubr.msk.bf16.gmra.mrb[200].mxu0 %vm421_vm4, %v6418_v4 }
0x16fd   :  { %11842 = vmatprep.mubr.msk.bf16.mxu0 %vm421_vm4, %v5513_v1  ;;  %v6781_v1 = vpop.permute.xlu1 %6780 }
0x1701   :  { %v6883_v49 = vpop.permute.xlu1 %6882 }
0x1702   :  { %v6624_v6 = vpop.f32.mrb[220].mxu1  ;;  %v6888_v57 = vsel %vm421_vm4, %v6883_v49, 0 }
0x1703   :  { %v6980_v45 = vmul.f32 0.35355338, %v6624_v6  ;;  %v11854_v22 = vpop.f32.mrb[221].mxu1 }
0x1704   :  { %v6627_v36 = vpop.f32.mrb[222].mxu1  ;;  %11843 = vmatmul.mubr.msk.bf16.vlgmr.msra.gmra.mrb[196].mxu0 %vm421_vm4, %v5514_v16 }
0x1705   :  { %v14412_v58 = vadd.f32 %v6980_v45, %v12985_v0  ;;  %v11855_v63 = vpop.f32.mrb[223].mxu1  ;;  %11875 = vmatpush3.bf16.xpose.msra.mxu0 %v6788_v9  ;;  %11846 = vmatprep.mubr.msk.bf16.mxu0 %vm421_vm4, %v5515_v59  ;;  %v6881_v17 = vpop.permute.xlu1 %6880 }
0x1706   :  { %11886 = vmatprep.subr.bf16.mxu0 %v12678_v30 }
0x1707   :  { %v6996_v44 = vsel %vm421_vm4, %v14412_v58, -inf }
0x1708   :  { %6997 = vmax.xlane.f32.xlu1 %v6996_v44 }
0x170a   :  { %v6674_v13 = vpop.f32.mrb[224].mxu1 }
0x170b   :  { %v6981_v34 = vmul.f32 0.35355338, %v6674_v13  ;;  %v11860_v52 = vpop.f32.mrb[225].mxu1 }
0x170c   :  { %v6677_v16 = vpop.f32.mrb[226].mxu1  ;;  %11847 = vmatmul.mubr.msk.bf16.gmra.mrb[200].mxu0 %vm421_vm4, %v5516_v28 }
0x170d   :  { %v6989_v24 = vadd.f32 %v6981_v34, %v12993_v8  ;;  %v11861_v32 = vpop.f32.mrb[227].mxu1  ;;  %11876 = vmatprep.mubr.msk.bf16.mxu0 %vm12680_vm3, %v12678_v30 }
0x170f   :  { %v6999_v59 = vsel %vm421_vm4, %v6989_v24, -inf }
0x1710   :  { %7000 = vmax.xlane.f32.xlu0 %v6999_v59 }
0x1712   :  { %v6724_v39 = vpop.f32.mrb[228].mxu1 }
0x1713   :  { %v6982_v51 = vmul.f32 0.35355338, %v6724_v39  ;;  %v11866_v27 = vpop.f32.mrb[229].mxu1 }
0x1714   :  { %v6727_v23 = vpop.f32.mrb[230].mxu1  ;;  %11877 = vmatmul.mubr.msk.bf16.vlgmr.msra.gmra.mrb[204].mxu0 %vm421_vm4, %v6781_v1 }
0x1715   :  { %v14432_v40 = vadd.f32 %v6982_v51, %v13003_v20  ;;  %v11867_v62 = vpop.f32.mrb[231].mxu1  ;;  %11887 = vmatpush3.bf16.xpose.msra.mxu0 %v6888_v57  ;;  %11888 = vmatprep.mubr.msk.bf16.mxu0 %vm12680_vm3, %v12678_v30 }
0x1716   :  { %11898 = vmatprep.subr.bf16.mxu0 %v12678_v30 }
0x1717   :  { %v7002_v28 = vsel %vm421_vm4, %v14432_v40, -inf }
0x1718   :  { %7003 = vmax.xlane.f32.xlu0 %v7002_v28 }
0x171a   :  { %v6774_v19 = vpop.f32.mrb[232].mxu1 }
0x171b   :  { %v6983_v55 = vmul.f32 0.35355338, %v6774_v19  ;;  %v11872_v25 = vpop.f32.mrb[233].mxu1 }
0x171c   :  { %v6777_v47 = vpop.f32.mrb[234].mxu1  ;;  %11889 = vmatmul.mubr.msk.bf16.vlgmr.msra.gmra.mrb[208].mxu0 %vm421_vm4, %v6881_v17 }
0x171d   :  { %v6991_v4 = vadd.f32 %v6983_v55, %v13013_v37  ;;  %v11873_v26 = vpop.f32.mrb[235].mxu1  ;;  %11900 = vmatprep.mubr.msk.bf16.mxu0 %vm12680_vm3, %v12678_v30 }
0x171f   :  { %v7005_v50 = vsel %vm421_vm4, %v6991_v4, -inf }
0x1720   :  { %7006 = vmax.xlane.f32.xlu1 %v7005_v50 }
0x1722   :  { %v6874_v5 = vpop.f32.mrb[236].mxu1 }
0x1723   :  { %v6985_v18 = vmul.f32 0.35355338, %v6874_v5  ;;  %v11884_v21 = vpop.f32.mrb[237].mxu1 }
0x1724   :  { %v6877_v6 = vpop.f32.mrb[238].mxu1 }
0x1725   :  { %v6993_v45 = vadd.f32 %v6985_v18, %v13034_v11  ;;  %v11885_v22 = vpop.f32.mrb[239].mxu1 }
0x1727   :  { %v7011_v9 = vsel %vm421_vm4, %v6993_v45, -inf }
0x1728   :  { %7012 = vmax.xlane.f32.xlu1 %v7011_v9 }
0x172a   :  { %v6974_v36 = vpop.f32.mrb[240].mxu1 }
0x172b   :  { %v6987_v63 = vmul.f32 0.35355338, %v6974_v36  ;;  %v11896_v44 = vpop.f32.mrb[241].mxu1 }
0x172c   :  { %v6977_v13 = vpop.f32.mrb[242].mxu1 }
0x172d   :  { %v6995_v1 = vadd.f32 %v6987_v63, %v13051_v43  ;;  %v11897_v34 = vpop.f32.mrb[243].mxu1 }
0x172f   :  { %v7017_v52 = vsel %vm421_vm4, %v6995_v1, -inf }
0x1730   :  { %7018 = vmax.xlane.f32.xlu1 %v7017_v52 }
0x1795   :  { %v6998_v49 = vpop.xlane.xlu1 %6997 }
0x1796   :  { %v7020_v18 = vsub.f32 %v14412_v58, %v6998_v49 }
0x1798   :  { %v7028_v6 = vmul.f32 1.442695, %v7020_v18 }
0x179d   :  { %v7001_v16 = vpop.xlane.xlu0 %7000 }
0x179e   :  { %v7021_v32 = vsub.f32 %v6989_v24, %v7001_v16 }
0x17a0   :  { %v7030_v59 = vmul.f32 1.442695, %v7021_v32 }
0x17a2   :  { %12461 = vpow2.f32 %v7030_v59 }
0x17a5   :  { %v7004_v21 = vpop.xlane.xlu0 %7003 }
0x17ac   :  { %v14448_v39 = vpop.eup %12461 }
0x17ad   :  { %v7007_v51 = vpop.xlane.xlu1 %7006  ;;  %v7047_v27 = vsel %vm421_vm4, %v14448_v39, 0.0 }
0x17ae   :  { %v7023_v57 = vsub.f32 %v6991_v4, %v7007_v51  ;;  %7048 = vadd.xlane.f32.xlu1 %v7047_v27 }
0x17b0   :  { %v7034_v23 = vmul.f32 1.442695, %v7023_v57 }
0x17b2   :  { %12463 = vpow2.f32 %v7034_v23 }
0x17b5   :  { %v7013_v62 = vpop.xlane.xlu1 %7012 }
0x17b6   :  { %v7025_v28 = vsub.f32 %v6993_v45, %v7013_v62  ;;  %v7022_v45 = vsub.f32 %v14432_v40, %v7004_v21 }
0x17b8   :  { %v7038_v19 = vmul.f32 1.442695, %v7025_v28 }
0x17ba   :  { %12465 = vpow2.f32 %v7038_v19 }
0x17bc   :  { %v14452_v17 = vpop.eup %12463 }
0x17bd   :  { %v7019_v24 = vpop.xlane.xlu1 %7018  ;;  %v7053_v55 = vsel %vm421_vm4, %v14452_v17, 0.0 }
0x17be   :  { %v7027_v25 = vsub.f32 %v6995_v1, %v7019_v24  ;;  %7054 = vadd.xlane.f32.xlu1 %v7053_v55  ;;  %v7032_v1 = vmul.f32 1.442695, %v7022_v45 }
0x17c0   :  { %v7042_v47 = vmul.f32 1.442695, %v7027_v25 }
0x17c2   :  { %12467 = vpow2.f32 %v7042_v47 }
0x17c3   :  { %12469 = vpow2.f32 %v7028_v6 }
0x17c4   :  { %v14456_v26 = vpop.eup %12465  ;;  %12471 = vpow2.f32 %v7032_v1 }
0x17c5   :  { %v7059_v4 = vsel %vm421_vm4, %v14456_v26, 0.0 }
0x17c6   :  { %7060 = vadd.xlane.f32.xlu1 %v7059_v4 }
0x17cc   :  { %v14460_v50 = vpop.eup %12467 }
0x17cd   :  { %v7065_v5 = vsel %vm421_vm4, %v14460_v50, 0.0  ;;  %v12470_v51 = vpop.eup %12469 }
0x17ce   :  { %7066 = vadd.xlane.f32.xlu1 %v7065_v5  ;;  %v7044_v27 = vsel %vm421_vm4, %v12470_v51, 0.0  ;;  %v14485_v57 = vpop.eup %12471 }
0x17cf   :  { %v7050_v23 = vsel %vm421_vm4, %v14485_v57, 0.0 }
0x17df   :  { %7140 = vrot.lane.b32.xlu1 %v13890_v38, %s12689_s25 }
0x17e3   :  { %7188 = vrot.lane.b32.xlu1 %v13898_v48, %s12689_s25 }
0x17e7   :  { %7284 = vrot.lane.b32.xlu1 %v13904_v3, %s12689_s25  ;;  %v6824_v22 = vpop.f32.mrb[204].mxu0 }
0x17e8   :  { %v6984_v9 = vmul.f32 0.35355338, %v6824_v22  ;;  %v11878_v36 = vpop.f32.mrb[205].mxu0 }
0x17e9   :  { %v6827_v63 = vpop.f32.mrb[206].mxu0 }
0x17ea   :  { %v6992_v44 = vadd.f32 %v6984_v9, %v13026_v2  ;;  %v11879_v13 = vpop.f32.mrb[207].mxu0 }
0x17eb   :  { %7380 = vrot.lane.b32.xlu1 %v13910_v10, %s12689_s25 }
0x17ec   :  { %v7008_v58 = vsel %vm421_vm4, %v6992_v44, -inf }
0x17ed   :  { %7009 = vmax.xlane.f32.xlu0 %v7008_v58 }
0x17ef   :  { %7571 = vrot.lane.b32.xlu1 %v13888_v42, %s12690_s27  ;;  %v6924_v40 = vpop.f32.mrb[208].mxu0 }
0x17f0   :  { %v6986_v34 = vmul.f32 0.35355338, %v6924_v40  ;;  %v11890_v52 = vpop.f32.mrb[209].mxu0 }
0x17f1   :  { %v6927_v16 = vpop.f32.mrb[210].mxu0 }
0x17f2   :  { %v6994_v32 = vadd.f32 %v6986_v34, %v13042_v31  ;;  %v11891_v59 = vpop.f32.mrb[211].mxu0 }
0x17f3   :  { %7621 = vrot.lane.b32.xlu1 %v13890_v38, %s12690_s27 }
0x17f4   :  { %v7014_v49 = vsel %vm421_vm4, %v6994_v32, -inf }
0x17f5   :  { %7015 = vmax.xlane.f32.xlu0 %v7014_v49 }
0x17f7   :  { %7671 = vrot.lane.b32.xlu1 %v13898_v48, %s12690_s27 }
0x17f9   :  { %7045 = vadd.xlane.f32.xlu0 %v7044_v27 }
0x17fb   :  { %7669 = vrot.lane.b32.xlu1 %v13898_v48, %s12691_s28 }
0x17fd   :  { %7051 = vadd.xlane.f32.xlu0 %v7050_v23 }
0x17ff   :  { %7771 = vrot.lane.b32.xlu1 %v13904_v3, %s12690_s27 }
0x1803   :  { %7769 = vrot.lane.b32.xlu1 %v13904_v3, %s12691_s28 }
0x1807   :  { %7871 = vrot.lane.b32.xlu1 %v13910_v10, %s12690_s27 }
0x180b   :  { %7869 = vrot.lane.b32.xlu1 %v13910_v10, %s12691_s28 }
0x1813   :  { %7092 = vrot.lane.b32.xlu0 %v13888_v42, %s12689_s25 }
0x1817   :  { %7236 = vrot.lane.b32.xlu0 %v13894_v54, %s12689_s25 }
0x181b   :  { %7332 = vrot.lane.b32.xlu0 %v13906_v14, %s12689_s25 }
0x183b   :  { %v7049_v62 = vpop.xlane.xlu1 %7048 }
0x183c   :  { %12473 = vrcp.f32 %v7049_v62 }
0x1846   :  { %v12474_v24 = vpop.eup %12473 }
0x1847   :  { %v7077_v25 = vmul.f32 %v12474_v24, %v14448_v39 }
0x1849   :  { %v7085_v5 = vpack.c.bf16 %v7077_v25, %v7077_v25 }
0x184b   :  { %v7055_v28 = vpop.xlane.xlu1 %7054 }
0x1853   :  { %v7061_v19 = vpop.xlane.xlu1 %7060 }
0x185b   :  { %v14505_v55 = vpop.xlane.xlu1 %7066 }
0x185f   :  { %v7141_v47 = vpop.permute.xlu1 %7140 }
0x1860   :  { %v7146_v4 = vsel %vm921_vm5, %v7141_v47, 0 }
0x1861   :  { %11905 = vmatpush3.bf16.msra.mxu1 %v7146_v4 }
0x1862   :  { %11916 = vmatprep.subr.bf16.mxu1 %v12678_v30 }
0x1863   :  { %v7189_v27 = vpop.permute.xlu1 %7188 }
0x1864   :  { %11907 = vmatmul.mubr.msk.bf16.vlgmr.msra.gmra.mrb[244].mxu1 %vm421_vm4, %v7085_v5 }
0x1865   :  { %11918 = vmatprep.mubr.msk.bf16.mxu1 %vm12680_vm3, %v12678_v30 }
0x1867   :  { %v7285_v4 = vpop.permute.xlu1 %7284 }
0x187a   :  { %v7010_v18 = vpop.xlane.xlu0 %7009 }
0x187b   :  { %v7024_v21 = vsub.f32 %v6992_v44, %v7010_v18 }
0x187d   :  { %v7036_v6 = vmul.f32 1.442695, %v7024_v21  ;;  %v7290_v21 = vsel %vm921_vm5, %v7285_v4, 0 }
0x187f   :  { %12475 = vpow2.f32 %v7036_v6 }
0x1880   :  { %12477 = vrcp.f32 %v7055_v28 }
0x1882   :  { %v7016_v45 = vpop.xlane.xlu0 %7015 }
0x1883   :  { %v7026_v22 = vsub.f32 %v6994_v32, %v7016_v45 }
0x1885   :  { %v7040_v39 = vmul.f32 1.442695, %v7026_v22 }
0x1886   :  { %v7046_v9 = vpop.xlane.xlu0 %7045 }
0x1887   :  { %12479 = vpow2.f32 %v7040_v39 }
0x1888   :  { %12481 = vrcp.f32 %v7046_v9 }
0x1889   :  { %v14513_v36 = vpop.eup %12475  ;;  %12483 = vrcp.f32 %v7061_v19 }
0x188a   :  { %v7052_v63 = vpop.xlane.xlu0 %7051  ;;  %v7056_v13 = vsel %vm421_vm4, %v14513_v36, 0.0  ;;  %v12478_v1 = vpop.eup %12477 }
0x188b   :  { %7057 = vadd.xlane.f32.xlu0 %v7056_v13  ;;  %12485 = vrcp.f32 %v7052_v63  ;;  %v7079_v34 = vmul.f32 %v12478_v1, %v14452_v17  ;;  %v7194_v17 = vsel %vm921_vm5, %v7189_v27, 0  ;;  %v7381_v63 = vpop.permute.xlu1 %7380 }
0x188c   :  { %12487 = vrcp.f32 %v14505_v55  ;;  %v7386_v55 = vsel %vm921_vm5, %v7381_v63, 0 }
0x188d   :  { %v7087_v28 = vpack.c.bf16 %v7079_v34, %v7079_v34 }
0x188e   :  { %v7093_v44 = vpop.permute.xlu0 %7092 }
0x188f   :  { %v7098_v58 = vsel %vm921_vm5, %v7093_v44, 0  ;;  %v7572_v34 = vpop.permute.xlu1 %7571 }
0x1890   :  { %11899 = vmatpush3.bf16.msra.mxu0 %v7098_v58 }
0x1891   :  { %v14518_v40 = vpop.eup %12479  ;;  %11910 = vmatprep.subr.bf16.mxu0 %v12678_v30 }
0x1892   :  { %v12482_v52 = vpop.eup %12481  ;;  %v7237_v16 = vpop.permute.xlu0 %7236  ;;  %v7062_v32 = vsel %vm421_vm4, %v14518_v40, 0.0 }
0x1893   :  { %v7242_v59 = vsel %vm921_vm5, %v7237_v16, 0  ;;  %7063 = vadd.xlane.f32.xlu0 %v7062_v32  ;;  %v7076_v49 = vmul.f32 %v12482_v52, %v12470_v51  ;;  %v12484_v23 = vpop.eup %12483  ;;  %v7577_v32 = vsel %vm421_vm4, %v7572_v34, 0  ;;  %v7622_v27 = vpop.permute.xlu1 %7621 }
0x1894   :  { %11917 = vmatpush3.bf16.msra.mxu1 %v7242_v59  ;;  %v7081_v47 = vmul.f32 %v12484_v23, %v14456_v26 }
0x1895   :  { %v7084_v62 = vpack.c.bf16 %v7076_v49, %v7076_v49  ;;  %11928 = vmatprep.subr.bf16.mxu1 %v12678_v30  ;;  %v12486_v19 = vpop.eup %12485 }
0x1896   :  { %v7333_v24 = vpop.permute.xlu0 %7332  ;;  %v7078_v51 = vmul.f32 %v12486_v19, %v14485_v57  ;;  %v7089_v18 = vpack.c.bf16 %v7081_v47, %v7081_v47  ;;  %v12488_v57 = vpop.eup %12487 }
0x1897   :  { %11901 = vmatmul.mubr.msk.bf16.vlgmr.msra.gmra.mrb[212].mxu0 %vm421_vm4, %v7084_v62  ;;  %v7338_v25 = vsel %vm921_vm5, %v7333_v24, 0  ;;  %11919 = vmatmul.mubr.msk.bf16.vlgmr.msra.gmra.mrb[248].mxu1 %vm421_vm4, %v7087_v28  ;;  %v7083_v22 = vmul.f32 %v12488_v57, %v14460_v50  ;;  %v10723_v50 = vld [vmem:[%s15477_s6 + $0x18] sm:$0xf]  ;;  %v7627_v62 = vsel %vm421_vm4, %v7622_v27, 0 }
0x1898   :  { %11911 = vmatpush3.bf16.msra.mxu0 %v7194_v17  ;;  %11929 = vmatpush3.bf16.msra.mxu1 %v7338_v25  ;;  %v7086_v5 = vpack.c.bf16 %v7078_v51, %v7078_v51  ;;  %v7494_v49 = vsel %vm921_vm5, %v10723_v50, 0 }
0x1899   :  { %11912 = vmatprep.mubr.msk.bf16.mxu0 %vm12680_vm3, %v12678_v30  ;;  %11922 = vmatprep.subr.bf16.mxu0 %v12678_v30  ;;  %v7091_v44 = vpack.c.bf16 %v7083_v22, %v7083_v22 }
0x189a   :  { %11930 = vmatprep.mubr.msk.bf16.mxu1 %vm12680_vm3, %v12678_v30  ;;  %11940 = vmatprep.subr.bf16.mxu1 %v12678_v30 }
0x189f   :  { %11913 = vmatmul.mubr.msk.bf16.vlgmr.msra.gmra.mrb[216].mxu0 %vm421_vm4, %v7086_v5  ;;  %11931 = vmatmul.mubr.msk.bf16.vlgmr.msra.gmra.mrb[252].mxu1 %vm421_vm4, %v7089_v18 }
0x18a0   :  { %11923 = vmatpush3.bf16.msra.mxu0 %v7290_v21  ;;  %11924 = vmatprep.mubr.msk.bf16.mxu0 %vm12680_vm3, %v12678_v30 }
0x18a1   :  { %11934 = vmatprep.subr.bf16.mxu0 %v12678_v30  ;;  %11942 = vmatprep.mubr.msk.bf16.mxu1 %vm12680_vm3, %v12678_v30 }
0x18a9   :  { %7428 = vrot.lane.b32.xlu0 %v13914_v33, %s12689_s25  ;;  %s15502_s25 = smov 40  }
0x18ad   :  { %7569 = vrot.lane.b32.xlu0 %v13888_v42, %s12691_s28 }
0x18b1   :  { %7619 = vrot.lane.b32.xlu0 %v13890_v38, %s12691_s28 }
0x18b5   :  { %7721 = vrot.lane.b32.xlu0 %v13894_v54, %s12690_s27 }
0x18b9   :  { %7719 = vrot.lane.b32.xlu0 %v13894_v54, %s12691_s28 }
0x18bd   :  { %7821 = vrot.lane.b32.xlu0 %v13906_v14, %s12690_s27 }
0x18c1   :  { %7819 = vrot.lane.b32.xlu0 %v13906_v14, %s12691_s28 }
0x18c5   :  { %7921 = vrot.lane.b32.xlu0 %v13914_v33, %s12690_s27 }
0x18c9   :  { %7919 = vrot.lane.b32.xlu0 %v13914_v33, %s12691_s28 }
0x1918   :  { %v7058_v26 = vpop.xlane.xlu0 %7057 }
0x1919   :  { %12489 = vrcp.f32 %v7058_v26 }
0x1920   :  { %v7064_v6 = vpop.xlane.xlu0 %7063 }
0x1921   :  { %12491 = vrcp.f32 %v7064_v6 }
0x1923   :  { %v12490_v45 = vpop.eup %12489 }
0x1924   :  { %v7429_v39 = vpop.permute.xlu0 %7428  ;;  %v7080_v9 = vmul.f32 %v12490_v45, %v14513_v36 }
0x1925   :  { %v7434_v13 = vsel %vm921_vm5, %v7429_v39, 0 }
0x1926   :  { %11941 = vmatpush3.bf16.msra.mxu1 %v7434_v13  ;;  %v7088_v1 = vpack.c.bf16 %v7080_v9, %v7080_v9 }
0x1927   :  { %11956 = vmatprep.subr.bf16.mxu1 %v12678_v30 }
0x1928   :  { %11925 = vmatmul.mubr.msk.bf16.vlgmr.msra.gmra.mrb[220].mxu0 %vm421_vm4, %v7088_v1  ;;  %v7570_v58 = vpop.permute.xlu0 %7569  ;;  %v7672_v1 = vpop.permute.xlu1 %7671 }
0x1929   :  { %11935 = vmatpush3.bf16.msra.mxu0 %v7386_v55  ;;  %11943 = vmatmul.mubr.msk.bf16.vlgmr.msra.gmra.mrb[0].mxu1 %vm421_vm4, %v7091_v44 }
0x192a   :  { %11936 = vmatprep.mubr.msk.bf16.mxu0 %vm12680_vm3, %v12678_v30  ;;  %11958 = vmatprep.mubr.msk.bf16.mxu1 %vm12680_vm3, %v12678_v30 }
0x192b   :  { %v12492_v36 = vpop.eup %12491  ;;  %12177 = vmatprep.subr.msk.bf16.mxu0 %vm921_vm5, %v10723_v50 }
0x192c   :  { %v7082_v52 = vmul.f32 %v12492_v36, %v14518_v40  ;;  %v7620_v16 = vpop.permute.xlu0 %7619 }
0x192e   :  { %v7090_v59 = vpack.c.bf16 %v7082_v52, %v7082_v52 }
0x192f   :  { %11957 = vmatpush3.bf16.xpose.msra.mxu1 %v7577_v32 }
0x1930   :  { %11937 = vmatmul.mubr.msk.bf16.vlgmr.msra.gmra.mrb[224].mxu0 %vm421_vm4, %v7090_v59  ;;  %11962 = vmatprep.subr.bf16.mxu1 %v12678_v30  ;;  %v7722_v23 = vpop.permute.xlu0 %7721 }
0x1931   :  { %11947 = vmatpush3.bf16.msra.mxu0 %v7494_v49  ;;  %v7727_v25 = vsel %vm421_vm4, %v7722_v23, 0 }
0x1932   :  { %11968 = vmatprep.subr.bf16.mxu0 %v12678_v30 }
0x1934   :  { %v7720_v19 = vpop.permute.xlu0 %7719 }
0x1936   :  { %11959 = vmatmul.mubr.msk.bf16.vlgmr.msra.gmra.mrb[4].mxu1 %vm421_vm4, %v7570_v58 }
0x1937   :  { %v7182_v40 = vpop.f32.mrb[244].mxu1  ;;  %11963 = vmatpush3.bf16.xpose.msra.mxu1 %v7627_v62  ;;  %11964 = vmatprep.mubr.msk.bf16.mxu1 %vm12680_vm3, %v12678_v30 }
0x1938   :  { %v11908_v28 = vpop.f32.mrb[245].mxu1  ;;  %11974 = vmatprep.subr.bf16.mxu1 %v12678_v30  ;;  %v7822_v51 = vpop.permute.xlu0 %7821 }
0x1939   :  { %v7185_v24 = vpop.f32.mrb[246].mxu1  ;;  %v7827_v4 = vsel %vm421_vm4, %v7822_v51, 0 }
0x193a   :  { %v11909_v17 = vpop.f32.mrb[247].mxu1 }
0x193c   :  { %v7820_v47 = vpop.permute.xlu0 %7819 }
0x193e   :  { %11965 = vmatmul.mubr.msk.bf16.vlgmr.msra.gmra.mrb[8].mxu1 %vm421_vm4, %v7620_v16  ;;  %v7677_v16 = vsel %vm421_vm4, %v7672_v1, 0 }
0x193f   :  { %11975 = vmatpush3.bf16.xpose.msra.mxu1 %v7727_v25  ;;  %11976 = vmatprep.mubr.msk.bf16.mxu1 %vm12680_vm3, %v12678_v30  ;;  %v7670_v25 = vpop.permute.xlu1 %7669 }
0x1940   :  { %11986 = vmatprep.subr.bf16.mxu1 %v12678_v30  ;;  %v7922_v5 = vpop.permute.xlu0 %7921 }
0x1941   :  { %v7927_v18 = vsel %vm421_vm4, %v7922_v5, 0 }
0x1944   :  { %v7920_v21 = vpop.permute.xlu0 %7919 }
0x1946   :  { %11977 = vmatmul.mubr.msk.bf16.vlgmr.msra.gmra.mrb[12].mxu1 %vm421_vm4, %v7720_v19 }
0x1947   :  { %11987 = vmatpush3.bf16.xpose.msra.mxu1 %v7827_v4  ;;  %11988 = vmatprep.mubr.msk.bf16.mxu1 %vm12680_vm3, %v12678_v30 }
0x1948   :  { %11998 = vmatprep.subr.bf16.mxu1 %v12678_v30 }
0x194e   :  { %11989 = vmatmul.mubr.msk.bf16.vlgmr.msra.gmra.mrb[16].mxu1 %vm421_vm4, %v7820_v47 }
0x194f   :  { %11999 = vmatpush3.bf16.xpose.msra.mxu1 %v7927_v18  ;;  %12000 = vmatprep.mubr.msk.bf16.mxu1 %vm12680_vm3, %v12678_v30 }
0x1950   :  { %12010 = vmatprep.subr.bf16.mxu1 %v12678_v30 }
0x1956   :  { %12001 = vmatmul.mubr.msk.bf16.vlgmr.msra.gmra.mrb[20].mxu1 %vm421_vm4, %v7920_v21  ;;  %v7772_v21 = vpop.permute.xlu1 %7771 }
0x1957   :  { %12012 = vmatprep.mubr.msk.bf16.mxu1 %vm12680_vm3, %v12678_v30 }
0x196a   :  { %v7134_v26 = vpop.f32.mrb[212].mxu0  ;;  %v7278_v57 = vpop.f32.mrb[248].mxu1 }
0x196b   :  { %v7476_v6 = vpack.c.bf16 %v7182_v40, %v7134_v26  ;;  %v11902_v45 = vpop.f32.mrb[213].mxu0  ;;  %v11920_v22 = vpop.f32.mrb[249].mxu1 }
0x196c   :  { %v7137_v39 = vpop.f32.mrb[214].mxu0  ;;  %v7281_v9 = vpop.f32.mrb[250].mxu1 }
0x196d   :  { %v11903_v63 = vpop.f32.mrb[215].mxu0  ;;  %11948 = vmatprep.mubr.msk.bf16.mxu0 %vm421_vm4, %v7476_v6  ;;  %v11921_v13 = vpop.f32.mrb[251].mxu1 }
0x196e   :  { %v7770_v9 = vpop.permute.xlu1 %7769  ;;  %v7777_v63 = vsel %vm421_vm4, %v7772_v21, 0 }
0x1972   :  { %v7230_v44 = vpop.f32.mrb[216].mxu0  ;;  %v7374_v55 = vpop.f32.mrb[252].mxu1 }
0x1973   :  { %v7477_v58 = vpack.c.bf16 %v7278_v57, %v7230_v44  ;;  %v11914_v50 = vpop.f32.mrb[217].mxu0  ;;  %v11932_v36 = vpop.f32.mrb[253].mxu1 }
0x1974   :  { %v7233_v34 = vpop.f32.mrb[218].mxu0  ;;  %v7377_v52 = vpop.f32.mrb[254].mxu1 }
0x1975   :  { %v11915_v32 = vpop.f32.mrb[219].mxu0  ;;  %11949 = vmatmul.mubr.msk.bf16.vlgmr.msra.gmra.mrb[196].mxu0 %vm421_vm4, %v7477_v58  ;;  %v11933_v59 = vpop.f32.mrb[255].mxu1 }
0x1976   :  { %11969 = vmatpush3.bf16.xpose.msra.mxu0 %v7677_v16  ;;  %v7872_v58 = vpop.permute.xlu1 %7871 }
0x1977   :  { %11980 = vmatprep.subr.bf16.mxu0 %v12678_v30  ;;  %v7877_v34 = vsel %vm421_vm4, %v7872_v58, 0 }
0x19fb   :  { %v7326_v49 = vpop.f32.mrb[220].mxu0 }
0x19fc   :  { %v7478_v27 = vpack.c.bf16 %v7374_v55, %v7326_v49  ;;  %v11926_v23 = vpop.f32.mrb[221].mxu0  ;;  %v7470_v62 = vpop.f32.mrb[0].mxu1 }
0x19fd   :  { %v7329_v40 = vpop.f32.mrb[222].mxu0  ;;  %v11944_v28 = vpop.f32.mrb[1].mxu1 }
0x19fe   :  { %v11927_v19 = vpop.f32.mrb[223].mxu0  ;;  %v7473_v24 = vpop.f32.mrb[2].mxu1  ;;  %11952 = vmatprep.mubr.msk.bf16.mxu0 %vm421_vm4, %v7478_v27 }
0x19ff   :  { %v11945_v17 = vpop.f32.mrb[3].mxu1  ;;  %v7870_v23 = vpop.permute.xlu1 %7869 }
0x1a03   :  { %v7422_v51 = vpop.f32.mrb[224].mxu0 }
0x1a04   :  { %v7479_v47 = vpack.c.bf16 %v7470_v62, %v7422_v51  ;;  %v11938_v4 = vpop.f32.mrb[225].mxu0 }
0x1a05   :  { %v7425_v5 = vpop.f32.mrb[226].mxu0 }
0x1a06   :  { %v11939_v18 = vpop.f32.mrb[227].mxu0  ;;  %11953 = vmatmul.mubr.msk.bf16.gmra.mrb[200].mxu0 %vm421_vm4, %v7479_v47 }
0x1a07   :  { %11970 = vmatprep.mubr.msk.bf16.mxu0 %vm12680_vm3, %v12678_v30 }
0x1a09   :  { %v7613_v26 = vpop.f32.mrb[4].mxu1 }
0x1a0a   :  { %v7969_v57 = vmul.f32 0.35355338, %v7613_v26  ;;  %v11960_v6 = vpop.f32.mrb[5].mxu1 }
0x1a0b   :  { %v7616_v45 = vpop.f32.mrb[6].mxu1 }
0x1a0c   :  { %v7977_v22 = vadd.f32 %v7969_v57, %v12985_v0  ;;  %v11961_v39 = vpop.f32.mrb[7].mxu1 }
0x1a0e   :  { %11971 = vmatmul.mubr.msk.bf16.vlgmr.msra.gmra.mrb[228].mxu0 %vm421_vm4, %v7670_v25  ;;  %v7985_v13 = vsel %vm421_vm4, %v7977_v22, -inf }
0x1a0f   :  { %11981 = vmatpush3.bf16.xpose.msra.mxu0 %v7777_v63  ;;  %7986 = vmax.xlane.f32.xlu1 %v7985_v13 }
0x1a10   :  { %11982 = vmatprep.mubr.msk.bf16.mxu0 %vm12680_vm3, %v12678_v30  ;;  %11992 = vmatprep.subr.bf16.mxu0 %v12678_v30 }
0x1a11   :  { %v7663_v1 = vpop.f32.mrb[8].mxu1 }
0x1a12   :  { %v7970_v44 = vmul.f32 0.35355338, %v7663_v1  ;;  %v11966_v55 = vpop.f32.mrb[9].mxu1 }
0x1a13   :  { %v7666_v0 = vpop.f32.mrb[10].mxu1 }
0x1a14   :  { %v7978_v50 = vadd.f32 %v7970_v44, %v12993_v8  ;;  %v11967_v36 = vpop.f32.mrb[11].mxu1 }
0x1a16   :  { %11983 = vmatmul.mubr.msk.bf16.vlgmr.msra.gmra.mrb[232].mxu0 %vm421_vm4, %v7770_v9  ;;  %v7988_v52 = vsel %vm421_vm4, %v7978_v50, -inf }
0x1a17   :  { %11993 = vmatpush3.bf16.xpose.msra.mxu0 %v7877_v34  ;;  %7989 = vmax.xlane.f32.xlu0 %v7988_v52 }
0x1a18   :  { %11994 = vmatprep.mubr.msk.bf16.mxu0 %vm12680_vm3, %v12678_v30  ;;  %12004 = vmatprep.subr.bf16.mxu0 %v12678_v30 }
0x1a19   :  { %v7763_v16 = vpop.f32.mrb[12].mxu1 }
0x1a1a   :  { %v7972_v32 = vmul.f32 0.35355338, %v7763_v16  ;;  %v11978_v59 = vpop.f32.mrb[13].mxu1 }
0x1a1b   :  { %v7766_v49 = vpop.f32.mrb[14].mxu1 }
0x1a1c   :  { %v7980_v8 = vadd.f32 %v7972_v32, %v13013_v37  ;;  %v11979_v27 = vpop.f32.mrb[15].mxu1 }
0x1a1e   :  { %11995 = vmatmul.mubr.msk.bf16.vlgmr.msra.gmra.mrb[236].mxu0 %vm421_vm4, %v7870_v23  ;;  %v7994_v62 = vsel %vm421_vm4, %v7980_v8, -inf }
0x1a1f   :  { %7995 = vmax.xlane.f32.xlu1 %v7994_v62  ;;  %12006 = vmatprep.mubr.msk.bf16.mxu0 %vm12680_vm3, %v12678_v30 }
0x1a21   :  { %v7863_v40 = vpop.f32.mrb[16].mxu1 }
0x1a22   :  { %v7974_v28 = vmul.f32 0.35355338, %v7863_v40  ;;  %v11990_v19 = vpop.f32.mrb[17].mxu1 }
0x1a23   :  { %v7866_v24 = vpop.f32.mrb[18].mxu1 }
0x1a24   :  { %v7982_v17 = vadd.f32 %v7974_v28, %v13034_v11  ;;  %v11991_v25 = vpop.f32.mrb[19].mxu1 }
0x1a26   :  { %v8000_v51 = vsel %vm421_vm4, %v7982_v17, -inf }
0x1a27   :  { %8001 = vmax.xlane.f32.xlu1 %v8000_v51 }
0x1a29   :  { %v7963_v37 = vpop.f32.mrb[20].mxu1 }
0x1a2a   :  { %v7976_v47 = vmul.f32 0.35355338, %v7963_v37  ;;  %v12002_v4 = vpop.f32.mrb[21].mxu1 }
0x1a2b   :  { %v7966_v5 = vpop.f32.mrb[22].mxu1 }
0x1a2c   :  { %v7984_v18 = vadd.f32 %v7976_v47, %v13051_v43  ;;  %v12003_v21 = vpop.f32.mrb[23].mxu1 }
0x1a2d   :  { %8081 = vrot.lane.b32.xlu0 %v13888_v42, %s15502_s25 }
0x1a2e   :  { %v8006_v26 = vsel %vm421_vm4, %v7984_v18, -inf }
0x1a2f   :  { %8007 = vmax.xlane.f32.xlu1 %v8006_v26 }
0x1a40   :  { %8129 = vrot.lane.b32.xlu1 %v13890_v38, %s15502_s25 }
0x1a44   :  { %8177 = vrot.lane.b32.xlu1 %v13898_v48, %s15502_s25 }
0x1a9c   :  { %v7987_v11 = vpop.xlane.xlu1 %7986 }
0x1a9d   :  { %v8009_v57 = vsub.f32 %v7977_v22, %v7987_v11 }
0x1a9f   :  { %v8017_v6 = vmul.f32 1.442695, %v8009_v57 }
0x1aa1   :  { %12493 = vpow2.f32 %v8017_v6 }
0x1aa4   :  { %v7990_v45 = vpop.xlane.xlu0 %7989 }
0x1aa5   :  { %v8010_v39 = vsub.f32 %v7978_v50, %v7990_v45 }
0x1aa7   :  { %v8019_v43 = vmul.f32 1.442695, %v8010_v39 }
0x1aa8   :  { %v8082_v9 = vpop.permute.xlu0 %8081 }
0x1aa9   :  { %12495 = vpow2.f32 %v8019_v43  ;;  %v8087_v42 = vsel %vm921_vm5, %v8082_v9, 0 }
0x1aaa   :  { %12005 = vmatpush3.bf16.msra.mxu0 %v8087_v42 }
0x1aab   :  { %v14647_v63 = vpop.eup %12493  ;;  %12016 = vmatprep.subr.bf16.mxu0 %v12678_v30 }
0x1aac   :  { %v7996_v38 = vpop.xlane.xlu1 %7995  ;;  %v8033_v48 = vsel %vm421_vm4, %v14647_v63, 0.0 }
0x1aad   :  { %v8012_v13 = vsub.f32 %v7980_v8, %v7996_v38  ;;  %8034 = vadd.xlane.f32.xlu0 %v8033_v48 }
0x1aaf   :  { %v8023_v22 = vmul.f32 1.442695, %v8012_v13 }
0x1ab1   :  { %12497 = vpow2.f32 %v8023_v22 }
0x1ab3   :  { %v14652_v1 = vpop.eup %12495 }
0x1ab4   :  { %v8002_v44 = vpop.xlane.xlu1 %8001  ;;  %v8036_v55 = vsel %vm421_vm4, %v14652_v1, 0.0 }
0x1ab5   :  { %v8014_v58 = vsub.f32 %v7982_v17, %v8002_v44  ;;  %8037 = vadd.xlane.f32.xlu1 %v8036_v55 }
0x1ab7   :  { %v8027_v0 = vmul.f32 1.442695, %v8014_v58 }
0x1ab9   :  { %12499 = vpow2.f32 %v8027_v0 }
0x1abb   :  { %v14656_v50 = vpop.eup %12497 }
0x1abc   :  { %v8008_v36 = vpop.xlane.xlu1 %8007  ;;  %v8042_v34 = vsel %vm421_vm4, %v14656_v50, 0.0 }
0x1abd   :  { %v8016_v52 = vsub.f32 %v7984_v18, %v8008_v36  ;;  %8043 = vadd.xlane.f32.xlu1 %v8042_v34 }
0x1abf   :  { %v8031_v16 = vmul.f32 1.442695, %v8016_v52 }
0x1ac0   :  { %v8130_v32 = vpop.permute.xlu1 %8129 }
0x1ac1   :  { %12501 = vpow2.f32 %v8031_v16  ;;  %v8135_v59 = vsel %vm921_vm5, %v8130_v32, 0 }
0x1ac2   :  { %12011 = vmatpush3.bf16.msra.mxu1 %v8135_v59 }
0x1ac3   :  { %v14661_v49 = vpop.eup %12499  ;;  %12022 = vmatprep.subr.bf16.mxu1 %v12678_v30 }
0x1ac4   :  { %v8048_v8 = vsel %vm421_vm4, %v14661_v49, 0.0 }
0x1ac5   :  { %8049 = vadd.xlane.f32.xlu1 %v8048_v8 }
0x1acb   :  { %v14666_v27 = vpop.eup %12501 }
0x1acc   :  { %v8054_v23 = vsel %vm421_vm4, %v14666_v27, 0.0 }
0x1acd   :  { %8055 = vadd.xlane.f32.xlu1 %v8054_v23 }
0x1ade   :  { %8273 = vrot.lane.b32.xlu1 %v13904_v3, %s15502_s25 }
0x1ae1   :  { %v7713_v62 = vpop.f32.mrb[228].mxu0 }
0x1ae2   :  { %v7971_v40 = vmul.f32 0.35355338, %v7713_v62  ;;  %v11972_v28 = vpop.f32.mrb[229].mxu0  ;;  %8369 = vrot.lane.b32.xlu1 %v13910_v10, %s15502_s25 }
0x1ae3   :  { %v7716_v19 = vpop.f32.mrb[230].mxu0 }
0x1ae4   :  { %v7979_v24 = vadd.f32 %v7971_v40, %v13003_v20  ;;  %v11973_v17 = vpop.f32.mrb[231].mxu0 }
0x1ae6   :  { %v7991_v25 = vsel %vm421_vm4, %v7979_v24, -inf }
0x1ae7   :  { %7992 = vmax.xlane.f32.xlu0 %v7991_v25 }
0x1ae9   :  { %v7813_v51 = vpop.f32.mrb[232].mxu0 }
0x1aea   :  { %v7973_v37 = vmul.f32 0.35355338, %v7813_v51  ;;  %v11984_v47 = vpop.f32.mrb[233].mxu0 }
0x1aeb   :  { %v7816_v4 = vpop.f32.mrb[234].mxu0 }
0x1aec   :  { %v7981_v5 = vadd.f32 %v7973_v37, %v13026_v2  ;;  %v11985_v3 = vpop.f32.mrb[235].mxu0  ;;  %v8178_v2 = vpop.permute.xlu1 %8177 }
0x1aed   :  { %v8183_v38 = vsel %vm921_vm5, %v8178_v2, 0 }
0x1aee   :  { %v7997_v18 = vsel %vm421_vm4, %v7981_v5, -inf }
0x1aef   :  { %7998 = vmax.xlane.f32.xlu0 %v7997_v18 }
0x1af1   :  { %v7913_v21 = vpop.f32.mrb[236].mxu0 }
0x1af2   :  { %v7975_v26 = vmul.f32 0.35355338, %v7913_v21  ;;  %v11996_v10 = vpop.f32.mrb[237].mxu0 }
0x1af3   :  { %v7916_v11 = vpop.f32.mrb[238].mxu0 }
0x1af4   :  { %v7983_v20 = vadd.f32 %v7975_v26, %v13042_v31  ;;  %v11997_v57 = vpop.f32.mrb[239].mxu0 }
0x1af6   :  { %v8003_v6 = vsel %vm421_vm4, %v7983_v20, -inf }
0x1af7   :  { %8004 = vmax.xlane.f32.xlu0 %v8003_v6 }
0x1b0d   :  { %8225 = vrot.lane.b32.xlu0 %v13894_v54, %s15502_s25 }
0x1b3a   :  { %v8035_v45 = vpop.xlane.xlu0 %8034 }
0x1b3b   :  { %12503 = vrcp.f32 %v8035_v45 }
0x1b42   :  { %v8038_v39 = vpop.xlane.xlu1 %8037 }
0x1b43   :  { %12505 = vrcp.f32 %v8038_v39 }
0x1b45   :  { %v12504_v43 = vpop.eup %12503 }
0x1b46   :  { %v8065_v9 = vmul.f32 %v12504_v43, %v14647_v63 }
0x1b48   :  { %v8073_v42 = vpack.c.bf16 %v8065_v9, %v8065_v9 }
0x1b4a   :  { %12007 = vmatmul.mubr.msk.bf16.vlgmr.msra.gmra.mrb[240].mxu0 %vm421_vm4, %v8073_v42  ;;  %v8044_v22 = vpop.xlane.xlu1 %8043 }
0x1b4b   :  { %12017 = vmatpush3.bf16.msra.mxu0 %v8183_v38  ;;  %12018 = vmatprep.mubr.msk.bf16.mxu0 %vm12680_vm3, %v12678_v30 }
0x1b4c   :  { %12028 = vmatprep.subr.bf16.mxu0 %v12678_v30 }
0x1b4d   :  { %v12506_v31 = vpop.eup %12505 }
0x1b4e   :  { %v8066_v54 = vmul.f32 %v12506_v31, %v14652_v1 }
0x1b50   :  { %v8074_v48 = vpack.c.bf16 %v8066_v54, %v8066_v54 }
0x1b52   :  { %12013 = vmatmul.mubr.msk.bf16.vlgmr.msra.gmra.mrb[24].mxu1 %vm421_vm4, %v8074_v48 }
0x1b53   :  { %12024 = vmatprep.mubr.msk.bf16.mxu1 %vm12680_vm3, %v12678_v30 }
0x1b74   :  { %v7993_v63 = vpop.xlane.xlu0 %7992 }
0x1b75   :  { %v8011_v13 = vsub.f32 %v7979_v24, %v7993_v63  ;;  %v8050_v24 = vpop.xlane.xlu1 %8049 }
0x1b77   :  { %v8021_v44 = vmul.f32 1.442695, %v8011_v13 }
0x1b79   :  { %12507 = vpow2.f32 %v8021_v44  ;;  %v8056_v4 = vpop.xlane.xlu1 %8055 }
0x1b7a   :  { %12509 = vrcp.f32 %v8044_v22 }
0x1b7c   :  { %v7999_v55 = vpop.xlane.xlu0 %7998 }
0x1b7d   :  { %v8013_v59 = vsub.f32 %v7981_v5, %v7999_v55  ;;  %v8274_v21 = vpop.permute.xlu1 %8273 }
0x1b7e   :  { %v8279_v11 = vsel %vm921_vm5, %v8274_v21, 0 }
0x1b7f   :  { %v8025_v8 = vmul.f32 1.442695, %v8013_v59 }
0x1b81   :  { %12511 = vpow2.f32 %v8025_v8  ;;  %v8370_v13 = vpop.permute.xlu1 %8369 }
0x1b82   :  { %v8375_v55 = vsel %vm921_vm5, %v8370_v13, 0 }
0x1b83   :  { %v12508_v58 = vpop.eup %12507 }
0x1b84   :  { %v12510_v0 = vpop.eup %12509  ;;  %v8005_v36 = vpop.xlane.xlu0 %8004  ;;  %v8039_v34 = vsel %vm421_vm4, %v12508_v58, 0.0 }
0x1b85   :  { %8040 = vadd.xlane.f32.xlu0 %v8039_v34  ;;  %v8068_v1 = vmul.f32 %v12510_v0, %v14656_v50  ;;  %v8015_v23 = vsub.f32 %v7983_v20, %v8005_v36 }
0x1b87   :  { %v8076_v32 = vpack.c.bf16 %v8068_v1, %v8068_v1  ;;  %v8029_v50 = vmul.f32 1.442695, %v8015_v23 }
0x1b88   :  { %v8226_v52 = vpop.permute.xlu0 %8225 }
0x1b89   :  { %v8231_v16 = vsel %vm921_vm5, %v8226_v52, 0  ;;  %12513 = vpow2.f32 %v8029_v50  ;;  %v10744_v52 = vld [vmem:[%s15477_s6 + $0x1c] sm:$0xf] }
0x1b8a   :  { %12023 = vmatpush3.bf16.msra.mxu1 %v8231_v16  ;;  %12515 = vrcp.f32 %v8050_v24  ;;  %v8483_v16 = vsel %vm921_vm5, %v10744_v52, 0 }
0x1b8b   :  { %12034 = vmatprep.subr.bf16.mxu1 %v12678_v30  ;;  %v12512_v62 = vpop.eup %12511 }
0x1b8c   :  { %v8045_v40 = vsel %vm421_vm4, %v12512_v62, 0.0 }
0x1b8d   :  { %12025 = vmatmul.mubr.msk.bf16.vlgmr.msra.gmra.mrb[28].mxu1 %vm421_vm4, %v8076_v32 }
0x1b8e   :  { %12036 = vmatprep.mubr.msk.bf16.mxu1 %vm12680_vm3, %v12678_v30 }
0x1b93   :  { %v12514_v28 = vpop.eup %12513 }
0x1b94   :  { %v8051_v19 = vsel %vm421_vm4, %v12514_v28, 0.0 }
0x1b9b   :  { %8321 = vrot.lane.b32.xlu0 %v13906_v14, %s15502_s25  ;;  %v12516_v14 = vpop.eup %12515 }
0x1b9c   :  { %v8070_v25 = vmul.f32 %v12516_v14, %v14661_v49 }
0x1b9e   :  { %v8078_v47 = vpack.c.bf16 %v8070_v25, %v8070_v25 }
0x1bba   :  { %8046 = vadd.xlane.f32.xlu0 %v8045_v40 }
0x1bbe   :  { %8052 = vadd.xlane.f32.xlu0 %v8051_v19 }
0x1bd4   :  { %8417 = vrot.lane.b32.xlu0 %v13914_v33, %s15502_s25 }
0x1c12   :  { %v8041_v17 = vpop.xlane.xlu0 %8040 }
0x1c13   :  { %12517 = vrcp.f32 %v8041_v17 }
0x1c14   :  { %12519 = vrcp.f32 %v8056_v4 }
0x1c16   :  { %v8322_v51 = vpop.permute.xlu0 %8321 }
0x1c17   :  { %v8327_v37 = vsel %vm921_vm5, %v8322_v51, 0 }
0x1c18   :  { %12035 = vmatpush3.bf16.msra.mxu1 %v8327_v37 }
0x1c19   :  { %12046 = vmatprep.subr.bf16.mxu1 %v12678_v30 }
0x1c1b   :  { %12037 = vmatmul.mubr.msk.bf16.vlgmr.msra.gmra.mrb[32].mxu1 %vm421_vm4, %v8078_v47 }
0x1c1c   :  { %12048 = vmatprep.mubr.msk.bf16.mxu1 %vm12680_vm3, %v12678_v30 }
0x1c1d   :  { %v12518_v33 = vpop.eup %12517  ;;  %v8123_v5 = vpop.f32.mrb[240].mxu0 }
0x1c1e   :  { %v12008_v3 = vpop.f32.mrb[241].mxu0  ;;  %v8067_v18 = vmul.f32 %v12518_v33, %v12508_v58  ;;  %v12520_v43 = vpop.eup %12519 }
0x1c1f   :  { %v8126_v26 = vpop.f32.mrb[242].mxu0  ;;  %v8072_v42 = vmul.f32 %v12520_v43, %v14666_v27 }
0x1c20   :  { %v12009_v49 = vpop.f32.mrb[243].mxu0  ;;  %v8075_v10 = vpack.c.bf16 %v8067_v18, %v8067_v18 }
0x1c21   :  { %v8080_v48 = vpack.c.bf16 %v8072_v42, %v8072_v42 }
0x1c22   :  { %12019 = vmatmul.mubr.msk.bf16.vlgmr.msra.gmra.mrb[244].mxu0 %vm421_vm4, %v8075_v10  ;;  %v10750_v10 = vld [vmem:[%s15478_s7 + $0x1] ss:$0 sm:$0xff] }
0x1c23   :  { %12029 = vmatpush3.bf16.msra.mxu0 %v8279_v11  ;;  %12030 = vmatprep.mubr.msk.bf16.mxu0 %vm12680_vm3, %v12678_v30 }
0x1c24   :  { %12040 = vmatprep.subr.bf16.mxu0 %v12678_v30 }
0x1c25   :  { %v8171_v20 = vpop.f32.mrb[24].mxu1 }
0x1c26   :  { %v8465_v57 = vpack.c.bf16 %v8171_v20, %v8123_v5  ;;  %v12014_v6 = vpop.f32.mrb[25].mxu1 }
0x1c27   :  { %v8174_v45 = vpop.f32.mrb[26].mxu1 }
0x1c28   :  { %v12015_v2 = vpop.f32.mrb[27].mxu1 }
0x1c47   :  { %v8047_v39 = vpop.xlane.xlu0 %8046 }
0x1c48   :  { %12521 = vrcp.f32 %v8047_v39 }
0x1c4b   :  { %v8053_v9 = vpop.xlane.xlu0 %8052 }
0x1c4c   :  { %12523 = vrcp.f32 %v8053_v9 }
0x1c4f   :  { %v8418_v38 = vpop.permute.xlu0 %8417 }
0x1c50   :  { %v8423_v31 = vsel %vm921_vm5, %v8418_v38, 0 }
0x1c51   :  { %12047 = vmatpush3.bf16.msra.mxu1 %v8423_v31 }
0x1c52   :  { %v12522_v54 = vpop.eup %12521 }
0x1c53   :  { %v8069_v63 = vmul.f32 %v12522_v54, %v12512_v62 }
0x1c54   :  { %12049 = vmatmul.mubr.msk.bf16.vlgmr.msra.gmra.mrb[36].mxu1 %vm421_vm4, %v8080_v48 }
0x1c55   :  { %v8077_v22 = vpack.c.bf16 %v8069_v63, %v8069_v63 }
0x1c56   :  { %v12524_v44 = vpop.eup %12523 }
0x1c57   :  { %12031 = vmatmul.mubr.msk.bf16.vlgmr.msra.gmra.mrb[248].mxu0 %vm421_vm4, %v8077_v22  ;;  %v8071_v27 = vmul.f32 %v12524_v44, %v12514_v28 }
0x1c58   :  { %12041 = vmatpush3.bf16.msra.mxu0 %v8375_v55  ;;  %12042 = vmatprep.mubr.msk.bf16.mxu0 %vm12680_vm3, %v12678_v30 }
0x1c59   :  { %v8079_v58 = vpack.c.bf16 %v8071_v27, %v8071_v27  ;;  %12178 = vmatprep.subr.msk.bf16.mxu0 %vm921_vm5, %v10744_v52 }
0x1c5f   :  { %12043 = vmatmul.mubr.msk.bf16.vlgmr.msra.gmra.mrb[252].mxu0 %vm421_vm4, %v8079_v58 }
0x1c60   :  { %v8267_v0 = vpop.f32.mrb[28].mxu1  ;;  %12054 = vmatprep.mubr.msk.bf16.mxu0 %vm421_vm4, %v8465_v57  ;;  %12053 = vmatpush3.bf16.msra.mxu0 %v8483_v16 }
0x1c61   :  { %v12026_v36 = vpop.f32.mrb[29].mxu1 }
0x1c62   :  { %v8270_v34 = vpop.f32.mrb[30].mxu1 }
0x1c63   :  { %v12027_v1 = vpop.f32.mrb[31].mxu1 }
0x1cee   :  { %v8363_v32 = vpop.f32.mrb[32].mxu1 }
0x1cef   :  { %v12038_v59 = vpop.f32.mrb[33].mxu1 }
0x1cf0   :  { %v8366_v8 = vpop.f32.mrb[34].mxu1 }
0x1cf1   :  { %v12039_v23 = vpop.f32.mrb[35].mxu1 }
0x1cf5   :  { %v8219_v50 = vpop.f32.mrb[244].mxu0 }
0x1cf6   :  { %v8466_v62 = vpack.c.bf16 %v8267_v0, %v8219_v50  ;;  %v12020_v40 = vpop.f32.mrb[245].mxu0 }
0x1cf7   :  { %v8222_v28 = vpop.f32.mrb[246].mxu0 }
0x1cf8   :  { %v12021_v19 = vpop.f32.mrb[247].mxu0  ;;  %12055 = vmatmul.mubr.msk.bf16.vlgmr.msra.gmra.mrb[196].mxu0 %vm421_vm4, %v8466_v62 }
0x1d27   :  { %v8459_v24 = vpop.f32.mrb[36].mxu1 }
0x1d28   :  { %v12050_v14 = vpop.f32.mrb[37].mxu1 }
0x1d29   :  { %v8462_v17 = vpop.f32.mrb[38].mxu1 }
0x1d2a   :  { %v8315_v25 = vpop.f32.mrb[248].mxu0  ;;  %v12051_v51 = vpop.f32.mrb[39].mxu1 }
0x1d2b   :  { %v8467_v37 = vpack.c.bf16 %v8363_v32, %v8315_v25  ;;  %v12032_v47 = vpop.f32.mrb[249].mxu0 }
0x1d2c   :  { %v8318_v4 = vpop.f32.mrb[250].mxu0 }
0x1d2d   :  { %v12033_v33 = vpop.f32.mrb[251].mxu0  ;;  %12058 = vmatprep.mubr.msk.bf16.mxu0 %vm421_vm4, %v8467_v37 }
0x1d32   :  { %v8411_v5 = vpop.f32.mrb[252].mxu0 }
0x1d33   :  { %v8468_v3 = vpack.c.bf16 %v8459_v24, %v8411_v5  ;;  %v12044_v18 = vpop.f32.mrb[253].mxu0 }
0x1d34   :  { %v8414_v21 = vpop.f32.mrb[254].mxu0 }
0x1d35   :  { %v12045_v26 = vpop.f32.mrb[255].mxu0  ;;  %12059 = vmatmul.mubr.msk.bf16.gmra.mrb[200].mxu0 %vm421_vm4, %v8468_v3 }
0x1d36   :  { %8912 = vmatprep.mubr.bf16.mxu0 %v12677_v29 }
0x1dcb   :  { %v12056_v49 = vpop.f32.mrb[196].mxu0 }
0x1dcc   :  { %v8519_v11 = vpop.f32.mrb[197].mxu0  ;;  %v8560_v2 = vadd.f32 %v12056_v49, %v13860_v60 }
0x1dcd   :  { %v8558_v20 = vadd.f32 %v8519_v11, %v13850_v12  ;;  %v12057_v57 = vpop.f32.mrb[198].mxu0 }
0x1dce   :  { %v8561_v6 = vadd.f32 %v12057_v57, %v13858_v46  ;;  %v8522_v45 = vpop.f32.mrb[199].mxu0  ;;  %v8576_v31 = vadd.f32 %v10750_v10, %v8560_v2 }
0x1dcf   :  { %v8574_v39 = vadd.f32 %v10750_v10, %v8558_v20  ;;  %v8559_v43 = vadd.f32 %v8522_v45, %v13852_v53 }
0x1dd0   :  { %v8577_v9 = vadd.f32 %v10750_v10, %v8561_v6  ;;  %v8588_v46 = vsel %vm317_vm2, %v8576_v31, 0.0 }
0x1dd1   :  { %v8575_v42 = vadd.f32 %v10750_v10, %v8559_v43  ;;  %v8582_v38 = vsel %vm317_vm2, %v8574_v39, 0.0 }
0x1dd2   :  { %8583 = vadd.xlane.f32.xlu1 %v8582_v38  ;;  %v8591_v12 = vsel %vm317_vm2, %v8577_v9, 0.0 }
0x1dd3   :  { %v8585_v54 = vsel %vm317_vm2, %v8575_v42, 0.0 }
0x1dd4   :  { %8586 = vadd.xlane.f32.xlu0 %v8585_v54  ;;  %v12235_v54 = vld [vmem:[%s15483_s10] ss:$8 sps:$4 sm:$0xff]  }
0x1dd6   :  { %8592 = vadd.xlane.f32.xlu1 %v8591_v12  ;;  %v12237_v12 = vld [vmem:[%s15483_s10 + $0x4] ss:$8 sps:$4 sm:$0xff]  }
0x1dd7   :  { %8880 = vmatprep.subr.bf16.mxu0 %v12237_v12 }
0x1dd8   :  { %8589 = vadd.xlane.f32.xlu0 %v8588_v46  ;;  %8881 = vmatpush1.bf16.msra.mxu0 %v12235_v54 }
0x1e08   :  { %v12060_v48 = vpop.f32.mrb[200].mxu0 }
0x1e09   :  { %v8564_v60 = vadd.f32 %v12060_v48, %v13876_v35  ;;  %v8535_v63 = vpop.f32.mrb[201].mxu0 }
0x1e0a   :  { %v8562_v53 = vadd.f32 %v8535_v63, %v13868_v7  ;;  %v12061_v13 = vpop.f32.mrb[202].mxu0 }
0x1e0b   :  { %v8580_v22 = vadd.f32 %v10750_v10, %v8564_v60  ;;  %v8565_v44 = vadd.f32 %v12061_v13, %v13878_v61  ;;  %v8538_v55 = vpop.f32.mrb[203].mxu0 }
0x1e0c   :  { %v8578_v27 = vadd.f32 %v10750_v10, %v8562_v53  ;;  %v8563_v58 = vadd.f32 %v8538_v55, %v13870_v15 }
0x1e0d   :  { %v8581_v0 = vadd.f32 %v10750_v10, %v8565_v44  ;;  %v8600_v35 = vsel %vm317_vm2, %v8580_v22, 0.0 }
0x1e0e   :  { %v8579_v36 = vadd.f32 %v10750_v10, %v8563_v58  ;;  %v8594_v34 = vsel %vm317_vm2, %v8578_v27, 0.0 }
0x1e0f   :  { %8595 = vadd.xlane.f32.xlu0 %v8594_v34  ;;  %v8603_v7 = vsel %vm317_vm2, %v8581_v0, 0.0  ;;  %v10752_v34 = vld [vmem:[%s15479_s8 + $0x1] ss:$0 sm:$0xff] }
0x1e10   :  { %v8597_v1 = vsel %vm317_vm2, %v8579_v36, 0.0 }
0x1e11   :  { %8598 = vadd.xlane.f32.xlu1 %v8597_v1 }
0x1e13   :  { %8601 = vadd.xlane.f32.xlu0 %v8600_v35 }
0x1e15   :  { %8604 = vadd.xlane.f32.xlu1 %v8603_v7 }
0x1e5f   :  { %v8584_v52 = vpop.xlane.xlu1 %8583 }
0x1e60   :  { %v8606_v61 = vmul.f32 0.03125, %v8584_v52 }
0x1e61   :  { %v8587_v16 = vpop.xlane.xlu0 %8586 }
0x1e62   :  { %v14753_v32 = vsub.f32 %v8574_v39, %v8606_v61  ;;  %v8607_v15 = vmul.f32 0.03125, %v8587_v16  ;;  %v10754_v61 = vld [vmem:[%s15480_s9 + $0x1] ss:$0 sm:$0xff] }
0x1e63   :  { %v8593_v59 = vpop.xlane.xlu1 %8592 }
0x1e64   :  { %v14755_v8 = vsub.f32 %v8575_v42, %v8607_v15  ;;  %v8609_v23 = vmul.f32 0.03125, %v8593_v59  ;;  %v8622_v50 = vmul.f32 %v14753_v32, %v14753_v32 }
0x1e65   :  { %v8590_v62 = vpop.xlane.xlu0 %8589 }
0x1e66   :  { %v14759_v40 = vsub.f32 %v8577_v9, %v8609_v23  ;;  %v8608_v28 = vmul.f32 0.03125, %v8590_v62  ;;  %v8630_v19 = vsel %vm317_vm2, %v8622_v50, 0.0  ;;  %v8623_v24 = vmul.f32 %v14755_v8, %v14755_v8 }
0x1e67   :  { %8631 = vadd.xlane.f32.xlu0 %v8630_v19 }
0x1e68   :  { %v14764_v14 = vsub.f32 %v8576_v31, %v8608_v28  ;;  %v8633_v17 = vsel %vm317_vm2, %v8623_v24, 0.0  ;;  %v8625_v25 = vmul.f32 %v14759_v40, %v14759_v40  ;;  %v12225_v31 = vld [vmem:[%s15481_s2] sm:$0xff]  }
0x1e69   :  { %8634 = vadd.xlane.f32.xlu1 %v8633_v17  ;;  %12070 = vmatprep.mubr.msk.bf16.mxu1 %vm8750_vm14, %v12225_v31 }
0x1e6a   :  { %v8624_v51 = vmul.f32 %v14764_v14, %v14764_v14  ;;  %v8639_v37 = vsel %vm317_vm2, %v8625_v25, 0.0 }
0x1e6c   :  { %v8636_v47 = vsel %vm317_vm2, %v8624_v51, 0.0 }
0x1e6d   :  { %8640 = vadd.xlane.f32.xlu1 %v8639_v37  ;;  %8637 = vadd.xlane.f32.xlu0 %v8636_v47 }
0x1e9c   :  { %v8596_v4 = vpop.xlane.xlu0 %8595 }
0x1e9d   :  { %v8610_v33 = vmul.f32 0.03125, %v8596_v4 }
0x1e9e   :  { %v8599_v5 = vpop.xlane.xlu1 %8598 }
0x1e9f   :  { %v14773_v3 = vsub.f32 %v8578_v27, %v8610_v33  ;;  %v8611_v18 = vmul.f32 0.03125, %v8599_v5 }
0x1ea0   :  { %v8602_v21 = vpop.xlane.xlu0 %8601 }
0x1ea1   :  { %v14775_v26 = vsub.f32 %v8579_v36, %v8611_v18  ;;  %v8612_v49 = vmul.f32 0.03125, %v8602_v21  ;;  %v8626_v10 = vmul.f32 %v14773_v3, %v14773_v3 }
0x1ea2   :  { %v8605_v11 = vpop.xlane.xlu1 %8604 }
0x1ea3   :  { %v14779_v20 = vsub.f32 %v8580_v22, %v8612_v49  ;;  %v8613_v57 = vmul.f32 0.03125, %v8605_v11  ;;  %v8642_v6 = vsel %vm317_vm2, %v8626_v10, 0.0  ;;  %v8627_v45 = vmul.f32 %v14775_v26, %v14775_v26 }
0x1ea4   :  { %8643 = vadd.xlane.f32.xlu0 %v8642_v6 }
0x1ea5   :  { %v14784_v2 = vsub.f32 %v8581_v0, %v8613_v57  ;;  %v8645_v39 = vsel %vm317_vm2, %v8627_v45, 0.0  ;;  %v8628_v43 = vmul.f32 %v14779_v20, %v14779_v20 }
0x1ea6   :  { %8646 = vadd.xlane.f32.xlu1 %v8645_v39 }
0x1ea7   :  { %v8648_v9 = vsel %vm317_vm2, %v8628_v43, 0.0  ;;  %v8629_v42 = vmul.f32 %v14784_v2, %v14784_v2 }
0x1ea8   :  { %8649 = vadd.xlane.f32.xlu0 %v8648_v9 }
0x1ea9   :  { %v8651_v38 = vsel %vm317_vm2, %v8629_v42, 0.0 }
0x1eaa   :  { %8652 = vadd.xlane.f32.xlu1 %v8651_v38 }
0x1ef4   :  { %v8632_v46 = vpop.xlane.xlu0 %8631 }
0x1ef5   :  { %v8654_v48 = vmul.f32 0.03125, %v8632_v46 }
0x1ef6   :  { %v8635_v60 = vpop.xlane.xlu1 %8634 }
0x1ef7   :  { %v8662_v63 = vadd.f32 1e-05, %v8654_v48  ;;  %v8655_v53 = vmul.f32 0.03125, %v8635_v60 }
0x1ef9   :  { %12525 = vrsqrt.f32 %v8662_v63  ;;  %v8663_v13 = vadd.f32 1e-05, %v8655_v53 }
0x1efa   :  { %v8641_v22 = vpop.xlane.xlu1 %8640  ;;  %v8638_v44 = vpop.xlane.xlu0 %8637 }
0x1efb   :  { %12527 = vrsqrt.f32 %v8663_v13  ;;  %v8657_v55 = vmul.f32 0.03125, %v8641_v22  ;;  %v8656_v27 = vmul.f32 0.03125, %v8638_v44  ;;  %v14831_v13 = vld [vmem:[%s15482_s12] ss:$8 sps:$4 sm:$0xff]   ;;  %v14837_v22 = vld [vmem:[%s15482_s12 + $0x14] ss:$8 sps:$4 sm:$0xff]  }
0x1efc   :  { %v14845_v44 = vld [vmem:[%s15482_s12 + $0x10] ss:$8 sps:$4 sm:$0xff]  }
0x1efd   :  { %v8665_v58 = vadd.f32 1e-05, %v8657_v55  ;;  %v8664_v0 = vadd.f32 1e-05, %v8656_v27  ;;  %v12228_v55 = vld [vmem:[%s15481_s2 + $0x18] sm:$0xff]  }
0x1efe   :  { %v14857_v27 = vld [vmem:[%s15482_s12 + $0x24] ss:$8 sps:$4 sm:$0xff]  }
0x1eff   :  { %12529 = vrsqrt.f32 %v8665_v58  ;;  %v14862_v58 = vld [vmem:[%s15482_s12 + $0x20] ss:$8 sps:$4 sm:$0xff]  }
0x1f00   :  { %12531 = vrsqrt.f32 %v8664_v0  ;;  %v12243_v0 = vld [vmem:[%s15483_s10 + $0x14] ss:$8 sps:$4 sm:$0xff]  }
0x1f01   :  { %8882 = vmatprep.subr.bf16.mxu0 %v12243_v0 }
0x1f03   :  { %v12526_v36 = vpop.eup %12525 }
0x1f04   :  { %v8678_v1 = vmul.f32 %v12526_v36, %v14753_v32  ;;  %v12241_v36 = vld [vmem:[%s15483_s10 + $0x10] ss:$8 sps:$4 sm:$0xff]  }
0x1f05   :  { %v12528_v35 = vpop.eup %12527  ;;  %8883 = vmatpush1.bf16.msra.mxu0 %v12241_v36 }
0x1f06   :  { %v8679_v7 = vmul.f32 %v12528_v35, %v14755_v8  ;;  %v8694_v52 = vmul.f32 %v10752_v34, %v8678_v1  ;;  %v14880_v1 = vld [vmem:[%s15482_s12 + $0x30] ss:$8 sps:$4 sm:$0xff]  }
0x1f08   :  { %v8695_v16 = vmul.f32 %v10752_v34, %v8679_v7  ;;  %v8710_v23 = vadd.f32 %v10754_v61, %v8694_v52 }
0x1f09   :  { %v12530_v15 = vpop.eup %12529 }
0x1f0a   :  { %v12532_v59 = vpop.eup %12531  ;;  %v8711_v50 = vadd.f32 %v10754_v61, %v8695_v16  ;;  %v8681_v62 = vmul.f32 %v12530_v15, %v14759_v40 }
0x1f0b   :  { %v8680_v28 = vmul.f32 %v12532_v59, %v14764_v14 }
0x1f0c   :  { %v8726_v19 = vpack.c.bf16 %v8711_v50, %v8710_v23  ;;  %v8697_v24 = vmul.f32 %v10752_v34, %v8681_v62 }
0x1f0d   :  { %v8696_v32 = vmul.f32 %v10752_v34, %v8680_v28 }
0x1f0e   :  { %12062 = vmatprep.subr.bf16.mxu1 %v8726_v19  ;;  %v8713_v17 = vadd.f32 %v10754_v61, %v8697_v24 }
0x1f0f   :  { %12063 = vmatpush3.bf16.msra.mxu1 %v8726_v19  ;;  %v8712_v8 = vadd.f32 %v10754_v61, %v8696_v32 }
0x1f11   :  { %v8727_v25 = vpack.c.bf16 %v8713_v17, %v8712_v8 }
0x1f13   :  { %12064 = vmatprep.subr.bf16.mxu1 %v8727_v25 }
0x1f14   :  { %12065 = vmatpush3.bf16.msra.mxu1 %v8727_v25  ;;  %v8844_v25 = vsub.s32 1, %v12869_v41 }
0x1f31   :  { %v8644_v51 = vpop.xlane.xlu0 %8643 }
0x1f32   :  { %v8658_v37 = vmul.f32 0.03125, %v8644_v51  ;;  %v8836_v51 = vld [vmem:[%s15484_s11] sm:$0x3] }
0x1f33   :  { %v8647_v47 = vpop.xlane.xlu1 %8646 }
0x1f34   :  { %v8666_v4 = vadd.f32 1e-05, %v8658_v37  ;;  %v8659_v33 = vmul.f32 0.03125, %v8647_v47  ;;  %v8841_v37 = vrot.slane %v8836_v51, %v12976_v56  ;;  %v8845_v47 = vrot.slane %v8836_v51, %v8844_v25 }
0x1f35   :  { %v8650_v5 = vpop.xlane.xlu0 %8649 }
0x1f36   :  { %12533 = vrsqrt.f32 %v8666_v4  ;;  %v8667_v40 = vadd.f32 1e-05, %v8659_v33  ;;  %v8660_v18 = vmul.f32 0.03125, %v8650_v5 }
0x1f37   :  { %v8653_v14 = vpop.xlane.xlu1 %8652 }
0x1f38   :  { %12535 = vrsqrt.f32 %v8667_v40  ;;  %v8668_v21 = vadd.f32 1e-05, %v8660_v18  ;;  %v8661_v49 = vmul.f32 0.03125, %v8653_v14 }
0x1f3a   :  { %12537 = vrsqrt.f32 %v8668_v21  ;;  %v8669_v10 = vadd.f32 1e-05, %v8661_v49 }
0x1f3c   :  { %12539 = vrsqrt.f32 %v8669_v10 }
0x1f40   :  { %v12534_v11 = vpop.eup %12533 }
0x1f41   :  { %v8682_v57 = vmul.f32 %v12534_v11, %v14773_v3 }
0x1f42   :  { %v12536_v6 = vpop.eup %12535 }
0x1f43   :  { %v8683_v45 = vmul.f32 %v12536_v6, %v14775_v26  ;;  %v8698_v39 = vmul.f32 %v10752_v34, %v8682_v57  ;;  %v14820_v26 = vld [vmem:[%s15482_s12 + $0x4] ss:$8 sps:$4 sm:$0xff]  }
0x1f44   :  { %v12538_v43 = vpop.eup %12537  ;;  %9340 = vmatprep.subr.bf16.mxu0 %v14820_v26 }
0x1f45   :  { %v8699_v9 = vmul.f32 %v10752_v34, %v8683_v45  ;;  %v8684_v42 = vmul.f32 %v12538_v43, %v14779_v20  ;;  %v8714_v31 = vadd.f32 %v10754_v61, %v8698_v39  ;;  %v12226_v20 = vld [vmem:[%s15481_s2 + $0x8] sm:$0xff]  }
0x1f46   :  { %v12540_v38 = vpop.eup %12539 }
0x1f47   :  { %v8715_v54 = vadd.f32 %v10754_v61, %v8699_v9  ;;  %v8685_v12 = vmul.f32 %v12540_v38, %v14784_v2  ;;  %v8700_v46 = vmul.f32 %v10752_v34, %v8684_v42  ;;  %v12227_v2 = vld [vmem:[%s15481_s2 + $0x10] sm:$0xff]  }
0x1f49   :  { %v8728_v48 = vpack.c.bf16 %v8715_v54, %v8714_v31  ;;  %v8701_v60 = vmul.f32 %v10752_v34, %v8685_v12  ;;  %v8716_v63 = vadd.f32 %v10754_v61, %v8700_v46  ;;  %v14875_v34 = vld [vmem:[%s15482_s12 + $0x34] ss:$8 sps:$4 sm:$0xff]  }
0x1f4b   :  { %12066 = vmatprep.subr.bf16.mxu1 %v8728_v48  ;;  %v8717_v53 = vadd.f32 %v10754_v61, %v8701_v60 }
0x1f4c   :  { %12067 = vmatpush3.bf16.msra.mxu1 %v8728_v48 }
0x1f4d   :  { %v8729_v3 = vpack.c.bf16 %v8717_v53, %v8716_v63 }
0x1f4f   :  { %12068 = vmatprep.subr.bf16.mxu1 %v8729_v3 }
0x1f50   :  { %12069 = vmatpush3.bf16.msra.mxu1 %v8729_v3 }
0x1f51   :  { %9020 = vmatprep.subr.bf16.mxu1 %v14820_v26 }
0x1f53   :  { %12071 = vmatmul.mubr.msk.bf16.vlgmr.msra.gmra.mrb[40].mxu1 %vm8750_vm14, %v12226_v20 }
0x1f54   :  { %12074 = vmatprep.mubr.msk.bf16.mxu1 %vm8750_vm14, %v12227_v2  ;;  %9021 = vmatpush1.bf16.msra.mxu1 %v14831_v13 }
0x1f55   :  { %9022 = vmatprep.subr.bf16.mxu1 %v14837_v22 }
0x1f58   :  { %9023 = vmatpush1.bf16.msra.mxu1 %v14845_v44 }
0x1f59   :  { %9024 = vmatprep.subr.bf16.mxu1 %v14857_v27 }
0x1f5b   :  { %12075 = vmatmul.mubr.msk.bf16.gmra.mrb[44].mxu1 %vm8750_vm14, %v12228_v55 }
0x1f5c   :  { %9052 = vmatprep.mubr.bf16.mxu1 %v12677_v29  ;;  %9025 = vmatpush1.bf16.msra.mxu1 %v14862_v58 }
0x1f5d   :  { %9026 = vmatprep.subr.bf16.mxu1 %v14875_v34 }
0x1f60   :  { %9027 = vmatpush1.bf16.msra.mxu1 %v14880_v1 }
0x1f61   :  { %9174 = vmatprep.subr.bf16.mxu1 %v14820_v26 }
0x1f63   :  { %9053 = vmatmul.mubr.bf16.vlgmr.msra.gmra.mrb[48].mxu1 %v12677_v29 }
0x1f64   :  { %9175 = vmatpush1.bf16.msra.mxu1 %v14831_v13  ;;  %9206 = vmatprep.mubr.bf16.mxu1 %v12677_v29 }
0x1f65   :  { %9176 = vmatprep.subr.bf16.mxu1 %v14837_v22 }
0x1f68   :  { %9177 = vmatpush1.bf16.msra.mxu1 %v14845_v44 }
0x1f69   :  { %9178 = vmatprep.subr.bf16.mxu1 %v14857_v27 }
0x1f6c   :  { %9179 = vmatpush1.bf16.msra.mxu1 %v14862_v58 }
0x1f6d   :  { %9180 = vmatprep.subr.bf16.mxu1 %v14875_v34 }
0x1f70   :  { %9181 = vmatpush1.bf16.msra.mxu1 %v14880_v1 }
0x1f71   :  { %9506 = vmatprep.subr.bf16.mxu1 %v14820_v26 }
0x2026   :  { %v12072_v35 = vpop.f32.mrb[40].mxu1 }
0x2027   :  { %v8797_v7 = vpop.f32.mrb[41].mxu1 }
0x2028   :  { %v12073_v52 = vpop.f32.mrb[42].mxu1 }
0x2029   :  { %v8829_v61 = vpack.c.bf16 %v12073_v52, %v12072_v35  ;;  %v8800_v16 = vpop.f32.mrb[43].mxu1 }
0x202a   :  { %v8828_v15 = vpack.c.bf16 %v8800_v16, %v8797_v7 }
0x202c   :  { %10767 = vmatmul.mubr.msk.bf16.vlgmr.msra.gmra.mrb[0].mxu0 %vm317_vm2, %v8828_v15 }
0x202d   :  { %8922 = vmatprep.mubr.bf16.mxu0 %v12677_v29  ;;  %9341 = vmatpush1.bf16.msra.mxu0 %v14831_v13 }
0x202e   :  { %v12076_v59 = vpop.f32.mrb[44].mxu1  ;;  %9342 = vmatprep.subr.bf16.mxu0 %v14837_v22 }
0x202f   :  { %v8813_v23 = vpop.f32.mrb[45].mxu1 }
0x2030   :  { %v12077_v50 = vpop.f32.mrb[46].mxu1 }
0x2031   :  { %v8831_v62 = vpack.c.bf16 %v12077_v50, %v12076_v59  ;;  %v8816_v28 = vpop.f32.mrb[47].mxu1  ;;  %9343 = vmatpush1.bf16.msra.mxu0 %v14845_v44  ;;  %v14950_v59 = vld [vmem:[%s15476_s1] sm:$0xff] }
0x2032   :  { %v8830_v19 = vpack.c.bf16 %v8816_v28, %v8813_v23  ;;  %9344 = vmatprep.subr.bf16.mxu0 %v14857_v27  ;;  %vm9114_vm15 = vcmp.gt.s32.totalorder %v14950_v59, 0  ;;  %vm9116_vm0 = vcmp.gt.s32.totalorder %v14950_v59, 7  ;;  %vm9269_vm1 = vcmp.gt.s32.totalorder %v14950_v59, 1 }
0x2033   :  { %v9117_v28 = vsel %vm9116_vm0, 1.0, %v12678_v30  ;;  %vm9271_vm3 = vcmp.gt.s32.totalorder %v14950_v59, 6  ;;  %vm9435_vm4 = vcmp.gt.s32.totalorder %v14950_v59, 2  ;;  %vm9437_vm5 = vcmp.gt.s32.totalorder %v14950_v59, 5 }
0x2034   :  { %10768 = vmatmul.mubr.msk.bf16.gmra.mrb[4].mxu0 %vm317_vm2, %v8829_v61  ;;  %vm9601_vm6 = vcmp.gt.s32.totalorder %v14950_v59, 3  ;;  %vm9603_vm7 = vcmp.gt.s32.totalorder %v14950_v59, 4 }
0x2035   :  { %8932 = vmatprep.mubr.bf16.mxu0 %v12677_v29  ;;  %9345 = vmatpush1.bf16.msra.mxu0 %v14862_v58 }
0x2036   :  { %9346 = vmatprep.subr.bf16.mxu0 %v14875_v34  ;;  %v9054_v24 = vpop.f32.mrb[48].mxu1 }
0x2037   :  { %v9056_v32 = vpop.f32.mrb[49].mxu1 }
0x2038   :  { %v9058_v17 = vpop.f32.mrb[50].mxu1 }
0x2039   :  { %9347 = vmatpush1.bf16.msra.mxu0 %v14880_v1  ;;  %v9059_v8 = vpop.f32.mrb[51].mxu1 }
0x203a   :  { %9672 = vmatprep.subr.bf16.mxu0 %v14820_v26 }
0x203c   :  { %10769 = vmatmul.mubr.msk.bf16.gmra.mrb[8].mxu0 %vm317_vm2, %v8830_v19 }
0x203d   :  { %8942 = vmatprep.mubr.bf16.mxu0 %v12677_v29 }
0x2044   :  { %10770 = vmatmul.mubr.msk.bf16.gmra.mrb[12].mxu0 %vm317_vm2, %v8831_v62  ;;  %v9115_v62 = vsel %vm9114_vm15, 1.0, %v12678_v30 }
0x2045   :  { %9372 = vmatprep.mubr.bf16.mxu0 %v12677_v29 }
0x20ff   :  { %v8914_v4 = vpop.f32.mrb[0].mxu0 }
0x2100   :  { %v8915_v33 = vadd.f32 %v8914_v4, %v8841_v37  ;;  %v8916_v5 = vpop.f32.mrb[1].mxu0 }
0x2101   :  { %v14917_v40 = vadd.f32 %v8916_v5, %v8845_v47  ;;  %v8918_v18 = vpop.f32.mrb[2].mxu0 }
0x2102   :  { %v9062_v14 = vadd.f32 %v9054_v24, %v8915_v33  ;;  %v14919_v21 = vadd.f32 %v8918_v18, %v8841_v37  ;;  %v8920_v49 = vpop.f32.mrb[3].mxu0  ;;  %v12198_v24 = vpack.i.bf16 %v9117_v28, %v9115_v62 }
0x2103   :  { %v14921_v10 = vadd.f32 %v8920_v49, %v8845_v47 }
0x2104   :  { %12541 = vtanh.f32 %v9062_v14  ;;  %v10779_v52 = vmul.f32 -1.442695, %v9062_v14 }
0x2107   :  { %v8924_v41 = vpop.f32.mrb[4].mxu0 }
0x2108   :  { %v14923_v11 = vadd.f32 %v8924_v41, %v8841_v37  ;;  %v8926_v57 = vpop.f32.mrb[5].mxu0 }
0x2109   :  { %v14925_v6 = vadd.f32 %v8926_v57, %v8845_v47  ;;  %v8928_v56 = vpop.f32.mrb[6].mxu0 }
0x210a   :  { %v14927_v45 = vadd.f32 %v8928_v56, %v8841_v37  ;;  %v8930_v39 = vpop.f32.mrb[7].mxu0 }
0x210b   :  { %v14929_v43 = vadd.f32 %v8930_v39, %v8845_v47 }
0x210e   :  { %v12542_v9 = vpop.eup %12541 }
0x210f   :  { %9082 = vrot.lane.b32.xlu0 %v12542_v9, %s12682_s29  ;;  %v8934_v42 = vpop.f32.mrb[8].mxu0 }
0x2110   :  { %v14932_v38 = vadd.f32 %v8934_v42, %v8841_v37  ;;  %v8936_v31 = vpop.f32.mrb[9].mxu0 }
0x2111   :  { %v14934_v54 = vadd.f32 %v8936_v31, %v8845_v47  ;;  %v8938_v12 = vpop.f32.mrb[10].mxu0 }
0x2112   :  { %v14936_v46 = vadd.f32 %v8938_v12, %v8841_v37  ;;  %v8940_v48 = vpop.f32.mrb[11].mxu0 }
0x2113   :  { %v14938_v60 = vadd.f32 %v8940_v48, %v8845_v47 }
0x2117   :  { %v8944_v63 = vpop.f32.mrb[12].mxu0 }
0x2118   :  { %v14940_v53 = vadd.f32 %v8944_v63, %v8841_v37  ;;  %v8946_v3 = vpop.f32.mrb[13].mxu0 }
0x2119   :  { %v14942_v20 = vadd.f32 %v8946_v3, %v8845_v47  ;;  %v8948_v2 = vpop.f32.mrb[14].mxu0 }
0x211a   :  { %v14944_v55 = vadd.f32 %v8948_v2, %v8841_v37  ;;  %v8950_v0 = vpop.f32.mrb[15].mxu0 }
0x211b   :  { %v8951_v36 = vadd.f32 %v8950_v0, %v8845_v47  ;;  %v9141_v47 = vsub.f32 1.0, %v9115_v62 }
0x211d   :  { %v9065_v35 = vadd.f32 %v9056_v32, %v8951_v36  ;;  %v9149_v32 = vsub.f32 1.0, %v9117_v28 }
0x211f   :  { %12543 = vtanh.f32 %v9065_v35  ;;  %v10780_v15 = vmul.f32 -1.442695, %v9065_v35 }
0x2120   :  { %12545 = vpow2.f32 %v10779_v52 }
0x2129   :  { %v12544_v7 = vpop.eup %12543 }
0x212a   :  { %9099 = vrot.lane.b32.xlu1 %v12544_v7, %s12682_s29  ;;  %v12546_v61 = vpop.eup %12545 }
0x212b   :  { %v9069_v16 = vadd.f32 1.0, %v12546_v61 }
0x212d   :  { %12547 = vrcp.f32 %v9069_v16 }
0x212e   :  { %12549 = vpow2.f32 %v10780_v15 }
0x2137   :  { %v12548_v23 = vpop.eup %12547 }
0x2138   :  { %v12550_v17 = vpop.eup %12549  ;;  %v9080_v4 = vmul.f32 0.0, %v12548_v23 }
0x2139   :  { %v9076_v8 = vadd.f32 1.0, %v12550_v17 }
0x213b   :  { %12551 = vrcp.f32 %v9076_v8 }
0x2145   :  { %v12552_v25 = vpop.eup %12551 }
0x2146   :  { %v9097_v14 = vmul.f32 0.0, %v12552_v25 }
0x2181   :  { %v9083_v50 = vpop.permute.xlu0 %9082 }
0x2182   :  { %v9085_v19 = vmul.f32 %v12548_v23, %v9083_v50 }
0x2184   :  { %9087 = vrot.lane.b32.xlu1 %v9085_v19, %s12693_s4 }
0x2188   :  { %12199 = vperm.xlu1 %12197, %v12198_v24  }
0x218c   :  { %9152 = vperm.xlu1 %12197, %v9149_v32  }
0x219c   :  { %v9100_v51 = vpop.permute.xlu1 %9099 }
0x219d   :  { %v9102_v37 = vmul.f32 %v12552_v25, %v9100_v51 }
0x219f   :  { %9104 = vrot.lane.b32.xlu0 %v9102_v37, %s12693_s4 }
0x21a3   :  { %9144 = vperm.xlu0 %12196, %v9141_v47  }
0x21f6   :  { %v9088_v33 = vpop.permute.xlu1 %9087 }
0x21f7   :  { %v14958_v5 = vadd.f32 %v9088_v33, %v9080_v4 }
0x21f9   :  { %12553 = vtanh.f32 %v14958_v5 }
0x2203   :  { %v12554_v18 = vpop.eup %12553 }
0x2204   :  { %9093 = vrot.lane.b32.xlu0 %v12554_v18, %s12682_s29  ;;  %v9270_v18 = vsel %vm9269_vm1, 1.0, %v12678_v30 }
0x2207   :  { %v12200_v39 = vpop.permute.xlu1 %12199 }
0x2208   :  { %v14966_v42 = vunpack.i.l.bf16 %v12200_v39  ;;  %v14976_v0 = vunpack.i.h.bf16 %v12200_v39 }
0x220b   :  { %v9153_v3 = vpop.permute.xlu1 %9152 }
0x220c   :  { %v9155_v35 = vmul.f32 0.0, %v9153_v3 }
0x2211   :  { %v9105_v49 = vpop.permute.xlu0 %9104 }
0x2212   :  { %v14962_v41 = vadd.f32 %v9105_v49, %v9097_v14 }
0x2214   :  { %12555 = vtanh.f32 %v14962_v41  ;;  %v9159_v3 = vmul.f32 %v14976_v0, %v14962_v41 }
0x221e   :  { %v12556_v57 = vpop.eup %12555 }
0x221f   :  { %9110 = vrot.lane.b32.xlu1 %v12556_v57, %s12682_s29 }
0x2222   :  { %v9145_v56 = vpop.permute.xlu0 %9144 }
0x2223   :  { %v14968_v12 = vmul.f32 0.0, %v9145_v56  ;;  %v9272_v56 = vsel %vm9271_vm3, 1.0, %v12678_v30 }
0x2276   :  { %v9094_v9 = vpop.permute.xlu0 %9093 }
0x2277   :  { %v9096_v31 = vmul.f32 %v12548_v23, %v9094_v9  ;;  %v9297_v9 = vsub.f32 1.0, %v9270_v18 }
0x2279   :  { %v14971_v48 = vmul.f32 %v14966_v42, %v9096_v31  ;;  %v9309_v31 = vsub.f32 1.0, %v9272_v56 }
0x227b   :  { %v9148_v63 = vadd.f32 %v14968_v12, %v14971_v48 }
0x227d   :  { %9162 = vrot.lane.b32.xlu0 %v9148_v63, %s12693_s4  ;;  %v12203_v63 = vpack.i.bf16 %v9272_v56, %v9270_v18 }
0x2291   :  { %v9111_v2 = vpop.permute.xlu1 %9110 }
0x2292   :  { %v9113_v36 = vmul.f32 %v12552_v25, %v9111_v2  ;;  %v9157_v2 = vmul.f32 %v14966_v42, %v14958_v5 }
0x2294   :  { %v14979_v7 = vmul.f32 %v14976_v0, %v9113_v36  ;;  %v15013_v36 = vadd.f32 %v9157_v2, %v14968_v12 }
0x2296   :  { %v9156_v52 = vadd.f32 %v9155_v35, %v14979_v7 }
0x2298   :  { %9166 = vrot.lane.b32.xlu1 %v9156_v52, %s12682_s29  ;;  %v15015_v52 = vadd.f32 %v9159_v3, %v9155_v35 }
0x22ef   :  { %v9163_v61 = vpop.permute.xlu0 %9162 }
0x230a   :  { %v9167_v16 = vpop.permute.xlu1 %9166 }
0x230b   :  { %v14984_v15 = vsel %vm317_vm2, %v9163_v61, %v9167_v16 }
0x230c   :  { %v9170_v23 = vpack.c.bf16 %v14984_v15, %v14984_v15 }
0x230e   :  { %10781 = vmatmul.mubr.msk.bf16.vlgmr.msra.gmra.mrb[52].mxu1 %vm8750_vm14, %v9170_v23 }
0x230f   :  { %9507 = vmatpush1.bf16.msra.mxu1 %v14831_v13  ;;  %9538 = vmatprep.mubr.bf16.mxu1 %v12677_v29 }
0x2310   :  { %9508 = vmatprep.subr.bf16.mxu1 %v14837_v22 }
0x2313   :  { %9509 = vmatpush1.bf16.msra.mxu1 %v14845_v44 }
0x2314   :  { %9510 = vmatprep.subr.bf16.mxu1 %v14857_v27 }
0x2317   :  { %9511 = vmatpush1.bf16.msra.mxu1 %v14862_v58 }
0x2318   :  { %9512 = vmatprep.subr.bf16.mxu1 %v14875_v34 }
0x231b   :  { %9513 = vmatpush1.bf16.msra.mxu1 %v14880_v1 }
0x231c   :  { %9810 = vmatprep.subr.bf16.mxu1 %v14820_v26 }
0x23e1   :  { %v9208_v50 = vpop.f32.mrb[52].mxu1 }
0x23e2   :  { %v9217_v62 = vadd.f32 %v9208_v50, %v14919_v21  ;;  %v9210_v28 = vpop.f32.mrb[53].mxu1 }
0x23e3   :  { %v9220_v19 = vadd.f32 %v9210_v28, %v14942_v20  ;;  %v9212_v24 = vpop.f32.mrb[54].mxu1 }
0x23e4   :  { %12557 = vtanh.f32 %v9217_v62  ;;  %v9213_v32 = vpop.f32.mrb[55].mxu1  ;;  %v10782_v25 = vmul.f32 -1.442695, %v9217_v62 }
0x23e5   :  { %12559 = vtanh.f32 %v9220_v19  ;;  %v10783_v51 = vmul.f32 -1.442695, %v9220_v19 }
0x23e6   :  { %12561 = vpow2.f32 %v10782_v25 }
0x23e7   :  { %12563 = vpow2.f32 %v10783_v51 }
0x23ee   :  { %v12558_v17 = vpop.eup %12557 }
0x23ef   :  { %v12560_v8 = vpop.eup %12559  ;;  %9237 = vrot.lane.b32.xlu0 %v12558_v17, %s12682_s29 }
0x23f0   :  { %9254 = vrot.lane.b32.xlu1 %v12560_v8, %s12682_s29  ;;  %v12562_v37 = vpop.eup %12561 }
0x23f1   :  { %v12564_v47 = vpop.eup %12563  ;;  %v9224_v21 = vadd.f32 1.0, %v12562_v37 }
0x23f2   :  { %v9231_v4 = vadd.f32 1.0, %v12564_v47 }
0x23f3   :  { %12565 = vrcp.f32 %v9224_v21 }
0x23f4   :  { %12567 = vrcp.f32 %v9231_v4 }
0x23fd   :  { %v12566_v20 = vpop.eup %12565 }
0x23fe   :  { %v12568_v14 = vpop.eup %12567  ;;  %v9235_v61 = vmul.f32 %v12566_v20, %v15013_v36 }
0x23ff   :  { %v9252_v23 = vmul.f32 %v12568_v14, %v15015_v52 }
0x2461   :  { %v9238_v33 = vpop.permute.xlu0 %9237 }
0x2462   :  { %v9240_v49 = vmul.f32 %v12566_v20, %v9238_v33  ;;  %v9255_v57 = vpop.permute.xlu1 %9254 }
0x2463   :  { %v9257_v39 = vmul.f32 %v12568_v14, %v9255_v57 }
0x2464   :  { %9242 = vrot.lane.b32.xlu0 %v9240_v49, %s12693_s4 }
0x2465   :  { %9259 = vrot.lane.b32.xlu1 %v9257_v39, %s12693_s4 }
0x2468   :  { %9300 = vperm.xlu0 %12196, %v9297_v9  }
0x2469   :  { %9312 = vperm.xlu1 %12197, %v9309_v31  }
0x246c   :  { %12204 = vperm.xlu0 %12196, %v12203_v63  }
0x24d6   :  { %v9243_v16 = vpop.permute.xlu0 %9242 }
0x24d7   :  { %v15019_v50 = vadd.f32 %v9243_v16, %v9235_v61  ;;  %v9260_v62 = vpop.permute.xlu1 %9259 }
0x24d8   :  { %v15021_v28 = vadd.f32 %v9260_v62, %v9252_v23 }
0x24d9   :  { %12569 = vtanh.f32 %v15019_v50 }
0x24da   :  { %12571 = vtanh.f32 %v15021_v28 }
0x24e3   :  { %v12570_v5 = vpop.eup %12569 }
0x24e4   :  { %v12572_v41 = vpop.eup %12571  ;;  %9248 = vrot.lane.b32.xlu1 %v12570_v5, %s12682_s29 }
0x24e5   :  { %9265 = vrot.lane.b32.xlu0 %v12572_v41, %s12682_s29 }
0x24e7   :  { %v15027_v12 = vpop.permute.xlu0 %9300 }
0x24e8   :  { %v9303_v35 = vmul.f32 %v15027_v12, %v14984_v15  ;;  %v15031_v19 = vpop.permute.xlu1 %9312 }
0x24e9   :  { %v9315_v24 = vmul.f32 %v15031_v19, %v14984_v15 }
0x24ea   :  { %9305 = vrot.lane.b32.xlu1 %v9303_v35, %s12681_s26 }
0x24eb   :  { %9317 = vrot.lane.b32.xlu0 %v9315_v24, %s12682_s29  ;;  %v12205_v32 = vpop.permute.xlu0 %12204 }
0x24ec   :  { %v15037_v37 = vunpack.i.l.bf16 %v12205_v32  ;;  %v15039_v47 = vunpack.i.h.bf16 %v12205_v32  ;;  %v9436_v32 = vsel %vm9435_vm4, 1.0, %v12678_v30 }
0x2556   :  { %v9249_v17 = vpop.permute.xlu1 %9248 }
0x2557   :  { %v9251_v8 = vmul.f32 %v12566_v20, %v9249_v17  ;;  %v9266_v25 = vpop.permute.xlu0 %9265 }
0x2558   :  { %v9268_v51 = vmul.f32 %v12568_v14, %v9266_v25 }
0x2559   :  { %v15042_v21 = vmul.f32 %v15037_v37, %v9251_v8 }
0x255a   :  { %v15045_v33 = vmul.f32 %v15039_v47, %v9268_v51  ;;  %v9438_v51 = vsel %vm9437_vm5, 1.0, %v12678_v30 }
0x255c   :  { %v9306_v4 = vpop.permute.xlu1 %9305 }
0x255d   :  { %v9308_v15 = vadd.f32 %v9306_v4, %v15042_v21  ;;  %v9318_v18 = vpop.permute.xlu0 %9317 }
0x255e   :  { %v9320_v49 = vadd.f32 %v9318_v18, %v15045_v33  ;;  %v9475_v18 = vsub.f32 1.0, %v9438_v51 }
0x255f   :  { %9328 = vrot.lane.b32.xlu1 %v9308_v15, %s12693_s4  ;;  %v9463_v15 = vsub.f32 1.0, %v9436_v32 }
0x2560   :  { %9332 = vrot.lane.b32.xlu0 %v9320_v49, %s12682_s29  ;;  %v12208_v49 = vpack.i.bf16 %v9438_v51, %v9436_v32 }
0x25d1   :  { %v9329_v20 = vpop.permute.xlu1 %9328 }
0x25d2   :  { %v9333_v14 = vpop.permute.xlu0 %9332 }
0x25d3   :  { %v15052_v57 = vsel %vm317_vm2, %v9329_v20, %v9333_v14  ;;  %v9321_v20 = vmul.f32 %v15037_v37, %v15019_v50  ;;  %v9324_v14 = vmul.f32 %v15039_v47, %v15021_v28 }
0x25d4   :  { %v9336_v56 = vpack.c.bf16 %v15052_v57, %v15052_v57 }
0x25d6   :  { %10784 = vmatmul.mubr.msk.bf16.vlgmr.msra.gmra.mrb[16].mxu0 %vm8750_vm14, %v9336_v56  ;;  %v9322_v56 = vmul.f32 %v15027_v12, %v15013_v36 }
0x25d7   :  { %9673 = vmatpush1.bf16.msra.mxu0 %v14831_v13  ;;  %9704 = vmatprep.mubr.bf16.mxu0 %v12677_v29 }
0x25d8   :  { %9674 = vmatprep.subr.bf16.mxu0 %v14837_v22 }
0x25db   :  { %9675 = vmatpush1.bf16.msra.mxu0 %v14845_v44 }
0x25dc   :  { %9676 = vmatprep.subr.bf16.mxu0 %v14857_v27 }
0x25df   :  { %9677 = vmatpush1.bf16.msra.mxu0 %v14862_v58 }
0x25e0   :  { %9678 = vmatprep.subr.bf16.mxu0 %v14875_v34 }
0x25e3   :  { %9679 = vmatpush1.bf16.msra.mxu0 %v14880_v1 }
0x25e4   :  { %9948 = vmatprep.subr.bf16.mxu0 %v14820_v26 }
0x26a9   :  { %v9374_v39 = vpop.f32.mrb[16].mxu0 }
0x26aa   :  { %v9383_v9 = vadd.f32 %v9374_v39, %v14923_v11  ;;  %v9376_v31 = vpop.f32.mrb[17].mxu0  ;;  %v9325_v39 = vmul.f32 %v15031_v19, %v15015_v52 }
0x26ab   :  { %v9386_v63 = vadd.f32 %v9376_v31, %v14938_v60  ;;  %v9378_v3 = vpop.f32.mrb[18].mxu0 }
0x26ac   :  { %12573 = vtanh.f32 %v9383_v9  ;;  %v9379_v2 = vpop.f32.mrb[19].mxu0  ;;  %v10785_v23 = vmul.f32 -1.442695, %v9383_v9  ;;  %v15084_v9 = vadd.f32 %v9322_v56, %v9321_v20  ;;  %v15086_v31 = vadd.f32 %v9325_v39, %v9324_v14 }
0x26ad   :  { %12575 = vtanh.f32 %v9386_v63  ;;  %v10786_v62 = vmul.f32 -1.442695, %v9386_v63 }
0x26ae   :  { %12577 = vpow2.f32 %v10785_v23 }
0x26af   :  { %12579 = vpow2.f32 %v10786_v62 }
0x26b6   :  { %v12574_v61 = vpop.eup %12573 }
0x26b7   :  { %v12576_v16 = vpop.eup %12575  ;;  %9403 = vrot.lane.b32.xlu1 %v12574_v61, %s12682_s29 }
0x26b8   :  { %9420 = vrot.lane.b32.xlu0 %v12576_v16, %s12682_s29  ;;  %v12578_v5 = vpop.eup %12577 }
0x26b9   :  { %v12580_v41 = vpop.eup %12579  ;;  %v9390_v11 = vadd.f32 1.0, %v12578_v5 }
0x26ba   :  { %v9397_v35 = vadd.f32 1.0, %v12580_v41 }
0x26bb   :  { %12581 = vrcp.f32 %v9390_v11 }
0x26bc   :  { %12583 = vrcp.f32 %v9397_v35 }
0x26c5   :  { %v12582_v60 = vpop.eup %12581 }
0x26c6   :  { %v12584_v17 = vpop.eup %12583  ;;  %v9401_v63 = vmul.f32 %v12582_v60, %v15084_v9 }
0x26c7   :  { %v9418_v2 = vmul.f32 %v12584_v17, %v15086_v31 }
0x2729   :  { %v9404_v24 = vpop.permute.xlu1 %9403 }
0x272a   :  { %v9406_v8 = vmul.f32 %v12582_v60, %v9404_v24  ;;  %v9421_v25 = vpop.permute.xlu0 %9420 }
0x272b   :  { %v9423_v4 = vmul.f32 %v12584_v17, %v9421_v25 }
0x272c   :  { %9408 = vrot.lane.b32.xlu1 %v9406_v8, %s12693_s4 }
0x272d   :  { %9425 = vrot.lane.b32.xlu0 %v9423_v4, %s12693_s4 }
0x2730   :  { %9466 = vperm.xlu1 %12197, %v9463_v15  }
0x2731   :  { %9478 = vperm.xlu0 %12196, %v9475_v18  }
0x2734   :  { %12209 = vperm.xlu1 %12197, %v12208_v49  }
0x279e   :  { %v9409_v3 = vpop.permute.xlu1 %9408 }
0x279f   :  { %v15090_v61 = vadd.f32 %v9409_v3, %v9401_v63  ;;  %v9426_v50 = vpop.permute.xlu0 %9425 }
0x27a0   :  { %v15092_v16 = vadd.f32 %v9426_v50, %v9418_v2 }
0x27a1   :  { %12585 = vtanh.f32 %v15090_v61 }
0x27a2   :  { %12587 = vtanh.f32 %v15092_v16 }
0x27ab   :  { %v12586_v36 = vpop.eup %12585 }
0x27ac   :  { %v12588_v52 = vpop.eup %12587  ;;  %9414 = vrot.lane.b32.xlu0 %v12586_v36, %s12682_s29 }
0x27ad   :  { %9431 = vrot.lane.b32.xlu1 %v12588_v52, %s12682_s29 }
0x27af   :  { %v15098_v28 = vpop.permute.xlu1 %9466 }
0x27b0   :  { %v9469_v23 = vmul.f32 %v15098_v28, %v15052_v57  ;;  %v15102_v62 = vpop.permute.xlu0 %9478 }
0x27b1   :  { %v9481_v5 = vmul.f32 %v15102_v62, %v15052_v57 }
0x27b2   :  { %9471 = vrot.lane.b32.xlu0 %v9469_v23, %s12681_s26 }
0x27b3   :  { %9483 = vrot.lane.b32.xlu1 %v9481_v5, %s12682_s29  ;;  %v12210_v41 = vpop.permute.xlu1 %12209 }
0x27b4   :  { %v15108_v8 = vunpack.i.l.bf16 %v12210_v41  ;;  %v15110_v25 = vunpack.i.h.bf16 %v12210_v41 }
0x27b6   :  { %v9487_v59 = vmul.f32 %v15108_v8, %v15090_v61 }
0x281e   :  { %v9415_v11 = vpop.permute.xlu0 %9414 }
0x281f   :  { %v9417_v35 = vmul.f32 %v12582_v60, %v9415_v11  ;;  %v9432_v24 = vpop.permute.xlu1 %9431 }
0x2820   :  { %v9434_v32 = vmul.f32 %v12584_v17, %v9432_v24  ;;  %v9602_v24 = vsel %vm9601_vm6, 1.0, %v12678_v30 }
0x2821   :  { %v15113_v51 = vmul.f32 %v15108_v8, %v9417_v35 }
0x2822   :  { %v15116_v15 = vmul.f32 %v15110_v25, %v9434_v32 }
0x2824   :  { %v9472_v4 = vpop.permute.xlu0 %9471 }
0x2825   :  { %v9474_v57 = vadd.f32 %v9472_v4, %v15113_v51  ;;  %v9484_v18 = vpop.permute.xlu1 %9483 }
0x2826   :  { %v9486_v49 = vadd.f32 %v9484_v18, %v15116_v15  ;;  %v9604_v18 = vsel %vm9603_vm7, 1.0, %v12678_v30  ;;  %v9488_v30 = vmul.f32 %v15098_v28, %v15084_v9 }
0x2827   :  { %9494 = vrot.lane.b32.xlu0 %v9474_v57, %s12693_s4 }
0x2828   :  { %9498 = vrot.lane.b32.xlu1 %v9486_v49, %s12682_s29 }
0x2899   :  { %v9495_v60 = vpop.permute.xlu0 %9494 }
0x289a   :  { %v9499_v17 = vpop.permute.xlu1 %9498 }
0x289b   :  { %v15123_v20 = vsel %vm317_vm2, %v9495_v60, %v9499_v17  ;;  %v9629_v60 = vsub.f32 1.0, %v9602_v24  ;;  %v9641_v17 = vsub.f32 1.0, %v9604_v18 }
0x289c   :  { %v9502_v14 = vpack.c.bf16 %v15123_v20, %v15123_v20 }
0x289e   :  { %10787 = vmatmul.mubr.msk.bf16.vlgmr.msra.gmra.mrb[56].mxu1 %vm8750_vm14, %v9502_v14  ;;  %v12213_v14 = vpack.i.bf16 %v9604_v18, %v9602_v24 }
0x289f   :  { %9811 = vmatpush1.bf16.msra.mxu1 %v14831_v13  ;;  %9842 = vmatprep.mubr.bf16.mxu1 %v12677_v29 }
0x28a0   :  { %9812 = vmatprep.subr.bf16.mxu1 %v14837_v22 }
0x28a3   :  { %9813 = vmatpush1.bf16.msra.mxu1 %v14845_v44 }
0x28a4   :  { %9814 = vmatprep.subr.bf16.mxu1 %v14857_v27 }
0x28a7   :  { %9815 = vmatpush1.bf16.msra.mxu1 %v14862_v58 }
0x28a8   :  { %9816 = vmatprep.subr.bf16.mxu1 %v14875_v34 }
0x28ab   :  { %9817 = vmatpush1.bf16.msra.mxu1 %v14880_v1 }
0x28ac   :  { %10086 = vmatprep.subr.bf16.mxu1 %v14820_v26 }
0x2971   :  { %v9540_v56 = vpop.f32.mrb[56].mxu1 }
0x2972   :  { %v9549_v39 = vadd.f32 %v9540_v56, %v14927_v45  ;;  %v9542_v63 = vpop.f32.mrb[57].mxu1  ;;  %v9490_v56 = vmul.f32 %v15110_v25, %v15092_v16 }
0x2973   :  { %v9552_v3 = vadd.f32 %v9542_v63, %v14934_v54  ;;  %v9544_v2 = vpop.f32.mrb[58].mxu1  ;;  %v15155_v63 = vadd.f32 %v9488_v30, %v9487_v59 }
0x2974   :  { %12589 = vtanh.f32 %v9549_v39  ;;  %v9545_v50 = vpop.f32.mrb[59].mxu1  ;;  %v10788_v23 = vmul.f32 -1.442695, %v9549_v39  ;;  %v9491_v39 = vmul.f32 %v15102_v62, %v15086_v31 }
0x2975   :  { %12591 = vtanh.f32 %v9552_v3  ;;  %v10789_v5 = vmul.f32 -1.442695, %v9552_v3 }
0x2976   :  { %12593 = vpow2.f32 %v10788_v23  ;;  %v15157_v3 = vadd.f32 %v9491_v39, %v9490_v56 }
0x2977   :  { %12595 = vpow2.f32 %v10789_v5 }
0x297e   :  { %v12590_v36 = vpop.eup %12589 }
0x297f   :  { %v12592_v52 = vpop.eup %12591  ;;  %9569 = vrot.lane.b32.xlu0 %v12590_v36, %s12682_s29 }
0x2980   :  { %9586 = vrot.lane.b32.xlu1 %v12592_v52, %s12682_s29  ;;  %v12594_v26 = vpop.eup %12593 }
0x2981   :  { %v12596_v41 = vpop.eup %12595  ;;  %v9556_v45 = vadd.f32 1.0, %v12594_v26 }
0x2982   :  { %v9563_v11 = vadd.f32 1.0, %v12596_v41 }
0x2983   :  { %12597 = vrcp.f32 %v9556_v45 }
0x2984   :  { %12599 = vrcp.f32 %v9563_v11 }
0x298d   :  { %v12598_v54 = vpop.eup %12597 }
0x298e   :  { %v12600_v32 = vpop.eup %12599  ;;  %v9567_v2 = vmul.f32 %v12598_v54, %v15155_v63 }
0x298f   :  { %v9584_v36 = vmul.f32 %v12600_v32, %v15157_v3 }
0x29f1   :  { %v9570_v35 = vpop.permute.xlu0 %9569 }
0x29f2   :  { %v9572_v4 = vmul.f32 %v12598_v54, %v9570_v35  ;;  %v9587_v57 = vpop.permute.xlu1 %9586 }
0x29f3   :  { %v9589_v49 = vmul.f32 %v12600_v32, %v9587_v57 }
0x29f4   :  { %9574 = vrot.lane.b32.xlu0 %v9572_v4, %s12693_s4 }
0x29f5   :  { %9591 = vrot.lane.b32.xlu1 %v9589_v49, %s12693_s4 }
0x29f8   :  { %9632 = vperm.xlu0 %12196, %v9629_v60  }
0x29f9   :  { %9644 = vperm.xlu1 %12197, %v9641_v17  }
0x29fc   :  { %12214 = vperm.xlu0 %12196, %v12213_v14  }
0x2a66   :  { %v9575_v50 = vpop.permute.xlu0 %9574 }
0x2a67   :  { %v15161_v52 = vadd.f32 %v9575_v50, %v9567_v2  ;;  %v9592_v61 = vpop.permute.xlu1 %9591 }
0x2a68   :  { %v15163_v23 = vadd.f32 %v9592_v61, %v9584_v36 }
0x2a69   :  { %12601 = vtanh.f32 %v15161_v52 }
0x2a6a   :  { %12603 = vtanh.f32 %v15163_v23 }
0x2a73   :  { %v12602_v9 = vpop.eup %12601 }
0x2a74   :  { %v12604_v31 = vpop.eup %12603  ;;  %9580 = vrot.lane.b32.xlu1 %v12602_v9, %s12682_s29 }
0x2a75   :  { %9597 = vrot.lane.b32.xlu0 %v12604_v31, %s12682_s29 }
0x2a77   :  { %v15169_v16 = vpop.permute.xlu0 %9632 }
0x2a78   :  { %v9635_v5 = vmul.f32 %v15169_v16, %v15123_v20  ;;  %v15173_v26 = vpop.permute.xlu1 %9644 }
0x2a79   :  { %v9647_v41 = vmul.f32 %v15173_v26, %v15123_v20 }
0x2a7a   :  { %9637 = vrot.lane.b32.xlu1 %v9635_v5, %s12681_s26 }
0x2a7b   :  { %9649 = vrot.lane.b32.xlu0 %v9647_v41, %s12682_s29  ;;  %v12215_v45 = vpop.permute.xlu0 %12214 }
0x2a7c   :  { %v15179_v57 = vunpack.i.l.bf16 %v12215_v45  ;;  %v15181_v18 = vunpack.i.h.bf16 %v12215_v45 }
0x2ae6   :  { %v9581_v11 = vpop.permute.xlu1 %9580 }
0x2ae7   :  { %v9583_v35 = vmul.f32 %v12598_v54, %v9581_v11  ;;  %v9598_v24 = vpop.permute.xlu0 %9597 }
0x2ae8   :  { %v9600_v4 = vmul.f32 %v12600_v32, %v9598_v24  ;;  %v9656_v24 = vmul.f32 %v15181_v18, %v15163_v23 }
0x2ae9   :  { %v15184_v49 = vmul.f32 %v15179_v57, %v9583_v35  ;;  %v9653_v35 = vmul.f32 %v15179_v57, %v15161_v52 }
0x2aea   :  { %v15187_v17 = vmul.f32 %v15181_v18, %v9600_v4  ;;  %v9654_v4 = vmul.f32 %v15169_v16, %v15155_v63 }
0x2aec   :  { %v9638_v60 = vpop.permute.xlu1 %9637 }
0x2aed   :  { %v9640_v20 = vadd.f32 %v9638_v60, %v15184_v49  ;;  %v9650_v14 = vpop.permute.xlu0 %9649  ;;  %v9657_v60 = vmul.f32 %v15173_v26, %v15157_v3 }
0x2aee   :  { %v9652_v59 = vadd.f32 %v9650_v14, %v15187_v17 }
0x2aef   :  { %9660 = vrot.lane.b32.xlu1 %v9640_v20, %s12693_s4  ;;  %v15217_v20 = vadd.f32 %v9654_v4, %v9653_v35  ;;  %v15219_v14 = vadd.f32 %v9657_v60, %v9656_v24  ;;  %v12676_v35 = vld [vmem:[%s15482_s12 + $0x30] ss:$8 sps:$4 sm:$0xff]  }
0x2af0   :  { %9664 = vrot.lane.b32.xlu0 %v9652_v59, %s12682_s29 }
0x2b61   :  { %v9661_v54 = vpop.permute.xlu1 %9660 }
0x2b62   :  { %v9665_v32 = vpop.permute.xlu0 %9664 }
0x2b63   :  { %v9667_v56 = vsel %vm317_vm2, %v9661_v54, %v9665_v32 }
0x2b64   :  { %v9668_v30 = vpack.c.bf16 %v9667_v56, %v9667_v56  ;;  %v9779_v23 = vmul.f32 %v9667_v56, %v15173_v26 }
0x2b66   :  { %10790 = vmatmul.mubr.msk.bf16.vlgmr.msra.gmra.mrb[20].mxu0 %vm8750_vm14, %v9668_v30 }
0x2b67   :  { %9949 = vmatpush1.bf16.msra.mxu0 %v14831_v13  ;;  %9980 = vmatprep.mubr.bf16.mxu0 %v12677_v29 }
0x2b68   :  { %9950 = vmatprep.subr.bf16.mxu0 %v14837_v22 }
0x2b6b   :  { %9951 = vmatpush1.bf16.msra.mxu0 %v14845_v44 }
0x2b6c   :  { %9952 = vmatprep.subr.bf16.mxu0 %v14857_v27 }
0x2b6f   :  { %9953 = vmatpush1.bf16.msra.mxu0 %v14862_v58 }
0x2b70   :  { %9954 = vmatprep.subr.bf16.mxu0 %v14875_v34 }
0x2b73   :  { %9955 = vmatpush1.bf16.msra.mxu0 %v14880_v1 }
0x2c39   :  { %v9706_v39 = vpop.f32.mrb[20].mxu0 }
0x2c3a   :  { %v9714_v2 = vadd.f32 %v9706_v39, %v14932_v38  ;;  %v9708_v50 = vpop.f32.mrb[21].mxu0 }
0x2c3b   :  { %v9716_v13 = vadd.f32 %v9708_v50, %v14929_v43  ;;  %v9710_v36 = vpop.f32.mrb[22].mxu0 }
0x2c3c   :  { %12605 = vtanh.f32 %v9714_v2  ;;  %v9711_v61 = vpop.f32.mrb[23].mxu0  ;;  %v10791_v27 = vmul.f32 -1.442695, %v9714_v2  ;;  %v9785_v2 = vmul.f32 %v9667_v56, %v15169_v16 }
0x2c3d   :  { %12607 = vtanh.f32 %v9716_v13  ;;  %v10792_v58 = vmul.f32 -1.442695, %v9716_v13 }
0x2c3e   :  { %12609 = vpow2.f32 %v10791_v27 }
0x2c3f   :  { %12611 = vpow2.f32 %v10792_v58 }
0x2c46   :  { %v12606_v22 = vpop.eup %12605 }
0x2c47   :  { %v12608_v44 = vpop.eup %12607  ;;  %9733 = vrot.lane.b32.xlu1 %v12606_v22, %s12682_s29 }
0x2c48   :  { %9750 = vrot.lane.b32.xlu0 %v12608_v44, %s12682_s29  ;;  %v12610_v34 = vpop.eup %12609 }
0x2c49   :  { %v12612_v1 = vpop.eup %12611  ;;  %v9720_v38 = vadd.f32 1.0, %v12610_v34 }
0x2c4a   :  { %v9727_v9 = vadd.f32 1.0, %v12612_v1 }
0x2c4b   :  { %12613 = vrcp.f32 %v9720_v38 }
0x2c4c   :  { %12615 = vrcp.f32 %v9727_v9 }
0x2c55   :  { %v12614_v43 = vpop.eup %12613 }
0x2c56   :  { %v12616_v5 = vpop.eup %12615  ;;  %v9731_v59 = vmul.f32 %v12614_v43, %v15217_v20 }
0x2c57   :  { %v9748_v32 = vmul.f32 %v12616_v5, %v15219_v14 }
0x2cb9   :  { %v9734_v31 = vpop.permute.xlu1 %9733 }
0x2cba   :  { %v9736_v41 = vmul.f32 %v12614_v43, %v9734_v31  ;;  %v9751_v45 = vpop.permute.xlu0 %9750  ;;  %v12670_v31 = vld [vmem:[%s15482_s12] ss:$8 sps:$4 sm:$0xff]  }
0x2cbb   :  { %v9753_v11 = vmul.f32 %v12616_v5, %v9751_v45  ;;  %v12673_v45 = vld [vmem:[%s15482_s12 + $0x24] ss:$8 sps:$4 sm:$0xff]  }
0x2cbc   :  { %9738 = vrot.lane.b32.xlu1 %v9736_v41, %s12693_s4  ;;  %v12672_v41 = vld [vmem:[%s15482_s12 + $0x10] ss:$8 sps:$4 sm:$0xff]  }
0x2cbd   :  { %9755 = vrot.lane.b32.xlu0 %v9753_v11, %s12693_s4  ;;  %v12674_v11 = vld [vmem:[%s15482_s12 + $0x20] ss:$8 sps:$4 sm:$0xff]  }
0x2d2e   :  { %v9739_v54 = vpop.permute.xlu1 %9738 }
0x2d2f   :  { %v15223_v30 = vadd.f32 %v9739_v54, %v9731_v59  ;;  %v9756_v52 = vpop.permute.xlu0 %9755 }
0x2d30   :  { %v15225_v39 = vadd.f32 %v9756_v52, %v9748_v32 }
0x2d31   :  { %12617 = vtanh.f32 %v15223_v30 }
0x2d32   :  { %12619 = vtanh.f32 %v15225_v39 }
0x2d3b   :  { %v12618_v63 = vpop.eup %12617 }
0x2d3c   :  { %v12620_v3 = vpop.eup %12619  ;;  %9744 = vrot.lane.b32.xlu1 %v12618_v63, %s12682_s29 }
0x2d3d   :  { %9761 = vrot.lane.b32.xlu0 %v12620_v3, %s12682_s29 }
0x2d40   :  { %9781 = vrot.lane.b32.xlu1 %v9779_v23, %s12681_s26 }
0x2d41   :  { %9787 = vrot.lane.b32.xlu0 %v9785_v2, %s12682_s29 }
0x2dae   :  { %v9745_v50 = vpop.permute.xlu1 %9744 }
0x2daf   :  { %v9747_v13 = vmul.f32 %v12614_v43, %v9745_v50  ;;  %v9762_v36 = vpop.permute.xlu0 %9761 }
0x2db0   :  { %v9764_v61 = vmul.f32 %v12616_v5, %v9762_v36  ;;  %v12671_v5 = vld [vmem:[%s15482_s12 + $0x14] ss:$8 sps:$4 sm:$0xff]  }
0x2db1   :  { %v15236_v22 = vmul.f32 %v15181_v18, %v9747_v13 }
0x2db2   :  { %v9782_v44 = vpop.permute.xlu1 %9781  ;;  %v15239_v27 = vmul.f32 %v15179_v57, %v9764_v61 }
0x2db3   :  { %v9784_v58 = vadd.f32 %v9782_v44, %v15236_v22  ;;  %v9788_v34 = vpop.permute.xlu0 %9787 }
0x2db4   :  { %v9790_v56 = vadd.f32 %v9788_v34, %v15239_v27 }
0x2db5   :  { %9798 = vrot.lane.b32.xlu1 %v9784_v58, %s12693_s4 }
0x2db6   :  { %9802 = vrot.lane.b32.xlu0 %v9790_v56, %s12682_s29  ;;  %v9791_v56 = vmul.f32 %v15181_v18, %v15223_v30 }
0x2e27   :  { %v9799_v1 = vpop.permute.xlu1 %9798 }
0x2e28   :  { %v9803_v38 = vpop.permute.xlu0 %9802 }
0x2e29   :  { %v15246_v9 = vsel %vm317_vm2, %v9799_v1, %v9803_v38  ;;  %v9794_v1 = vmul.f32 %v15179_v57, %v15225_v39  ;;  %v9792_v38 = vmul.f32 %v15217_v20, %v15173_v26 }
0x2e2a   :  { %v9806_v43 = vpack.c.bf16 %v15246_v9, %v15246_v9  ;;  %v9923_v26 = vmul.f32 %v15246_v9, %v15098_v28 }
0x2e2c   :  { %10793 = vmatmul.mubr.msk.bf16.vlgmr.msra.gmra.mrb[60].mxu1 %vm8750_vm14, %v9806_v43  ;;  %v9795_v43 = vmul.f32 %v15219_v14, %v15169_v16  ;;  %v9917_v16 = vmul.f32 %v15246_v9, %v15102_v62 }
0x2e2d   :  { %10087 = vmatpush1.bf16.msra.mxu1 %v12670_v31  ;;  %10118 = vmatprep.mubr.bf16.mxu1 %v12677_v29  ;;  %v12675_v29 = vld [vmem:[%s15482_s12 + $0x34] ss:$8 sps:$4 sm:$0xff]   ;;  %v15287_v31 = vadd.f32 %v9792_v38, %v9791_v56 }
0x2e2e   :  { %10088 = vmatprep.subr.bf16.mxu1 %v12671_v5  ;;  %v15289_v5 = vadd.f32 %v9795_v43, %v9794_v1 }
0x2e31   :  { %10089 = vmatpush1.bf16.msra.mxu1 %v12672_v41 }
0x2e32   :  { %10090 = vmatprep.subr.bf16.mxu1 %v12673_v45 }
0x2e35   :  { %10091 = vmatpush1.bf16.msra.mxu1 %v12674_v11 }
0x2e36   :  { %10092 = vmatprep.subr.bf16.mxu1 %v12675_v29 }
0x2e39   :  { %10093 = vmatpush1.bf16.msra.mxu1 %v12676_v35 }
0x2eff   :  { %v9844_v24 = vpop.f32.mrb[60].mxu1 }
0x2f00   :  { %v9852_v4 = vadd.f32 %v9844_v24, %v14936_v46  ;;  %v9846_v60 = vpop.f32.mrb[61].mxu1 }
0x2f01   :  { %v9854_v59 = vadd.f32 %v9846_v60, %v14925_v6  ;;  %v9848_v54 = vpop.f32.mrb[62].mxu1 }
0x2f02   :  { %12621 = vtanh.f32 %v9852_v4  ;;  %v9849_v32 = vpop.f32.mrb[63].mxu1  ;;  %v10794_v3 = vmul.f32 -1.442695, %v9852_v4 }
0x2f03   :  { %12623 = vtanh.f32 %v9854_v59  ;;  %v10795_v23 = vmul.f32 -1.442695, %v9854_v59 }
0x2f04   :  { %12625 = vpow2.f32 %v10794_v3 }
0x2f05   :  { %12627 = vpow2.f32 %v10795_v23 }
0x2f0c   :  { %v12622_v52 = vpop.eup %12621 }
0x2f0d   :  { %v12624_v63 = vpop.eup %12623  ;;  %9871 = vrot.lane.b32.xlu1 %v12622_v52, %s12682_s29 }
0x2f0e   :  { %9888 = vrot.lane.b32.xlu0 %v12624_v63, %s12682_s29  ;;  %v12626_v2 = vpop.eup %12625 }
0x2f0f   :  { %v12628_v50 = vpop.eup %12627  ;;  %v9858_v46 = vadd.f32 1.0, %v12626_v2 }
0x2f10   :  { %v9865_v13 = vadd.f32 1.0, %v12628_v50 }
0x2f11   :  { %12629 = vrcp.f32 %v9858_v46 }
0x2f12   :  { %12631 = vrcp.f32 %v9865_v13 }
0x2f1b   :  { %v12630_v6 = vpop.eup %12629 }
0x2f1c   :  { %v12632_v61 = vpop.eup %12631  ;;  %v9869_v41 = vmul.f32 %v12630_v6, %v15287_v31 }
0x2f1d   :  { %v9886_v11 = vmul.f32 %v12632_v61, %v15289_v5 }
0x2f7f   :  { %v9872_v36 = vpop.permute.xlu1 %9871 }
0x2f80   :  { %v9874_v44 = vmul.f32 %v12630_v6, %v9872_v36  ;;  %v9889_v58 = vpop.permute.xlu0 %9888 }
0x2f81   :  { %v9891_v34 = vmul.f32 %v12632_v61, %v9889_v58 }
0x2f82   :  { %9876 = vrot.lane.b32.xlu1 %v9874_v44, %s12693_s4 }
0x2f83   :  { %9893 = vrot.lane.b32.xlu0 %v9891_v34, %s12693_s4 }
0x2ff4   :  { %v9877_v45 = vpop.permute.xlu1 %9876 }
0x2ff5   :  { %v9879_v29 = vadd.f32 %v9877_v45, %v9869_v41  ;;  %v9894_v18 = vpop.permute.xlu0 %9893 }
0x2ff6   :  { %v9896_v30 = vadd.f32 %v9894_v18, %v9886_v11 }
0x2ff7   :  { %12633 = vtanh.f32 %v9879_v29 }
0x2ff8   :  { %12635 = vtanh.f32 %v9896_v30 }
0x3001   :  { %v12634_v57 = vpop.eup %12633 }
0x3002   :  { %v12636_v39 = vpop.eup %12635  ;;  %9882 = vrot.lane.b32.xlu1 %v12634_v57, %s12682_s29  ;;  %v9929_v57 = vmul.f32 %v15110_v25, %v9879_v29 }
0x3003   :  { %9899 = vrot.lane.b32.xlu0 %v12636_v39, %s12682_s29  ;;  %v9932_v39 = vmul.f32 %v15108_v8, %v9896_v30 }
0x3006   :  { %9919 = vrot.lane.b32.xlu1 %v9917_v16, %s12681_s26  ;;  %v9930_v16 = vmul.f32 %v15287_v31, %v15102_v62 }
0x3007   :  { %9925 = vrot.lane.b32.xlu0 %v9923_v26, %s12682_s29  ;;  %v9933_v26 = vmul.f32 %v15289_v5, %v15098_v28 }
0x3074   :  { %v9883_v20 = vpop.permute.xlu1 %9882 }
0x3075   :  { %v9885_v14 = vmul.f32 %v12630_v6, %v9883_v20  ;;  %v9900_v35 = vpop.permute.xlu0 %9899  ;;  %v15325_v20 = vadd.f32 %v9930_v16, %v9929_v57 }
0x3076   :  { %v9902_v24 = vmul.f32 %v12632_v61, %v9900_v35 }
0x3077   :  { %v15302_v4 = vmul.f32 %v15110_v25, %v9885_v14  ;;  %v15327_v14 = vadd.f32 %v9933_v26, %v9932_v39 }
0x3078   :  { %v9920_v60 = vpop.permute.xlu1 %9919  ;;  %v15305_v59 = vmul.f32 %v15108_v8, %v9902_v24 }
0x3079   :  { %v9922_v54 = vadd.f32 %v9920_v60, %v15302_v4  ;;  %v9926_v32 = vpop.permute.xlu0 %9925 }
0x307a   :  { %v9928_v9 = vadd.f32 %v9926_v32, %v15305_v59 }
0x307b   :  { %9936 = vrot.lane.b32.xlu1 %v9922_v54, %s12693_s4 }
0x307c   :  { %9940 = vrot.lane.b32.xlu0 %v9928_v9, %s12682_s29 }
0x30ed   :  { %v9937_v52 = vpop.permute.xlu1 %9936 }
0x30ee   :  { %v9941_v63 = vpop.permute.xlu0 %9940 }
0x30ef   :  { %v9943_v3 = vsel %vm317_vm2, %v9937_v52, %v9941_v63 }
0x30f0   :  { %v9944_v23 = vpack.c.bf16 %v9943_v3, %v9943_v3  ;;  %v10055_v28 = vmul.f32 %v9943_v3, %v15031_v19  ;;  %v10061_v62 = vmul.f32 %v9943_v3, %v15027_v12 }
0x30f2   :  { %10796 = vmatmul.mubr.msk.bf16.vlgmr.msra.gmra.mrb[24].mxu0 %vm8750_vm14, %v9944_v23 }
0x31c5   :  { %v9982_v2 = vpop.f32.mrb[24].mxu0 }
0x31c6   :  { %v9990_v50 = vadd.f32 %v9982_v2, %v14940_v53  ;;  %v9984_v46 = vpop.f32.mrb[25].mxu0 }
0x31c7   :  { %v9992_v13 = vadd.f32 %v9984_v46, %v14921_v10  ;;  %v9986_v6 = vpop.f32.mrb[26].mxu0 }
0x31c8   :  { %12637 = vtanh.f32 %v9990_v50  ;;  %v9987_v36 = vpop.f32.mrb[27].mxu0  ;;  %v10797_v58 = vmul.f32 -1.442695, %v9990_v50 }
0x31c9   :  { %12639 = vtanh.f32 %v9992_v13  ;;  %v10798_v34 = vmul.f32 -1.442695, %v9992_v13 }
0x31ca   :  { %12641 = vpow2.f32 %v10797_v58 }
0x31cb   :  { %12643 = vpow2.f32 %v10798_v34 }
0x31d2   :  { %v12638_v61 = vpop.eup %12637 }
0x31d3   :  { %v12640_v44 = vpop.eup %12639  ;;  %10009 = vrot.lane.b32.xlu1 %v12638_v61, %s12682_s29 }
0x31d4   :  { %10026 = vrot.lane.b32.xlu0 %v12640_v44, %s12682_s29  ;;  %v12642_v56 = vpop.eup %12641 }
0x31d5   :  { %v12644_v1 = vpop.eup %12643  ;;  %v9996_v53 = vadd.f32 1.0, %v12642_v56 }
0x31d6   :  { %v10003_v38 = vadd.f32 1.0, %v12644_v1 }
0x31d7   :  { %12645 = vrcp.f32 %v9996_v53 }
0x31d8   :  { %12647 = vrcp.f32 %v10003_v38 }
0x31e1   :  { %v12646_v10 = vpop.eup %12645 }
0x31e2   :  { %v12648_v41 = vpop.eup %12647  ;;  %v10007_v35 = vmul.f32 %v12646_v10, %v15325_v20 }
0x31e3   :  { %v10024_v60 = vmul.f32 %v12648_v41, %v15327_v14 }
0x3245   :  { %v10010_v43 = vpop.permute.xlu1 %10009 }
0x3246   :  { %v10012_v45 = vmul.f32 %v12646_v10, %v10010_v43  ;;  %v10027_v11 = vpop.permute.xlu0 %10026 }
0x3247   :  { %v10029_v18 = vmul.f32 %v12648_v41, %v10027_v11 }
0x3248   :  { %10014 = vrot.lane.b32.xlu1 %v10012_v45, %s12693_s4 }
0x3249   :  { %10031 = vrot.lane.b32.xlu0 %v10029_v18, %s12693_s4 }
0x32ba   :  { %v10015_v24 = vpop.permute.xlu1 %10014 }
0x32bb   :  { %v10017_v54 = vadd.f32 %v10015_v24, %v10007_v35  ;;  %v10032_v32 = vpop.permute.xlu0 %10031 }
0x32bc   :  { %v10034_v25 = vadd.f32 %v10032_v32, %v10024_v60  ;;  %v10068_v60 = vmul.f32 %v15325_v20, %v15031_v19  ;;  %v10071_v32 = vmul.f32 %v15327_v14, %v15027_v12  ;;  %v12247_v12 = vld [vmem:[%s15485_s14] sm:$0xff]  }
0x32bd   :  { %12649 = vtanh.f32 %v10017_v54  ;;  %v10067_v35 = vmul.f32 %v15039_v47, %v10017_v54  ;;  %12078 = vmatprep.subr.bf16.mxu0 %v12247_v12 }
0x32be   :  { %12651 = vtanh.f32 %v10034_v25  ;;  %v10070_v24 = vmul.f32 %v15037_v37, %v10034_v25  ;;  %12079 = vmatpush3.bf16.msra.mxu0 %v12247_v12 }
0x32c7   :  { %v12650_v8 = vpop.eup %12649 }
0x32c8   :  { %v12652_v29 = vpop.eup %12651  ;;  %10020 = vrot.lane.b32.xlu1 %v12650_v8, %s12682_s29  ;;  %v10069_v8 = vadd.f32 %v10068_v60, %v10067_v35  ;;  %v12251_v35 = vld [vmem:[%s15487_s16] sm:$0xff]  }
0x32c9   :  { %10037 = vrot.lane.b32.xlu0 %v12652_v29, %s12682_s29  ;;  %v10072_v29 = vadd.f32 %v10071_v32, %v10070_v24  ;;  %12102 = vmatprep.subr.bf16.mxu1 %v12251_v35  ;;  %v12252_v24 = vld [vmem:[%s15487_s16 + $0x8] sm:$0xff]   ;;  %v10814_v60 = vld [vmem:[%s15488_s15] ss:$0 sm:$0xff] }
0x32cc   :  { %10057 = vrot.lane.b32.xlu1 %v10055_v28, %s12681_s26 }
0x32cd   :  { %10063 = vrot.lane.b32.xlu0 %v10061_v62, %s12682_s29 }
0x333a   :  { %v10021_v31 = vpop.permute.xlu1 %10020 }
0x333b   :  { %v10023_v5 = vmul.f32 %v12646_v10, %v10021_v31  ;;  %v10038_v30 = vpop.permute.xlu0 %10037 }
0x333c   :  { %v10040_v9 = vmul.f32 %v12648_v41, %v10038_v30 }
0x333d   :  { %v15338_v52 = vmul.f32 %v15039_v47, %v10023_v5 }
0x333e   :  { %v10058_v63 = vpop.permute.xlu1 %10057  ;;  %v10048_v23 = vmul.f32 %v15037_v37, %v10040_v9 }
0x333f   :  { %v10060_v2 = vadd.f32 %v10058_v63, %v15338_v52  ;;  %v10064_v50 = vpop.permute.xlu0 %10063 }
0x3340   :  { %v10066_v46 = vadd.f32 %v10064_v50, %v10048_v23 }
0x3341   :  { %10074 = vrot.lane.b32.xlu1 %v10060_v2, %s12693_s4 }
0x3342   :  { %10078 = vrot.lane.b32.xlu0 %v10066_v46, %s12682_s29 }
0x33b3   :  { %v10075_v3 = vpop.permute.xlu1 %10074 }
0x33b4   :  { %v10079_v13 = vpop.permute.xlu0 %10078 }
0x33b5   :  { %v10081_v6 = vsel %vm317_vm2, %v10075_v3, %v10079_v13  ;;  %v12250_v13 = vld [vmem:[%s15486_s13 + $0x8] sm:$0xff]  }
0x33b6   :  { %v10082_v36 = vpack.c.bf16 %v10081_v6, %v10081_v6 }
0x33b8   :  { %10799 = vmatmul.mubr.msk.bf16.vlgmr.msra.gmra.mrb[64].mxu1 %vm8750_vm14, %v10082_v36 }
0x33b9   :  { %12103 = vmatpush3.bf16.msra.mxu1 %v12251_v35 }
0x33ba   :  { %12104 = vmatprep.subr.bf16.mxu1 %v12252_v24 }
0x33bd   :  { %12105 = vmatpush3.bf16.msra.mxu1 %v12252_v24 }
0x348b   :  { %v10120_v61 = vpop.f32.mrb[64].mxu1 }
0x348c   :  { %v10128_v44 = vadd.f32 %v10120_v61, %v14944_v55  ;;  %v10122_v58 = vpop.f32.mrb[65].mxu1 }
0x348d   :  { %v10130_v34 = vadd.f32 %v10122_v58, %v14917_v40  ;;  %v10124_v56 = vpop.f32.mrb[66].mxu1 }
0x348e   :  { %12653 = vtanh.f32 %v10128_v44  ;;  %v10125_v1 = vpop.f32.mrb[67].mxu1  ;;  %v10800_v10 = vmul.f32 -1.442695, %v10128_v44 }
0x348f   :  { %12655 = vtanh.f32 %v10130_v34  ;;  %v10801_v43 = vmul.f32 -1.442695, %v10130_v34 }
0x3490   :  { %12657 = vpow2.f32 %v10800_v10 }
0x3491   :  { %12659 = vpow2.f32 %v10801_v43 }
0x3498   :  { %v12654_v53 = vpop.eup %12653 }
0x3499   :  { %v12656_v38 = vpop.eup %12655  ;;  %10147 = vrot.lane.b32.xlu0 %v12654_v53, %s12682_s29 }
0x349a   :  { %10164 = vrot.lane.b32.xlu1 %v12656_v38, %s12682_s29  ;;  %v12658_v41 = vpop.eup %12657 }
0x349b   :  { %v12660_v45 = vpop.eup %12659  ;;  %v10134_v55 = vadd.f32 1.0, %v12658_v41 }
0x349c   :  { %v10141_v11 = vadd.f32 1.0, %v12660_v45 }
0x349d   :  { %12661 = vrcp.f32 %v10134_v55 }
0x349e   :  { %12663 = vrcp.f32 %v10141_v11 }
0x34a7   :  { %v15350_v40 = vpop.eup %12661 }
0x34a8   :  { %v12664_v57 = vpop.eup %12663  ;;  %v10145_v28 = vmul.f32 %v15350_v40, %v10069_v8 }
0x34a9   :  { %v10162_v31 = vmul.f32 %v12664_v57, %v10072_v29 }
0x350b   :  { %v10148_v18 = vpop.permute.xlu0 %10147 }
0x350c   :  { %v10150_v39 = vmul.f32 %v15350_v40, %v10148_v18  ;;  %v10165_v16 = vpop.permute.xlu1 %10164 }
0x350d   :  { %v10167_v26 = vmul.f32 %v12664_v57, %v10165_v16 }
0x350e   :  { %10152 = vrot.lane.b32.xlu0 %v10150_v39, %s12693_s4 }
0x350f   :  { %10169 = vrot.lane.b32.xlu1 %v10167_v26, %s12693_s4 }
0x3580   :  { %v10153_v62 = vpop.permute.xlu0 %10152 }
0x3581   :  { %v10155_v5 = vadd.f32 %v10153_v62, %v10145_v28  ;;  %v10170_v30 = vpop.permute.xlu1 %10169 }
0x3582   :  { %v10172_v9 = vadd.f32 %v10170_v30, %v10162_v31 }
0x3583   :  { %12665 = vtanh.f32 %v10155_v5 }
0x3584   :  { %12667 = vtanh.f32 %v10172_v9 }
0x358d   :  { %v12666_v47 = vpop.eup %12665 }
0x358e   :  { %v12668_v54 = vpop.eup %12667  ;;  %10158 = vrot.lane.b32.xlu0 %v12666_v47, %s12682_s29 }
0x358f   :  { %10175 = vrot.lane.b32.xlu1 %v12668_v54, %s12682_s29 }
0x3593   :  { %10050 = vrot.lane.b32.xlu1 %v10048_v23, %s12693_s4 }
0x3597   :  { %9774 = vrot.lane.b32.xlu1 %v15239_v27, %s12693_s4 }
0x359b   :  { %9458 = vrot.lane.b32.xlu1 %v15116_v15, %s12693_s4 }
0x359f   :  { %9136 = vrot.lane.b32.xlu1 %v14979_v7, %s12693_s4 }
0x35a3   :  { %9125 = vrot.lane.b32.xlu1 %v14971_v48, %s12693_s4  ;;  %v12248_v48 = vld [vmem:[%s15485_s14 + $0x8] sm:$0xff]  }
0x35a4   :  { %12080 = vmatprep.subr.bf16.mxu0 %v12248_v48 }
0x35a5   :  { %12081 = vmatpush3.bf16.msra.mxu0 %v12248_v48 }
0x35a7   :  { %9446 = vrot.lane.b32.xlu1 %v15113_v51, %s12693_s4 }
0x35ab   :  { %9767 = vrot.lane.b32.xlu1 %v15236_v22, %s12693_s4 }
0x35af   :  { %10043 = vrot.lane.b32.xlu1 %v15338_v52, %s12693_s4 }
0x3601   :  { %v10176_v19 = vpop.permute.xlu1 %10175 }
0x3602   :  { %v10178_v37 = vmul.f32 %v12664_v57, %v10176_v19 }
0x3604   :  { %v10186_v7 = vmul.f32 %v14966_v42, %v10178_v37  ;;  %v12249_v42 = vld [vmem:[%s15486_s13] sm:$0xff]  }
0x3605   :  { %v10051_v51 = vpop.permute.xlu1 %10050  ;;  %12090 = vmatprep.subr.bf16.mxu0 %v12249_v42 }
0x3606   :  { %10054 = vst.msk [vmem:[#allocation4 + $0x8] sm:$0xff] %vm317_vm2, %v10051_v51  ;;  %10188 = vrot.lane.b32.xlu0 %v10186_v7, %s12693_s4 }
0x3609   :  { %v9775_v15 = vpop.permute.xlu1 %9774 }
0x360a   :  { %9778 = vst.msk [vmem:[#allocation4 + $0x18] sm:$0xff] %vm317_vm2, %v9775_v15  ;;  %9912 = vrot.lane.b32.xlu0 %v15305_v59, %s12693_s4  ;;  %v10159_v59 = vpop.permute.xlu0 %10158 }
0x360d   :  { %v9459_v22 = vpop.permute.xlu1 %9458  ;;  %v10205_v2 = vld [vmem:[#allocation4 + $0x8] sm:$0xff] }
0x360e   :  { %9462 = vst.msk [vmem:[#allocation4 + $0x28] sm:$0xff] %vm317_vm2, %v9459_v22  ;;  %9624 = vrot.lane.b32.xlu0 %v15187_v17, %s12693_s4  ;;  %v10161_v17 = vmul.f32 %v15350_v40, %v10159_v59 }
0x3611   :  { %v9137_v27 = vpop.permute.xlu1 %9136 }
0x3612   :  { %9140 = vst.msk [vmem:[#allocation4 + $0x38] sm:$0xff] %vm317_vm2, %v9137_v27  ;;  %9292 = vrot.lane.b32.xlu0 %v15045_v33, %s12693_s4  ;;  %v10179_v33 = vmul.f32 %v14976_v0, %v10161_v17  ;;  %v10207_v0 = vld [vmem:[#allocation4 + $0x18] sm:$0xff] }
0x3615   :  { %v9126_v20 = vpop.permute.xlu1 %9125  ;;  %v10209_v61 = vld [vmem:[#allocation4 + $0x28] sm:$0xff] }
0x3616   :  { %9128 = vst.msk [vmem:[#allocation3] sm:$0xff] %vm317_vm2, %v9126_v20  ;;  %9280 = vrot.lane.b32.xlu0 %v15042_v21, %s12693_s4 }
0x3619   :  { %v9447_v14 = vpop.permute.xlu1 %9446  ;;  %v10211_v56 = vld [vmem:[#allocation4 + $0x38] sm:$0xff] }
0x361a   :  { %9450 = vst.msk [vmem:[#allocation3 + $0x10] sm:$0xff] %vm317_vm2, %v9447_v14  ;;  %9612 = vrot.lane.b32.xlu0 %v15184_v49, %s12693_s4 }
0x361d   :  { %v9768_v25 = vpop.permute.xlu1 %9767  ;;  %v10192_v38 = vld [vmem:[#allocation3] sm:$0xff] }
0x361e   :  { %9771 = vst.msk [vmem:[#allocation3 + $0x20] sm:$0xff] %vm317_vm2, %v9768_v25  ;;  %9905 = vrot.lane.b32.xlu0 %v15302_v4, %s12693_s4 }
0x3621   :  { %v10044_v52 = vpop.permute.xlu1 %10043  ;;  %v10194_v41 = vld [vmem:[#allocation3 + $0x10] sm:$0xff] }
0x3622   :  { %10047 = vst.msk [vmem:[#allocation3 + $0x30] sm:$0xff] %vm317_vm2, %v10044_v52  ;;  %10181 = vrot.lane.b32.xlu0 %v10179_v33, %s12693_s4 }
0x3625   :  { %v10196_v40 = vld [vmem:[#allocation3 + $0x20] sm:$0xff] }
0x3629   :  { %v10198_v39 = vld [vmem:[#allocation3 + $0x30] sm:$0xff] }
0x3678   :  { %v10189_v21 = vpop.permute.xlu0 %10188 }
0x3679   :  { %10191 = vst.msk [vmem:[#allocation4] sm:$0xff] %vm317_vm2, %v10189_v21  ;;  %v10815_v21 = vld [vmem:[%s15489_s17] ss:$0 sm:$0xff] }
0x367c   :  { %v9913_v63 = vpop.permute.xlu0 %9912 }
0x367d   :  { %9916 = vst.msk [vmem:[#allocation4 + $0x10] sm:$0xff] %vm317_vm2, %v9913_v63 }
0x3680   :  { %v9625_v49 = vpop.permute.xlu0 %9624  ;;  %v10204_v23 = vld [vmem:[#allocation4] sm:$0xff] }
0x3681   :  { %9628 = vst.msk [vmem:[#allocation4 + $0x20] sm:$0xff] %vm317_vm2, %v9625_v49  ;;  %v10212_v50 = vpack.c.bf16 %v10205_v2, %v10204_v23 }
0x3683   :  { %12082 = vmatprep.mubr.msk.bf16.mxu0 %vm317_vm2, %v10212_v50 }
0x3684   :  { %v10206_v4 = vld [vmem:[#allocation4 + $0x10] sm:$0xff]  ;;  %v9293_v46 = vpop.permute.xlu0 %9292 }
0x3685   :  { %v10213_v3 = vpack.c.bf16 %v10207_v0, %v10206_v4  ;;  %9296 = vst.msk [vmem:[#allocation4 + $0x30] sm:$0xff] %vm317_vm2, %v9293_v46 }
0x3687   :  { %12083 = vmatmul.mubr.msk.bf16.vlgmr.msra.gmra.mrb[28].mxu0 %vm317_vm2, %v10213_v3 }
0x3688   :  { %v9281_v6 = vpop.permute.xlu0 %9280  ;;  %v10208_v36 = vld [vmem:[#allocation4 + $0x20] sm:$0xff]  ;;  %12091 = vmatpush3.bf16.msra.mxu0 %v12249_v42 }
0x3689   :  { %9284 = vst.msk [vmem:[#allocation3 + $0x8] sm:$0xff] %vm317_vm2, %v9281_v6  ;;  %v10214_v44 = vpack.c.bf16 %v10209_v61, %v10208_v36  ;;  %12092 = vmatprep.subr.bf16.mxu0 %v12250_v13 }
0x368b   :  { %12086 = vmatprep.mubr.msk.bf16.mxu0 %vm317_vm2, %v10214_v44 }
0x368c   :  { %v9613_v58 = vpop.permute.xlu0 %9612  ;;  %v10210_v34 = vld [vmem:[#allocation4 + $0x30] sm:$0xff]  ;;  %12093 = vmatpush3.bf16.msra.mxu0 %v12250_v13 }
0x368d   :  { %9616 = vst.msk [vmem:[#allocation3 + $0x18] sm:$0xff] %vm317_vm2, %v9613_v58  ;;  %v10215_v1 = vpack.c.bf16 %v10211_v56, %v10210_v34 }
0x368f   :  { %12087 = vmatmul.mubr.msk.bf16.gmra.mrb[32].mxu0 %vm317_vm2, %v10215_v1 }
0x3690   :  { %v9906_v53 = vpop.permute.xlu0 %9905  ;;  %v10193_v10 = vld [vmem:[#allocation3 + $0x8] sm:$0xff] }
0x3691   :  { %9909 = vst.msk [vmem:[#allocation3 + $0x28] sm:$0xff] %vm317_vm2, %v9906_v53  ;;  %v10200_v43 = vpack.c.bf16 %v10193_v10, %v10192_v38 }
0x3693   :  { %12094 = vmatprep.mubr.msk.bf16.mxu0 %vm317_vm2, %v10200_v43 }
0x3694   :  { %v10195_v45 = vld [vmem:[#allocation3 + $0x18] sm:$0xff]  ;;  %v10182_v55 = vpop.permute.xlu0 %10181 }
0x3695   :  { %v10201_v11 = vpack.c.bf16 %v10195_v45, %v10194_v41  ;;  %10185 = vst.msk [vmem:[#allocation3 + $0x38] sm:$0xff] %vm317_vm2, %v10182_v55 }
0x3697   :  { %12095 = vmatmul.mubr.msk.bf16.vlgmr.msra.gmra.mrb[28].mxu0 %vm317_vm2, %v10201_v11 }
0x3698   :  { %v10197_v18 = vld [vmem:[#allocation3 + $0x28] sm:$0xff] }
0x3699   :  { %v10202_v57 = vpack.c.bf16 %v10197_v18, %v10196_v40 }
0x369b   :  { %12098 = vmatprep.mubr.msk.bf16.mxu0 %vm317_vm2, %v10202_v57 }
0x369c   :  { %v10199_v16 = vld [vmem:[#allocation3 + $0x38] sm:$0xff] }
0x369d   :  { %v10203_v26 = vpack.c.bf16 %v10199_v16, %v10198_v39 }
0x369f   :  { %12099 = vmatmul.mubr.msk.bf16.gmra.mrb[32].mxu0 %vm317_vm2, %v10203_v26 }
0x376a   :  { %v12096_v32 = vpop.f32.mrb[28].mxu0 }
0x376b   :  { %v10411_v8 = vadd.f32 %v12096_v32, %v10814_v60  ;;  %v10371_v29 = vpop.f32.mrb[29].mxu0 }
0x376c   :  { %v10409_v28 = vadd.f32 %v10814_v60, %v10371_v29  ;;  %v12097_v62 = vpop.f32.mrb[30].mxu0 }
0x376d   :  { %v10412_v31 = vadd.f32 %v12097_v62, %v10814_v60  ;;  %v10374_v5 = vpop.f32.mrb[31].mxu0  ;;  %v10419_v9 = vmax.f32 %v10411_v8, 0.0 }
0x376e   :  { %v10410_v30 = vadd.f32 %v10814_v60, %v10374_v5  ;;  %v10417_v54 = vmax.f32 %v10409_v28, 0.0 }
0x376f   :  { %v10420_v47 = vmax.f32 %v10412_v31, 0.0 }
0x3770   :  { %v10418_v12 = vmax.f32 %v10410_v30, 0.0 }
0x3771   :  { %v10426_v19 = vpack.c.bf16 %v10420_v47, %v10419_v9 }
0x3772   :  { %v10425_v37 = vpack.c.bf16 %v10418_v12, %v10417_v54  ;;  %v12100_v48 = vpop.f32.mrb[32].mxu0 }
0x3773   :  { %v10415_v7 = vadd.f32 %v12100_v48, %v10814_v60  ;;  %v10387_v51 = vpop.f32.mrb[33].mxu0 }
0x3774   :  { %v10413_v15 = vadd.f32 %v10814_v60, %v10387_v51  ;;  %v12101_v22 = vpop.f32.mrb[34].mxu0  ;;  %12106 = vmatprep.mubr.msk.bf16.mxu1 %vm317_vm2, %v10425_v37 }
0x3775   :  { %v10416_v42 = vadd.f32 %v12101_v22, %v10814_v60  ;;  %v10390_v27 = vpop.f32.mrb[35].mxu0  ;;  %12107 = vmatmul.mubr.msk.bf16.vlgmr.msra.gmra.mrb[68].mxu1 %vm317_vm2, %v10426_v19  ;;  %v10423_v59 = vmax.f32 %v10415_v7, 0.0 }
0x3776   :  { %v10414_v20 = vadd.f32 %v10814_v60, %v10390_v27  ;;  %v10421_v17 = vmax.f32 %v10413_v15, 0.0 }
0x3777   :  { %v10424_v14 = vmax.f32 %v10416_v42, 0.0 }
0x3778   :  { %v10422_v25 = vmax.f32 %v10414_v20, 0.0 }
0x3779   :  { %v10428_v33 = vpack.c.bf16 %v10424_v14, %v10423_v59 }
0x377a   :  { %v10427_v52 = vpack.c.bf16 %v10422_v25, %v10421_v17 }
0x377c   :  { %12110 = vmatprep.mubr.msk.bf16.mxu1 %vm317_vm2, %v10427_v52 }
0x377d   :  { %12111 = vmatmul.mubr.msk.bf16.gmra.mrb[72].mxu1 %vm317_vm2, %v10428_v33 }
0x3848   :  { %v12108_v63 = vpop.f32.mrb[68].mxu1 }
0x3849   :  { %v10507_v49 = vadd.f32 %v12108_v63, %v10815_v21  ;;  %v10498_v23 = vpop.f32.mrb[69].mxu1 }
0x384a   :  { %v10499_v2 = vadd.f32 %v10815_v21, %v10498_v23  ;;  %v12109_v50 = vpop.f32.mrb[70].mxu1 }
0x384b   :  { %10531 = vst [vmem:[%s15490_s18 + $0x10] sm:$0xff] %v10507_v49  ;;  %v10510_v0 = vadd.f32 %v12109_v50, %v10815_v21  ;;  %v10501_v4 = vpop.f32.mrb[71].mxu1 }
0x384c   :  { %10529 = vst [vmem:[%s15490_s18] sm:$0xff] %v10499_v2  ;;  %v10502_v46 = vadd.f32 %v10815_v21, %v10501_v4 }
0x384d   :  { %10532 = vst [vmem:[%s15490_s18 + $0x18] sm:$0xff] %v10510_v0 }
0x384e   :  { %10530 = vst [vmem:[%s15490_s18 + $0x8] sm:$0xff] %v10502_v46 }
0x3850   :  { %v12112_v3 = vpop.f32.mrb[72].mxu1 }
0x3851   :  { %v10523_v13 = vadd.f32 %v12112_v3, %v10815_v21  ;;  %v10514_v6 = vpop.f32.mrb[73].mxu1 }
0x3852   :  { %v10515_v36 = vadd.f32 %v10815_v21, %v10514_v6  ;;  %v12113_v61 = vpop.f32.mrb[74].mxu1 }
0x3853   :  { %10535 = vst [vmem:[%s15490_s18 + $0x30] sm:$0xff] %v10523_v13  ;;  %v10526_v44 = vadd.f32 %v12113_v61, %v10815_v21  ;;  %v10517_v58 = vpop.f32.mrb[75].mxu1 }
0x3854   :  { %10533 = vst [vmem:[%s15490_s18 + $0x20] sm:$0xff] %v10515_v36  ;;  %v10518_v34 = vadd.f32 %v10815_v21, %v10517_v58 }
0x3855   :  { %10536 = vst [vmem:[%s15490_s18 + $0x38] sm:$0xff] %v10526_v44 }
0x3856   :  { %10534 = vst [vmem:[%s15490_s18 + $0x28] sm:$0xff] %v10518_v34 }

</bundles_post_ra>
